<compile_context>
chip_gen: v5e
topology: v5e:2x2
jax: 0.10.0
libtpu: 0.0.40
codegen_flags: <defaults>
</compile_context>

<pallas_src>
import functools
import math

import jax
import jax.numpy as jnp
from jax.experimental import pallas as pl
from jax.experimental.pallas import tpu as pltpu


# ----------------------------------------------------------------------------
# Kernel 1: fused U-Net ConvBlock
#   [Conv3x3(pad=1, bias) -> InstanceNorm2d -> ReLU] x 2
#   + optional fused skip-concat (two input refs, Cin-split weight)
#   + optional fused final 1x1 conv.
# One grid step = one sample.  Activations use a lane-dense padded-flat layout
# (C, (H+2)*(W+2) + 2E) with a zero ring + zero extension; the conv is 9
# shifted-slice matmuls (bf16 MXU inputs, f32 accumulation).
# ----------------------------------------------------------------------------
def _conv_block_kernel(*args, n_in, cins, e, wrow, npad, nval, has_final):
    xs = args[:n_in]                                    # padded-flat+ext inputs
    w1_ref, b1_ref, w2_ref, b2_ref, mask_ref = args[n_in:n_in + 5]
    i = n_in + 5
    if has_final:
        wf_ref, bf_ref = args[i], args[i + 1]
        i += 2
    o_ref = args[i]
    h_ref = args[i + 1]                                 # VMEM scratch (c1, npad+2e)

    mask = mask_ref[...]                                # (1, npad): 1 interior, 0 ring
    inv_n = 1.0 / float(nval)
    c1 = h_ref.shape[0]

    offs, o = [], 0
    for c in cins:
        offs.append(o)
        o += c

    def conv3x3(src_refs, src_offs, src_cs, w_ref):
        # sum over the 9 taps (and over the fused-concat inputs) of
        #   W[tap, :, cin_slice] @ x[cin_slice, shifted lane window]
        acc = None
        for t in range(9):
            dy, dx = t // 3, t % 3
            d = (dy - 1) * wrow + (dx - 1)
            for r, off, c in zip(src_refs, src_offs, src_cs):
                wt = w_ref[t, :, off:off + c]                          # (Cout, c) bf16
                xt = r[:, e + d:e + d + npad].astype(jnp.bfloat16)     # (c, npad)
                p = jnp.dot(wt, xt, preferred_element_type=jnp.float32)
                acc = p if acc is None else acc + p
        return acc                                                     # (Cout, npad) f32

    def inst_norm_relu(y, b_ref):
        # InstanceNorm2d(eps=1e-5, affine=False): per-(sample, channel) stats
        # over the nval interior pixels.  Ring positions are masked to 0, so
        # they drop out of the lane (XLU) reductions and stay 0 so the output
        # can serve directly as the next conv's zero-padded input.
        y = (y + b_ref[...]) * mask
        mean = jnp.sum(y, axis=-1, keepdims=True) * inv_n
        cen = (y - mean) * mask
        var = jnp.sum(cen * cen, axis=-1, keepdims=True) * inv_n
        return jnp.maximum(cen * jax.lax.rsqrt(var + 1e-5), 0.0)

    h1 = inst_norm_relu(conv3x3(xs, offs, list(cins), w1_ref), b1_ref)   # (c1, npad)

    # Re-extend the intermediate inside VMEM for the second conv's shifts.
    h_ref[...] = jnp.zeros_like(h_ref)
    h_ref[:, e:e + npad] = h1
    h2 = inst_norm_relu(conv3x3([h_ref], [0], [c1], w2_ref), b2_ref)     # (c2, npad)

    if has_final:
        y = jnp.dot(wf_ref[...], h2, preferred_element_type=jnp.float32) + bf_ref[...]
        o_ref[...] = y.astype(o_ref.dtype)
    else:
        o_ref[...] = h2.astype(o_ref.dtype)


def conv_block_fused(inputs, block_params, final=None):
    """Fused ConvBlock.  inputs: list of (B,C_i,H,W) (2 entries = fused concat)."""
    B, _, H, W = inputs[0].shape
    Hp, Wp = H + 2, W + 2
    npad = Hp * Wp
    e = Wp + 1                      # max |shift| of the 9 taps in flat coords
    next_ = npad + 2 * e
    nval = H * W

    (w1, b1), (w2, b2) = block_params
    cins = tuple(int(x.shape[1]) for x in inputs)
    cin_tot = sum(cins)
    c1, c2 = int(w1.shape[0]), int(w2.shape[0])

    # lane-dense padded-flat + extension layout per input: (B, C, npad + 2e)
    xs = []
    for x in inputs:
        xp = jnp.pad(x.astype(jnp.float32), ((0, 0), (0, 0), (1, 1), (1, 1)))
        xf = xp.reshape(B, int(x.shape[1]), npad)
        xs.append(jnp.pad(xf, ((0, 0), (0, 0), (e, e))))

    # weights: (Cout,Cin,3,3) -> (9, Cout, Cin), tap-major, bf16 MXU inputs
    w1m = jnp.transpose(w1, (2, 3, 0, 1)).reshape(9, c1, cin_tot).astype(jnp.bfloat16)
    w2m = jnp.transpose(w2, (2, 3, 0, 1)).reshape(9, c2, c1).astype(jnp.bfloat16)
    b1m = b1.reshape(c1, 1).astype(jnp.float32)
    b2m = b2.reshape(c2, 1).astype(jnp.float32)

    # interior mask (hoisted constant; 1 at valid pixels, 0 on the padding ring)
    rr = jnp.arange(Hp)
    cc = jnp.arange(Wp)
    interior = ((rr[:, None] >= 1) & (rr[:, None] <= Hp - 2) &
                (cc[None, :] >= 1) & (cc[None, :] <= Wp - 2))
    mask = interior.astype(jnp.float32).reshape(1, npad)

    operands = list(xs) + [w1m, b1m, w2m, b2m, mask]
    in_specs = [pl.BlockSpec((pl.Squeezed(), int(c), next_), lambda b: (b, 0, 0))
                for c in cins]
    in_specs += [
        pl.BlockSpec((9, c1, cin_tot), lambda b: (0, 0, 0)),
        pl.BlockSpec((c1, 1), lambda b: (0, 0)),
        pl.BlockSpec((9, c2, c1), lambda b: (0, 0, 0)),
        pl.BlockSpec((c2, 1), lambda b: (0, 0)),
        pl.BlockSpec((1, npad), lambda b: (0, 0)),
    ]

    c_out = c2
    has_final = final is not None
    if has_final:
        wf, bf = final                                   # (cf, c2), (cf,)
        cf = int(wf.shape[0])
        operands += [wf.reshape(cf, c2).astype(jnp.float32),
                     bf.reshape(cf, 1).astype(jnp.float32)]
        in_specs += [pl.BlockSpec((cf, c2), lambda b: (0, 0)),
                     pl.BlockSpec((cf, 1), lambda b: (0, 0))]
        c_out = cf

    out = pl.pallas_call(
        functools.partial(_conv_block_kernel, n_in=len(inputs), cins=cins,
                          e=e, wrow=Wp, npad=npad, nval=nval,
                          has_final=has_final),
        out_shape=jax.ShapeDtypeStruct((B, c_out, npad), jnp.float32),
        grid=(B,),
        in_specs=in_specs,
        out_specs=pl.BlockSpec((pl.Squeezed(), c_out, npad), lambda b: (b, 0, 0)),
        scratch_shapes=[pltpu.VMEM((c1, next_), jnp.float32)],
        compiler_params=pltpu.CompilerParams(dimension_semantics=("parallel",)),
    )(*operands)

    # padded-flat -> NCHW (crop the zero ring)
    return out.reshape(B, c_out, Hp, Wp)[:, :, 1:-1, 1:-1]


# ----------------------------------------------------------------------------
# Kernel 2: fused k-space conv chain: [Conv3x3(valid, no bias) -> ReLU] x N.
# Same flat shifted-slice trick with the ORIGINAL row stride carried through
# the chain (garbage columns are never read by valid outputs and are cropped
# by the wrapper at the end).  Intermediates stay in VMEM scratch.
# ----------------------------------------------------------------------------
def _kspace_chain_kernel(*args, n_layers, wrow, npos):
    x_ref = args[0]
    w_refs = args[1:1 + n_layers]
    o_ref = args[1 + n_layers]
    scratches = args[2 + n_layers:]

    def conv_relu(src_ref, w_ref):
        acc = None
        for t in range(9):
            dy, dx = t // 3, t % 3
            d = dy * wrow + dx
            xt = src_ref[:, d:d + npos].astype(jnp.bfloat16)       # (Cin, npos)
            p = jnp.dot(w_ref[t], xt, preferred_element_type=jnp.float32)
            acc = p if acc is None else acc + p
        return jnp.maximum(acc, 0.0)                               # (Cout, npos)

    src = x_ref
    for i in range(n_layers):
        y = conv_relu(src, w_refs[i])
        if i + 1 < n_layers:
            s = scratches[i]
            s[...] = jnp.zeros_like(s)
            s[:, :npos] = y
            src = s
        else:
            o_ref[...] = y.astype(o_ref.dtype)


def kspace_conv_chain(x, weights):
    """x: (B, 2, H, W) k-space (real/imag channels).  Valid 3x3 convs + ReLU."""
    if not weights:
        return x
    B, c0, H, W = x.shape
    n = len(weights)
    npos = H * W
    ext = 2 * (W + 1)                                   # max tap shift (2*W + 2)
    xf = jnp.pad(x.astype(jnp.float32).reshape(B, c0, npos), ((0, 0), (0, 0), (0, ext)))

    wms = [jnp.transpose(w, (2, 3, 0, 1))
           .reshape(9, int(w.shape[0]), int(w.shape[1])).astype(jnp.bfloat16)
           for w in weights]
    out_chs = [int(w.shape[0]) for w in weights]
    c_last = out_chs[-1]

    in_specs = [pl.BlockSpec((pl.Squeezed(), c0, npos + ext), lambda b: (b, 0, 0))]
    in_specs += [pl.BlockSpec(tuple(wm.shape), lambda b: (0, 0, 0)) for wm in wms]
    scratch = [pltpu.VMEM((out_chs[i], npos + ext), jnp.float32) for i in range(n - 1)]

    out = pl.pallas_call(
        functools.partial(_kspace_chain_kernel, n_layers=n, wrow=W, npos=npos),
        out_shape=jax.ShapeDtypeStruct((B, c_last, npos), jnp.float32),
        grid=(B,),
        in_specs=in_specs,
        out_specs=pl.BlockSpec((pl.Squeezed(), c_last, npos), lambda b: (b, 0, 0)),
        scratch_shapes=scratch,
        compiler_params=pltpu.CompilerParams(dimension_semantics=("parallel",)),
    )(xf, *wms)

    Hc, Wc = H - 2 * n, W - 2 * n
    return out.reshape(B, c_last, H, W)[:, :, :Hc, :Wc]


# ----------------------------------------------------------------------------
# FFT helpers (centered, orthonormal) — plain JAX (no Pallas FFT primitive)
# ----------------------------------------------------------------------------
def fft2c(x):
    x = jnp.fft.ifftshift(x, axes=(-2, -1))
    x = jnp.fft.fft2(x, axes=(-2, -1), norm="ortho")
    return jnp.fft.fftshift(x, axes=(-2, -1))


def ifft2c(x):
    x = jnp.fft.ifftshift(x, axes=(-2, -1))
    x = jnp.fft.ifft2(x, axes=(-2, -1), norm="ortho")
    return jnp.fft.fftshift(x, axes=(-2, -1))


def chans_to_complex(x):   # (B, 2, H, W) -> (B, H, W) complex
    return x[:, 0] + 1j * x[:, 1]


def complex_to_chans(x):   # (B, H, W) complex -> (B, 2, H, W)
    return jnp.stack([jnp.real(x), jnp.imag(x)], axis=1).astype(jnp.float32)


# ----------------------------------------------------------------------------
# Parameter init (deterministic, PyTorch-default-like uniform fan-in scaling)
# ----------------------------------------------------------------------------
def init_conv_params(key, cin, cout, k, bias=True):
    wkey, bkey = jax.random.split(key)
    scale = 1.0 / math.sqrt(cin * k * k)
    w = jax.random.uniform(wkey, (cout, cin, k, k), jnp.float32, -scale, scale)
    b = jax.random.uniform(bkey, (cout,), jnp.float32, -scale, scale) if bias else None
    return w, b


def init_kspace_conv_weights(key, number_of_conv_layers):
    keys = jax.random.split(key, max(1, number_of_conv_layers))
    weights, ch = [], 2
    for i in range(number_of_conv_layers // 2):
        w, _ = init_conv_params(keys[i], ch, ch * 2, 3, bias=False)
        weights.append(w)
        ch *= 2
    for i in range(number_of_conv_layers // 2, number_of_conv_layers):
        w, _ = init_conv_params(keys[i], ch, ch // 2, 3, bias=False)
        weights.append(w)
        ch //= 2
    return weights


def init_unet_params(key, in_chans, out_chans, chans, num_pool_layers):
    keys = iter(jax.random.split(key, 64))

    def conv_block(cin, cout):
        return [init_conv_params(next(keys), cin, cout, 3),
                init_conv_params(next(keys), cout, cout, 3)]

    params = {"down": [], "up": []}
    ch = chans
    params["down"].append(conv_block(in_chans, chans))
    for _ in range(num_pool_layers - 1):
        params["down"].append(conv_block(ch, ch * 2))
        ch *= 2
    params["mid"] = conv_block(ch, ch)
    for _ in range(num_pool_layers - 1):
        params["up"].append(conv_block(ch * 2, ch // 2))
        ch //= 2
    params["up"].append(conv_block(ch * 2, ch))
    params["final"] = [init_conv_params(next(keys), ch, ch // 2, 1),
                       init_conv_params(next(keys), ch // 2, out_chans, 1),
                       init_conv_params(next(keys), out_chans, out_chans, 1)]
    return params


# ----------------------------------------------------------------------------
# Model forward
# ----------------------------------------------------------------------------
def make_cartesian_mask(resolution, decimation_rate):
    rows = jnp.arange(resolution)
    keep = (rows % decimation_rate) == 0
    center, half_band = resolution // 2, max(1, resolution // 16)
    keep = keep | ((rows >= center - half_band) & (rows < center + half_band))
    return jnp.broadcast_to(keep.astype(jnp.float32)[:, None], (resolution, resolution))


def sub_sampling_layer(input_data, mask):
    # input_data: (B, 1, H, W, 2) -> (B, 1, H, W, 2)
    # TODO(synk): SubSamplingLayer source (learned/spiral trajectory + regridding) was
    # not provided; implemented as deterministic cartesian k-space masking (fft->mask->ifft).
    x = input_data[:, 0, :, :, 0] + 1j * input_data[:, 0, :, :, 1]   # (B, H, W) complex
    k = fft2c(x) * mask                                              # mask multiply left to XLA fusion
    img = ifft2c(k)
    out = jnp.stack([jnp.real(img), jnp.imag(img)], axis=-1)         # (B, H, W, 2)
    return out[:, None].astype(jnp.float32)                          # (B, 1, H, W, 2)


def max_pool2(x):
    # TODO(synk): fuse into the preceding block kernel (keep tensor in VMEM).
    B, C, H, W = x.shape
    return x.reshape(B, C, H // 2, 2, W // 2, 2).max(axis=(3, 5))


def upsample2_bilinear(x):
    B, C, H, W = x.shape
    return jax.image.resize(x, (B, C, 2 * H, 2 * W), method="bilinear")


def compose_final_1x1(final_params):
    # Three 1x1 convs with no nonlinearity between them compose exactly:
    #   W = W3 @ W2 @ W1,  b = W3 @ (W2 @ b1 + b2) + b3
    (w1, b1), (w2, b2), (w3, b3) = final_params
    W1, W2, W3 = w1[:, :, 0, 0], w2[:, :, 0, 0], w3[:, :, 0, 0]
    W = W3 @ (W2 @ W1)
    bias = W3 @ (W2 @ b1 + b2) + b3
    return W, bias                                       # (cf, c2), (cf,)


def unet_forward(x, params):
    stack, out = [], x
    for bp in params["down"]:
        out = conv_block_fused([out], bp)
        stack.append(out)
        out = max_pool2(out)
    out = conv_block_fused([out], params["mid"])
    ups = params["up"]
    final_wb = compose_final_1x1(params["final"])
    for li, bp in enumerate(ups):
        out_up = upsample2_bilinear(out)
        skip = stack.pop()
        # skip-concat + (for the last block) the composed final 1x1 conv are
        # fused into the block kernel.
        out = conv_block_fused([out_up, skip], bp,
                               final=final_wb if li == len(ups) - 1 else None)
    return out


def k_space_reconstruction_forward(x, conv_weights, unet_params):
    # x: (B, 2, H, W) — channel axis holds (real, imag)
    k = complex_to_chans(fft2c(chans_to_complex(x)))              # fft2
    k = kspace_conv_chain(k, conv_weights)                        # Conv2d(k=3, no pad, no bias)+ReLU
    img = complex_to_chans(ifft2c(chans_to_complex(k)))           # ifft2
    return unet_forward(img, unet_params)                         # UnetModel(in=2, out=1)


def model_forward(input_data, params):
    sub = sub_sampling_layer(input_data, params["mask"])          # (B, 1, H, W, 2)
    x = jnp.transpose(sub[:, 0], (0, 3, 1, 2))                    # squeeze(1).permute(0,3,1,2)
    return k_space_reconstruction_forward(x, params["kconv"], params["unet"])


# ----------------------------------------------------------------------------
if __name__ == "__main__":
    key = jax.random.PRNGKey(0)
    B, H, W = 2, 16, 16
    decimation_rate = 4
    number_of_conv_layers = 2
    unet_chans, unet_num_pool_layers, unet_drop_prob = 8, 2, 0.0

    k_in, k_kconv, k_unet = jax.random.split(key, 3)
    input_data = jax.random.normal(k_in, (B, 1, H, W, 2), dtype=jnp.float32)

    params = {
        "mask": make_cartesian_mask(H, decimation_rate),
        "kconv": init_kspace_conv_weights(k_kconv, number_of_conv_layers),
        "unet": init_unet_params(k_unet, 2, 1, unet_chans, unet_num_pool_layers),
    }

    fwd = jax.jit(model_forward)
    out = fwd(input_data, params)
    out = jax.block_until_ready(out)

    H_out = H - 2 * number_of_conv_layers
    assert out.shape == (B, 1, H_out, H_out), out.shape
    assert out.dtype == jnp.float32
    assert bool(jnp.all(jnp.isfinite(out)))
    print("KERNEL_OK")
</pallas_src>

<mosaic_0001>
module attributes {stable_mosaic.version = 11 : i64} {
  func.func @_kspace_chain_kernel(%arg0: i32, %arg1: memref<1x2x290xf32, #tpu.memory_space<vmem>>, %arg2: memref<9x4x2xbf16, #tpu.memory_space<vmem>>, %arg3: memref<9x2x4xbf16, #tpu.memory_space<vmem>>, %arg4: memref<1x2x256xf32, #tpu.memory_space<vmem>>, %arg5: memref<4x290xf32, #tpu.memory_space<vmem>>) attributes {dimension_semantics = [#tpu.dimension_semantics<parallel>], iteration_bounds = array<i64: 2>, scalar_prefetch = 0 : i64, scratch_operands = 1 : i64, tpu.core_type = #tpu.core_type<tc>, window_params = [{transform_indices = @transform_0, window_bounds = array<i64: 1, 2, 290>}, {pipeline_mode = #tpu.pipeline_mode<synchronous>, transform_indices = @transform_1, window_bounds = array<i64: 9, 4, 2>}, {pipeline_mode = #tpu.pipeline_mode<synchronous>, transform_indices = @transform_2, window_bounds = array<i64: 9, 2, 4>}, {transform_indices = @transform_3, window_bounds = array<i64: 1, 2, 256>}]} {
    %c0 = arith.constant 0 : index
    %c0_0 = arith.constant 0 : index
    %c0_1 = arith.constant 0 : index
    %0 = vector.load %arg1[%c0, %c0_0, %c0_1] : memref<1x2x290xf32, #tpu.memory_space<vmem>>, vector<1x2x256xf32>
    %1 = vector.shape_cast %0 : vector<1x2x256xf32> to vector<2x256xf32>
    %2 = arith.truncf %1 : vector<2x256xf32> to vector<2x256xbf16>
    %c0_2 = arith.constant 0 : index
    %c0_3 = arith.constant 0 : index
    %c0_4 = arith.constant 0 : index
    %3 = vector.load %arg2[%c0_2, %c0_3, %c0_4] : memref<9x4x2xbf16, #tpu.memory_space<vmem>>, vector<1x4x2xbf16>
    %4 = vector.shape_cast %3 : vector<1x4x2xbf16> to vector<4x2xbf16>
    %cst = arith.constant dense<0.000000e+00> : vector<4x256xf32>
    %5 = tpu.matmul %4, %2, %cst {dimension_numbers = #tpu.dot_dimension_numbers<[1], [0], [0], [1], [0, 0, 1, 1], [], []>} : vector<4x2xbf16>, vector<2x256xbf16>, vector<4x256xf32> -> vector<4x256xf32>
    %c0_5 = arith.constant 0 : index
    %c0_6 = arith.constant 0 : index
    %c1 = arith.constant 1 : index
    %6 = vector.load %arg1[%c0_5, %c0_6, %c1] : memref<1x2x290xf32, #tpu.memory_space<vmem>>, vector<1x2x256xf32>
    %7 = vector.shape_cast %6 : vector<1x2x256xf32> to vector<2x256xf32>
    %8 = arith.truncf %7 : vector<2x256xf32> to vector<2x256xbf16>
    %c1_7 = arith.constant 1 : index
    %c0_8 = arith.constant 0 : index
    %c0_9 = arith.constant 0 : index
    %9 = vector.load %arg2[%c1_7, %c0_8, %c0_9] : memref<9x4x2xbf16, #tpu.memory_space<vmem>>, vector<1x4x2xbf16>
    %10 = vector.shape_cast %9 : vector<1x4x2xbf16> to vector<4x2xbf16>
    %cst_10 = arith.constant dense<0.000000e+00> : vector<4x256xf32>
    %11 = tpu.matmul %10, %8, %cst_10 {dimension_numbers = #tpu.dot_dimension_numbers<[1], [0], [0], [1], [0, 0, 1, 1], [], []>} : vector<4x2xbf16>, vector<2x256xbf16>, vector<4x256xf32> -> vector<4x256xf32>
    %12 = arith.addf %5, %11 : vector<4x256xf32>
    %c0_11 = arith.constant 0 : index
    %c0_12 = arith.constant 0 : index
    %c2 = arith.constant 2 : index
    %13 = vector.load %arg1[%c0_11, %c0_12, %c2] : memref<1x2x290xf32, #tpu.memory_space<vmem>>, vector<1x2x256xf32>
    %14 = vector.shape_cast %13 : vector<1x2x256xf32> to vector<2x256xf32>
    %15 = arith.truncf %14 : vector<2x256xf32> to vector<2x256xbf16>
    %c2_13 = arith.constant 2 : index
    %c0_14 = arith.constant 0 : index
    %c0_15 = arith.constant 0 : index
    %16 = vector.load %arg2[%c2_13, %c0_14, %c0_15] : memref<9x4x2xbf16, #tpu.memory_space<vmem>>, vector<1x4x2xbf16>
    %17 = vector.shape_cast %16 : vector<1x4x2xbf16> to vector<4x2xbf16>
    %cst_16 = arith.constant dense<0.000000e+00> : vector<4x256xf32>
    %18 = tpu.matmul %17, %15, %cst_16 {dimension_numbers = #tpu.dot_dimension_numbers<[1], [0], [0], [1], [0, 0, 1, 1], [], []>} : vector<4x2xbf16>, vector<2x256xbf16>, vector<4x256xf32> -> vector<4x256xf32>
    %19 = arith.addf %12, %18 : vector<4x256xf32>
    %c0_17 = arith.constant 0 : index
    %c0_18 = arith.constant 0 : index
    %c16 = arith.constant 16 : index
    %20 = vector.load %arg1[%c0_17, %c0_18, %c16] : memref<1x2x290xf32, #tpu.memory_space<vmem>>, vector<1x2x256xf32>
    %21 = vector.shape_cast %20 : vector<1x2x256xf32> to vector<2x256xf32>
    %22 = arith.truncf %21 : vector<2x256xf32> to vector<2x256xbf16>
    %c3 = arith.constant 3 : index
    %c0_19 = arith.constant 0 : index
    %c0_20 = arith.constant 0 : index
    %23 = vector.load %arg2[%c3, %c0_19, %c0_20] : memref<9x4x2xbf16, #tpu.memory_space<vmem>>, vector<1x4x2xbf16>
    %24 = vector.shape_cast %23 : vector<1x4x2xbf16> to vector<4x2xbf16>
    %cst_21 = arith.constant dense<0.000000e+00> : vector<4x256xf32>
    %25 = tpu.matmul %24, %22, %cst_21 {dimension_numbers = #tpu.dot_dimension_numbers<[1], [0], [0], [1], [0, 0, 1, 1], [], []>} : vector<4x2xbf16>, vector<2x256xbf16>, vector<4x256xf32> -> vector<4x256xf32>
    %26 = arith.addf %19, %25 : vector<4x256xf32>
    %c0_22 = arith.constant 0 : index
    %c0_23 = arith.constant 0 : index
    %c17 = arith.constant 17 : index
    %27 = vector.load %arg1[%c0_22, %c0_23, %c17] : memref<1x2x290xf32, #tpu.memory_space<vmem>>, vector<1x2x256xf32>
    %28 = vector.shape_cast %27 : vector<1x2x256xf32> to vector<2x256xf32>
    %29 = arith.truncf %28 : vector<2x256xf32> to vector<2x256xbf16>
    %c4 = arith.constant 4 : index
    %c0_24 = arith.constant 0 : index
    %c0_25 = arith.constant 0 : index
    %30 = vector.load %arg2[%c4, %c0_24, %c0_25] : memref<9x4x2xbf16, #tpu.memory_space<vmem>>, vector<1x4x2xbf16>
    %31 = vector.shape_cast %30 : vector<1x4x2xbf16> to vector<4x2xbf16>
    %cst_26 = arith.constant dense<0.000000e+00> : vector<4x256xf32>
    %32 = tpu.matmul %31, %29, %cst_26 {dimension_numbers = #tpu.dot_dimension_numbers<[1], [0], [0], [1], [0, 0, 1, 1], [], []>} : vector<4x2xbf16>, vector<2x256xbf16>, vector<4x256xf32> -> vector<4x256xf32>
    %33 = arith.addf %26, %32 : vector<4x256xf32>
    %c0_27 = arith.constant 0 : index
    %c0_28 = arith.constant 0 : index
    %c18 = arith.constant 18 : index
    %34 = vector.load %arg1[%c0_27, %c0_28, %c18] : memref<1x2x290xf32, #tpu.memory_space<vmem>>, vector<1x2x256xf32>
    %35 = vector.shape_cast %34 : vector<1x2x256xf32> to vector<2x256xf32>
    %36 = arith.truncf %35 : vector<2x256xf32> to vector<2x256xbf16>
    %c5 = arith.constant 5 : index
    %c0_29 = arith.constant 0 : index
    %c0_30 = arith.constant 0 : index
    %37 = vector.load %arg2[%c5, %c0_29, %c0_30] : memref<9x4x2xbf16, #tpu.memory_space<vmem>>, vector<1x4x2xbf16>
    %38 = vector.shape_cast %37 : vector<1x4x2xbf16> to vector<4x2xbf16>
    %cst_31 = arith.constant dense<0.000000e+00> : vector<4x256xf32>
    %39 = tpu.matmul %38, %36, %cst_31 {dimension_numbers = #tpu.dot_dimension_numbers<[1], [0], [0], [1], [0, 0, 1, 1], [], []>} : vector<4x2xbf16>, vector<2x256xbf16>, vector<4x256xf32> -> vector<4x256xf32>
    %40 = arith.addf %33, %39 : vector<4x256xf32>
    %c0_32 = arith.constant 0 : index
    %c0_33 = arith.constant 0 : index
    %c32 = arith.constant 32 : index
    %41 = vector.load %arg1[%c0_32, %c0_33, %c32] : memref<1x2x290xf32, #tpu.memory_space<vmem>>, vector<1x2x256xf32>
    %42 = vector.shape_cast %41 : vector<1x2x256xf32> to vector<2x256xf32>
    %43 = arith.truncf %42 : vector<2x256xf32> to vector<2x256xbf16>
    %c6 = arith.constant 6 : index
    %c0_34 = arith.constant 0 : index
    %c0_35 = arith.constant 0 : index
    %44 = vector.load %arg2[%c6, %c0_34, %c0_35] : memref<9x4x2xbf16, #tpu.memory_space<vmem>>, vector<1x4x2xbf16>
    %45 = vector.shape_cast %44 : vector<1x4x2xbf16> to vector<4x2xbf16>
    %cst_36 = arith.constant dense<0.000000e+00> : vector<4x256xf32>
    %46 = tpu.matmul %45, %43, %cst_36 {dimension_numbers = #tpu.dot_dimension_numbers<[1], [0], [0], [1], [0, 0, 1, 1], [], []>} : vector<4x2xbf16>, vector<2x256xbf16>, vector<4x256xf32> -> vector<4x256xf32>
    %47 = arith.addf %40, %46 : vector<4x256xf32>
    %c0_37 = arith.constant 0 : index
    %c0_38 = arith.constant 0 : index
    %c33 = arith.constant 33 : index
    %48 = vector.load %arg1[%c0_37, %c0_38, %c33] : memref<1x2x290xf32, #tpu.memory_space<vmem>>, vector<1x2x256xf32>
    %49 = vector.shape_cast %48 : vector<1x2x256xf32> to vector<2x256xf32>
    %50 = arith.truncf %49 : vector<2x256xf32> to vector<2x256xbf16>
    %c7 = arith.constant 7 : index
    %c0_39 = arith.constant 0 : index
    %c0_40 = arith.constant 0 : index
    %51 = vector.load %arg2[%c7, %c0_39, %c0_40] : memref<9x4x2xbf16, #tpu.memory_space<vmem>>, vector<1x4x2xbf16>
    %52 = vector.shape_cast %51 : vector<1x4x2xbf16> to vector<4x2xbf16>
    %cst_41 = arith.constant dense<0.000000e+00> : vector<4x256xf32>
    %53 = tpu.matmul %52, %50, %cst_41 {dimension_numbers = #tpu.dot_dimension_numbers<[1], [0], [0], [1], [0, 0, 1, 1], [], []>} : vector<4x2xbf16>, vector<2x256xbf16>, vector<4x256xf32> -> vector<4x256xf32>
    %54 = arith.addf %47, %53 : vector<4x256xf32>
    %c0_42 = arith.constant 0 : index
    %c0_43 = arith.constant 0 : index
    %c34 = arith.constant 34 : index
    %55 = vector.load %arg1[%c0_42, %c0_43, %c34] : memref<1x2x290xf32, #tpu.memory_space<vmem>>, vector<1x2x256xf32>
    %56 = vector.shape_cast %55 : vector<1x2x256xf32> to vector<2x256xf32>
    %57 = arith.truncf %56 : vector<2x256xf32> to vector<2x256xbf16>
    %c8 = arith.constant 8 : index
    %c0_44 = arith.constant 0 : index
    %c0_45 = arith.constant 0 : index
    %58 = vector.load %arg2[%c8, %c0_44, %c0_45] : memref<9x4x2xbf16, #tpu.memory_space<vmem>>, vector<1x4x2xbf16>
    %59 = vector.shape_cast %58 : vector<1x4x2xbf16> to vector<4x2xbf16>
    %cst_46 = arith.constant dense<0.000000e+00> : vector<4x256xf32>
    %60 = tpu.matmul %59, %57, %cst_46 {dimension_numbers = #tpu.dot_dimension_numbers<[1], [0], [0], [1], [0, 0, 1, 1], [], []>} : vector<4x2xbf16>, vector<2x256xbf16>, vector<4x256xf32> -> vector<4x256xf32>
    %61 = arith.addf %54, %60 : vector<4x256xf32>
    %cst_47 = arith.constant 0.000000e+00 : f32
    %62 = vector.broadcast %cst_47 : f32 to vector<4x256xf32>
    %63 = arith.maximumf %61, %62 : vector<4x256xf32>
    %cst_48 = arith.constant 0.000000e+00 : f32
    %64 = vector.broadcast %cst_48 : f32 to vector<4x290xf32>
    %c0_49 = arith.constant 0 : index
    %c0_50 = arith.constant 0 : index
    %65 = vector.load %arg5[%c0_49, %c0_50] : memref<4x290xf32, #tpu.memory_space<vmem>>, vector<4x290xf32>
    tpu.vector_store %arg5[%c0_49, %c0_50], %64 {strides = array<i32>} : memref<4x290xf32, #tpu.memory_space<vmem>>, vector<4x290xf32>,
    %c0_51 = arith.constant 0 : index
    %c0_52 = arith.constant 0 : index
    %66 = vector.load %arg5[%c0_51, %c0_52] : memref<4x290xf32, #tpu.memory_space<vmem>>, vector<4x256xf32>
    tpu.vector_store %arg5[%c0_51, %c0_52], %63 {strides = array<i32>} : memref<4x290xf32, #tpu.memory_space<vmem>>, vector<4x256xf32>,
    %c0_53 = arith.constant 0 : index
    %c0_54 = arith.constant 0 : index
    %67 = vector.load %arg5[%c0_53, %c0_54] : memref<4x290xf32, #tpu.memory_space<vmem>>, vector<4x256xf32>
    %68 = arith.truncf %67 : vector<4x256xf32> to vector<4x256xbf16>
    %c0_55 = arith.constant 0 : index
    %c0_56 = arith.constant 0 : index
    %c0_57 = arith.constant 0 : index
    %69 = vector.load %arg3[%c0_55, %c0_56, %c0_57] : memref<9x2x4xbf16, #tpu.memory_space<vmem>>, vector<1x2x4xbf16>
    %70 = vector.shape_cast %69 : vector<1x2x4xbf16> to vector<2x4xbf16>
    %cst_58 = arith.constant dense<0.000000e+00> : vector<2x256xf32>
    %71 = tpu.matmul %70, %68, %cst_58 {dimension_numbers = #tpu.dot_dimension_numbers<[1], [0], [0], [1], [0, 0, 1, 1], [], []>} : vector<2x4xbf16>, vector<4x256xbf16>, vector<2x256xf32> -> vector<2x256xf32>
    %c0_59 = arith.constant 0 : index
    %c1_60 = arith.constant 1 : index
    %72 = vector.load %arg5[%c0_59, %c1_60] : memref<4x290xf32, #tpu.memory_space<vmem>>, vector<4x256xf32>
    %73 = arith.truncf %72 : vector<4x256xf32> to vector<4x256xbf16>
    %c1_61 = arith.constant 1 : index
    %c0_62 = arith.constant 0 : index
    %c0_63 = arith.constant 0 : index
    %74 = vector.load %arg3[%c1_61, %c0_62, %c0_63] : memref<9x2x4xbf16, #tpu.memory_space<vmem>>, vector<1x2x4xbf16>
    %75 = vector.shape_cast %74 : vector<1x2x4xbf16> to vector<2x4xbf16>
    %cst_64 = arith.constant dense<0.000000e+00> : vector<2x256xf32>
    %76 = tpu.matmul %75, %73, %cst_64 {dimension_numbers = #tpu.dot_dimension_numbers<[1], [0], [0], [1], [0, 0, 1, 1], [], []>} : vector<2x4xbf16>, vector<4x256xbf16>, vector<2x256xf32> -> vector<2x256xf32>
    %77 = arith.addf %71, %76 : vector<2x256xf32>
    %c0_65 = arith.constant 0 : index
    %c2_66 = arith.constant 2 : index
    %78 = vector.load %arg5[%c0_65, %c2_66] : memref<4x290xf32, #tpu.memory_space<vmem>>, vector<4x256xf32>
    %79 = arith.truncf %78 : vector<4x256xf32> to vector<4x256xbf16>
    %c2_67 = arith.constant 2 : index
    %c0_68 = arith.constant 0 : index
    %c0_69 = arith.constant 0 : index
    %80 = vector.load %arg3[%c2_67, %c0_68, %c0_69] : memref<9x2x4xbf16, #tpu.memory_space<vmem>>, vector<1x2x4xbf16>
    %81 = vector.shape_cast %80 : vector<1x2x4xbf16> to vector<2x4xbf16>
    %cst_70 = arith.constant dense<0.000000e+00> : vector<2x256xf32>
    %82 = tpu.matmul %81, %79, %cst_70 {dimension_numbers = #tpu.dot_dimension_numbers<[1], [0], [0], [1], [0, 0, 1, 1], [], []>} : vector<2x4xbf16>, vector<4x256xbf16>, vector<2x256xf32> -> vector<2x256xf32>
    %83 = arith.addf %77, %82 : vector<2x256xf32>
    %c0_71 = arith.constant 0 : index
    %c16_72 = arith.constant 16 : index
    %84 = vector.load %arg5[%c0_71, %c16_72] : memref<4x290xf32, #tpu.memory_space<vmem>>, vector<4x256xf32>
    %85 = arith.truncf %84 : vector<4x256xf32> to vector<4x256xbf16>
    %c3_73 = arith.constant 3 : index
    %c0_74 = arith.constant 0 : index
    %c0_75 = arith.constant 0 : index
    %86 = vector.load %arg3[%c3_73, %c0_74, %c0_75] : memref<9x2x4xbf16, #tpu.memory_space<vmem>>, vector<1x2x4xbf16>
    %87 = vector.shape_cast %86 : vector<1x2x4xbf16> to vector<2x4xbf16>
    %cst_76 = arith.constant dense<0.000000e+00> : vector<2x256xf32>
    %88 = tpu.matmul %87, %85, %cst_76 {dimension_numbers = #tpu.dot_dimension_numbers<[1], [0], [0], [1], [0, 0, 1, 1], [], []>} : vector<2x4xbf16>, vector<4x256xbf16>, vector<2x256xf32> -> vector<2x256xf32>
    %89 = arith.addf %83, %88 : vector<2x256xf32>
    %c0_77 = arith.constant 0 : index
    %c17_78 = arith.constant 17 : index
    %90 = vector.load %arg5[%c0_77, %c17_78] : memref<4x290xf32, #tpu.memory_space<vmem>>, vector<4x256xf32>
    %91 = arith.truncf %90 : vector<4x256xf32> to vector<4x256xbf16>
    %c4_79 = arith.constant 4 : index
    %c0_80 = arith.constant 0 : index
    %c0_81 = arith.constant 0 : index
    %92 = vector.load %arg3[%c4_79, %c0_80, %c0_81] : memref<9x2x4xbf16, #tpu.memory_space<vmem>>, vector<1x2x4xbf16>
    %93 = vector.shape_cast %92 : vector<1x2x4xbf16> to vector<2x4xbf16>
    %cst_82 = arith.constant dense<0.000000e+00> : vector<2x256xf32>
    %94 = tpu.matmul %93, %91, %cst_82 {dimension_numbers = #tpu.dot_dimension_numbers<[1], [0], [0], [1], [0, 0, 1, 1], [], []>} : vector<2x4xbf16>, vector<4x256xbf16>, vector<2x256xf32> -> vector<2x256xf32>
    %95 = arith.addf %89, %94 : vector<2x256xf32>
    %c0_83 = arith.constant 0 : index
    %c18_84 = arith.constant 18 : index
    %96 = vector.load %arg5[%c0_83, %c18_84] : memref<4x290xf32, #tpu.memory_space<vmem>>, vector<4x256xf32>
    %97 = arith.truncf %96 : vector<4x256xf32> to vector<4x256xbf16>
    %c5_85 = arith.constant 5 : index
    %c0_86 = arith.constant 0 : index
    %c0_87 = arith.constant 0 : index
    %98 = vector.load %arg3[%c5_85, %c0_86, %c0_87] : memref<9x2x4xbf16, #tpu.memory_space<vmem>>, vector<1x2x4xbf16>
    %99 = vector.shape_cast %98 : vector<1x2x4xbf16> to vector<2x4xbf16>
    %cst_88 = arith.constant dense<0.000000e+00> : vector<2x256xf32>
    %100 = tpu.matmul %99, %97, %cst_88 {dimension_numbers = #tpu.dot_dimension_numbers<[1], [0], [0], [1], [0, 0, 1, 1], [], []>} : vector<2x4xbf16>, vector<4x256xbf16>, vector<2x256xf32> -> vector<2x256xf32>
    %101 = arith.addf %95, %100 : vector<2x256xf32>
    %c0_89 = arith.constant 0 : index
    %c32_90 = arith.constant 32 : index
    %102 = vector.load %arg5[%c0_89, %c32_90] : memref<4x290xf32, #tpu.memory_space<vmem>>, vector<4x256xf32>
    %103 = arith.truncf %102 : vector<4x256xf32> to vector<4x256xbf16>
    %c6_91 = arith.constant 6 : index
    %c0_92 = arith.constant 0 : index
    %c0_93 = arith.constant 0 : index
    %104 = vector.load %arg3[%c6_91, %c0_92, %c0_93] : memref<9x2x4xbf16, #tpu.memory_space<vmem>>, vector<1x2x4xbf16>
    %105 = vector.shape_cast %104 : vector<1x2x4xbf16> to vector<2x4xbf16>
    %cst_94 = arith.constant dense<0.000000e+00> : vector<2x256xf32>
    %106 = tpu.matmul %105, %103, %cst_94 {dimension_numbers = #tpu.dot_dimension_numbers<[1], [0], [0], [1], [0, 0, 1, 1], [], []>} : vector<2x4xbf16>, vector<4x256xbf16>, vector<2x256xf32> -> vector<2x256xf32>
    %107 = arith.addf %101, %106 : vector<2x256xf32>
    %c0_95 = arith.constant 0 : index
    %c33_96 = arith.constant 33 : index
    %108 = vector.load %arg5[%c0_95, %c33_96] : memref<4x290xf32, #tpu.memory_space<vmem>>, vector<4x256xf32>
    %109 = arith.truncf %108 : vector<4x256xf32> to vector<4x256xbf16>
    %c7_97 = arith.constant 7 : index
    %c0_98 = arith.constant 0 : index
    %c0_99 = arith.constant 0 : index
    %110 = vector.load %arg3[%c7_97, %c0_98, %c0_99] : memref<9x2x4xbf16, #tpu.memory_space<vmem>>, vector<1x2x4xbf16>
    %111 = vector.shape_cast %110 : vector<1x2x4xbf16> to vector<2x4xbf16>
    %cst_100 = arith.constant dense<0.000000e+00> : vector<2x256xf32>
    %112 = tpu.matmul %111, %109, %cst_100 {dimension_numbers = #tpu.dot_dimension_numbers<[1], [0], [0], [1], [0, 0, 1, 1], [], []>} : vector<2x4xbf16>, vector<4x256xbf16>, vector<2x256xf32> -> vector<2x256xf32>
    %113 = arith.addf %107, %112 : vector<2x256xf32>
    %c0_101 = arith.constant 0 : index
    %c34_102 = arith.constant 34 : index
    %114 = vector.load %arg5[%c0_101, %c34_102] : memref<4x290xf32, #tpu.memory_space<vmem>>, vector<4x256xf32>
    %115 = arith.truncf %114 : vector<4x256xf32> to vector<4x256xbf16>
    %c8_103 = arith.constant 8 : index
    %c0_104 = arith.constant 0 : index
    %c0_105 = arith.constant 0 : index
    %116 = vector.load %arg3[%c8_103, %c0_104, %c0_105] : memref<9x2x4xbf16, #tpu.memory_space<vmem>>, vector<1x2x4xbf16>
    %117 = vector.shape_cast %116 : vector<1x2x4xbf16> to vector<2x4xbf16>
    %cst_106 = arith.constant dense<0.000000e+00> : vector<2x256xf32>
    %118 = tpu.matmul %117, %115, %cst_106 {dimension_numbers = #tpu.dot_dimension_numbers<[1], [0], [0], [1], [0, 0, 1, 1], [], []>} : vector<2x4xbf16>, vector<4x256xbf16>, vector<2x256xf32> -> vector<2x256xf32>
    %119 = arith.addf %113, %118 : vector<2x256xf32>
    %cst_107 = arith.constant 0.000000e+00 : f32
    %120 = vector.broadcast %cst_107 : f32 to vector<2x256xf32>
    %121 = arith.maximumf %119, %120 : vector<2x256xf32>
    %c0_108 = arith.constant 0 : index
    %c0_109 = arith.constant 0 : index
    %c0_110 = arith.constant 0 : index
    %122 = vector.load %arg4[%c0_108, %c0_109, %c0_110] : memref<1x2x256xf32, #tpu.memory_space<vmem>>, vector<1x2x256xf32>
    %123 = vector.shape_cast %122 : vector<1x2x256xf32> to vector<2x256xf32>
    %124 = vector.shape_cast %121 : vector<2x256xf32> to vector<1x2x256xf32>
    tpu.vector_store %arg4[%c0_108, %c0_109, %c0_110], %124 {strides = array<i32>} : memref<1x2x256xf32, #tpu.memory_space<vmem>>, vector<1x2x256xf32>,
    return
  }
  func.func @transform_0(%arg0: i32) -> (i32, i32, i32) {
    %c0_i32 = arith.constant 0 : i32
    %c0_i32_0 = arith.constant 0 : i32
    %c0_i32_1 = arith.constant 0 : i32
    return %arg0, %c0_i32, %c0_i32_0 : i32, i32, i32
  }
  func.func @transform_1(%arg0: i32) -> (i32, i32, i32) {
    %c0_i32 = arith.constant 0 : i32
    %c0_i32_0 = arith.constant 0 : i32
    %c0_i32_1 = arith.constant 0 : i32
    %c0_i32_2 = arith.constant 0 : i32
    return %c0_i32, %c0_i32_0, %c0_i32_1 : i32, i32, i32
  }
  func.func @transform_2(%arg0: i32) -> (i32, i32, i32) {
    %c0_i32 = arith.constant 0 : i32
    %c0_i32_0 = arith.constant 0 : i32
    %c0_i32_1 = arith.constant 0 : i32
    %c0_i32_2 = arith.constant 0 : i32
    return %c0_i32, %c0_i32_0, %c0_i32_1 : i32, i32, i32
  }
  func.func @transform_3(%arg0: i32) -> (i32, i32, i32) {
    %c0_i32 = arith.constant 0 : i32
    %c0_i32_0 = arith.constant 0 : i32
    %c0_i32_1 = arith.constant 0 : i32
    return %arg0, %c0_i32, %c0_i32_0 : i32, i32, i32
  }
}

module attributes {stable_mosaic.version = 11 : i64} {
  func.func @_conv_block_kernel(%arg0: i32, %arg1: memref<1x2x226xf32, #tpu.memory_space<vmem>>, %arg2: memref<9x8x2xbf16, #tpu.memory_space<vmem>>, %arg3: memref<8x1xf32, #tpu.memory_space<vmem>>, %arg4: memref<9x8x8xbf16, #tpu.memory_space<vmem>>, %arg5: memref<8x1xf32, #tpu.memory_space<vmem>>, %arg6: memref<1x196xf32, #tpu.memory_space<vmem>>, %arg7: memref<1x8x196xf32, #tpu.memory_space<vmem>>, %arg8: memref<8x226xf32, #tpu.memory_space<vmem>>) attributes {dimension_semantics = [#tpu.dimension_semantics<parallel>], iteration_bounds = array<i64: 2>, scalar_prefetch = 0 : i64, scratch_operands = 1 : i64, tpu.core_type = #tpu.core_type<tc>, window_params = [{transform_indices = @transform_0, window_bounds = array<i64: 1, 2, 226>}, {pipeline_mode = #tpu.pipeline_mode<synchronous>, transform_indices = @transform_1, window_bounds = array<i64: 9, 8, 2>}, {pipeline_mode = #tpu.pipeline_mode<synchronous>, transform_indices = @transform_2, window_bounds = array<i64: 8, 1>}, {pipeline_mode = #tpu.pipeline_mode<synchronous>, transform_indices = @transform_3, window_bounds = array<i64: 9, 8, 8>}, {pipeline_mode = #tpu.pipeline_mode<synchronous>, transform_indices = @transform_4, window_bounds = array<i64: 8, 1>}, {pipeline_mode = #tpu.pipeline_mode<synchronous>, transform_indices = @transform_5, window_bounds = array<i64: 1, 196>}, {transform_indices = @transform_6, window_bounds = array<i64: 1, 8, 196>}]} {
    %c0 = arith.constant 0 : index
    %c0_0 = arith.constant 0 : index
    %0 = vector.load %arg6[%c0, %c0_0] : memref<1x196xf32, #tpu.memory_space<vmem>>, vector<1x196xf32>
    %c0_1 = arith.constant 0 : index
    %c0_2 = arith.constant 0 : index
    %c0_3 = arith.constant 0 : index
    %1 = vector.load %arg2[%c0_1, %c0_2, %c0_3] : memref<9x8x2xbf16, #tpu.memory_space<vmem>>, vector<1x8x2xbf16>
    %2 = vector.shape_cast %1 : vector<1x8x2xbf16> to vector<8x2xbf16>
    %c0_4 = arith.constant 0 : index
    %c0_5 = arith.constant 0 : index
    %c0_6 = arith.constant 0 : index
    %3 = vector.load %arg1[%c0_4, %c0_5, %c0_6] : memref<1x2x226xf32, #tpu.memory_space<vmem>>, vector<1x2x196xf32>
    %4 = vector.shape_cast %3 : vector<1x2x196xf32> to vector<2x196xf32>
    %5 = arith.truncf %4 : vector<2x196xf32> to vector<2x196xbf16>
    %cst = arith.constant dense<0.000000e+00> : vector<8x196xf32>
    %6 = tpu.matmul %2, %5, %cst {dimension_numbers = #tpu.dot_dimension_numbers<[1], [0], [0], [1], [0, 0, 1, 1], [], []>} : vector<8x2xbf16>, vector<2x196xbf16>, vector<8x196xf32> -> vector<8x196xf32>
    %c1 = arith.constant 1 : index
    %c0_7 = arith.constant 0 : index
    %c0_8 = arith.constant 0 : index
    %7 = vector.load %arg2[%c1, %c0_7, %c0_8] : memref<9x8x2xbf16, #tpu.memory_space<vmem>>, vector<1x8x2xbf16>
    %8 = vector.shape_cast %7 : vector<1x8x2xbf16> to vector<8x2xbf16>
    %c0_9 = arith.constant 0 : index
    %c0_10 = arith.constant 0 : index
    %c1_11 = arith.constant 1 : index
    %9 = vector.load %arg1[%c0_9, %c0_10, %c1_11] : memref<1x2x226xf32, #tpu.memory_space<vmem>>, vector<1x2x196xf32>
    %10 = vector.shape_cast %9 : vector<1x2x196xf32> to vector<2x196xf32>
    %11 = arith.truncf %10 : vector<2x196xf32> to vector<2x196xbf16>
    %cst_12 = arith.constant dense<0.000000e+00> : vector<8x196xf32>
    %12 = tpu.matmul %8, %11, %cst_12 {dimension_numbers = #tpu.dot_dimension_numbers<[1], [0], [0], [1], [0, 0, 1, 1], [], []>} : vector<8x2xbf16>, vector<2x196xbf16>, vector<8x196xf32> -> vector<8x196xf32>
    %13 = arith.addf %6, %12 : vector<8x196xf32>
    %c2 = arith.constant 2 : index
    %c0_13 = arith.constant 0 : index
    %c0_14 = arith.constant 0 : index
    %14 = vector.load %arg2[%c2, %c0_13, %c0_14] : memref<9x8x2xbf16, #tpu.memory_space<vmem>>, vector<1x8x2xbf16>
    %15 = vector.shape_cast %14 : vector<1x8x2xbf16> to vector<8x2xbf16>
    %c0_15 = arith.constant 0 : index
    %c0_16 = arith.constant 0 : index
    %c2_17 = arith.constant 2 : index
    %16 = vector.load %arg1[%c0_15, %c0_16, %c2_17] : memref<1x2x226xf32, #tpu.memory_space<vmem>>, vector<1x2x196xf32>
    %17 = vector.shape_cast %16 : vector<1x2x196xf32> to vector<2x196xf32>
    %18 = arith.truncf %17 : vector<2x196xf32> to vector<2x196xbf16>
    %cst_18 = arith.constant dense<0.000000e+00> : vector<8x196xf32>
    %19 = tpu.matmul %15, %18, %cst_18 {dimension_numbers = #tpu.dot_dimension_numbers<[1], [0], [0], [1], [0, 0, 1, 1], [], []>} : vector<8x2xbf16>, vector<2x196xbf16>, vector<8x196xf32> -> vector<8x196xf32>
    %20 = arith.addf %13, %19 : vector<8x196xf32>
    %c3 = arith.constant 3 : index
    %c0_19 = arith.constant 0 : index
    %c0_20 = arith.constant 0 : index
    %21 = vector.load %arg2[%c3, %c0_19, %c0_20] : memref<9x8x2xbf16, #tpu.memory_space<vmem>>, vector<1x8x2xbf16>
    %22 = vector.shape_cast %21 : vector<1x8x2xbf16> to vector<8x2xbf16>
    %c0_21 = arith.constant 0 : index
    %c0_22 = arith.constant 0 : index
    %c14 = arith.constant 14 : index
    %23 = vector.load %arg1[%c0_21, %c0_22, %c14] : memref<1x2x226xf32, #tpu.memory_space<vmem>>, vector<1x2x196xf32>
    %24 = vector.shape_cast %23 : vector<1x2x196xf32> to vector<2x196xf32>
    %25 = arith.truncf %24 : vector<2x196xf32> to vector<2x196xbf16>
    %cst_23 = arith.constant dense<0.000000e+00> : vector<8x196xf32>
    %26 = tpu.matmul %22, %25, %cst_23 {dimension_numbers = #tpu.dot_dimension_numbers<[1], [0], [0], [1], [0, 0, 1, 1], [], []>} : vector<8x2xbf16>, vector<2x196xbf16>, vector<8x196xf32> -> vector<8x196xf32>
    %27 = arith.addf %20, %26 : vector<8x196xf32>
    %c4 = arith.constant 4 : index
    %c0_24 = arith.constant 0 : index
    %c0_25 = arith.constant 0 : index
    %28 = vector.load %arg2[%c4, %c0_24, %c0_25] : memref<9x8x2xbf16, #tpu.memory_space<vmem>>, vector<1x8x2xbf16>
    %29 = vector.shape_cast %28 : vector<1x8x2xbf16> to vector<8x2xbf16>
    %c0_26 = arith.constant 0 : index
    %c0_27 = arith.constant 0 : index
    %c15 = arith.constant 15 : index
    %30 = vector.load %arg1[%c0_26, %c0_27, %c15] : memref<1x2x226xf32, #tpu.memory_space<vmem>>, vector<1x2x196xf32>
    %31 = vector.shape_cast %30 : vector<1x2x196xf32> to vector<2x196xf32>
    %32 = arith.truncf %31 : vector<2x196xf32> to vector<2x196xbf16>
    %cst_28 = arith.constant dense<0.000000e+00> : vector<8x196xf32>
    %33 = tpu.matmul %29, %32, %cst_28 {dimension_numbers = #tpu.dot_dimension_numbers<[1], [0], [0], [1], [0, 0, 1, 1], [], []>} : vector<8x2xbf16>, vector<2x196xbf16>, vector<8x196xf32> -> vector<8x196xf32>
    %34 = arith.addf %27, %33 : vector<8x196xf32>
    %c5 = arith.constant 5 : index
    %c0_29 = arith.constant 0 : index
    %c0_30 = arith.constant 0 : index
    %35 = vector.load %arg2[%c5, %c0_29, %c0_30] : memref<9x8x2xbf16, #tpu.memory_space<vmem>>, vector<1x8x2xbf16>
    %36 = vector.shape_cast %35 : vector<1x8x2xbf16> to vector<8x2xbf16>
    %c0_31 = arith.constant 0 : index
    %c0_32 = arith.constant 0 : index
    %c16 = arith.constant 16 : index
    %37 = vector.load %arg1[%c0_31, %c0_32, %c16] : memref<1x2x226xf32, #tpu.memory_space<vmem>>, vector<1x2x196xf32>
    %38 = vector.shape_cast %37 : vector<1x2x196xf32> to vector<2x196xf32>
    %39 = arith.truncf %38 : vector<2x196xf32> to vector<2x196xbf16>
    %cst_33 = arith.constant dense<0.000000e+00> : vector<8x196xf32>
    %40 = tpu.matmul %36, %39, %cst_33 {dimension_numbers = #tpu.dot_dimension_numbers<[1], [0], [0], [1], [0, 0, 1, 1], [], []>} : vector<8x2xbf16>, vector<2x196xbf16>, vector<8x196xf32> -> vector<8x196xf32>
    %41 = arith.addf %34, %40 : vector<8x196xf32>
    %c6 = arith.constant 6 : index
    %c0_34 = arith.constant 0 : index
    %c0_35 = arith.constant 0 : index
    %42 = vector.load %arg2[%c6, %c0_34, %c0_35] : memref<9x8x2xbf16, #tpu.memory_space<vmem>>, vector<1x8x2xbf16>
    %43 = vector.shape_cast %42 : vector<1x8x2xbf16> to vector<8x2xbf16>
    %c0_36 = arith.constant 0 : index
    %c0_37 = arith.constant 0 : index
    %c28 = arith.constant 28 : index
    %44 = vector.load %arg1[%c0_36, %c0_37, %c28] : memref<1x2x226xf32, #tpu.memory_space<vmem>>, vector<1x2x196xf32>
    %45 = vector.shape_cast %44 : vector<1x2x196xf32> to vector<2x196xf32>
    %46 = arith.truncf %45 : vector<2x196xf32> to vector<2x196xbf16>
    %cst_38 = arith.constant dense<0.000000e+00> : vector<8x196xf32>
    %47 = tpu.matmul %43, %46, %cst_38 {dimension_numbers = #tpu.dot_dimension_numbers<[1], [0], [0], [1], [0, 0, 1, 1], [], []>} : vector<8x2xbf16>, vector<2x196xbf16>, vector<8x196xf32> -> vector<8x196xf32>
    %48 = arith.addf %41, %47 : vector<8x196xf32>
    %c7 = arith.constant 7 : index
    %c0_39 = arith.constant 0 : index
    %c0_40 = arith.constant 0 : index
    %49 = vector.load %arg2[%c7, %c0_39, %c0_40] : memref<9x8x2xbf16, #tpu.memory_space<vmem>>, vector<1x8x2xbf16>
    %50 = vector.shape_cast %49 : vector<1x8x2xbf16> to vector<8x2xbf16>
    %c0_41 = arith.constant 0 : index
    %c0_42 = arith.constant 0 : index
    %c29 = arith.constant 29 : index
    %51 = vector.load %arg1[%c0_41, %c0_42, %c29] : memref<1x2x226xf32, #tpu.memory_space<vmem>>, vector<1x2x196xf32>
    %52 = vector.shape_cast %51 : vector<1x2x196xf32> to vector<2x196xf32>
    %53 = arith.truncf %52 : vector<2x196xf32> to vector<2x196xbf16>
    %cst_43 = arith.constant dense<0.000000e+00> : vector<8x196xf32>
    %54 = tpu.matmul %50, %53, %cst_43 {dimension_numbers = #tpu.dot_dimension_numbers<[1], [0], [0], [1], [0, 0, 1, 1], [], []>} : vector<8x2xbf16>, vector<2x196xbf16>, vector<8x196xf32> -> vector<8x196xf32>
    %55 = arith.addf %48, %54 : vector<8x196xf32>
    %c8 = arith.constant 8 : index
    %c0_44 = arith.constant 0 : index
    %c0_45 = arith.constant 0 : index
    %56 = vector.load %arg2[%c8, %c0_44, %c0_45] : memref<9x8x2xbf16, #tpu.memory_space<vmem>>, vector<1x8x2xbf16>
    %57 = vector.shape_cast %56 : vector<1x8x2xbf16> to vector<8x2xbf16>
    %c0_46 = arith.constant 0 : index
    %c0_47 = arith.constant 0 : index
    %c30 = arith.constant 30 : index
    %58 = vector.load %arg1[%c0_46, %c0_47, %c30] : memref<1x2x226xf32, #tpu.memory_space<vmem>>, vector<1x2x196xf32>
    %59 = vector.shape_cast %58 : vector<1x2x196xf32> to vector<2x196xf32>
    %60 = arith.truncf %59 : vector<2x196xf32> to vector<2x196xbf16>
    %cst_48 = arith.constant dense<0.000000e+00> : vector<8x196xf32>
    %61 = tpu.matmul %57, %60, %cst_48 {dimension_numbers = #tpu.dot_dimension_numbers<[1], [0], [0], [1], [0, 0, 1, 1], [], []>} : vector<8x2xbf16>, vector<2x196xbf16>, vector<8x196xf32> -> vector<8x196xf32>
    %62 = arith.addf %55, %61 : vector<8x196xf32>
    %c0_49 = arith.constant 0 : index
    %c0_50 = arith.constant 0 : index
    %63 = vector.load %arg3[%c0_49, %c0_50] : memref<8x1xf32, #tpu.memory_space<vmem>>, vector<8x1xf32>
    %64 = vector.broadcast %63 : vector<8x1xf32> to vector<8x196xf32>
    %65 = arith.addf %62, %64 : vector<8x196xf32>
    %66 = vector.broadcast %0 : vector<1x196xf32> to vector<8x196xf32>
    %67 = arith.mulf %65, %66 : vector<8x196xf32>
    %cst_51 = arith.constant dense<0.000000e+00> : vector<8xf32>
    %68 = vector.multi_reduction <add>, %67, %cst_51 [1] : vector<8x196xf32> to vector<8xf32>
    %69 = vector.shape_cast %68 : vector<8xf32> to vector<8x1xf32>
    %cst_52 = arith.constant 0.0069444445 : f32
    %70 = vector.broadcast %cst_52 : f32 to vector<8x1xf32>
    %71 = arith.mulf %69, %70 : vector<8x1xf32>
    %72 = vector.broadcast %71 : vector<8x1xf32> to vector<8x196xf32>
    %73 = arith.subf %67, %72 : vector<8x196xf32>
    %74 = vector.broadcast %0 : vector<1x196xf32> to vector<8x196xf32>
    %75 = arith.mulf %73, %74 : vector<8x196xf32>
    %76 = arith.mulf %75, %75 : vector<8x196xf32>
    %cst_53 = arith.constant dense<0.000000e+00> : vector<8xf32>
    %77 = vector.multi_reduction <add>, %76, %cst_53 [1] : vector<8x196xf32> to vector<8xf32>
    %78 = vector.shape_cast %77 : vector<8xf32> to vector<8x1xf32>
    %cst_54 = arith.constant 0.0069444445 : f32
    %79 = vector.broadcast %cst_54 : f32 to vector<8x1xf32>
    %80 = arith.mulf %78, %79 : vector<8x1xf32>
    %cst_55 = arith.constant 9.99999974E-6 : f32
    %81 = vector.broadcast %cst_55 : f32 to vector<8x1xf32>
    %82 = arith.addf %80, %81 : vector<8x1xf32>
    %83 = math.rsqrt %82 : vector<8x1xf32>
    %84 = vector.broadcast %83 : vector<8x1xf32> to vector<8x196xf32>
    %85 = arith.mulf %75, %84 : vector<8x196xf32>
    %cst_56 = arith.constant 0.000000e+00 : f32
    %86 = vector.broadcast %cst_56 : f32 to vector<8x196xf32>
    %87 = arith.maximumf %85, %86 : vector<8x196xf32>
    %cst_57 = arith.constant 0.000000e+00 : f32
    %88 = vector.broadcast %cst_57 : f32 to vector<8x226xf32>
    %c0_58 = arith.constant 0 : index
    %c0_59 = arith.constant 0 : index
    %89 = vector.load %arg8[%c0_58, %c0_59] : memref<8x226xf32, #tpu.memory_space<vmem>>, vector<8x226xf32>
    tpu.vector_store %arg8[%c0_58, %c0_59], %88 {strides = array<i32>} : memref<8x226xf32, #tpu.memory_space<vmem>>, vector<8x226xf32>,
    %c0_60 = arith.constant 0 : index
    %c15_61 = arith.constant 15 : index
    %90 = vector.load %arg8[%c0_60, %c15_61] : memref<8x226xf32, #tpu.memory_space<vmem>>, vector<8x196xf32>
    tpu.vector_store %arg8[%c0_60, %c15_61], %87 {strides = array<i32>} : memref<8x226xf32, #tpu.memory_space<vmem>>, vector<8x196xf32>,
    %c0_62 = arith.constant 0 : index
    %c0_63 = arith.constant 0 : index
    %c0_64 = arith.constant 0 : index
    %91 = vector.load %arg4[%c0_62, %c0_63, %c0_64] : memref<9x8x8xbf16, #tpu.memory_space<vmem>>, vector<1x8x8xbf16>
    %92 = vector.shape_cast %91 : vector<1x8x8xbf16> to vector<8x8xbf16>
    %c0_65 = arith.constant 0 : index
    %c0_66 = arith.constant 0 : index
    %93 = vector.load %arg8[%c0_65, %c0_66] : memref<8x226xf32, #tpu.memory_space<vmem>>, vector<8x196xf32>
    %94 = arith.truncf %93 : vector<8x196xf32> to vector<8x196xbf16>
    %cst_67 = arith.constant dense<0.000000e+00> : vector<8x196xf32>
    %95 = tpu.matmul %92, %94, %cst_67 {dimension_numbers = #tpu.dot_dimension_numbers<[1], [0], [0], [1], [0, 0, 1, 1], [], []>} : vector<8x8xbf16>, vector<8x196xbf16>, vector<8x196xf32> -> vector<8x196xf32>
    %c1_68 = arith.constant 1 : index
    %c0_69 = arith.constant 0 : index
    %c0_70 = arith.constant 0 : index
    %96 = vector.load %arg4[%c1_68, %c0_69, %c0_70] : memref<9x8x8xbf16, #tpu.memory_space<vmem>>, vector<1x8x8xbf16>
    %97 = vector.shape_cast %96 : vector<1x8x8xbf16> to vector<8x8xbf16>
    %c0_71 = arith.constant 0 : index
    %c1_72 = arith.constant 1 : index
    %98 = vector.load %arg8[%c0_71, %c1_72] : memref<8x226xf32, #tpu.memory_space<vmem>>, vector<8x196xf32>
    %99 = arith.truncf %98 : vector<8x196xf32> to vector<8x196xbf16>
    %cst_73 = arith.constant dense<0.000000e+00> : vector<8x196xf32>
    %100 = tpu.matmul %97, %99, %cst_73 {dimension_numbers = #tpu.dot_dimension_numbers<[1], [0], [0], [1], [0, 0, 1, 1], [], []>} : vector<8x8xbf16>, vector<8x196xbf16>, vector<8x196xf32> -> vector<8x196xf32>
    %101 = arith.addf %95, %100 : vector<8x196xf32>
    %c2_74 = arith.constant 2 : index
    %c0_75 = arith.constant 0 : index
    %c0_76 = arith.constant 0 : index
    %102 = vector.load %arg4[%c2_74, %c0_75, %c0_76] : memref<9x8x8xbf16, #tpu.memory_space<vmem>>, vector<1x8x8xbf16>
    %103 = vector.shape_cast %102 : vector<1x8x8xbf16> to vector<8x8xbf16>
    %c0_77 = arith.constant 0 : index
    %c2_78 = arith.constant 2 : index
    %104 = vector.load %arg8[%c0_77, %c2_78] : memref<8x226xf32, #tpu.memory_space<vmem>>, vector<8x196xf32>
    %105 = arith.truncf %104 : vector<8x196xf32> to vector<8x196xbf16>
    %cst_79 = arith.constant dense<0.000000e+00> : vector<8x196xf32>
    %106 = tpu.matmul %103, %105, %cst_79 {dimension_numbers = #tpu.dot_dimension_numbers<[1], [0], [0], [1], [0, 0, 1, 1], [], []>} : vector<8x8xbf16>, vector<8x196xbf16>, vector<8x196xf32> -> vector<8x196xf32>
    %107 = arith.addf %101, %106 : vector<8x196xf32>
    %c3_80 = arith.constant 3 : index
    %c0_81 = arith.constant 0 : index
    %c0_82 = arith.constant 0 : index
    %108 = vector.load %arg4[%c3_80, %c0_81, %c0_82] : memref<9x8x8xbf16, #tpu.memory_space<vmem>>, vector<1x8x8xbf16>
    %109 = vector.shape_cast %108 : vector<1x8x8xbf16> to vector<8x8xbf16>
    %c0_83 = arith.constant 0 : index
    %c14_84 = arith.constant 14 : index
    %110 = vector.load %arg8[%c0_83, %c14_84] : memref<8x226xf32, #tpu.memory_space<vmem>>, vector<8x196xf32>
    %111 = arith.truncf %110 : vector<8x196xf32> to vector<8x196xbf16>
    %cst_85 = arith.constant dense<0.000000e+00> : vector<8x196xf32>
    %112 = tpu.matmul %109, %111, %cst_85 {dimension_numbers = #tpu.dot_dimension_numbers<[1], [0], [0], [1], [0, 0, 1, 1], [], []>} : vector<8x8xbf16>, vector<8x196xbf16>, vector<8x196xf32> -> vector<8x196xf32>
    %113 = arith.addf %107, %112 : vector<8x196xf32>
    %c4_86 = arith.constant 4 : index
    %c0_87 = arith.constant 0 : index
    %c0_88 = arith.constant 0 : index
    %114 = vector.load %arg4[%c4_86, %c0_87, %c0_88] : memref<9x8x8xbf16, #tpu.memory_space<vmem>>, vector<1x8x8xbf16>
    %115 = vector.shape_cast %114 : vector<1x8x8xbf16> to vector<8x8xbf16>
    %c0_89 = arith.constant 0 : index
    %c15_90 = arith.constant 15 : index
    %116 = vector.load %arg8[%c0_89, %c15_90] : memref<8x226xf32, #tpu.memory_space<vmem>>, vector<8x196xf32>
    %117 = arith.truncf %116 : vector<8x196xf32> to vector<8x196xbf16>
    %cst_91 = arith.constant dense<0.000000e+00> : vector<8x196xf32>
    %118 = tpu.matmul %115, %117, %cst_91 {dimension_numbers = #tpu.dot_dimension_numbers<[1], [0], [0], [1], [0, 0, 1, 1], [], []>} : vector<8x8xbf16>, vector<8x196xbf16>, vector<8x196xf32> -> vector<8x196xf32>
    %119 = arith.addf %113, %118 : vector<8x196xf32>
    %c5_92 = arith.constant 5 : index
    %c0_93 = arith.constant 0 : index
    %c0_94 = arith.constant 0 : index
    %120 = vector.load %arg4[%c5_92, %c0_93, %c0_94] : memref<9x8x8xbf16, #tpu.memory_space<vmem>>, vector<1x8x8xbf16>
    %121 = vector.shape_cast %120 : vector<1x8x8xbf16> to vector<8x8xbf16>
    %c0_95 = arith.constant 0 : index
    %c16_96 = arith.constant 16 : index
    %122 = vector.load %arg8[%c0_95, %c16_96] : memref<8x226xf32, #tpu.memory_space<vmem>>, vector<8x196xf32>
    %123 = arith.truncf %122 : vector<8x196xf32> to vector<8x196xbf16>
    %cst_97 = arith.constant dense<0.000000e+00> : vector<8x196xf32>
    %124 = tpu.matmul %121, %123, %cst_97 {dimension_numbers = #tpu.dot_dimension_numbers<[1], [0], [0], [1], [0, 0, 1, 1], [], []>} : vector<8x8xbf16>, vector<8x196xbf16>, vector<8x196xf32> -> vector<8x196xf32>
    %125 = arith.addf %119, %124 : vector<8x196xf32>
    %c6_98 = arith.constant 6 : index
    %c0_99 = arith.constant 0 : index
    %c0_100 = arith.constant 0 : index
    %126 = vector.load %arg4[%c6_98, %c0_99, %c0_100] : memref<9x8x8xbf16, #tpu.memory_space<vmem>>, vector<1x8x8xbf16>
    %127 = vector.shape_cast %126 : vector<1x8x8xbf16> to vector<8x8xbf16>
    %c0_101 = arith.constant 0 : index
    %c28_102 = arith.constant 28 : index
    %128 = vector.load %arg8[%c0_101, %c28_102] : memref<8x226xf32, #tpu.memory_space<vmem>>, vector<8x196xf32>
    %129 = arith.truncf %128 : vector<8x196xf32> to vector<8x196xbf16>
    %cst_103 = arith.constant dense<0.000000e+00> : vector<8x196xf32>
    %130 = tpu.matmul %127, %129, %cst_103 {dimension_numbers = #tpu.dot_dimension_numbers<[1], [0], [0], [1], [0, 0, 1, 1], [], []>} : vector<8x8xbf16>, vector<8x196xbf16>, vector<8x196xf32> -> vector<8x196xf32>
    %131 = arith.addf %125, %130 : vector<8x196xf32>
    %c7_104 = arith.constant 7 : index
    %c0_105 = arith.constant 0 : index
    %c0_106 = arith.constant 0 : index
    %132 = vector.load %arg4[%c7_104, %c0_105, %c0_106] : memref<9x8x8xbf16, #tpu.memory_space<vmem>>, vector<1x8x8xbf16>
    %133 = vector.shape_cast %132 : vector<1x8x8xbf16> to vector<8x8xbf16>
    %c0_107 = arith.constant 0 : index
    %c29_108 = arith.constant 29 : index
    %134 = vector.load %arg8[%c0_107, %c29_108] : memref<8x226xf32, #tpu.memory_space<vmem>>, vector<8x196xf32>
    %135 = arith.truncf %134 : vector<8x196xf32> to vector<8x196xbf16>
    %cst_109 = arith.constant dense<0.000000e+00> : vector<8x196xf32>
    %136 = tpu.matmul %133, %135, %cst_109 {dimension_numbers = #tpu.dot_dimension_numbers<[1], [0], [0], [1], [0, 0, 1, 1], [], []>} : vector<8x8xbf16>, vector<8x196xbf16>, vector<8x196xf32> -> vector<8x196xf32>
    %137 = arith.addf %131, %136 : vector<8x196xf32>
    %c8_110 = arith.constant 8 : index
    %c0_111 = arith.constant 0 : index
    %c0_112 = arith.constant 0 : index
    %138 = vector.load %arg4[%c8_110, %c0_111, %c0_112] : memref<9x8x8xbf16, #tpu.memory_space<vmem>>, vector<1x8x8xbf16>
    %139 = vector.shape_cast %138 : vector<1x8x8xbf16> to vector<8x8xbf16>
    %c0_113 = arith.constant 0 : index
    %c30_114 = arith.constant 30 : index
    %140 = vector.load %arg8[%c0_113, %c30_114] : memref<8x226xf32, #tpu.memory_space<vmem>>, vector<8x196xf32>
    %141 = arith.truncf %140 : vector<8x196xf32> to vector<8x196xbf16>
    %cst_115 = arith.constant dense<0.000000e+00> : vector<8x196xf32>
    %142 = tpu.matmul %139, %141, %cst_115 {dimension_numbers = #tpu.dot_dimension_numbers<[1], [0], [0], [1], [0, 0, 1, 1], [], []>} : vector<8x8xbf16>, vector<8x196xbf16>, vector<8x196xf32> -> vector<8x196xf32>
    %143 = arith.addf %137, %142 : vector<8x196xf32>
    %c0_116 = arith.constant 0 : index
    %c0_117 = arith.constant 0 : index
    %144 = vector.load %arg5[%c0_116, %c0_117] : memref<8x1xf32, #tpu.memory_space<vmem>>, vector<8x1xf32>
    %145 = vector.broadcast %144 : vector<8x1xf32> to vector<8x196xf32>
    %146 = arith.addf %143, %145 : vector<8x196xf32>
    %147 = vector.broadcast %0 : vector<1x196xf32> to vector<8x196xf32>
    %148 = arith.mulf %146, %147 : vector<8x196xf32>
    %cst_118 = arith.constant dense<0.000000e+00> : vector<8xf32>
    %149 = vector.multi_reduction <add>, %148, %cst_118 [1] : vector<8x196xf32> to vector<8xf32>
    %150 = vector.shape_cast %149 : vector<8xf32> to vector<8x1xf32>
    %cst_119 = arith.constant 0.0069444445 : f32
    %151 = vector.broadcast %cst_119 : f32 to vector<8x1xf32>
    %152 = arith.mulf %150, %151 : vector<8x1xf32>
    %153 = vector.broadcast %152 : vector<8x1xf32> to vector<8x196xf32>
    %154 = arith.subf %148, %153 : vector<8x196xf32>
    %155 = vector.broadcast %0 : vector<1x196xf32> to vector<8x196xf32>
    %156 = arith.mulf %154, %155 : vector<8x196xf32>
    %157 = arith.mulf %156, %156 : vector<8x196xf32>
    %cst_120 = arith.constant dense<0.000000e+00> : vector<8xf32>
    %158 = vector.multi_reduction <add>, %157, %cst_120 [1] : vector<8x196xf32> to vector<8xf32>
    %159 = vector.shape_cast %158 : vector<8xf32> to vector<8x1xf32>
    %cst_121 = arith.constant 0.0069444445 : f32
    %160 = vector.broadcast %cst_121 : f32 to vector<8x1xf32>
    %161 = arith.mulf %159, %160 : vector<8x1xf32>
    %cst_122 = arith.constant 9.99999974E-6 : f32
    %162 = vector.broadcast %cst_122 : f32 to vector<8x1xf32>
    %163 = arith.addf %161, %162 : vector<8x1xf32>
    %164 = math.rsqrt %163 : vector<8x1xf32>
    %165 = vector.broadcast %164 : vector<8x1xf32> to vector<8x196xf32>
    %166 = arith.mulf %156, %165 : vector<8x196xf32>
    %cst_123 = arith.constant 0.000000e+00 : f32
    %167 = vector.broadcast %cst_123 : f32 to vector<8x196xf32>
    %168 = arith.maximumf %166, %167 : vector<8x196xf32>
    %c0_124 = arith.constant 0 : index
    %c0_125 = arith.constant 0 : index
    %c0_126 = arith.constant 0 : index
    %169 = vector.load %arg7[%c0_124, %c0_125, %c0_126] : memref<1x8x196xf32, #tpu.memory_space<vmem>>, vector<1x8x196xf32>
    %170 = vector.shape_cast %169 : vector<1x8x196xf32> to vector<8x196xf32>
    %171 = vector.shape_cast %168 : vector<8x196xf32> to vector<1x8x196xf32>
    tpu.vector_store %arg7[%c0_124, %c0_125, %c0_126], %171 {strides = array<i32>} : memref<1x8x196xf32, #tpu.memory_space<vmem>>, vector<1x8x196xf32>,
    return
  }
  func.func @transform_0(%arg0: i32) -> (i32, i32, i32) {
    %c0_i32 = arith.constant 0 : i32
    %c0_i32_0 = arith.constant 0 : i32
    %c0_i32_1 = arith.constant 0 : i32
    return %arg0, %c0_i32, %c0_i32_0 : i32, i32, i32
  }
  func.func @transform_1(%arg0: i32) -> (i32, i32, i32) {
    %c0_i32 = arith.constant 0 : i32
    %c0_i32_0 = arith.constant 0 : i32
    %c0_i32_1 = arith.constant 0 : i32
    %c0_i32_2 = arith.constant 0 : i32
    return %c0_i32, %c0_i32_0, %c0_i32_1 : i32, i32, i32
  }
  func.func @transform_2(%arg0: i32) -> (i32, i32) {
    %c0_i32 = arith.constant 0 : i32
    %c0_i32_0 = arith.constant 0 : i32
    %c0_i32_1 = arith.constant 0 : i32
    return %c0_i32, %c0_i32_0 : i32, i32
  }
  func.func @transform_3(%arg0: i32) -> (i32, i32, i32) {
    %c0_i32 = arith.constant 0 : i32
    %c0_i32_0 = arith.constant 0 : i32
    %c0_i32_1 = arith.constant 0 : i32
    %c0_i32_2 = arith.constant 0 : i32
    return %c0_i32, %c0_i32_0, %c0_i32_1 : i32, i32, i32
  }
  func.func @transform_4(%arg0: i32) -> (i32, i32) {
    %c0_i32 = arith.constant 0 : i32
    %c0_i32_0 = arith.constant 0 : i32
    %c0_i32_1 = arith.constant 0 : i32
    return %c0_i32, %c0_i32_0 : i32, i32
  }
  func.func @transform_5(%arg0: i32) -> (i32, i32) {
    %c0_i32 = arith.constant 0 : i32
    %c0_i32_0 = arith.constant 0 : i32
    %c0_i32_1 = arith.constant 0 : i32
    return %c0_i32, %c0_i32_0 : i32, i32
  }
  func.func @transform_6(%arg0: i32) -> (i32, i32, i32) {
    %c0_i32 = arith.constant 0 : i32
    %c0_i32_0 = arith.constant 0 : i32
    %c0_i32_1 = arith.constant 0 : i32
    return %arg0, %c0_i32, %c0_i32_0 : i32, i32, i32
  }
}

module attributes {stable_mosaic.version = 11 : i64} {
  func.func @_conv_block_kernel(%arg0: i32, %arg1: memref<1x8x82xf32, #tpu.memory_space<vmem>>, %arg2: memref<9x16x8xbf16, #tpu.memory_space<vmem>>, %arg3: memref<16x1xf32, #tpu.memory_space<vmem>>, %arg4: memref<9x16x16xbf16, #tpu.memory_space<vmem>>, %arg5: memref<16x1xf32, #tpu.memory_space<vmem>>, %arg6: memref<1x64xf32, #tpu.memory_space<vmem>>, %arg7: memref<1x16x64xf32, #tpu.memory_space<vmem>>, %arg8: memref<16x82xf32, #tpu.memory_space<vmem>>) attributes {dimension_semantics = [#tpu.dimension_semantics<parallel>], iteration_bounds = array<i64: 2>, scalar_prefetch = 0 : i64, scratch_operands = 1 : i64, tpu.core_type = #tpu.core_type<tc>, window_params = [{transform_indices = @transform_0, window_bounds = array<i64: 1, 8, 82>}, {pipeline_mode = #tpu.pipeline_mode<synchronous>, transform_indices = @transform_1, window_bounds = array<i64: 9, 16, 8>}, {pipeline_mode = #tpu.pipeline_mode<synchronous>, transform_indices = @transform_2, window_bounds = array<i64: 16, 1>}, {pipeline_mode = #tpu.pipeline_mode<synchronous>, transform_indices = @transform_3, window_bounds = array<i64: 9, 16, 16>}, {pipeline_mode = #tpu.pipeline_mode<synchronous>, transform_indices = @transform_4, window_bounds = array<i64: 16, 1>}, {pipeline_mode = #tpu.pipeline_mode<synchronous>, transform_indices = @transform_5, window_bounds = array<i64: 1, 64>}, {transform_indices = @transform_6, window_bounds = array<i64: 1, 16, 64>}]} {
    %c0 = arith.constant 0 : index
    %c0_0 = arith.constant 0 : index
    %0 = vector.load %arg6[%c0, %c0_0] : memref<1x64xf32, #tpu.memory_space<vmem>>, vector<1x64xf32>
    %c0_1 = arith.constant 0 : index
    %c0_2 = arith.constant 0 : index
    %c0_3 = arith.constant 0 : index
    %1 = vector.load %arg2[%c0_1, %c0_2, %c0_3] : memref<9x16x8xbf16, #tpu.memory_space<vmem>>, vector<1x16x8xbf16>
    %2 = vector.shape_cast %1 : vector<1x16x8xbf16> to vector<16x8xbf16>
    %c0_4 = arith.constant 0 : index
    %c0_5 = arith.constant 0 : index
    %c0_6 = arith.constant 0 : index
    %3 = vector.load %arg1[%c0_4, %c0_5, %c0_6] : memref<1x8x82xf32, #tpu.memory_space<vmem>>, vector<1x8x64xf32>
    %4 = vector.shape_cast %3 : vector<1x8x64xf32> to vector<8x64xf32>
    %5 = arith.truncf %4 : vector<8x64xf32> to vector<8x64xbf16>
    %cst = arith.constant dense<0.000000e+00> : vector<16x64xf32>
    %6 = tpu.matmul %2, %5, %cst {dimension_numbers = #tpu.dot_dimension_numbers<[1], [0], [0], [1], [0, 0, 1, 1], [], []>} : vector<16x8xbf16>, vector<8x64xbf16>, vector<16x64xf32> -> vector<16x64xf32>
    %c1 = arith.constant 1 : index
    %c0_7 = arith.constant 0 : index
    %c0_8 = arith.constant 0 : index
    %7 = vector.load %arg2[%c1, %c0_7, %c0_8] : memref<9x16x8xbf16, #tpu.memory_space<vmem>>, vector<1x16x8xbf16>
    %8 = vector.shape_cast %7 : vector<1x16x8xbf16> to vector<16x8xbf16>
    %c0_9 = arith.constant 0 : index
    %c0_10 = arith.constant 0 : index
    %c1_11 = arith.constant 1 : index
    %9 = vector.load %arg1[%c0_9, %c0_10, %c1_11] : memref<1x8x82xf32, #tpu.memory_space<vmem>>, vector<1x8x64xf32>
    %10 = vector.shape_cast %9 : vector<1x8x64xf32> to vector<8x64xf32>
    %11 = arith.truncf %10 : vector<8x64xf32> to vector<8x64xbf16>
    %cst_12 = arith.constant dense<0.000000e+00> : vector<16x64xf32>
    %12 = tpu.matmul %8, %11, %cst_12 {dimension_numbers = #tpu.dot_dimension_numbers<[1], [0], [0], [1], [0, 0, 1, 1], [], []>} : vector<16x8xbf16>, vector<8x64xbf16>, vector<16x64xf32> -> vector<16x64xf32>
    %13 = arith.addf %6, %12 : vector<16x64xf32>
    %c2 = arith.constant 2 : index
    %c0_13 = arith.constant 0 : index
    %c0_14 = arith.constant 0 : index
    %14 = vector.load %arg2[%c2, %c0_13, %c0_14] : memref<9x16x8xbf16, #tpu.memory_space<vmem>>, vector<1x16x8xbf16>
    %15 = vector.shape_cast %14 : vector<1x16x8xbf16> to vector<16x8xbf16>
    %c0_15 = arith.constant 0 : index
    %c0_16 = arith.constant 0 : index
    %c2_17 = arith.constant 2 : index
    %16 = vector.load %arg1[%c0_15, %c0_16, %c2_17] : memref<1x8x82xf32, #tpu.memory_space<vmem>>, vector<1x8x64xf32>
    %17 = vector.shape_cast %16 : vector<1x8x64xf32> to vector<8x64xf32>
    %18 = arith.truncf %17 : vector<8x64xf32> to vector<8x64xbf16>
    %cst_18 = arith.constant dense<0.000000e+00> : vector<16x64xf32>
    %19 = tpu.matmul %15, %18, %cst_18 {dimension_numbers = #tpu.dot_dimension_numbers<[1], [0], [0], [1], [0, 0, 1, 1], [], []>} : vector<16x8xbf16>, vector<8x64xbf16>, vector<16x64xf32> -> vector<16x64xf32>
    %20 = arith.addf %13, %19 : vector<16x64xf32>
    %c3 = arith.constant 3 : index
    %c0_19 = arith.constant 0 : index
    %c0_20 = arith.constant 0 : index
    %21 = vector.load %arg2[%c3, %c0_19, %c0_20] : memref<9x16x8xbf16, #tpu.memory_space<vmem>>, vector<1x16x8xbf16>
    %22 = vector.shape_cast %21 : vector<1x16x8xbf16> to vector<16x8xbf16>
    %c0_21 = arith.constant 0 : index
    %c0_22 = arith.constant 0 : index
    %c8 = arith.constant 8 : index
    %23 = vector.load %arg1[%c0_21, %c0_22, %c8] : memref<1x8x82xf32, #tpu.memory_space<vmem>>, vector<1x8x64xf32>
    %24 = vector.shape_cast %23 : vector<1x8x64xf32> to vector<8x64xf32>
    %25 = arith.truncf %24 : vector<8x64xf32> to vector<8x64xbf16>
    %cst_23 = arith.constant dense<0.000000e+00> : vector<16x64xf32>
    %26 = tpu.matmul %22, %25, %cst_23 {dimension_numbers = #tpu.dot_dimension_numbers<[1], [0], [0], [1], [0, 0, 1, 1], [], []>} : vector<16x8xbf16>, vector<8x64xbf16>, vector<16x64xf32> -> vector<16x64xf32>
    %27 = arith.addf %20, %26 : vector<16x64xf32>
    %c4 = arith.constant 4 : index
    %c0_24 = arith.constant 0 : index
    %c0_25 = arith.constant 0 : index
    %28 = vector.load %arg2[%c4, %c0_24, %c0_25] : memref<9x16x8xbf16, #tpu.memory_space<vmem>>, vector<1x16x8xbf16>
    %29 = vector.shape_cast %28 : vector<1x16x8xbf16> to vector<16x8xbf16>
    %c0_26 = arith.constant 0 : index
    %c0_27 = arith.constant 0 : index
    %c9 = arith.constant 9 : index
    %30 = vector.load %arg1[%c0_26, %c0_27, %c9] : memref<1x8x82xf32, #tpu.memory_space<vmem>>, vector<1x8x64xf32>
    %31 = vector.shape_cast %30 : vector<1x8x64xf32> to vector<8x64xf32>
    %32 = arith.truncf %31 : vector<8x64xf32> to vector<8x64xbf16>
    %cst_28 = arith.constant dense<0.000000e+00> : vector<16x64xf32>
    %33 = tpu.matmul %29, %32, %cst_28 {dimension_numbers = #tpu.dot_dimension_numbers<[1], [0], [0], [1], [0, 0, 1, 1], [], []>} : vector<16x8xbf16>, vector<8x64xbf16>, vector<16x64xf32> -> vector<16x64xf32>
    %34 = arith.addf %27, %33 : vector<16x64xf32>
    %c5 = arith.constant 5 : index
    %c0_29 = arith.constant 0 : index
    %c0_30 = arith.constant 0 : index
    %35 = vector.load %arg2[%c5, %c0_29, %c0_30] : memref<9x16x8xbf16, #tpu.memory_space<vmem>>, vector<1x16x8xbf16>
    %36 = vector.shape_cast %35 : vector<1x16x8xbf16> to vector<16x8xbf16>
    %c0_31 = arith.constant 0 : index
    %c0_32 = arith.constant 0 : index
    %c10 = arith.constant 10 : index
    %37 = vector.load %arg1[%c0_31, %c0_32, %c10] : memref<1x8x82xf32, #tpu.memory_space<vmem>>, vector<1x8x64xf32>
    %38 = vector.shape_cast %37 : vector<1x8x64xf32> to vector<8x64xf32>
    %39 = arith.truncf %38 : vector<8x64xf32> to vector<8x64xbf16>
    %cst_33 = arith.constant dense<0.000000e+00> : vector<16x64xf32>
    %40 = tpu.matmul %36, %39, %cst_33 {dimension_numbers = #tpu.dot_dimension_numbers<[1], [0], [0], [1], [0, 0, 1, 1], [], []>} : vector<16x8xbf16>, vector<8x64xbf16>, vector<16x64xf32> -> vector<16x64xf32>
    %41 = arith.addf %34, %40 : vector<16x64xf32>
    %c6 = arith.constant 6 : index
    %c0_34 = arith.constant 0 : index
    %c0_35 = arith.constant 0 : index
    %42 = vector.load %arg2[%c6, %c0_34, %c0_35] : memref<9x16x8xbf16, #tpu.memory_space<vmem>>, vector<1x16x8xbf16>
    %43 = vector.shape_cast %42 : vector<1x16x8xbf16> to vector<16x8xbf16>
    %c0_36 = arith.constant 0 : index
    %c0_37 = arith.constant 0 : index
    %c16 = arith.constant 16 : index
    %44 = vector.load %arg1[%c0_36, %c0_37, %c16] : memref<1x8x82xf32, #tpu.memory_space<vmem>>, vector<1x8x64xf32>
    %45 = vector.shape_cast %44 : vector<1x8x64xf32> to vector<8x64xf32>
    %46 = arith.truncf %45 : vector<8x64xf32> to vector<8x64xbf16>
    %cst_38 = arith.constant dense<0.000000e+00> : vector<16x64xf32>
    %47 = tpu.matmul %43, %46, %cst_38 {dimension_numbers = #tpu.dot_dimension_numbers<[1], [0], [0], [1], [0, 0, 1, 1], [], []>} : vector<16x8xbf16>, vector<8x64xbf16>, vector<16x64xf32> -> vector<16x64xf32>
    %48 = arith.addf %41, %47 : vector<16x64xf32>
    %c7 = arith.constant 7 : index
    %c0_39 = arith.constant 0 : index
    %c0_40 = arith.constant 0 : index
    %49 = vector.load %arg2[%c7, %c0_39, %c0_40] : memref<9x16x8xbf16, #tpu.memory_space<vmem>>, vector<1x16x8xbf16>
    %50 = vector.shape_cast %49 : vector<1x16x8xbf16> to vector<16x8xbf16>
    %c0_41 = arith.constant 0 : index
    %c0_42 = arith.constant 0 : index
    %c17 = arith.constant 17 : index
    %51 = vector.load %arg1[%c0_41, %c0_42, %c17] : memref<1x8x82xf32, #tpu.memory_space<vmem>>, vector<1x8x64xf32>
    %52 = vector.shape_cast %51 : vector<1x8x64xf32> to vector<8x64xf32>
    %53 = arith.truncf %52 : vector<8x64xf32> to vector<8x64xbf16>
    %cst_43 = arith.constant dense<0.000000e+00> : vector<16x64xf32>
    %54 = tpu.matmul %50, %53, %cst_43 {dimension_numbers = #tpu.dot_dimension_numbers<[1], [0], [0], [1], [0, 0, 1, 1], [], []>} : vector<16x8xbf16>, vector<8x64xbf16>, vector<16x64xf32> -> vector<16x64xf32>
    %55 = arith.addf %48, %54 : vector<16x64xf32>
    %c8_44 = arith.constant 8 : index
    %c0_45 = arith.constant 0 : index
    %c0_46 = arith.constant 0 : index
    %56 = vector.load %arg2[%c8_44, %c0_45, %c0_46] : memref<9x16x8xbf16, #tpu.memory_space<vmem>>, vector<1x16x8xbf16>
    %57 = vector.shape_cast %56 : vector<1x16x8xbf16> to vector<16x8xbf16>
    %c0_47 = arith.constant 0 : index
    %c0_48 = arith.constant 0 : index
    %c18 = arith.constant 18 : index
    %58 = vector.load %arg1[%c0_47, %c0_48, %c18] : memref<1x8x82xf32, #tpu.memory_space<vmem>>, vector<1x8x64xf32>
    %59 = vector.shape_cast %58 : vector<1x8x64xf32> to vector<8x64xf32>
    %60 = arith.truncf %59 : vector<8x64xf32> to vector<8x64xbf16>
    %cst_49 = arith.constant dense<0.000000e+00> : vector<16x64xf32>
    %61 = tpu.matmul %57, %60, %cst_49 {dimension_numbers = #tpu.dot_dimension_numbers<[1], [0], [0], [1], [0, 0, 1, 1], [], []>} : vector<16x8xbf16>, vector<8x64xbf16>, vector<16x64xf32> -> vector<16x64xf32>
    %62 = arith.addf %55, %61 : vector<16x64xf32>
    %c0_50 = arith.constant 0 : index
    %c0_51 = arith.constant 0 : index
    %63 = vector.load %arg3[%c0_50, %c0_51] : memref<16x1xf32, #tpu.memory_space<vmem>>, vector<16x1xf32>
    %64 = vector.broadcast %63 : vector<16x1xf32> to vector<16x64xf32>
    %65 = arith.addf %62, %64 : vector<16x64xf32>
    %66 = vector.broadcast %0 : vector<1x64xf32> to vector<16x64xf32>
    %67 = arith.mulf %65, %66 : vector<16x64xf32>
    %cst_52 = arith.constant dense<0.000000e+00> : vector<16xf32>
    %68 = vector.multi_reduction <add>, %67, %cst_52 [1] : vector<16x64xf32> to vector<16xf32>
    %69 = vector.shape_cast %68 : vector<16xf32> to vector<16x1xf32>
    %cst_53 = arith.constant 0.027777778 : f32
    %70 = vector.broadcast %cst_53 : f32 to vector<16x1xf32>
    %71 = arith.mulf %69, %70 : vector<16x1xf32>
    %72 = vector.broadcast %71 : vector<16x1xf32> to vector<16x64xf32>
    %73 = arith.subf %67, %72 : vector<16x64xf32>
    %74 = vector.broadcast %0 : vector<1x64xf32> to vector<16x64xf32>
    %75 = arith.mulf %73, %74 : vector<16x64xf32>
    %76 = arith.mulf %75, %75 : vector<16x64xf32>
    %cst_54 = arith.constant dense<0.000000e+00> : vector<16xf32>
    %77 = vector.multi_reduction <add>, %76, %cst_54 [1] : vector<16x64xf32> to vector<16xf32>
    %78 = vector.shape_cast %77 : vector<16xf32> to vector<16x1xf32>
    %cst_55 = arith.constant 0.027777778 : f32
    %79 = vector.broadcast %cst_55 : f32 to vector<16x1xf32>
    %80 = arith.mulf %78, %79 : vector<16x1xf32>
    %cst_56 = arith.constant 9.99999974E-6 : f32
    %81 = vector.broadcast %cst_56 : f32 to vector<16x1xf32>
    %82 = arith.addf %80, %81 : vector<16x1xf32>
    %83 = math.rsqrt %82 : vector<16x1xf32>
    %84 = vector.broadcast %83 : vector<16x1xf32> to vector<16x64xf32>
    %85 = arith.mulf %75, %84 : vector<16x64xf32>
    %cst_57 = arith.constant 0.000000e+00 : f32
    %86 = vector.broadcast %cst_57 : f32 to vector<16x64xf32>
    %87 = arith.maximumf %85, %86 : vector<16x64xf32>
    %cst_58 = arith.constant 0.000000e+00 : f32
    %88 = vector.broadcast %cst_58 : f32 to vector<16x82xf32>
    %c0_59 = arith.constant 0 : index
    %c0_60 = arith.constant 0 : index
    %89 = vector.load %arg8[%c0_59, %c0_60] : memref<16x82xf32, #tpu.memory_space<vmem>>, vector<16x82xf32>
    tpu.vector_store %arg8[%c0_59, %c0_60], %88 {strides = array<i32>} : memref<16x82xf32, #tpu.memory_space<vmem>>, vector<16x82xf32>,
    %c0_61 = arith.constant 0 : index
    %c9_62 = arith.constant 9 : index
    %90 = vector.load %arg8[%c0_61, %c9_62] : memref<16x82xf32, #tpu.memory_space<vmem>>, vector<16x64xf32>
    tpu.vector_store %arg8[%c0_61, %c9_62], %87 {strides = array<i32>} : memref<16x82xf32, #tpu.memory_space<vmem>>, vector<16x64xf32>,
    %c0_63 = arith.constant 0 : index
    %c0_64 = arith.constant 0 : index
    %c0_65 = arith.constant 0 : index
    %91 = vector.load %arg4[%c0_63, %c0_64, %c0_65] : memref<9x16x16xbf16, #tpu.memory_space<vmem>>, vector<1x16x16xbf16>
    %92 = vector.shape_cast %91 : vector<1x16x16xbf16> to vector<16x16xbf16>
    %c0_66 = arith.constant 0 : index
    %c0_67 = arith.constant 0 : index
    %93 = vector.load %arg8[%c0_66, %c0_67] : memref<16x82xf32, #tpu.memory_space<vmem>>, vector<16x64xf32>
    %94 = arith.truncf %93 : vector<16x64xf32> to vector<16x64xbf16>
    %cst_68 = arith.constant dense<0.000000e+00> : vector<16x64xf32>
    %95 = tpu.matmul %92, %94, %cst_68 {dimension_numbers = #tpu.dot_dimension_numbers<[1], [0], [0], [1], [0, 0, 1, 1], [], []>} : vector<16x16xbf16>, vector<16x64xbf16>, vector<16x64xf32> -> vector<16x64xf32>
    %c1_69 = arith.constant 1 : index
    %c0_70 = arith.constant 0 : index
    %c0_71 = arith.constant 0 : index
    %96 = vector.load %arg4[%c1_69, %c0_70, %c0_71] : memref<9x16x16xbf16, #tpu.memory_space<vmem>>, vector<1x16x16xbf16>
    %97 = vector.shape_cast %96 : vector<1x16x16xbf16> to vector<16x16xbf16>
    %c0_72 = arith.constant 0 : index
    %c1_73 = arith.constant 1 : index
    %98 = vector.load %arg8[%c0_72, %c1_73] : memref<16x82xf32, #tpu.memory_space<vmem>>, vector<16x64xf32>
    %99 = arith.truncf %98 : vector<16x64xf32> to vector<16x64xbf16>
    %cst_74 = arith.constant dense<0.000000e+00> : vector<16x64xf32>
    %100 = tpu.matmul %97, %99, %cst_74 {dimension_numbers = #tpu.dot_dimension_numbers<[1], [0], [0], [1], [0, 0, 1, 1], [], []>} : vector<16x16xbf16>, vector<16x64xbf16>, vector<16x64xf32> -> vector<16x64xf32>
    %101 = arith.addf %95, %100 : vector<16x64xf32>
    %c2_75 = arith.constant 2 : index
    %c0_76 = arith.constant 0 : index
    %c0_77 = arith.constant 0 : index
    %102 = vector.load %arg4[%c2_75, %c0_76, %c0_77] : memref<9x16x16xbf16, #tpu.memory_space<vmem>>, vector<1x16x16xbf16>
    %103 = vector.shape_cast %102 : vector<1x16x16xbf16> to vector<16x16xbf16>
    %c0_78 = arith.constant 0 : index
    %c2_79 = arith.constant 2 : index
    %104 = vector.load %arg8[%c0_78, %c2_79] : memref<16x82xf32, #tpu.memory_space<vmem>>, vector<16x64xf32>
    %105 = arith.truncf %104 : vector<16x64xf32> to vector<16x64xbf16>
    %cst_80 = arith.constant dense<0.000000e+00> : vector<16x64xf32>
    %106 = tpu.matmul %103, %105, %cst_80 {dimension_numbers = #tpu.dot_dimension_numbers<[1], [0], [0], [1], [0, 0, 1, 1], [], []>} : vector<16x16xbf16>, vector<16x64xbf16>, vector<16x64xf32> -> vector<16x64xf32>
    %107 = arith.addf %101, %106 : vector<16x64xf32>
    %c3_81 = arith.constant 3 : index
    %c0_82 = arith.constant 0 : index
    %c0_83 = arith.constant 0 : index
    %108 = vector.load %arg4[%c3_81, %c0_82, %c0_83] : memref<9x16x16xbf16, #tpu.memory_space<vmem>>, vector<1x16x16xbf16>
    %109 = vector.shape_cast %108 : vector<1x16x16xbf16> to vector<16x16xbf16>
    %c0_84 = arith.constant 0 : index
    %c8_85 = arith.constant 8 : index
    %110 = vector.load %arg8[%c0_84, %c8_85] : memref<16x82xf32, #tpu.memory_space<vmem>>, vector<16x64xf32>
    %111 = arith.truncf %110 : vector<16x64xf32> to vector<16x64xbf16>
    %cst_86 = arith.constant dense<0.000000e+00> : vector<16x64xf32>
    %112 = tpu.matmul %109, %111, %cst_86 {dimension_numbers = #tpu.dot_dimension_numbers<[1], [0], [0], [1], [0, 0, 1, 1], [], []>} : vector<16x16xbf16>, vector<16x64xbf16>, vector<16x64xf32> -> vector<16x64xf32>
    %113 = arith.addf %107, %112 : vector<16x64xf32>
    %c4_87 = arith.constant 4 : index
    %c0_88 = arith.constant 0 : index
    %c0_89 = arith.constant 0 : index
    %114 = vector.load %arg4[%c4_87, %c0_88, %c0_89] : memref<9x16x16xbf16, #tpu.memory_space<vmem>>, vector<1x16x16xbf16>
    %115 = vector.shape_cast %114 : vector<1x16x16xbf16> to vector<16x16xbf16>
    %c0_90 = arith.constant 0 : index
    %c9_91 = arith.constant 9 : index
    %116 = vector.load %arg8[%c0_90, %c9_91] : memref<16x82xf32, #tpu.memory_space<vmem>>, vector<16x64xf32>
    %117 = arith.truncf %116 : vector<16x64xf32> to vector<16x64xbf16>
    %cst_92 = arith.constant dense<0.000000e+00> : vector<16x64xf32>
    %118 = tpu.matmul %115, %117, %cst_92 {dimension_numbers = #tpu.dot_dimension_numbers<[1], [0], [0], [1], [0, 0, 1, 1], [], []>} : vector<16x16xbf16>, vector<16x64xbf16>, vector<16x64xf32> -> vector<16x64xf32>
    %119 = arith.addf %113, %118 : vector<16x64xf32>
    %c5_93 = arith.constant 5 : index
    %c0_94 = arith.constant 0 : index
    %c0_95 = arith.constant 0 : index
    %120 = vector.load %arg4[%c5_93, %c0_94, %c0_95] : memref<9x16x16xbf16, #tpu.memory_space<vmem>>, vector<1x16x16xbf16>
    %121 = vector.shape_cast %120 : vector<1x16x16xbf16> to vector<16x16xbf16>
    %c0_96 = arith.constant 0 : index
    %c10_97 = arith.constant 10 : index
    %122 = vector.load %arg8[%c0_96, %c10_97] : memref<16x82xf32, #tpu.memory_space<vmem>>, vector<16x64xf32>
    %123 = arith.truncf %122 : vector<16x64xf32> to vector<16x64xbf16>
    %cst_98 = arith.constant dense<0.000000e+00> : vector<16x64xf32>
    %124 = tpu.matmul %121, %123, %cst_98 {dimension_numbers = #tpu.dot_dimension_numbers<[1], [0], [0], [1], [0, 0, 1, 1], [], []>} : vector<16x16xbf16>, vector<16x64xbf16>, vector<16x64xf32> -> vector<16x64xf32>
    %125 = arith.addf %119, %124 : vector<16x64xf32>
    %c6_99 = arith.constant 6 : index
    %c0_100 = arith.constant 0 : index
    %c0_101 = arith.constant 0 : index
    %126 = vector.load %arg4[%c6_99, %c0_100, %c0_101] : memref<9x16x16xbf16, #tpu.memory_space<vmem>>, vector<1x16x16xbf16>
    %127 = vector.shape_cast %126 : vector<1x16x16xbf16> to vector<16x16xbf16>
    %c0_102 = arith.constant 0 : index
    %c16_103 = arith.constant 16 : index
    %128 = vector.load %arg8[%c0_102, %c16_103] : memref<16x82xf32, #tpu.memory_space<vmem>>, vector<16x64xf32>
    %129 = arith.truncf %128 : vector<16x64xf32> to vector<16x64xbf16>
    %cst_104 = arith.constant dense<0.000000e+00> : vector<16x64xf32>
    %130 = tpu.matmul %127, %129, %cst_104 {dimension_numbers = #tpu.dot_dimension_numbers<[1], [0], [0], [1], [0, 0, 1, 1], [], []>} : vector<16x16xbf16>, vector<16x64xbf16>, vector<16x64xf32> -> vector<16x64xf32>
    %131 = arith.addf %125, %130 : vector<16x64xf32>
    %c7_105 = arith.constant 7 : index
    %c0_106 = arith.constant 0 : index
    %c0_107 = arith.constant 0 : index
    %132 = vector.load %arg4[%c7_105, %c0_106, %c0_107] : memref<9x16x16xbf16, #tpu.memory_space<vmem>>, vector<1x16x16xbf16>
    %133 = vector.shape_cast %132 : vector<1x16x16xbf16> to vector<16x16xbf16>
    %c0_108 = arith.constant 0 : index
    %c17_109 = arith.constant 17 : index
    %134 = vector.load %arg8[%c0_108, %c17_109] : memref<16x82xf32, #tpu.memory_space<vmem>>, vector<16x64xf32>
    %135 = arith.truncf %134 : vector<16x64xf32> to vector<16x64xbf16>
    %cst_110 = arith.constant dense<0.000000e+00> : vector<16x64xf32>
    %136 = tpu.matmul %133, %135, %cst_110 {dimension_numbers = #tpu.dot_dimension_numbers<[1], [0], [0], [1], [0, 0, 1, 1], [], []>} : vector<16x16xbf16>, vector<16x64xbf16>, vector<16x64xf32> -> vector<16x64xf32>
    %137 = arith.addf %131, %136 : vector<16x64xf32>
    %c8_111 = arith.constant 8 : index
    %c0_112 = arith.constant 0 : index
    %c0_113 = arith.constant 0 : index
    %138 = vector.load %arg4[%c8_111, %c0_112, %c0_113] : memref<9x16x16xbf16, #tpu.memory_space<vmem>>, vector<1x16x16xbf16>
    %139 = vector.shape_cast %138 : vector<1x16x16xbf16> to vector<16x16xbf16>
    %c0_114 = arith.constant 0 : index
    %c18_115 = arith.constant 18 : index
    %140 = vector.load %arg8[%c0_114, %c18_115] : memref<16x82xf32, #tpu.memory_space<vmem>>, vector<16x64xf32>
    %141 = arith.truncf %140 : vector<16x64xf32> to vector<16x64xbf16>
    %cst_116 = arith.constant dense<0.000000e+00> : vector<16x64xf32>
    %142 = tpu.matmul %139, %141, %cst_116 {dimension_numbers = #tpu.dot_dimension_numbers<[1], [0], [0], [1], [0, 0, 1, 1], [], []>} : vector<16x16xbf16>, vector<16x64xbf16>, vector<16x64xf32> -> vector<16x64xf32>
    %143 = arith.addf %137, %142 : vector<16x64xf32>
    %c0_117 = arith.constant 0 : index
    %c0_118 = arith.constant 0 : index
    %144 = vector.load %arg5[%c0_117, %c0_118] : memref<16x1xf32, #tpu.memory_space<vmem>>, vector<16x1xf32>
    %145 = vector.broadcast %144 : vector<16x1xf32> to vector<16x64xf32>
    %146 = arith.addf %143, %145 : vector<16x64xf32>
    %147 = vector.broadcast %0 : vector<1x64xf32> to vector<16x64xf32>
    %148 = arith.mulf %146, %147 : vector<16x64xf32>
    %cst_119 = arith.constant dense<0.000000e+00> : vector<16xf32>
    %149 = vector.multi_reduction <add>, %148, %cst_119 [1] : vector<16x64xf32> to vector<16xf32>
    %150 = vector.shape_cast %149 : vector<16xf32> to vector<16x1xf32>
    %cst_120 = arith.constant 0.027777778 : f32
    %151 = vector.broadcast %cst_120 : f32 to vector<16x1xf32>
    %152 = arith.mulf %150, %151 : vector<16x1xf32>
    %153 = vector.broadcast %152 : vector<16x1xf32> to vector<16x64xf32>
    %154 = arith.subf %148, %153 : vector<16x64xf32>
    %155 = vector.broadcast %0 : vector<1x64xf32> to vector<16x64xf32>
    %156 = arith.mulf %154, %155 : vector<16x64xf32>
    %157 = arith.mulf %156, %156 : vector<16x64xf32>
    %cst_121 = arith.constant dense<0.000000e+00> : vector<16xf32>
    %158 = vector.multi_reduction <add>, %157, %cst_121 [1] : vector<16x64xf32> to vector<16xf32>
    %159 = vector.shape_cast %158 : vector<16xf32> to vector<16x1xf32>
    %cst_122 = arith.constant 0.027777778 : f32
    %160 = vector.broadcast %cst_122 : f32 to vector<16x1xf32>
    %161 = arith.mulf %159, %160 : vector<16x1xf32>
    %cst_123 = arith.constant 9.99999974E-6 : f32
    %162 = vector.broadcast %cst_123 : f32 to vector<16x1xf32>
    %163 = arith.addf %161, %162 : vector<16x1xf32>
    %164 = math.rsqrt %163 : vector<16x1xf32>
    %165 = vector.broadcast %164 : vector<16x1xf32> to vector<16x64xf32>
    %166 = arith.mulf %156, %165 : vector<16x64xf32>
    %cst_124 = arith.constant 0.000000e+00 : f32
    %167 = vector.broadcast %cst_124 : f32 to vector<16x64xf32>
    %168 = arith.maximumf %166, %167 : vector<16x64xf32>
    %c0_125 = arith.constant 0 : index
    %c0_126 = arith.constant 0 : index
    %c0_127 = arith.constant 0 : index
    %169 = vector.load %arg7[%c0_125, %c0_126, %c0_127] : memref<1x16x64xf32, #tpu.memory_space<vmem>>, vector<1x16x64xf32>
    %170 = vector.shape_cast %169 : vector<1x16x64xf32> to vector<16x64xf32>
    %171 = vector.shape_cast %168 : vector<16x64xf32> to vector<1x16x64xf32>
    tpu.vector_store %arg7[%c0_125, %c0_126, %c0_127], %171 {strides = array<i32>} : memref<1x16x64xf32, #tpu.memory_space<vmem>>, vector<1x16x64xf32>,
    return
  }
  func.func @transform_0(%arg0: i32) -> (i32, i32, i32) {
    %c0_i32 = arith.constant 0 : i32
    %c0_i32_0 = arith.constant 0 : i32
    %c0_i32_1 = arith.constant 0 : i32
    return %arg0, %c0_i32, %c0_i32_0 : i32, i32, i32
  }
  func.func @transform_1(%arg0: i32) -> (i32, i32, i32) {
    %c0_i32 = arith.constant 0 : i32
    %c0_i32_0 = arith.constant 0 : i32
    %c0_i32_1 = arith.constant 0 : i32
    %c0_i32_2 = arith.constant 0 : i32
    return %c0_i32, %c0_i32_0, %c0_i32_1 : i32, i32, i32
  }
  func.func @transform_2(%arg0: i32) -> (i32, i32) {
    %c0_i32 = arith.constant 0 : i32
    %c0_i32_0 = arith.constant 0 : i32
    %c0_i32_1 = arith.constant 0 : i32
    return %c0_i32, %c0_i32_0 : i32, i32
  }
  func.func @transform_3(%arg0: i32) -> (i32, i32, i32) {
    %c0_i32 = arith.constant 0 : i32
    %c0_i32_0 = arith.constant 0 : i32
    %c0_i32_1 = arith.constant 0 : i32
    %c0_i32_2 = arith.constant 0 : i32
    return %c0_i32, %c0_i32_0, %c0_i32_1 : i32, i32, i32
  }
  func.func @transform_4(%arg0: i32) -> (i32, i32) {
    %c0_i32 = arith.constant 0 : i32
    %c0_i32_0 = arith.constant 0 : i32
    %c0_i32_1 = arith.constant 0 : i32
    return %c0_i32, %c0_i32_0 : i32, i32
  }
  func.func @transform_5(%arg0: i32) -> (i32, i32) {
    %c0_i32 = arith.constant 0 : i32
    %c0_i32_0 = arith.constant 0 : i32
    %c0_i32_1 = arith.constant 0 : i32
    return %c0_i32, %c0_i32_0 : i32, i32
  }
  func.func @transform_6(%arg0: i32) -> (i32, i32, i32) {
    %c0_i32 = arith.constant 0 : i32
    %c0_i32_0 = arith.constant 0 : i32
    %c0_i32_1 = arith.constant 0 : i32
    return %arg0, %c0_i32, %c0_i32_0 : i32, i32, i32
  }
}

module attributes {stable_mosaic.version = 11 : i64} {
  func.func @_conv_block_kernel(%arg0: i32, %arg1: memref<1x16x37xf32, #tpu.memory_space<vmem>>, %arg2: memref<9x16x16xbf16, #tpu.memory_space<vmem>>, %arg3: memref<16x1xf32, #tpu.memory_space<vmem>>, %arg4: memref<9x16x16xbf16, #tpu.memory_space<vmem>>, %arg5: memref<16x1xf32, #tpu.memory_space<vmem>>, %arg6: memref<1x25xf32, #tpu.memory_space<vmem>>, %arg7: memref<1x16x25xf32, #tpu.memory_space<vmem>>, %arg8: memref<16x37xf32, #tpu.memory_space<vmem>>) attributes {dimension_semantics = [#tpu.dimension_semantics<parallel>], iteration_bounds = array<i64: 2>, scalar_prefetch = 0 : i64, scratch_operands = 1 : i64, tpu.core_type = #tpu.core_type<tc>, window_params = [{transform_indices = @transform_0, window_bounds = array<i64: 1, 16, 37>}, {pipeline_mode = #tpu.pipeline_mode<synchronous>, transform_indices = @transform_1, window_bounds = array<i64: 9, 16, 16>}, {pipeline_mode = #tpu.pipeline_mode<synchronous>, transform_indices = @transform_2, window_bounds = array<i64: 16, 1>}, {pipeline_mode = #tpu.pipeline_mode<synchronous>, transform_indices = @transform_3, window_bounds = array<i64: 9, 16, 16>}, {pipeline_mode = #tpu.pipeline_mode<synchronous>, transform_indices = @transform_4, window_bounds = array<i64: 16, 1>}, {pipeline_mode = #tpu.pipeline_mode<synchronous>, transform_indices = @transform_5, window_bounds = array<i64: 1, 25>}, {transform_indices = @transform_6, window_bounds = array<i64: 1, 16, 25>}]} {
    %c0 = arith.constant 0 : index
    %c0_0 = arith.constant 0 : index
    %0 = vector.load %arg6[%c0, %c0_0] : memref<1x25xf32, #tpu.memory_space<vmem>>, vector<1x25xf32>
    %c0_1 = arith.constant 0 : index
    %c0_2 = arith.constant 0 : index
    %c0_3 = arith.constant 0 : index
    %1 = vector.load %arg2[%c0_1, %c0_2, %c0_3] : memref<9x16x16xbf16, #tpu.memory_space<vmem>>, vector<1x16x16xbf16>
    %2 = vector.shape_cast %1 : vector<1x16x16xbf16> to vector<16x16xbf16>
    %c0_4 = arith.constant 0 : index
    %c0_5 = arith.constant 0 : index
    %c0_6 = arith.constant 0 : index
    %3 = vector.load %arg1[%c0_4, %c0_5, %c0_6] : memref<1x16x37xf32, #tpu.memory_space<vmem>>, vector<1x16x25xf32>
    %4 = vector.shape_cast %3 : vector<1x16x25xf32> to vector<16x25xf32>
    %5 = arith.truncf %4 : vector<16x25xf32> to vector<16x25xbf16>
    %cst = arith.constant dense<0.000000e+00> : vector<16x25xf32>
    %6 = tpu.matmul %2, %5, %cst {dimension_numbers = #tpu.dot_dimension_numbers<[1], [0], [0], [1], [0, 0, 1, 1], [], []>} : vector<16x16xbf16>, vector<16x25xbf16>, vector<16x25xf32> -> vector<16x25xf32>
    %c1 = arith.constant 1 : index
    %c0_7 = arith.constant 0 : index
    %c0_8 = arith.constant 0 : index
    %7 = vector.load %arg2[%c1, %c0_7, %c0_8] : memref<9x16x16xbf16, #tpu.memory_space<vmem>>, vector<1x16x16xbf16>
    %8 = vector.shape_cast %7 : vector<1x16x16xbf16> to vector<16x16xbf16>
    %c0_9 = arith.constant 0 : index
    %c0_10 = arith.constant 0 : index
    %c1_11 = arith.constant 1 : index
    %9 = vector.load %arg1[%c0_9, %c0_10, %c1_11] : memref<1x16x37xf32, #tpu.memory_space<vmem>>, vector<1x16x25xf32>
    %10 = vector.shape_cast %9 : vector<1x16x25xf32> to vector<16x25xf32>
    %11 = arith.truncf %10 : vector<16x25xf32> to vector<16x25xbf16>
    %cst_12 = arith.constant dense<0.000000e+00> : vector<16x25xf32>
    %12 = tpu.matmul %8, %11, %cst_12 {dimension_numbers = #tpu.dot_dimension_numbers<[1], [0], [0], [1], [0, 0, 1, 1], [], []>} : vector<16x16xbf16>, vector<16x25xbf16>, vector<16x25xf32> -> vector<16x25xf32>
    %13 = arith.addf %6, %12 : vector<16x25xf32>
    %c2 = arith.constant 2 : index
    %c0_13 = arith.constant 0 : index
    %c0_14 = arith.constant 0 : index
    %14 = vector.load %arg2[%c2, %c0_13, %c0_14] : memref<9x16x16xbf16, #tpu.memory_space<vmem>>, vector<1x16x16xbf16>
    %15 = vector.shape_cast %14 : vector<1x16x16xbf16> to vector<16x16xbf16>
    %c0_15 = arith.constant 0 : index
    %c0_16 = arith.constant 0 : index
    %c2_17 = arith.constant 2 : index
    %16 = vector.load %arg1[%c0_15, %c0_16, %c2_17] : memref<1x16x37xf32, #tpu.memory_space<vmem>>, vector<1x16x25xf32>
    %17 = vector.shape_cast %16 : vector<1x16x25xf32> to vector<16x25xf32>
    %18 = arith.truncf %17 : vector<16x25xf32> to vector<16x25xbf16>
    %cst_18 = arith.constant dense<0.000000e+00> : vector<16x25xf32>
    %19 = tpu.matmul %15, %18, %cst_18 {dimension_numbers = #tpu.dot_dimension_numbers<[1], [0], [0], [1], [0, 0, 1, 1], [], []>} : vector<16x16xbf16>, vector<16x25xbf16>, vector<16x25xf32> -> vector<16x25xf32>
    %20 = arith.addf %13, %19 : vector<16x25xf32>
    %c3 = arith.constant 3 : index
    %c0_19 = arith.constant 0 : index
    %c0_20 = arith.constant 0 : index
    %21 = vector.load %arg2[%c3, %c0_19, %c0_20] : memref<9x16x16xbf16, #tpu.memory_space<vmem>>, vector<1x16x16xbf16>
    %22 = vector.shape_cast %21 : vector<1x16x16xbf16> to vector<16x16xbf16>
    %c0_21 = arith.constant 0 : index
    %c0_22 = arith.constant 0 : index
    %c5 = arith.constant 5 : index
    %23 = vector.load %arg1[%c0_21, %c0_22, %c5] : memref<1x16x37xf32, #tpu.memory_space<vmem>>, vector<1x16x25xf32>
    %24 = vector.shape_cast %23 : vector<1x16x25xf32> to vector<16x25xf32>
    %25 = arith.truncf %24 : vector<16x25xf32> to vector<16x25xbf16>
    %cst_23 = arith.constant dense<0.000000e+00> : vector<16x25xf32>
    %26 = tpu.matmul %22, %25, %cst_23 {dimension_numbers = #tpu.dot_dimension_numbers<[1], [0], [0], [1], [0, 0, 1, 1], [], []>} : vector<16x16xbf16>, vector<16x25xbf16>, vector<16x25xf32> -> vector<16x25xf32>
    %27 = arith.addf %20, %26 : vector<16x25xf32>
    %c4 = arith.constant 4 : index
    %c0_24 = arith.constant 0 : index
    %c0_25 = arith.constant 0 : index
    %28 = vector.load %arg2[%c4, %c0_24, %c0_25] : memref<9x16x16xbf16, #tpu.memory_space<vmem>>, vector<1x16x16xbf16>
    %29 = vector.shape_cast %28 : vector<1x16x16xbf16> to vector<16x16xbf16>
    %c0_26 = arith.constant 0 : index
    %c0_27 = arith.constant 0 : index
    %c6 = arith.constant 6 : index
    %30 = vector.load %arg1[%c0_26, %c0_27, %c6] : memref<1x16x37xf32, #tpu.memory_space<vmem>>, vector<1x16x25xf32>
    %31 = vector.shape_cast %30 : vector<1x16x25xf32> to vector<16x25xf32>
    %32 = arith.truncf %31 : vector<16x25xf32> to vector<16x25xbf16>
    %cst_28 = arith.constant dense<0.000000e+00> : vector<16x25xf32>
    %33 = tpu.matmul %29, %32, %cst_28 {dimension_numbers = #tpu.dot_dimension_numbers<[1], [0], [0], [1], [0, 0, 1, 1], [], []>} : vector<16x16xbf16>, vector<16x25xbf16>, vector<16x25xf32> -> vector<16x25xf32>
    %34 = arith.addf %27, %33 : vector<16x25xf32>
    %c5_29 = arith.constant 5 : index
    %c0_30 = arith.constant 0 : index
    %c0_31 = arith.constant 0 : index
    %35 = vector.load %arg2[%c5_29, %c0_30, %c0_31] : memref<9x16x16xbf16, #tpu.memory_space<vmem>>, vector<1x16x16xbf16>
    %36 = vector.shape_cast %35 : vector<1x16x16xbf16> to vector<16x16xbf16>
    %c0_32 = arith.constant 0 : index
    %c0_33 = arith.constant 0 : index
    %c7 = arith.constant 7 : index
    %37 = vector.load %arg1[%c0_32, %c0_33, %c7] : memref<1x16x37xf32, #tpu.memory_space<vmem>>, vector<1x16x25xf32>
    %38 = vector.shape_cast %37 : vector<1x16x25xf32> to vector<16x25xf32>
    %39 = arith.truncf %38 : vector<16x25xf32> to vector<16x25xbf16>
    %cst_34 = arith.constant dense<0.000000e+00> : vector<16x25xf32>
    %40 = tpu.matmul %36, %39, %cst_34 {dimension_numbers = #tpu.dot_dimension_numbers<[1], [0], [0], [1], [0, 0, 1, 1], [], []>} : vector<16x16xbf16>, vector<16x25xbf16>, vector<16x25xf32> -> vector<16x25xf32>
    %41 = arith.addf %34, %40 : vector<16x25xf32>
    %c6_35 = arith.constant 6 : index
    %c0_36 = arith.constant 0 : index
    %c0_37 = arith.constant 0 : index
    %42 = vector.load %arg2[%c6_35, %c0_36, %c0_37] : memref<9x16x16xbf16, #tpu.memory_space<vmem>>, vector<1x16x16xbf16>
    %43 = vector.shape_cast %42 : vector<1x16x16xbf16> to vector<16x16xbf16>
    %c0_38 = arith.constant 0 : index
    %c0_39 = arith.constant 0 : index
    %c10 = arith.constant 10 : index
    %44 = vector.load %arg1[%c0_38, %c0_39, %c10] : memref<1x16x37xf32, #tpu.memory_space<vmem>>, vector<1x16x25xf32>
    %45 = vector.shape_cast %44 : vector<1x16x25xf32> to vector<16x25xf32>
    %46 = arith.truncf %45 : vector<16x25xf32> to vector<16x25xbf16>
    %cst_40 = arith.constant dense<0.000000e+00> : vector<16x25xf32>
    %47 = tpu.matmul %43, %46, %cst_40 {dimension_numbers = #tpu.dot_dimension_numbers<[1], [0], [0], [1], [0, 0, 1, 1], [], []>} : vector<16x16xbf16>, vector<16x25xbf16>, vector<16x25xf32> -> vector<16x25xf32>
    %48 = arith.addf %41, %47 : vector<16x25xf32>
    %c7_41 = arith.constant 7 : index
    %c0_42 = arith.constant 0 : index
    %c0_43 = arith.constant 0 : index
    %49 = vector.load %arg2[%c7_41, %c0_42, %c0_43] : memref<9x16x16xbf16, #tpu.memory_space<vmem>>, vector<1x16x16xbf16>
    %50 = vector.shape_cast %49 : vector<1x16x16xbf16> to vector<16x16xbf16>
    %c0_44 = arith.constant 0 : index
    %c0_45 = arith.constant 0 : index
    %c11 = arith.constant 11 : index
    %51 = vector.load %arg1[%c0_44, %c0_45, %c11] : memref<1x16x37xf32, #tpu.memory_space<vmem>>, vector<1x16x25xf32>
    %52 = vector.shape_cast %51 : vector<1x16x25xf32> to vector<16x25xf32>
    %53 = arith.truncf %52 : vector<16x25xf32> to vector<16x25xbf16>
    %cst_46 = arith.constant dense<0.000000e+00> : vector<16x25xf32>
    %54 = tpu.matmul %50, %53, %cst_46 {dimension_numbers = #tpu.dot_dimension_numbers<[1], [0], [0], [1], [0, 0, 1, 1], [], []>} : vector<16x16xbf16>, vector<16x25xbf16>, vector<16x25xf32> -> vector<16x25xf32>
    %55 = arith.addf %48, %54 : vector<16x25xf32>
    %c8 = arith.constant 8 : index
    %c0_47 = arith.constant 0 : index
    %c0_48 = arith.constant 0 : index
    %56 = vector.load %arg2[%c8, %c0_47, %c0_48] : memref<9x16x16xbf16, #tpu.memory_space<vmem>>, vector<1x16x16xbf16>
    %57 = vector.shape_cast %56 : vector<1x16x16xbf16> to vector<16x16xbf16>
    %c0_49 = arith.constant 0 : index
    %c0_50 = arith.constant 0 : index
    %c12 = arith.constant 12 : index
    %58 = vector.load %arg1[%c0_49, %c0_50, %c12] : memref<1x16x37xf32, #tpu.memory_space<vmem>>, vector<1x16x25xf32>
    %59 = vector.shape_cast %58 : vector<1x16x25xf32> to vector<16x25xf32>
    %60 = arith.truncf %59 : vector<16x25xf32> to vector<16x25xbf16>
    %cst_51 = arith.constant dense<0.000000e+00> : vector<16x25xf32>
    %61 = tpu.matmul %57, %60, %cst_51 {dimension_numbers = #tpu.dot_dimension_numbers<[1], [0], [0], [1], [0, 0, 1, 1], [], []>} : vector<16x16xbf16>, vector<16x25xbf16>, vector<16x25xf32> -> vector<16x25xf32>
    %62 = arith.addf %55, %61 : vector<16x25xf32>
    %c0_52 = arith.constant 0 : index
    %c0_53 = arith.constant 0 : index
    %63 = vector.load %arg3[%c0_52, %c0_53] : memref<16x1xf32, #tpu.memory_space<vmem>>, vector<16x1xf32>
    %64 = vector.broadcast %63 : vector<16x1xf32> to vector<16x25xf32>
    %65 = arith.addf %62, %64 : vector<16x25xf32>
    %66 = vector.broadcast %0 : vector<1x25xf32> to vector<16x25xf32>
    %67 = arith.mulf %65, %66 : vector<16x25xf32>
    %cst_54 = arith.constant dense<0.000000e+00> : vector<16xf32>
    %68 = vector.multi_reduction <add>, %67, %cst_54 [1] : vector<16x25xf32> to vector<16xf32>
    %69 = vector.shape_cast %68 : vector<16xf32> to vector<16x1xf32>
    %cst_55 = arith.constant 0.111111112 : f32
    %70 = vector.broadcast %cst_55 : f32 to vector<16x1xf32>
    %71 = arith.mulf %69, %70 : vector<16x1xf32>
    %72 = vector.broadcast %71 : vector<16x1xf32> to vector<16x25xf32>
    %73 = arith.subf %67, %72 : vector<16x25xf32>
    %74 = vector.broadcast %0 : vector<1x25xf32> to vector<16x25xf32>
    %75 = arith.mulf %73, %74 : vector<16x25xf32>
    %76 = arith.mulf %75, %75 : vector<16x25xf32>
    %cst_56 = arith.constant dense<0.000000e+00> : vector<16xf32>
    %77 = vector.multi_reduction <add>, %76, %cst_56 [1] : vector<16x25xf32> to vector<16xf32>
    %78 = vector.shape_cast %77 : vector<16xf32> to vector<16x1xf32>
    %cst_57 = arith.constant 0.111111112 : f32
    %79 = vector.broadcast %cst_57 : f32 to vector<16x1xf32>
    %80 = arith.mulf %78, %79 : vector<16x1xf32>
    %cst_58 = arith.constant 9.99999974E-6 : f32
    %81 = vector.broadcast %cst_58 : f32 to vector<16x1xf32>
    %82 = arith.addf %80, %81 : vector<16x1xf32>
    %83 = math.rsqrt %82 : vector<16x1xf32>
    %84 = vector.broadcast %83 : vector<16x1xf32> to vector<16x25xf32>
    %85 = arith.mulf %75, %84 : vector<16x25xf32>
    %cst_59 = arith.constant 0.000000e+00 : f32
    %86 = vector.broadcast %cst_59 : f32 to vector<16x25xf32>
    %87 = arith.maximumf %85, %86 : vector<16x25xf32>
    %cst_60 = arith.constant 0.000000e+00 : f32
    %88 = vector.broadcast %cst_60 : f32 to vector<16x37xf32>
    %c0_61 = arith.constant 0 : index
    %c0_62 = arith.constant 0 : index
    %89 = vector.load %arg8[%c0_61, %c0_62] : memref<16x37xf32, #tpu.memory_space<vmem>>, vector<16x37xf32>
    tpu.vector_store %arg8[%c0_61, %c0_62], %88 {strides = array<i32>} : memref<16x37xf32, #tpu.memory_space<vmem>>, vector<16x37xf32>,
    %c0_63 = arith.constant 0 : index
    %c6_64 = arith.constant 6 : index
    %90 = vector.load %arg8[%c0_63, %c6_64] : memref<16x37xf32, #tpu.memory_space<vmem>>, vector<16x25xf32>
    tpu.vector_store %arg8[%c0_63, %c6_64], %87 {strides = array<i32>} : memref<16x37xf32, #tpu.memory_space<vmem>>, vector<16x25xf32>,
    %c0_65 = arith.constant 0 : index
    %c0_66 = arith.constant 0 : index
    %c0_67 = arith.constant 0 : index
    %91 = vector.load %arg4[%c0_65, %c0_66, %c0_67] : memref<9x16x16xbf16, #tpu.memory_space<vmem>>, vector<1x16x16xbf16>
    %92 = vector.shape_cast %91 : vector<1x16x16xbf16> to vector<16x16xbf16>
    %c0_68 = arith.constant 0 : index
    %c0_69 = arith.constant 0 : index
    %93 = vector.load %arg8[%c0_68, %c0_69] : memref<16x37xf32, #tpu.memory_space<vmem>>, vector<16x25xf32>
    %94 = arith.truncf %93 : vector<16x25xf32> to vector<16x25xbf16>
    %cst_70 = arith.constant dense<0.000000e+00> : vector<16x25xf32>
    %95 = tpu.matmul %92, %94, %cst_70 {dimension_numbers = #tpu.dot_dimension_numbers<[1], [0], [0], [1], [0, 0, 1, 1], [], []>} : vector<16x16xbf16>, vector<16x25xbf16>, vector<16x25xf32> -> vector<16x25xf32>
    %c1_71 = arith.constant 1 : index
    %c0_72 = arith.constant 0 : index
    %c0_73 = arith.constant 0 : index
    %96 = vector.load %arg4[%c1_71, %c0_72, %c0_73] : memref<9x16x16xbf16, #tpu.memory_space<vmem>>, vector<1x16x16xbf16>
    %97 = vector.shape_cast %96 : vector<1x16x16xbf16> to vector<16x16xbf16>
    %c0_74 = arith.constant 0 : index
    %c1_75 = arith.constant 1 : index
    %98 = vector.load %arg8[%c0_74, %c1_75] : memref<16x37xf32, #tpu.memory_space<vmem>>, vector<16x25xf32>
    %99 = arith.truncf %98 : vector<16x25xf32> to vector<16x25xbf16>
    %cst_76 = arith.constant dense<0.000000e+00> : vector<16x25xf32>
    %100 = tpu.matmul %97, %99, %cst_76 {dimension_numbers = #tpu.dot_dimension_numbers<[1], [0], [0], [1], [0, 0, 1, 1], [], []>} : vector<16x16xbf16>, vector<16x25xbf16>, vector<16x25xf32> -> vector<16x25xf32>
    %101 = arith.addf %95, %100 : vector<16x25xf32>
    %c2_77 = arith.constant 2 : index
    %c0_78 = arith.constant 0 : index
    %c0_79 = arith.constant 0 : index
    %102 = vector.load %arg4[%c2_77, %c0_78, %c0_79] : memref<9x16x16xbf16, #tpu.memory_space<vmem>>, vector<1x16x16xbf16>
    %103 = vector.shape_cast %102 : vector<1x16x16xbf16> to vector<16x16xbf16>
    %c0_80 = arith.constant 0 : index
    %c2_81 = arith.constant 2 : index
    %104 = vector.load %arg8[%c0_80, %c2_81] : memref<16x37xf32, #tpu.memory_space<vmem>>, vector<16x25xf32>
    %105 = arith.truncf %104 : vector<16x25xf32> to vector<16x25xbf16>
    %cst_82 = arith.constant dense<0.000000e+00> : vector<16x25xf32>
    %106 = tpu.matmul %103, %105, %cst_82 {dimension_numbers = #tpu.dot_dimension_numbers<[1], [0], [0], [1], [0, 0, 1, 1], [], []>} : vector<16x16xbf16>, vector<16x25xbf16>, vector<16x25xf32> -> vector<16x25xf32>
    %107 = arith.addf %101, %106 : vector<16x25xf32>
    %c3_83 = arith.constant 3 : index
    %c0_84 = arith.constant 0 : index
    %c0_85 = arith.constant 0 : index
    %108 = vector.load %arg4[%c3_83, %c0_84, %c0_85] : memref<9x16x16xbf16, #tpu.memory_space<vmem>>, vector<1x16x16xbf16>
    %109 = vector.shape_cast %108 : vector<1x16x16xbf16> to vector<16x16xbf16>
    %c0_86 = arith.constant 0 : index
    %c5_87 = arith.constant 5 : index
    %110 = vector.load %arg8[%c0_86, %c5_87] : memref<16x37xf32, #tpu.memory_space<vmem>>, vector<16x25xf32>
    %111 = arith.truncf %110 : vector<16x25xf32> to vector<16x25xbf16>
    %cst_88 = arith.constant dense<0.000000e+00> : vector<16x25xf32>
    %112 = tpu.matmul %109, %111, %cst_88 {dimension_numbers = #tpu.dot_dimension_numbers<[1], [0], [0], [1], [0, 0, 1, 1], [], []>} : vector<16x16xbf16>, vector<16x25xbf16>, vector<16x25xf32> -> vector<16x25xf32>
    %113 = arith.addf %107, %112 : vector<16x25xf32>
    %c4_89 = arith.constant 4 : index
    %c0_90 = arith.constant 0 : index
    %c0_91 = arith.constant 0 : index
    %114 = vector.load %arg4[%c4_89, %c0_90, %c0_91] : memref<9x16x16xbf16, #tpu.memory_space<vmem>>, vector<1x16x16xbf16>
    %115 = vector.shape_cast %114 : vector<1x16x16xbf16> to vector<16x16xbf16>
    %c0_92 = arith.constant 0 : index
    %c6_93 = arith.constant 6 : index
    %116 = vector.load %arg8[%c0_92, %c6_93] : memref<16x37xf32, #tpu.memory_space<vmem>>, vector<16x25xf32>
    %117 = arith.truncf %116 : vector<16x25xf32> to vector<16x25xbf16>
    %cst_94 = arith.constant dense<0.000000e+00> : vector<16x25xf32>
    %118 = tpu.matmul %115, %117, %cst_94 {dimension_numbers = #tpu.dot_dimension_numbers<[1], [0], [0], [1], [0, 0, 1, 1], [], []>} : vector<16x16xbf16>, vector<16x25xbf16>, vector<16x25xf32> -> vector<16x25xf32>
    %119 = arith.addf %113, %118 : vector<16x25xf32>
    %c5_95 = arith.constant 5 : index
    %c0_96 = arith.constant 0 : index
    %c0_97 = arith.constant 0 : index
    %120 = vector.load %arg4[%c5_95, %c0_96, %c0_97] : memref<9x16x16xbf16, #tpu.memory_space<vmem>>, vector<1x16x16xbf16>
    %121 = vector.shape_cast %120 : vector<1x16x16xbf16> to vector<16x16xbf16>
    %c0_98 = arith.constant 0 : index
    %c7_99 = arith.constant 7 : index
    %122 = vector.load %arg8[%c0_98, %c7_99] : memref<16x37xf32, #tpu.memory_space<vmem>>, vector<16x25xf32>
    %123 = arith.truncf %122 : vector<16x25xf32> to vector<16x25xbf16>
    %cst_100 = arith.constant dense<0.000000e+00> : vector<16x25xf32>
    %124 = tpu.matmul %121, %123, %cst_100 {dimension_numbers = #tpu.dot_dimension_numbers<[1], [0], [0], [1], [0, 0, 1, 1], [], []>} : vector<16x16xbf16>, vector<16x25xbf16>, vector<16x25xf32> -> vector<16x25xf32>
    %125 = arith.addf %119, %124 : vector<16x25xf32>
    %c6_101 = arith.constant 6 : index
    %c0_102 = arith.constant 0 : index
    %c0_103 = arith.constant 0 : index
    %126 = vector.load %arg4[%c6_101, %c0_102, %c0_103] : memref<9x16x16xbf16, #tpu.memory_space<vmem>>, vector<1x16x16xbf16>
    %127 = vector.shape_cast %126 : vector<1x16x16xbf16> to vector<16x16xbf16>
    %c0_104 = arith.constant 0 : index
    %c10_105 = arith.constant 10 : index
    %128 = vector.load %arg8[%c0_104, %c10_105] : memref<16x37xf32, #tpu.memory_space<vmem>>, vector<16x25xf32>
    %129 = arith.truncf %128 : vector<16x25xf32> to vector<16x25xbf16>
    %cst_106 = arith.constant dense<0.000000e+00> : vector<16x25xf32>
    %130 = tpu.matmul %127, %129, %cst_106 {dimension_numbers = #tpu.dot_dimension_numbers<[1], [0], [0], [1], [0, 0, 1, 1], [], []>} : vector<16x16xbf16>, vector<16x25xbf16>, vector<16x25xf32> -> vector<16x25xf32>
    %131 = arith.addf %125, %130 : vector<16x25xf32>
    %c7_107 = arith.constant 7 : index
    %c0_108 = arith.constant 0 : index
    %c0_109 = arith.constant 0 : index
    %132 = vector.load %arg4[%c7_107, %c0_108, %c0_109] : memref<9x16x16xbf16, #tpu.memory_space<vmem>>, vector<1x16x16xbf16>
    %133 = vector.shape_cast %132 : vector<1x16x16xbf16> to vector<16x16xbf16>
    %c0_110 = arith.constant 0 : index
    %c11_111 = arith.constant 11 : index
    %134 = vector.load %arg8[%c0_110, %c11_111] : memref<16x37xf32, #tpu.memory_space<vmem>>, vector<16x25xf32>
    %135 = arith.truncf %134 : vector<16x25xf32> to vector<16x25xbf16>
    %cst_112 = arith.constant dense<0.000000e+00> : vector<16x25xf32>
    %136 = tpu.matmul %133, %135, %cst_112 {dimension_numbers = #tpu.dot_dimension_numbers<[1], [0], [0], [1], [0, 0, 1, 1], [], []>} : vector<16x16xbf16>, vector<16x25xbf16>, vector<16x25xf32> -> vector<16x25xf32>
    %137 = arith.addf %131, %136 : vector<16x25xf32>
    %c8_113 = arith.constant 8 : index
    %c0_114 = arith.constant 0 : index
    %c0_115 = arith.constant 0 : index
    %138 = vector.load %arg4[%c8_113, %c0_114, %c0_115] : memref<9x16x16xbf16, #tpu.memory_space<vmem>>, vector<1x16x16xbf16>
    %139 = vector.shape_cast %138 : vector<1x16x16xbf16> to vector<16x16xbf16>
    %c0_116 = arith.constant 0 : index
    %c12_117 = arith.constant 12 : index
    %140 = vector.load %arg8[%c0_116, %c12_117] : memref<16x37xf32, #tpu.memory_space<vmem>>, vector<16x25xf32>
    %141 = arith.truncf %140 : vector<16x25xf32> to vector<16x25xbf16>
    %cst_118 = arith.constant dense<0.000000e+00> : vector<16x25xf32>
    %142 = tpu.matmul %139, %141, %cst_118 {dimension_numbers = #tpu.dot_dimension_numbers<[1], [0], [0], [1], [0, 0, 1, 1], [], []>} : vector<16x16xbf16>, vector<16x25xbf16>, vector<16x25xf32> -> vector<16x25xf32>
    %143 = arith.addf %137, %142 : vector<16x25xf32>
    %c0_119 = arith.constant 0 : index
    %c0_120 = arith.constant 0 : index
    %144 = vector.load %arg5[%c0_119, %c0_120] : memref<16x1xf32, #tpu.memory_space<vmem>>, vector<16x1xf32>
    %145 = vector.broadcast %144 : vector<16x1xf32> to vector<16x25xf32>
    %146 = arith.addf %143, %145 : vector<16x25xf32>
    %147 = vector.broadcast %0 : vector<1x25xf32> to vector<16x25xf32>
    %148 = arith.mulf %146, %147 : vector<16x25xf32>
    %cst_121 = arith.constant dense<0.000000e+00> : vector<16xf32>
    %149 = vector.multi_reduction <add>, %148, %cst_121 [1] : vector<16x25xf32> to vector<16xf32>
    %150 = vector.shape_cast %149 : vector<16xf32> to vector<16x1xf32>
    %cst_122 = arith.constant 0.111111112 : f32
    %151 = vector.broadcast %cst_122 : f32 to vector<16x1xf32>
    %152 = arith.mulf %150, %151 : vector<16x1xf32>
    %153 = vector.broadcast %152 : vector<16x1xf32> to vector<16x25xf32>
    %154 = arith.subf %148, %153 : vector<16x25xf32>
    %155 = vector.broadcast %0 : vector<1x25xf32> to vector<16x25xf32>
    %156 = arith.mulf %154, %155 : vector<16x25xf32>
    %157 = arith.mulf %156, %156 : vector<16x25xf32>
    %cst_123 = arith.constant dense<0.000000e+00> : vector<16xf32>
    %158 = vector.multi_reduction <add>, %157, %cst_123 [1] : vector<16x25xf32> to vector<16xf32>
    %159 = vector.shape_cast %158 : vector<16xf32> to vector<16x1xf32>
    %cst_124 = arith.constant 0.111111112 : f32
    %160 = vector.broadcast %cst_124 : f32 to vector<16x1xf32>
    %161 = arith.mulf %159, %160 : vector<16x1xf32>
    %cst_125 = arith.constant 9.99999974E-6 : f32
    %162 = vector.broadcast %cst_125 : f32 to vector<16x1xf32>
    %163 = arith.addf %161, %162 : vector<16x1xf32>
    %164 = math.rsqrt %163 : vector<16x1xf32>
    %165 = vector.broadcast %164 : vector<16x1xf32> to vector<16x25xf32>
    %166 = arith.mulf %156, %165 : vector<16x25xf32>
    %cst_126 = arith.constant 0.000000e+00 : f32
    %167 = vector.broadcast %cst_126 : f32 to vector<16x25xf32>
    %168 = arith.maximumf %166, %167 : vector<16x25xf32>
    %c0_127 = arith.constant 0 : index
    %c0_128 = arith.constant 0 : index
    %c0_129 = arith.constant 0 : index
    %169 = vector.load %arg7[%c0_127, %c0_128, %c0_129] : memref<1x16x25xf32, #tpu.memory_space<vmem>>, vector<1x16x25xf32>
    %170 = vector.shape_cast %169 : vector<1x16x25xf32> to vector<16x25xf32>
    %171 = vector.shape_cast %168 : vector<16x25xf32> to vector<1x16x25xf32>
    tpu.vector_store %arg7[%c0_127, %c0_128, %c0_129], %171 {strides = array<i32>} : memref<1x16x25xf32, #tpu.memory_space<vmem>>, vector<1x16x25xf32>,
    return
  }
  func.func @transform_0(%arg0: i32) -> (i32, i32, i32) {
    %c0_i32 = arith.constant 0 : i32
    %c0_i32_0 = arith.constant 0 : i32
    %c0_i32_1 = arith.constant 0 : i32
    return %arg0, %c0_i32, %c0_i32_0 : i32, i32, i32
  }
  func.func @transform_1(%arg0: i32) -> (i32, i32, i32) {
    %c0_i32 = arith.constant 0 : i32
    %c0_i32_0 = arith.constant 0 : i32
    %c0_i32_1 = arith.constant 0 : i32
    %c0_i32_2 = arith.constant 0 : i32
    return %c0_i32, %c0_i32_0, %c0_i32_1 : i32, i32, i32
  }
  func.func @transform_2(%arg0: i32) -> (i32, i32) {
    %c0_i32 = arith.constant 0 : i32
    %c0_i32_0 = arith.constant 0 : i32
    %c0_i32_1 = arith.constant 0 : i32
    return %c0_i32, %c0_i32_0 : i32, i32
  }
  func.func @transform_3(%arg0: i32) -> (i32, i32, i32) {
    %c0_i32 = arith.constant 0 : i32
    %c0_i32_0 = arith.constant 0 : i32
    %c0_i32_1 = arith.constant 0 : i32
    %c0_i32_2 = arith.constant 0 : i32
    return %c0_i32, %c0_i32_0, %c0_i32_1 : i32, i32, i32
  }
  func.func @transform_4(%arg0: i32) -> (i32, i32) {
    %c0_i32 = arith.constant 0 : i32
    %c0_i32_0 = arith.constant 0 : i32
    %c0_i32_1 = arith.constant 0 : i32
    return %c0_i32, %c0_i32_0 : i32, i32
  }
  func.func @transform_5(%arg0: i32) -> (i32, i32) {
    %c0_i32 = arith.constant 0 : i32
    %c0_i32_0 = arith.constant 0 : i32
    %c0_i32_1 = arith.constant 0 : i32
    return %c0_i32, %c0_i32_0 : i32, i32
  }
  func.func @transform_6(%arg0: i32) -> (i32, i32, i32) {
    %c0_i32 = arith.constant 0 : i32
    %c0_i32_0 = arith.constant 0 : i32
    %c0_i32_1 = arith.constant 0 : i32
    return %arg0, %c0_i32, %c0_i32_0 : i32, i32, i32
  }
}

module attributes {stable_mosaic.version = 11 : i64} {
  func.func @_conv_block_kernel(%arg0: i32, %arg1: memref<1x16x82xf32, #tpu.memory_space<vmem>>, %arg2: memref<1x16x82xf32, #tpu.memory_space<vmem>>, %arg3: memref<9x8x32xbf16, #tpu.memory_space<vmem>>, %arg4: memref<8x1xf32, #tpu.memory_space<vmem>>, %arg5: memref<9x8x8xbf16, #tpu.memory_space<vmem>>, %arg6: memref<8x1xf32, #tpu.memory_space<vmem>>, %arg7: memref<1x64xf32, #tpu.memory_space<vmem>>, %arg8: memref<1x8x64xf32, #tpu.memory_space<vmem>>, %arg9: memref<8x82xf32, #tpu.memory_space<vmem>>) attributes {dimension_semantics = [#tpu.dimension_semantics<parallel>], iteration_bounds = array<i64: 2>, scalar_prefetch = 0 : i64, scratch_operands = 1 : i64, tpu.core_type = #tpu.core_type<tc>, window_params = [{transform_indices = @transform_0, window_bounds = array<i64: 1, 16, 82>}, {transform_indices = @transform_1, window_bounds = array<i64: 1, 16, 82>}, {pipeline_mode = #tpu.pipeline_mode<synchronous>, transform_indices = @transform_2, window_bounds = array<i64: 9, 8, 32>}, {pipeline_mode = #tpu.pipeline_mode<synchronous>, transform_indices = @transform_3, window_bounds = array<i64: 8, 1>}, {pipeline_mode = #tpu.pipeline_mode<synchronous>, transform_indices = @transform_4, window_bounds = array<i64: 9, 8, 8>}, {pipeline_mode = #tpu.pipeline_mode<synchronous>, transform_indices = @transform_5, window_bounds = array<i64: 8, 1>}, {pipeline_mode = #tpu.pipeline_mode<synchronous>, transform_indices = @transform_6, window_bounds = array<i64: 1, 64>}, {transform_indices = @transform_7, window_bounds = array<i64: 1, 8, 64>}]} {
    %c0 = arith.constant 0 : index
    %c0_0 = arith.constant 0 : index
    %0 = vector.load %arg7[%c0, %c0_0] : memref<1x64xf32, #tpu.memory_space<vmem>>, vector<1x64xf32>
    %c0_1 = arith.constant 0 : index
    %c0_2 = arith.constant 0 : index
    %c0_3 = arith.constant 0 : index
    %1 = vector.load %arg3[%c0_1, %c0_2, %c0_3] : memref<9x8x32xbf16, #tpu.memory_space<vmem>>, vector<1x8x16xbf16>
    %2 = vector.shape_cast %1 : vector<1x8x16xbf16> to vector<8x16xbf16>
    %c0_4 = arith.constant 0 : index
    %c0_5 = arith.constant 0 : index
    %c0_6 = arith.constant 0 : index
    %3 = vector.load %arg1[%c0_4, %c0_5, %c0_6] : memref<1x16x82xf32, #tpu.memory_space<vmem>>, vector<1x16x64xf32>
    %4 = vector.shape_cast %3 : vector<1x16x64xf32> to vector<16x64xf32>
    %5 = arith.truncf %4 : vector<16x64xf32> to vector<16x64xbf16>
    %cst = arith.constant dense<0.000000e+00> : vector<8x64xf32>
    %6 = tpu.matmul %2, %5, %cst {dimension_numbers = #tpu.dot_dimension_numbers<[1], [0], [0], [1], [0, 0, 1, 1], [], []>} : vector<8x16xbf16>, vector<16x64xbf16>, vector<8x64xf32> -> vector<8x64xf32>
    %c0_7 = arith.constant 0 : index
    %c0_8 = arith.constant 0 : index
    %c16 = arith.constant 16 : index
    %7 = vector.load %arg3[%c0_7, %c0_8, %c16] : memref<9x8x32xbf16, #tpu.memory_space<vmem>>, vector<1x8x16xbf16>
    %8 = vector.shape_cast %7 : vector<1x8x16xbf16> to vector<8x16xbf16>
    %c0_9 = arith.constant 0 : index
    %c0_10 = arith.constant 0 : index
    %c0_11 = arith.constant 0 : index
    %9 = vector.load %arg2[%c0_9, %c0_10, %c0_11] : memref<1x16x82xf32, #tpu.memory_space<vmem>>, vector<1x16x64xf32>
    %10 = vector.shape_cast %9 : vector<1x16x64xf32> to vector<16x64xf32>
    %11 = arith.truncf %10 : vector<16x64xf32> to vector<16x64xbf16>
    %cst_12 = arith.constant dense<0.000000e+00> : vector<8x64xf32>
    %12 = tpu.matmul %8, %11, %cst_12 {dimension_numbers = #tpu.dot_dimension_numbers<[1], [0], [0], [1], [0, 0, 1, 1], [], []>} : vector<8x16xbf16>, vector<16x64xbf16>, vector<8x64xf32> -> vector<8x64xf32>
    %13 = arith.addf %6, %12 : vector<8x64xf32>
    %c1 = arith.constant 1 : index
    %c0_13 = arith.constant 0 : index
    %c0_14 = arith.constant 0 : index
    %14 = vector.load %arg3[%c1, %c0_13, %c0_14] : memref<9x8x32xbf16, #tpu.memory_space<vmem>>, vector<1x8x16xbf16>
    %15 = vector.shape_cast %14 : vector<1x8x16xbf16> to vector<8x16xbf16>
    %c0_15 = arith.constant 0 : index
    %c0_16 = arith.constant 0 : index
    %c1_17 = arith.constant 1 : index
    %16 = vector.load %arg1[%c0_15, %c0_16, %c1_17] : memref<1x16x82xf32, #tpu.memory_space<vmem>>, vector<1x16x64xf32>
    %17 = vector.shape_cast %16 : vector<1x16x64xf32> to vector<16x64xf32>
    %18 = arith.truncf %17 : vector<16x64xf32> to vector<16x64xbf16>
    %cst_18 = arith.constant dense<0.000000e+00> : vector<8x64xf32>
    %19 = tpu.matmul %15, %18, %cst_18 {dimension_numbers = #tpu.dot_dimension_numbers<[1], [0], [0], [1], [0, 0, 1, 1], [], []>} : vector<8x16xbf16>, vector<16x64xbf16>, vector<8x64xf32> -> vector<8x64xf32>
    %20 = arith.addf %13, %19 : vector<8x64xf32>
    %c1_19 = arith.constant 1 : index
    %c0_20 = arith.constant 0 : index
    %c16_21 = arith.constant 16 : index
    %21 = vector.load %arg3[%c1_19, %c0_20, %c16_21] : memref<9x8x32xbf16, #tpu.memory_space<vmem>>, vector<1x8x16xbf16>
    %22 = vector.shape_cast %21 : vector<1x8x16xbf16> to vector<8x16xbf16>
    %c0_22 = arith.constant 0 : index
    %c0_23 = arith.constant 0 : index
    %c1_24 = arith.constant 1 : index
    %23 = vector.load %arg2[%c0_22, %c0_23, %c1_24] : memref<1x16x82xf32, #tpu.memory_space<vmem>>, vector<1x16x64xf32>
    %24 = vector.shape_cast %23 : vector<1x16x64xf32> to vector<16x64xf32>
    %25 = arith.truncf %24 : vector<16x64xf32> to vector<16x64xbf16>
    %cst_25 = arith.constant dense<0.000000e+00> : vector<8x64xf32>
    %26 = tpu.matmul %22, %25, %cst_25 {dimension_numbers = #tpu.dot_dimension_numbers<[1], [0], [0], [1], [0, 0, 1, 1], [], []>} : vector<8x16xbf16>, vector<16x64xbf16>, vector<8x64xf32> -> vector<8x64xf32>
    %27 = arith.addf %20, %26 : vector<8x64xf32>
    %c2 = arith.constant 2 : index
    %c0_26 = arith.constant 0 : index
    %c0_27 = arith.constant 0 : index
    %28 = vector.load %arg3[%c2, %c0_26, %c0_27] : memref<9x8x32xbf16, #tpu.memory_space<vmem>>, vector<1x8x16xbf16>
    %29 = vector.shape_cast %28 : vector<1x8x16xbf16> to vector<8x16xbf16>
    %c0_28 = arith.constant 0 : index
    %c0_29 = arith.constant 0 : index
    %c2_30 = arith.constant 2 : index
    %30 = vector.load %arg1[%c0_28, %c0_29, %c2_30] : memref<1x16x82xf32, #tpu.memory_space<vmem>>, vector<1x16x64xf32>
    %31 = vector.shape_cast %30 : vector<1x16x64xf32> to vector<16x64xf32>
    %32 = arith.truncf %31 : vector<16x64xf32> to vector<16x64xbf16>
    %cst_31 = arith.constant dense<0.000000e+00> : vector<8x64xf32>
    %33 = tpu.matmul %29, %32, %cst_31 {dimension_numbers = #tpu.dot_dimension_numbers<[1], [0], [0], [1], [0, 0, 1, 1], [], []>} : vector<8x16xbf16>, vector<16x64xbf16>, vector<8x64xf32> -> vector<8x64xf32>
    %34 = arith.addf %27, %33 : vector<8x64xf32>
    %c2_32 = arith.constant 2 : index
    %c0_33 = arith.constant 0 : index
    %c16_34 = arith.constant 16 : index
    %35 = vector.load %arg3[%c2_32, %c0_33, %c16_34] : memref<9x8x32xbf16, #tpu.memory_space<vmem>>, vector<1x8x16xbf16>
    %36 = vector.shape_cast %35 : vector<1x8x16xbf16> to vector<8x16xbf16>
    %c0_35 = arith.constant 0 : index
    %c0_36 = arith.constant 0 : index
    %c2_37 = arith.constant 2 : index
    %37 = vector.load %arg2[%c0_35, %c0_36, %c2_37] : memref<1x16x82xf32, #tpu.memory_space<vmem>>, vector<1x16x64xf32>
    %38 = vector.shape_cast %37 : vector<1x16x64xf32> to vector<16x64xf32>
    %39 = arith.truncf %38 : vector<16x64xf32> to vector<16x64xbf16>
    %cst_38 = arith.constant dense<0.000000e+00> : vector<8x64xf32>
    %40 = tpu.matmul %36, %39, %cst_38 {dimension_numbers = #tpu.dot_dimension_numbers<[1], [0], [0], [1], [0, 0, 1, 1], [], []>} : vector<8x16xbf16>, vector<16x64xbf16>, vector<8x64xf32> -> vector<8x64xf32>
    %41 = arith.addf %34, %40 : vector<8x64xf32>
    %c3 = arith.constant 3 : index
    %c0_39 = arith.constant 0 : index
    %c0_40 = arith.constant 0 : index
    %42 = vector.load %arg3[%c3, %c0_39, %c0_40] : memref<9x8x32xbf16, #tpu.memory_space<vmem>>, vector<1x8x16xbf16>
    %43 = vector.shape_cast %42 : vector<1x8x16xbf16> to vector<8x16xbf16>
    %c0_41 = arith.constant 0 : index
    %c0_42 = arith.constant 0 : index
    %c8 = arith.constant 8 : index
    %44 = vector.load %arg1[%c0_41, %c0_42, %c8] : memref<1x16x82xf32, #tpu.memory_space<vmem>>, vector<1x16x64xf32>
    %45 = vector.shape_cast %44 : vector<1x16x64xf32> to vector<16x64xf32>
    %46 = arith.truncf %45 : vector<16x64xf32> to vector<16x64xbf16>
    %cst_43 = arith.constant dense<0.000000e+00> : vector<8x64xf32>
    %47 = tpu.matmul %43, %46, %cst_43 {dimension_numbers = #tpu.dot_dimension_numbers<[1], [0], [0], [1], [0, 0, 1, 1], [], []>} : vector<8x16xbf16>, vector<16x64xbf16>, vector<8x64xf32> -> vector<8x64xf32>
    %48 = arith.addf %41, %47 : vector<8x64xf32>
    %c3_44 = arith.constant 3 : index
    %c0_45 = arith.constant 0 : index
    %c16_46 = arith.constant 16 : index
    %49 = vector.load %arg3[%c3_44, %c0_45, %c16_46] : memref<9x8x32xbf16, #tpu.memory_space<vmem>>, vector<1x8x16xbf16>
    %50 = vector.shape_cast %49 : vector<1x8x16xbf16> to vector<8x16xbf16>
    %c0_47 = arith.constant 0 : index
    %c0_48 = arith.constant 0 : index
    %c8_49 = arith.constant 8 : index
    %51 = vector.load %arg2[%c0_47, %c0_48, %c8_49] : memref<1x16x82xf32, #tpu.memory_space<vmem>>, vector<1x16x64xf32>
    %52 = vector.shape_cast %51 : vector<1x16x64xf32> to vector<16x64xf32>
    %53 = arith.truncf %52 : vector<16x64xf32> to vector<16x64xbf16>
    %cst_50 = arith.constant dense<0.000000e+00> : vector<8x64xf32>
    %54 = tpu.matmul %50, %53, %cst_50 {dimension_numbers = #tpu.dot_dimension_numbers<[1], [0], [0], [1], [0, 0, 1, 1], [], []>} : vector<8x16xbf16>, vector<16x64xbf16>, vector<8x64xf32> -> vector<8x64xf32>
    %55 = arith.addf %48, %54 : vector<8x64xf32>
    %c4 = arith.constant 4 : index
    %c0_51 = arith.constant 0 : index
    %c0_52 = arith.constant 0 : index
    %56 = vector.load %arg3[%c4, %c0_51, %c0_52] : memref<9x8x32xbf16, #tpu.memory_space<vmem>>, vector<1x8x16xbf16>
    %57 = vector.shape_cast %56 : vector<1x8x16xbf16> to vector<8x16xbf16>
    %c0_53 = arith.constant 0 : index
    %c0_54 = arith.constant 0 : index
    %c9 = arith.constant 9 : index
    %58 = vector.load %arg1[%c0_53, %c0_54, %c9] : memref<1x16x82xf32, #tpu.memory_space<vmem>>, vector<1x16x64xf32>
    %59 = vector.shape_cast %58 : vector<1x16x64xf32> to vector<16x64xf32>
    %60 = arith.truncf %59 : vector<16x64xf32> to vector<16x64xbf16>
    %cst_55 = arith.constant dense<0.000000e+00> : vector<8x64xf32>
    %61 = tpu.matmul %57, %60, %cst_55 {dimension_numbers = #tpu.dot_dimension_numbers<[1], [0], [0], [1], [0, 0, 1, 1], [], []>} : vector<8x16xbf16>, vector<16x64xbf16>, vector<8x64xf32> -> vector<8x64xf32>
    %62 = arith.addf %55, %61 : vector<8x64xf32>
    %c4_56 = arith.constant 4 : index
    %c0_57 = arith.constant 0 : index
    %c16_58 = arith.constant 16 : index
    %63 = vector.load %arg3[%c4_56, %c0_57, %c16_58] : memref<9x8x32xbf16, #tpu.memory_space<vmem>>, vector<1x8x16xbf16>
    %64 = vector.shape_cast %63 : vector<1x8x16xbf16> to vector<8x16xbf16>
    %c0_59 = arith.constant 0 : index
    %c0_60 = arith.constant 0 : index
    %c9_61 = arith.constant 9 : index
    %65 = vector.load %arg2[%c0_59, %c0_60, %c9_61] : memref<1x16x82xf32, #tpu.memory_space<vmem>>, vector<1x16x64xf32>
    %66 = vector.shape_cast %65 : vector<1x16x64xf32> to vector<16x64xf32>
    %67 = arith.truncf %66 : vector<16x64xf32> to vector<16x64xbf16>
    %cst_62 = arith.constant dense<0.000000e+00> : vector<8x64xf32>
    %68 = tpu.matmul %64, %67, %cst_62 {dimension_numbers = #tpu.dot_dimension_numbers<[1], [0], [0], [1], [0, 0, 1, 1], [], []>} : vector<8x16xbf16>, vector<16x64xbf16>, vector<8x64xf32> -> vector<8x64xf32>
    %69 = arith.addf %62, %68 : vector<8x64xf32>
    %c5 = arith.constant 5 : index
    %c0_63 = arith.constant 0 : index
    %c0_64 = arith.constant 0 : index
    %70 = vector.load %arg3[%c5, %c0_63, %c0_64] : memref<9x8x32xbf16, #tpu.memory_space<vmem>>, vector<1x8x16xbf16>
    %71 = vector.shape_cast %70 : vector<1x8x16xbf16> to vector<8x16xbf16>
    %c0_65 = arith.constant 0 : index
    %c0_66 = arith.constant 0 : index
    %c10 = arith.constant 10 : index
    %72 = vector.load %arg1[%c0_65, %c0_66, %c10] : memref<1x16x82xf32, #tpu.memory_space<vmem>>, vector<1x16x64xf32>
    %73 = vector.shape_cast %72 : vector<1x16x64xf32> to vector<16x64xf32>
    %74 = arith.truncf %73 : vector<16x64xf32> to vector<16x64xbf16>
    %cst_67 = arith.constant dense<0.000000e+00> : vector<8x64xf32>
    %75 = tpu.matmul %71, %74, %cst_67 {dimension_numbers = #tpu.dot_dimension_numbers<[1], [0], [0], [1], [0, 0, 1, 1], [], []>} : vector<8x16xbf16>, vector<16x64xbf16>, vector<8x64xf32> -> vector<8x64xf32>
    %76 = arith.addf %69, %75 : vector<8x64xf32>
    %c5_68 = arith.constant 5 : index
    %c0_69 = arith.constant 0 : index
    %c16_70 = arith.constant 16 : index
    %77 = vector.load %arg3[%c5_68, %c0_69, %c16_70] : memref<9x8x32xbf16, #tpu.memory_space<vmem>>, vector<1x8x16xbf16>
    %78 = vector.shape_cast %77 : vector<1x8x16xbf16> to vector<8x16xbf16>
    %c0_71 = arith.constant 0 : index
    %c0_72 = arith.constant 0 : index
    %c10_73 = arith.constant 10 : index
    %79 = vector.load %arg2[%c0_71, %c0_72, %c10_73] : memref<1x16x82xf32, #tpu.memory_space<vmem>>, vector<1x16x64xf32>
    %80 = vector.shape_cast %79 : vector<1x16x64xf32> to vector<16x64xf32>
    %81 = arith.truncf %80 : vector<16x64xf32> to vector<16x64xbf16>
    %cst_74 = arith.constant dense<0.000000e+00> : vector<8x64xf32>
    %82 = tpu.matmul %78, %81, %cst_74 {dimension_numbers = #tpu.dot_dimension_numbers<[1], [0], [0], [1], [0, 0, 1, 1], [], []>} : vector<8x16xbf16>, vector<16x64xbf16>, vector<8x64xf32> -> vector<8x64xf32>
    %83 = arith.addf %76, %82 : vector<8x64xf32>
    %c6 = arith.constant 6 : index
    %c0_75 = arith.constant 0 : index
    %c0_76 = arith.constant 0 : index
    %84 = vector.load %arg3[%c6, %c0_75, %c0_76] : memref<9x8x32xbf16, #tpu.memory_space<vmem>>, vector<1x8x16xbf16>
    %85 = vector.shape_cast %84 : vector<1x8x16xbf16> to vector<8x16xbf16>
    %c0_77 = arith.constant 0 : index
    %c0_78 = arith.constant 0 : index
    %c16_79 = arith.constant 16 : index
    %86 = vector.load %arg1[%c0_77, %c0_78, %c16_79] : memref<1x16x82xf32, #tpu.memory_space<vmem>>, vector<1x16x64xf32>
    %87 = vector.shape_cast %86 : vector<1x16x64xf32> to vector<16x64xf32>
    %88 = arith.truncf %87 : vector<16x64xf32> to vector<16x64xbf16>
    %cst_80 = arith.constant dense<0.000000e+00> : vector<8x64xf32>
    %89 = tpu.matmul %85, %88, %cst_80 {dimension_numbers = #tpu.dot_dimension_numbers<[1], [0], [0], [1], [0, 0, 1, 1], [], []>} : vector<8x16xbf16>, vector<16x64xbf16>, vector<8x64xf32> -> vector<8x64xf32>
    %90 = arith.addf %83, %89 : vector<8x64xf32>
    %c6_81 = arith.constant 6 : index
    %c0_82 = arith.constant 0 : index
    %c16_83 = arith.constant 16 : index
    %91 = vector.load %arg3[%c6_81, %c0_82, %c16_83] : memref<9x8x32xbf16, #tpu.memory_space<vmem>>, vector<1x8x16xbf16>
    %92 = vector.shape_cast %91 : vector<1x8x16xbf16> to vector<8x16xbf16>
    %c0_84 = arith.constant 0 : index
    %c0_85 = arith.constant 0 : index
    %c16_86 = arith.constant 16 : index
    %93 = vector.load %arg2[%c0_84, %c0_85, %c16_86] : memref<1x16x82xf32, #tpu.memory_space<vmem>>, vector<1x16x64xf32>
    %94 = vector.shape_cast %93 : vector<1x16x64xf32> to vector<16x64xf32>
    %95 = arith.truncf %94 : vector<16x64xf32> to vector<16x64xbf16>
    %cst_87 = arith.constant dense<0.000000e+00> : vector<8x64xf32>
    %96 = tpu.matmul %92, %95, %cst_87 {dimension_numbers = #tpu.dot_dimension_numbers<[1], [0], [0], [1], [0, 0, 1, 1], [], []>} : vector<8x16xbf16>, vector<16x64xbf16>, vector<8x64xf32> -> vector<8x64xf32>
    %97 = arith.addf %90, %96 : vector<8x64xf32>
    %c7 = arith.constant 7 : index
    %c0_88 = arith.constant 0 : index
    %c0_89 = arith.constant 0 : index
    %98 = vector.load %arg3[%c7, %c0_88, %c0_89] : memref<9x8x32xbf16, #tpu.memory_space<vmem>>, vector<1x8x16xbf16>
    %99 = vector.shape_cast %98 : vector<1x8x16xbf16> to vector<8x16xbf16>
    %c0_90 = arith.constant 0 : index
    %c0_91 = arith.constant 0 : index
    %c17 = arith.constant 17 : index
    %100 = vector.load %arg1[%c0_90, %c0_91, %c17] : memref<1x16x82xf32, #tpu.memory_space<vmem>>, vector<1x16x64xf32>
    %101 = vector.shape_cast %100 : vector<1x16x64xf32> to vector<16x64xf32>
    %102 = arith.truncf %101 : vector<16x64xf32> to vector<16x64xbf16>
    %cst_92 = arith.constant dense<0.000000e+00> : vector<8x64xf32>
    %103 = tpu.matmul %99, %102, %cst_92 {dimension_numbers = #tpu.dot_dimension_numbers<[1], [0], [0], [1], [0, 0, 1, 1], [], []>} : vector<8x16xbf16>, vector<16x64xbf16>, vector<8x64xf32> -> vector<8x64xf32>
    %104 = arith.addf %97, %103 : vector<8x64xf32>
    %c7_93 = arith.constant 7 : index
    %c0_94 = arith.constant 0 : index
    %c16_95 = arith.constant 16 : index
    %105 = vector.load %arg3[%c7_93, %c0_94, %c16_95] : memref<9x8x32xbf16, #tpu.memory_space<vmem>>, vector<1x8x16xbf16>
    %106 = vector.shape_cast %105 : vector<1x8x16xbf16> to vector<8x16xbf16>
    %c0_96 = arith.constant 0 : index
    %c0_97 = arith.constant 0 : index
    %c17_98 = arith.constant 17 : index
    %107 = vector.load %arg2[%c0_96, %c0_97, %c17_98] : memref<1x16x82xf32, #tpu.memory_space<vmem>>, vector<1x16x64xf32>
    %108 = vector.shape_cast %107 : vector<1x16x64xf32> to vector<16x64xf32>
    %109 = arith.truncf %108 : vector<16x64xf32> to vector<16x64xbf16>
    %cst_99 = arith.constant dense<0.000000e+00> : vector<8x64xf32>
    %110 = tpu.matmul %106, %109, %cst_99 {dimension_numbers = #tpu.dot_dimension_numbers<[1], [0], [0], [1], [0, 0, 1, 1], [], []>} : vector<8x16xbf16>, vector<16x64xbf16>, vector<8x64xf32> -> vector<8x64xf32>
    %111 = arith.addf %104, %110 : vector<8x64xf32>
    %c8_100 = arith.constant 8 : index
    %c0_101 = arith.constant 0 : index
    %c0_102 = arith.constant 0 : index
    %112 = vector.load %arg3[%c8_100, %c0_101, %c0_102] : memref<9x8x32xbf16, #tpu.memory_space<vmem>>, vector<1x8x16xbf16>
    %113 = vector.shape_cast %112 : vector<1x8x16xbf16> to vector<8x16xbf16>
    %c0_103 = arith.constant 0 : index
    %c0_104 = arith.constant 0 : index
    %c18 = arith.constant 18 : index
    %114 = vector.load %arg1[%c0_103, %c0_104, %c18] : memref<1x16x82xf32, #tpu.memory_space<vmem>>, vector<1x16x64xf32>
    %115 = vector.shape_cast %114 : vector<1x16x64xf32> to vector<16x64xf32>
    %116 = arith.truncf %115 : vector<16x64xf32> to vector<16x64xbf16>
    %cst_105 = arith.constant dense<0.000000e+00> : vector<8x64xf32>
    %117 = tpu.matmul %113, %116, %cst_105 {dimension_numbers = #tpu.dot_dimension_numbers<[1], [0], [0], [1], [0, 0, 1, 1], [], []>} : vector<8x16xbf16>, vector<16x64xbf16>, vector<8x64xf32> -> vector<8x64xf32>
    %118 = arith.addf %111, %117 : vector<8x64xf32>
    %c8_106 = arith.constant 8 : index
    %c0_107 = arith.constant 0 : index
    %c16_108 = arith.constant 16 : index
    %119 = vector.load %arg3[%c8_106, %c0_107, %c16_108] : memref<9x8x32xbf16, #tpu.memory_space<vmem>>, vector<1x8x16xbf16>
    %120 = vector.shape_cast %119 : vector<1x8x16xbf16> to vector<8x16xbf16>
    %c0_109 = arith.constant 0 : index
    %c0_110 = arith.constant 0 : index
    %c18_111 = arith.constant 18 : index
    %121 = vector.load %arg2[%c0_109, %c0_110, %c18_111] : memref<1x16x82xf32, #tpu.memory_space<vmem>>, vector<1x16x64xf32>
    %122 = vector.shape_cast %121 : vector<1x16x64xf32> to vector<16x64xf32>
    %123 = arith.truncf %122 : vector<16x64xf32> to vector<16x64xbf16>
    %cst_112 = arith.constant dense<0.000000e+00> : vector<8x64xf32>
    %124 = tpu.matmul %120, %123, %cst_112 {dimension_numbers = #tpu.dot_dimension_numbers<[1], [0], [0], [1], [0, 0, 1, 1], [], []>} : vector<8x16xbf16>, vector<16x64xbf16>, vector<8x64xf32> -> vector<8x64xf32>
    %125 = arith.addf %118, %124 : vector<8x64xf32>
    %c0_113 = arith.constant 0 : index
    %c0_114 = arith.constant 0 : index
    %126 = vector.load %arg4[%c0_113, %c0_114] : memref<8x1xf32, #tpu.memory_space<vmem>>, vector<8x1xf32>
    %127 = vector.broadcast %126 : vector<8x1xf32> to vector<8x64xf32>
    %128 = arith.addf %125, %127 : vector<8x64xf32>
    %129 = vector.broadcast %0 : vector<1x64xf32> to vector<8x64xf32>
    %130 = arith.mulf %128, %129 : vector<8x64xf32>
    %cst_115 = arith.constant dense<0.000000e+00> : vector<8xf32>
    %131 = vector.multi_reduction <add>, %130, %cst_115 [1] : vector<8x64xf32> to vector<8xf32>
    %132 = vector.shape_cast %131 : vector<8xf32> to vector<8x1xf32>
    %cst_116 = arith.constant 0.027777778 : f32
    %133 = vector.broadcast %cst_116 : f32 to vector<8x1xf32>
    %134 = arith.mulf %132, %133 : vector<8x1xf32>
    %135 = vector.broadcast %134 : vector<8x1xf32> to vector<8x64xf32>
    %136 = arith.subf %130, %135 : vector<8x64xf32>
    %137 = vector.broadcast %0 : vector<1x64xf32> to vector<8x64xf32>
    %138 = arith.mulf %136, %137 : vector<8x64xf32>
    %139 = arith.mulf %138, %138 : vector<8x64xf32>
    %cst_117 = arith.constant dense<0.000000e+00> : vector<8xf32>
    %140 = vector.multi_reduction <add>, %139, %cst_117 [1] : vector<8x64xf32> to vector<8xf32>
    %141 = vector.shape_cast %140 : vector<8xf32> to vector<8x1xf32>
    %cst_118 = arith.constant 0.027777778 : f32
    %142 = vector.broadcast %cst_118 : f32 to vector<8x1xf32>
    %143 = arith.mulf %141, %142 : vector<8x1xf32>
    %cst_119 = arith.constant 9.99999974E-6 : f32
    %144 = vector.broadcast %cst_119 : f32 to vector<8x1xf32>
    %145 = arith.addf %143, %144 : vector<8x1xf32>
    %146 = math.rsqrt %145 : vector<8x1xf32>
    %147 = vector.broadcast %146 : vector<8x1xf32> to vector<8x64xf32>
    %148 = arith.mulf %138, %147 : vector<8x64xf32>
    %cst_120 = arith.constant 0.000000e+00 : f32
    %149 = vector.broadcast %cst_120 : f32 to vector<8x64xf32>
    %150 = arith.maximumf %148, %149 : vector<8x64xf32>
    %cst_121 = arith.constant 0.000000e+00 : f32
    %151 = vector.broadcast %cst_121 : f32 to vector<8x82xf32>
    %c0_122 = arith.constant 0 : index
    %c0_123 = arith.constant 0 : index
    %152 = vector.load %arg9[%c0_122, %c0_123] : memref<8x82xf32, #tpu.memory_space<vmem>>, vector<8x82xf32>
    tpu.vector_store %arg9[%c0_122, %c0_123], %151 {strides = array<i32>} : memref<8x82xf32, #tpu.memory_space<vmem>>, vector<8x82xf32>,
    %c0_124 = arith.constant 0 : index
    %c9_125 = arith.constant 9 : index
    %153 = vector.load %arg9[%c0_124, %c9_125] : memref<8x82xf32, #tpu.memory_space<vmem>>, vector<8x64xf32>
    tpu.vector_store %arg9[%c0_124, %c9_125], %150 {strides = array<i32>} : memref<8x82xf32, #tpu.memory_space<vmem>>, vector<8x64xf32>,
    %c0_126 = arith.constant 0 : index
    %c0_127 = arith.constant 0 : index
    %c0_128 = arith.constant 0 : index
    %154 = vector.load %arg5[%c0_126, %c0_127, %c0_128] : memref<9x8x8xbf16, #tpu.memory_space<vmem>>, vector<1x8x8xbf16>
    %155 = vector.shape_cast %154 : vector<1x8x8xbf16> to vector<8x8xbf16>
    %c0_129 = arith.constant 0 : index
    %c0_130 = arith.constant 0 : index
    %156 = vector.load %arg9[%c0_129, %c0_130] : memref<8x82xf32, #tpu.memory_space<vmem>>, vector<8x64xf32>
    %157 = arith.truncf %156 : vector<8x64xf32> to vector<8x64xbf16>
    %cst_131 = arith.constant dense<0.000000e+00> : vector<8x64xf32>
    %158 = tpu.matmul %155, %157, %cst_131 {dimension_numbers = #tpu.dot_dimension_numbers<[1], [0], [0], [1], [0, 0, 1, 1], [], []>} : vector<8x8xbf16>, vector<8x64xbf16>, vector<8x64xf32> -> vector<8x64xf32>
    %c1_132 = arith.constant 1 : index
    %c0_133 = arith.constant 0 : index
    %c0_134 = arith.constant 0 : index
    %159 = vector.load %arg5[%c1_132, %c0_133, %c0_134] : memref<9x8x8xbf16, #tpu.memory_space<vmem>>, vector<1x8x8xbf16>
    %160 = vector.shape_cast %159 : vector<1x8x8xbf16> to vector<8x8xbf16>
    %c0_135 = arith.constant 0 : index
    %c1_136 = arith.constant 1 : index
    %161 = vector.load %arg9[%c0_135, %c1_136] : memref<8x82xf32, #tpu.memory_space<vmem>>, vector<8x64xf32>
    %162 = arith.truncf %161 : vector<8x64xf32> to vector<8x64xbf16>
    %cst_137 = arith.constant dense<0.000000e+00> : vector<8x64xf32>
    %163 = tpu.matmul %160, %162, %cst_137 {dimension_numbers = #tpu.dot_dimension_numbers<[1], [0], [0], [1], [0, 0, 1, 1], [], []>} : vector<8x8xbf16>, vector<8x64xbf16>, vector<8x64xf32> -> vector<8x64xf32>
    %164 = arith.addf %158, %163 : vector<8x64xf32>
    %c2_138 = arith.constant 2 : index
    %c0_139 = arith.constant 0 : index
    %c0_140 = arith.constant 0 : index
    %165 = vector.load %arg5[%c2_138, %c0_139, %c0_140] : memref<9x8x8xbf16, #tpu.memory_space<vmem>>, vector<1x8x8xbf16>
    %166 = vector.shape_cast %165 : vector<1x8x8xbf16> to vector<8x8xbf16>
    %c0_141 = arith.constant 0 : index
    %c2_142 = arith.constant 2 : index
    %167 = vector.load %arg9[%c0_141, %c2_142] : memref<8x82xf32, #tpu.memory_space<vmem>>, vector<8x64xf32>
    %168 = arith.truncf %167 : vector<8x64xf32> to vector<8x64xbf16>
    %cst_143 = arith.constant dense<0.000000e+00> : vector<8x64xf32>
    %169 = tpu.matmul %166, %168, %cst_143 {dimension_numbers = #tpu.dot_dimension_numbers<[1], [0], [0], [1], [0, 0, 1, 1], [], []>} : vector<8x8xbf16>, vector<8x64xbf16>, vector<8x64xf32> -> vector<8x64xf32>
    %170 = arith.addf %164, %169 : vector<8x64xf32>
    %c3_144 = arith.constant 3 : index
    %c0_145 = arith.constant 0 : index
    %c0_146 = arith.constant 0 : index
    %171 = vector.load %arg5[%c3_144, %c0_145, %c0_146] : memref<9x8x8xbf16, #tpu.memory_space<vmem>>, vector<1x8x8xbf16>
    %172 = vector.shape_cast %171 : vector<1x8x8xbf16> to vector<8x8xbf16>
    %c0_147 = arith.constant 0 : index
    %c8_148 = arith.constant 8 : index
    %173 = vector.load %arg9[%c0_147, %c8_148] : memref<8x82xf32, #tpu.memory_space<vmem>>, vector<8x64xf32>
    %174 = arith.truncf %173 : vector<8x64xf32> to vector<8x64xbf16>
    %cst_149 = arith.constant dense<0.000000e+00> : vector<8x64xf32>
    %175 = tpu.matmul %172, %174, %cst_149 {dimension_numbers = #tpu.dot_dimension_numbers<[1], [0], [0], [1], [0, 0, 1, 1], [], []>} : vector<8x8xbf16>, vector<8x64xbf16>, vector<8x64xf32> -> vector<8x64xf32>
    %176 = arith.addf %170, %175 : vector<8x64xf32>
    %c4_150 = arith.constant 4 : index
    %c0_151 = arith.constant 0 : index
    %c0_152 = arith.constant 0 : index
    %177 = vector.load %arg5[%c4_150, %c0_151, %c0_152] : memref<9x8x8xbf16, #tpu.memory_space<vmem>>, vector<1x8x8xbf16>
    %178 = vector.shape_cast %177 : vector<1x8x8xbf16> to vector<8x8xbf16>
    %c0_153 = arith.constant 0 : index
    %c9_154 = arith.constant 9 : index
    %179 = vector.load %arg9[%c0_153, %c9_154] : memref<8x82xf32, #tpu.memory_space<vmem>>, vector<8x64xf32>
    %180 = arith.truncf %179 : vector<8x64xf32> to vector<8x64xbf16>
    %cst_155 = arith.constant dense<0.000000e+00> : vector<8x64xf32>
    %181 = tpu.matmul %178, %180, %cst_155 {dimension_numbers = #tpu.dot_dimension_numbers<[1], [0], [0], [1], [0, 0, 1, 1], [], []>} : vector<8x8xbf16>, vector<8x64xbf16>, vector<8x64xf32> -> vector<8x64xf32>
    %182 = arith.addf %176, %181 : vector<8x64xf32>
    %c5_156 = arith.constant 5 : index
    %c0_157 = arith.constant 0 : index
    %c0_158 = arith.constant 0 : index
    %183 = vector.load %arg5[%c5_156, %c0_157, %c0_158] : memref<9x8x8xbf16, #tpu.memory_space<vmem>>, vector<1x8x8xbf16>
    %184 = vector.shape_cast %183 : vector<1x8x8xbf16> to vector<8x8xbf16>
    %c0_159 = arith.constant 0 : index
    %c10_160 = arith.constant 10 : index
    %185 = vector.load %arg9[%c0_159, %c10_160] : memref<8x82xf32, #tpu.memory_space<vmem>>, vector<8x64xf32>
    %186 = arith.truncf %185 : vector<8x64xf32> to vector<8x64xbf16>
    %cst_161 = arith.constant dense<0.000000e+00> : vector<8x64xf32>
    %187 = tpu.matmul %184, %186, %cst_161 {dimension_numbers = #tpu.dot_dimension_numbers<[1], [0], [0], [1], [0, 0, 1, 1], [], []>} : vector<8x8xbf16>, vector<8x64xbf16>, vector<8x64xf32> -> vector<8x64xf32>
    %188 = arith.addf %182, %187 : vector<8x64xf32>
    %c6_162 = arith.constant 6 : index
    %c0_163 = arith.constant 0 : index
    %c0_164 = arith.constant 0 : index
    %189 = vector.load %arg5[%c6_162, %c0_163, %c0_164] : memref<9x8x8xbf16, #tpu.memory_space<vmem>>, vector<1x8x8xbf16>
    %190 = vector.shape_cast %189 : vector<1x8x8xbf16> to vector<8x8xbf16>
    %c0_165 = arith.constant 0 : index
    %c16_166 = arith.constant 16 : index
    %191 = vector.load %arg9[%c0_165, %c16_166] : memref<8x82xf32, #tpu.memory_space<vmem>>, vector<8x64xf32>
    %192 = arith.truncf %191 : vector<8x64xf32> to vector<8x64xbf16>
    %cst_167 = arith.constant dense<0.000000e+00> : vector<8x64xf32>
    %193 = tpu.matmul %190, %192, %cst_167 {dimension_numbers = #tpu.dot_dimension_numbers<[1], [0], [0], [1], [0, 0, 1, 1], [], []>} : vector<8x8xbf16>, vector<8x64xbf16>, vector<8x64xf32> -> vector<8x64xf32>
    %194 = arith.addf %188, %193 : vector<8x64xf32>
    %c7_168 = arith.constant 7 : index
    %c0_169 = arith.constant 0 : index
    %c0_170 = arith.constant 0 : index
    %195 = vector.load %arg5[%c7_168, %c0_169, %c0_170] : memref<9x8x8xbf16, #tpu.memory_space<vmem>>, vector<1x8x8xbf16>
    %196 = vector.shape_cast %195 : vector<1x8x8xbf16> to vector<8x8xbf16>
    %c0_171 = arith.constant 0 : index
    %c17_172 = arith.constant 17 : index
    %197 = vector.load %arg9[%c0_171, %c17_172] : memref<8x82xf32, #tpu.memory_space<vmem>>, vector<8x64xf32>
    %198 = arith.truncf %197 : vector<8x64xf32> to vector<8x64xbf16>
    %cst_173 = arith.constant dense<0.000000e+00> : vector<8x64xf32>
    %199 = tpu.matmul %196, %198, %cst_173 {dimension_numbers = #tpu.dot_dimension_numbers<[1], [0], [0], [1], [0, 0, 1, 1], [], []>} : vector<8x8xbf16>, vector<8x64xbf16>, vector<8x64xf32> -> vector<8x64xf32>
    %200 = arith.addf %194, %199 : vector<8x64xf32>
    %c8_174 = arith.constant 8 : index
    %c0_175 = arith.constant 0 : index
    %c0_176 = arith.constant 0 : index
    %201 = vector.load %arg5[%c8_174, %c0_175, %c0_176] : memref<9x8x8xbf16, #tpu.memory_space<vmem>>, vector<1x8x8xbf16>
    %202 = vector.shape_cast %201 : vector<1x8x8xbf16> to vector<8x8xbf16>
    %c0_177 = arith.constant 0 : index
    %c18_178 = arith.constant 18 : index
    %203 = vector.load %arg9[%c0_177, %c18_178] : memref<8x82xf32, #tpu.memory_space<vmem>>, vector<8x64xf32>
    %204 = arith.truncf %203 : vector<8x64xf32> to vector<8x64xbf16>
    %cst_179 = arith.constant dense<0.000000e+00> : vector<8x64xf32>
    %205 = tpu.matmul %202, %204, %cst_179 {dimension_numbers = #tpu.dot_dimension_numbers<[1], [0], [0], [1], [0, 0, 1, 1], [], []>} : vector<8x8xbf16>, vector<8x64xbf16>, vector<8x64xf32> -> vector<8x64xf32>
    %206 = arith.addf %200, %205 : vector<8x64xf32>
    %c0_180 = arith.constant 0 : index
    %c0_181 = arith.constant 0 : index
    %207 = vector.load %arg6[%c0_180, %c0_181] : memref<8x1xf32, #tpu.memory_space<vmem>>, vector<8x1xf32>
    %208 = vector.broadcast %207 : vector<8x1xf32> to vector<8x64xf32>
    %209 = arith.addf %206, %208 : vector<8x64xf32>
    %210 = vector.broadcast %0 : vector<1x64xf32> to vector<8x64xf32>
    %211 = arith.mulf %209, %210 : vector<8x64xf32>
    %cst_182 = arith.constant dense<0.000000e+00> : vector<8xf32>
    %212 = vector.multi_reduction <add>, %211, %cst_182 [1] : vector<8x64xf32> to vector<8xf32>
    %213 = vector.shape_cast %212 : vector<8xf32> to vector<8x1xf32>
    %cst_183 = arith.constant 0.027777778 : f32
    %214 = vector.broadcast %cst_183 : f32 to vector<8x1xf32>
    %215 = arith.mulf %213, %214 : vector<8x1xf32>
    %216 = vector.broadcast %215 : vector<8x1xf32> to vector<8x64xf32>
    %217 = arith.subf %211, %216 : vector<8x64xf32>
    %218 = vector.broadcast %0 : vector<1x64xf32> to vector<8x64xf32>
    %219 = arith.mulf %217, %218 : vector<8x64xf32>
    %220 = arith.mulf %219, %219 : vector<8x64xf32>
    %cst_184 = arith.constant dense<0.000000e+00> : vector<8xf32>
    %221 = vector.multi_reduction <add>, %220, %cst_184 [1] : vector<8x64xf32> to vector<8xf32>
    %222 = vector.shape_cast %221 : vector<8xf32> to vector<8x1xf32>
    %cst_185 = arith.constant 0.027777778 : f32
    %223 = vector.broadcast %cst_185 : f32 to vector<8x1xf32>
    %224 = arith.mulf %222, %223 : vector<8x1xf32>
    %cst_186 = arith.constant 9.99999974E-6 : f32
    %225 = vector.broadcast %cst_186 : f32 to vector<8x1xf32>
    %226 = arith.addf %224, %225 : vector<8x1xf32>
    %227 = math.rsqrt %226 : vector<8x1xf32>
    %228 = vector.broadcast %227 : vector<8x1xf32> to vector<8x64xf32>
    %229 = arith.mulf %219, %228 : vector<8x64xf32>
    %cst_187 = arith.constant 0.000000e+00 : f32
    %230 = vector.broadcast %cst_187 : f32 to vector<8x64xf32>
    %231 = arith.maximumf %229, %230 : vector<8x64xf32>
    %c0_188 = arith.constant 0 : index
    %c0_189 = arith.constant 0 : index
    %c0_190 = arith.constant 0 : index
    %232 = vector.load %arg8[%c0_188, %c0_189, %c0_190] : memref<1x8x64xf32, #tpu.memory_space<vmem>>, vector<1x8x64xf32>
    %233 = vector.shape_cast %232 : vector<1x8x64xf32> to vector<8x64xf32>
    %234 = vector.shape_cast %231 : vector<8x64xf32> to vector<1x8x64xf32>
    tpu.vector_store %arg8[%c0_188, %c0_189, %c0_190], %234 {strides = array<i32>} : memref<1x8x64xf32, #tpu.memory_space<vmem>>, vector<1x8x64xf32>,
    return
  }
  func.func @transform_0(%arg0: i32) -> (i32, i32, i32) {
    %c0_i32 = arith.constant 0 : i32
    %c0_i32_0 = arith.constant 0 : i32
    %c0_i32_1 = arith.constant 0 : i32
    return %arg0, %c0_i32, %c0_i32_0 : i32, i32, i32
  }
  func.func @transform_1(%arg0: i32) -> (i32, i32, i32) {
    %c0_i32 = arith.constant 0 : i32
    %c0_i32_0 = arith.constant 0 : i32
    %c0_i32_1 = arith.constant 0 : i32
    return %arg0, %c0_i32, %c0_i32_0 : i32, i32, i32
  }
  func.func @transform_2(%arg0: i32) -> (i32, i32, i32) {
    %c0_i32 = arith.constant 0 : i32
    %c0_i32_0 = arith.constant 0 : i32
    %c0_i32_1 = arith.constant 0 : i32
    %c0_i32_2 = arith.constant 0 : i32
    return %c0_i32, %c0_i32_0, %c0_i32_1 : i32, i32, i32
  }
  func.func @transform_3(%arg0: i32) -> (i32, i32) {
    %c0_i32 = arith.constant 0 : i32
    %c0_i32_0 = arith.constant 0 : i32
    %c0_i32_1 = arith.constant 0 : i32
    return %c0_i32, %c0_i32_0 : i32, i32
  }
  func.func @transform_4(%arg0: i32) -> (i32, i32, i32) {
    %c0_i32 = arith.constant 0 : i32
    %c0_i32_0 = arith.constant 0 : i32
    %c0_i32_1 = arith.constant 0 : i32
    %c0_i32_2 = arith.constant 0 : i32
    return %c0_i32, %c0_i32_0, %c0_i32_1 : i32, i32, i32
  }
  func.func @transform_5(%arg0: i32) -> (i32, i32) {
    %c0_i32 = arith.constant 0 : i32
    %c0_i32_0 = arith.constant 0 : i32
    %c0_i32_1 = arith.constant 0 : i32
    return %c0_i32, %c0_i32_0 : i32, i32
  }
  func.func @transform_6(%arg0: i32) -> (i32, i32) {
    %c0_i32 = arith.constant 0 : i32
    %c0_i32_0 = arith.constant 0 : i32
    %c0_i32_1 = arith.constant 0 : i32
    return %c0_i32, %c0_i32_0 : i32, i32
  }
  func.func @transform_7(%arg0: i32) -> (i32, i32, i32) {
    %c0_i32 = arith.constant 0 : i32
    %c0_i32_0 = arith.constant 0 : i32
    %c0_i32_1 = arith.constant 0 : i32
    return %arg0, %c0_i32, %c0_i32_0 : i32, i32, i32
  }
}

module attributes {stable_mosaic.version = 11 : i64} {
  func.func @_conv_block_kernel(%arg0: i32, %arg1: memref<1x8x226xf32, #tpu.memory_space<vmem>>, %arg2: memref<1x8x226xf32, #tpu.memory_space<vmem>>, %arg3: memref<9x8x16xbf16, #tpu.memory_space<vmem>>, %arg4: memref<8x1xf32, #tpu.memory_space<vmem>>, %arg5: memref<9x8x8xbf16, #tpu.memory_space<vmem>>, %arg6: memref<8x1xf32, #tpu.memory_space<vmem>>, %arg7: memref<1x196xf32, #tpu.memory_space<vmem>>, %arg8: memref<1x8xf32, #tpu.memory_space<vmem>>, %arg9: memref<1x1xf32, #tpu.memory_space<vmem>>, %arg10: memref<1x1x196xf32, #tpu.memory_space<vmem>>, %arg11: memref<8x226xf32, #tpu.memory_space<vmem>>) attributes {dimension_semantics = [#tpu.dimension_semantics<parallel>], iteration_bounds = array<i64: 2>, scalar_prefetch = 0 : i64, scratch_operands = 1 : i64, tpu.core_type = #tpu.core_type<tc>, window_params = [{transform_indices = @transform_0, window_bounds = array<i64: 1, 8, 226>}, {transform_indices = @transform_1, window_bounds = array<i64: 1, 8, 226>}, {pipeline_mode = #tpu.pipeline_mode<synchronous>, transform_indices = @transform_2, window_bounds = array<i64: 9, 8, 16>}, {pipeline_mode = #tpu.pipeline_mode<synchronous>, transform_indices = @transform_3, window_bounds = array<i64: 8, 1>}, {pipeline_mode = #tpu.pipeline_mode<synchronous>, transform_indices = @transform_4, window_bounds = array<i64: 9, 8, 8>}, {pipeline_mode = #tpu.pipeline_mode<synchronous>, transform_indices = @transform_5, window_bounds = array<i64: 8, 1>}, {pipeline_mode = #tpu.pipeline_mode<synchronous>, transform_indices = @transform_6, window_bounds = array<i64: 1, 196>}, {pipeline_mode = #tpu.pipeline_mode<synchronous>, transform_indices = @transform_7, window_bounds = array<i64: 1, 8>}, {pipeline_mode = #tpu.pipeline_mode<synchronous>, transform_indices = @transform_8, window_bounds = array<i64: 1, 1>}, {transform_indices = @transform_9, window_bounds = array<i64: 1, 1, 196>}]} {
    %c0 = arith.constant 0 : index
    %c0_0 = arith.constant 0 : index
    %0 = vector.load %arg7[%c0, %c0_0] : memref<1x196xf32, #tpu.memory_space<vmem>>, vector<1x196xf32>
    %c0_1 = arith.constant 0 : index
    %c0_2 = arith.constant 0 : index
    %c0_3 = arith.constant 0 : index
    %1 = vector.load %arg3[%c0_1, %c0_2, %c0_3] : memref<9x8x16xbf16, #tpu.memory_space<vmem>>, vector<1x8x8xbf16>
    %2 = vector.shape_cast %1 : vector<1x8x8xbf16> to vector<8x8xbf16>
    %c0_4 = arith.constant 0 : index
    %c0_5 = arith.constant 0 : index
    %c0_6 = arith.constant 0 : index
    %3 = vector.load %arg1[%c0_4, %c0_5, %c0_6] : memref<1x8x226xf32, #tpu.memory_space<vmem>>, vector<1x8x196xf32>
    %4 = vector.shape_cast %3 : vector<1x8x196xf32> to vector<8x196xf32>
    %5 = arith.truncf %4 : vector<8x196xf32> to vector<8x196xbf16>
    %cst = arith.constant dense<0.000000e+00> : vector<8x196xf32>
    %6 = tpu.matmul %2, %5, %cst {dimension_numbers = #tpu.dot_dimension_numbers<[1], [0], [0], [1], [0, 0, 1, 1], [], []>} : vector<8x8xbf16>, vector<8x196xbf16>, vector<8x196xf32> -> vector<8x196xf32>
    %c0_7 = arith.constant 0 : index
    %c0_8 = arith.constant 0 : index
    %c8 = arith.constant 8 : index
    %7 = vector.load %arg3[%c0_7, %c0_8, %c8] : memref<9x8x16xbf16, #tpu.memory_space<vmem>>, vector<1x8x8xbf16>
    %8 = vector.shape_cast %7 : vector<1x8x8xbf16> to vector<8x8xbf16>
    %c0_9 = arith.constant 0 : index
    %c0_10 = arith.constant 0 : index
    %c0_11 = arith.constant 0 : index
    %9 = vector.load %arg2[%c0_9, %c0_10, %c0_11] : memref<1x8x226xf32, #tpu.memory_space<vmem>>, vector<1x8x196xf32>
    %10 = vector.shape_cast %9 : vector<1x8x196xf32> to vector<8x196xf32>
    %11 = arith.truncf %10 : vector<8x196xf32> to vector<8x196xbf16>
    %cst_12 = arith.constant dense<0.000000e+00> : vector<8x196xf32>
    %12 = tpu.matmul %8, %11, %cst_12 {dimension_numbers = #tpu.dot_dimension_numbers<[1], [0], [0], [1], [0, 0, 1, 1], [], []>} : vector<8x8xbf16>, vector<8x196xbf16>, vector<8x196xf32> -> vector<8x196xf32>
    %13 = arith.addf %6, %12 : vector<8x196xf32>
    %c1 = arith.constant 1 : index
    %c0_13 = arith.constant 0 : index
    %c0_14 = arith.constant 0 : index
    %14 = vector.load %arg3[%c1, %c0_13, %c0_14] : memref<9x8x16xbf16, #tpu.memory_space<vmem>>, vector<1x8x8xbf16>
    %15 = vector.shape_cast %14 : vector<1x8x8xbf16> to vector<8x8xbf16>
    %c0_15 = arith.constant 0 : index
    %c0_16 = arith.constant 0 : index
    %c1_17 = arith.constant 1 : index
    %16 = vector.load %arg1[%c0_15, %c0_16, %c1_17] : memref<1x8x226xf32, #tpu.memory_space<vmem>>, vector<1x8x196xf32>
    %17 = vector.shape_cast %16 : vector<1x8x196xf32> to vector<8x196xf32>
    %18 = arith.truncf %17 : vector<8x196xf32> to vector<8x196xbf16>
    %cst_18 = arith.constant dense<0.000000e+00> : vector<8x196xf32>
    %19 = tpu.matmul %15, %18, %cst_18 {dimension_numbers = #tpu.dot_dimension_numbers<[1], [0], [0], [1], [0, 0, 1, 1], [], []>} : vector<8x8xbf16>, vector<8x196xbf16>, vector<8x196xf32> -> vector<8x196xf32>
    %20 = arith.addf %13, %19 : vector<8x196xf32>
    %c1_19 = arith.constant 1 : index
    %c0_20 = arith.constant 0 : index
    %c8_21 = arith.constant 8 : index
    %21 = vector.load %arg3[%c1_19, %c0_20, %c8_21] : memref<9x8x16xbf16, #tpu.memory_space<vmem>>, vector<1x8x8xbf16>
    %22 = vector.shape_cast %21 : vector<1x8x8xbf16> to vector<8x8xbf16>
    %c0_22 = arith.constant 0 : index
    %c0_23 = arith.constant 0 : index
    %c1_24 = arith.constant 1 : index
    %23 = vector.load %arg2[%c0_22, %c0_23, %c1_24] : memref<1x8x226xf32, #tpu.memory_space<vmem>>, vector<1x8x196xf32>
    %24 = vector.shape_cast %23 : vector<1x8x196xf32> to vector<8x196xf32>
    %25 = arith.truncf %24 : vector<8x196xf32> to vector<8x196xbf16>
    %cst_25 = arith.constant dense<0.000000e+00> : vector<8x196xf32>
    %26 = tpu.matmul %22, %25, %cst_25 {dimension_numbers = #tpu.dot_dimension_numbers<[1], [0], [0], [1], [0, 0, 1, 1], [], []>} : vector<8x8xbf16>, vector<8x196xbf16>, vector<8x196xf32> -> vector<8x196xf32>
    %27 = arith.addf %20, %26 : vector<8x196xf32>
    %c2 = arith.constant 2 : index
    %c0_26 = arith.constant 0 : index
    %c0_27 = arith.constant 0 : index
    %28 = vector.load %arg3[%c2, %c0_26, %c0_27] : memref<9x8x16xbf16, #tpu.memory_space<vmem>>, vector<1x8x8xbf16>
    %29 = vector.shape_cast %28 : vector<1x8x8xbf16> to vector<8x8xbf16>
    %c0_28 = arith.constant 0 : index
    %c0_29 = arith.constant 0 : index
    %c2_30 = arith.constant 2 : index
    %30 = vector.load %arg1[%c0_28, %c0_29, %c2_30] : memref<1x8x226xf32, #tpu.memory_space<vmem>>, vector<1x8x196xf32>
    %31 = vector.shape_cast %30 : vector<1x8x196xf32> to vector<8x196xf32>
    %32 = arith.truncf %31 : vector<8x196xf32> to vector<8x196xbf16>
    %cst_31 = arith.constant dense<0.000000e+00> : vector<8x196xf32>
    %33 = tpu.matmul %29, %32, %cst_31 {dimension_numbers = #tpu.dot_dimension_numbers<[1], [0], [0], [1], [0, 0, 1, 1], [], []>} : vector<8x8xbf16>, vector<8x196xbf16>, vector<8x196xf32> -> vector<8x196xf32>
    %34 = arith.addf %27, %33 : vector<8x196xf32>
    %c2_32 = arith.constant 2 : index
    %c0_33 = arith.constant 0 : index
    %c8_34 = arith.constant 8 : index
    %35 = vector.load %arg3[%c2_32, %c0_33, %c8_34] : memref<9x8x16xbf16, #tpu.memory_space<vmem>>, vector<1x8x8xbf16>
    %36 = vector.shape_cast %35 : vector<1x8x8xbf16> to vector<8x8xbf16>
    %c0_35 = arith.constant 0 : index
    %c0_36 = arith.constant 0 : index
    %c2_37 = arith.constant 2 : index
    %37 = vector.load %arg2[%c0_35, %c0_36, %c2_37] : memref<1x8x226xf32, #tpu.memory_space<vmem>>, vector<1x8x196xf32>
    %38 = vector.shape_cast %37 : vector<1x8x196xf32> to vector<8x196xf32>
    %39 = arith.truncf %38 : vector<8x196xf32> to vector<8x196xbf16>
    %cst_38 = arith.constant dense<0.000000e+00> : vector<8x196xf32>
    %40 = tpu.matmul %36, %39, %cst_38 {dimension_numbers = #tpu.dot_dimension_numbers<[1], [0], [0], [1], [0, 0, 1, 1], [], []>} : vector<8x8xbf16>, vector<8x196xbf16>, vector<8x196xf32> -> vector<8x196xf32>
    %41 = arith.addf %34, %40 : vector<8x196xf32>
    %c3 = arith.constant 3 : index
    %c0_39 = arith.constant 0 : index
    %c0_40 = arith.constant 0 : index
    %42 = vector.load %arg3[%c3, %c0_39, %c0_40] : memref<9x8x16xbf16, #tpu.memory_space<vmem>>, vector<1x8x8xbf16>
    %43 = vector.shape_cast %42 : vector<1x8x8xbf16> to vector<8x8xbf16>
    %c0_41 = arith.constant 0 : index
    %c0_42 = arith.constant 0 : index
    %c14 = arith.constant 14 : index
    %44 = vector.load %arg1[%c0_41, %c0_42, %c14] : memref<1x8x226xf32, #tpu.memory_space<vmem>>, vector<1x8x196xf32>
    %45 = vector.shape_cast %44 : vector<1x8x196xf32> to vector<8x196xf32>
    %46 = arith.truncf %45 : vector<8x196xf32> to vector<8x196xbf16>
    %cst_43 = arith.constant dense<0.000000e+00> : vector<8x196xf32>
    %47 = tpu.matmul %43, %46, %cst_43 {dimension_numbers = #tpu.dot_dimension_numbers<[1], [0], [0], [1], [0, 0, 1, 1], [], []>} : vector<8x8xbf16>, vector<8x196xbf16>, vector<8x196xf32> -> vector<8x196xf32>
    %48 = arith.addf %41, %47 : vector<8x196xf32>
    %c3_44 = arith.constant 3 : index
    %c0_45 = arith.constant 0 : index
    %c8_46 = arith.constant 8 : index
    %49 = vector.load %arg3[%c3_44, %c0_45, %c8_46] : memref<9x8x16xbf16, #tpu.memory_space<vmem>>, vector<1x8x8xbf16>
    %50 = vector.shape_cast %49 : vector<1x8x8xbf16> to vector<8x8xbf16>
    %c0_47 = arith.constant 0 : index
    %c0_48 = arith.constant 0 : index
    %c14_49 = arith.constant 14 : index
    %51 = vector.load %arg2[%c0_47, %c0_48, %c14_49] : memref<1x8x226xf32, #tpu.memory_space<vmem>>, vector<1x8x196xf32>
    %52 = vector.shape_cast %51 : vector<1x8x196xf32> to vector<8x196xf32>
    %53 = arith.truncf %52 : vector<8x196xf32> to vector<8x196xbf16>
    %cst_50 = arith.constant dense<0.000000e+00> : vector<8x196xf32>
    %54 = tpu.matmul %50, %53, %cst_50 {dimension_numbers = #tpu.dot_dimension_numbers<[1], [0], [0], [1], [0, 0, 1, 1], [], []>} : vector<8x8xbf16>, vector<8x196xbf16>, vector<8x196xf32> -> vector<8x196xf32>
    %55 = arith.addf %48, %54 : vector<8x196xf32>
    %c4 = arith.constant 4 : index
    %c0_51 = arith.constant 0 : index
    %c0_52 = arith.constant 0 : index
    %56 = vector.load %arg3[%c4, %c0_51, %c0_52] : memref<9x8x16xbf16, #tpu.memory_space<vmem>>, vector<1x8x8xbf16>
    %57 = vector.shape_cast %56 : vector<1x8x8xbf16> to vector<8x8xbf16>
    %c0_53 = arith.constant 0 : index
    %c0_54 = arith.constant 0 : index
    %c15 = arith.constant 15 : index
    %58 = vector.load %arg1[%c0_53, %c0_54, %c15] : memref<1x8x226xf32, #tpu.memory_space<vmem>>, vector<1x8x196xf32>
    %59 = vector.shape_cast %58 : vector<1x8x196xf32> to vector<8x196xf32>
    %60 = arith.truncf %59 : vector<8x196xf32> to vector<8x196xbf16>
    %cst_55 = arith.constant dense<0.000000e+00> : vector<8x196xf32>
    %61 = tpu.matmul %57, %60, %cst_55 {dimension_numbers = #tpu.dot_dimension_numbers<[1], [0], [0], [1], [0, 0, 1, 1], [], []>} : vector<8x8xbf16>, vector<8x196xbf16>, vector<8x196xf32> -> vector<8x196xf32>
    %62 = arith.addf %55, %61 : vector<8x196xf32>
    %c4_56 = arith.constant 4 : index
    %c0_57 = arith.constant 0 : index
    %c8_58 = arith.constant 8 : index
    %63 = vector.load %arg3[%c4_56, %c0_57, %c8_58] : memref<9x8x16xbf16, #tpu.memory_space<vmem>>, vector<1x8x8xbf16>
    %64 = vector.shape_cast %63 : vector<1x8x8xbf16> to vector<8x8xbf16>
    %c0_59 = arith.constant 0 : index
    %c0_60 = arith.constant 0 : index
    %c15_61 = arith.constant 15 : index
    %65 = vector.load %arg2[%c0_59, %c0_60, %c15_61] : memref<1x8x226xf32, #tpu.memory_space<vmem>>, vector<1x8x196xf32>
    %66 = vector.shape_cast %65 : vector<1x8x196xf32> to vector<8x196xf32>
    %67 = arith.truncf %66 : vector<8x196xf32> to vector<8x196xbf16>
    %cst_62 = arith.constant dense<0.000000e+00> : vector<8x196xf32>
    %68 = tpu.matmul %64, %67, %cst_62 {dimension_numbers = #tpu.dot_dimension_numbers<[1], [0], [0], [1], [0, 0, 1, 1], [], []>} : vector<8x8xbf16>, vector<8x196xbf16>, vector<8x196xf32> -> vector<8x196xf32>
    %69 = arith.addf %62, %68 : vector<8x196xf32>
    %c5 = arith.constant 5 : index
    %c0_63 = arith.constant 0 : index
    %c0_64 = arith.constant 0 : index
    %70 = vector.load %arg3[%c5, %c0_63, %c0_64] : memref<9x8x16xbf16, #tpu.memory_space<vmem>>, vector<1x8x8xbf16>
    %71 = vector.shape_cast %70 : vector<1x8x8xbf16> to vector<8x8xbf16>
    %c0_65 = arith.constant 0 : index
    %c0_66 = arith.constant 0 : index
    %c16 = arith.constant 16 : index
    %72 = vector.load %arg1[%c0_65, %c0_66, %c16] : memref<1x8x226xf32, #tpu.memory_space<vmem>>, vector<1x8x196xf32>
    %73 = vector.shape_cast %72 : vector<1x8x196xf32> to vector<8x196xf32>
    %74 = arith.truncf %73 : vector<8x196xf32> to vector<8x196xbf16>
    %cst_67 = arith.constant dense<0.000000e+00> : vector<8x196xf32>
    %75 = tpu.matmul %71, %74, %cst_67 {dimension_numbers = #tpu.dot_dimension_numbers<[1], [0], [0], [1], [0, 0, 1, 1], [], []>} : vector<8x8xbf16>, vector<8x196xbf16>, vector<8x196xf32> -> vector<8x196xf32>
    %76 = arith.addf %69, %75 : vector<8x196xf32>
    %c5_68 = arith.constant 5 : index
    %c0_69 = arith.constant 0 : index
    %c8_70 = arith.constant 8 : index
    %77 = vector.load %arg3[%c5_68, %c0_69, %c8_70] : memref<9x8x16xbf16, #tpu.memory_space<vmem>>, vector<1x8x8xbf16>
    %78 = vector.shape_cast %77 : vector<1x8x8xbf16> to vector<8x8xbf16>
    %c0_71 = arith.constant 0 : index
    %c0_72 = arith.constant 0 : index
    %c16_73 = arith.constant 16 : index
    %79 = vector.load %arg2[%c0_71, %c0_72, %c16_73] : memref<1x8x226xf32, #tpu.memory_space<vmem>>, vector<1x8x196xf32>
    %80 = vector.shape_cast %79 : vector<1x8x196xf32> to vector<8x196xf32>
    %81 = arith.truncf %80 : vector<8x196xf32> to vector<8x196xbf16>
    %cst_74 = arith.constant dense<0.000000e+00> : vector<8x196xf32>
    %82 = tpu.matmul %78, %81, %cst_74 {dimension_numbers = #tpu.dot_dimension_numbers<[1], [0], [0], [1], [0, 0, 1, 1], [], []>} : vector<8x8xbf16>, vector<8x196xbf16>, vector<8x196xf32> -> vector<8x196xf32>
    %83 = arith.addf %76, %82 : vector<8x196xf32>
    %c6 = arith.constant 6 : index
    %c0_75 = arith.constant 0 : index
    %c0_76 = arith.constant 0 : index
    %84 = vector.load %arg3[%c6, %c0_75, %c0_76] : memref<9x8x16xbf16, #tpu.memory_space<vmem>>, vector<1x8x8xbf16>
    %85 = vector.shape_cast %84 : vector<1x8x8xbf16> to vector<8x8xbf16>
    %c0_77 = arith.constant 0 : index
    %c0_78 = arith.constant 0 : index
    %c28 = arith.constant 28 : index
    %86 = vector.load %arg1[%c0_77, %c0_78, %c28] : memref<1x8x226xf32, #tpu.memory_space<vmem>>, vector<1x8x196xf32>
    %87 = vector.shape_cast %86 : vector<1x8x196xf32> to vector<8x196xf32>
    %88 = arith.truncf %87 : vector<8x196xf32> to vector<8x196xbf16>
    %cst_79 = arith.constant dense<0.000000e+00> : vector<8x196xf32>
    %89 = tpu.matmul %85, %88, %cst_79 {dimension_numbers = #tpu.dot_dimension_numbers<[1], [0], [0], [1], [0, 0, 1, 1], [], []>} : vector<8x8xbf16>, vector<8x196xbf16>, vector<8x196xf32> -> vector<8x196xf32>
    %90 = arith.addf %83, %89 : vector<8x196xf32>
    %c6_80 = arith.constant 6 : index
    %c0_81 = arith.constant 0 : index
    %c8_82 = arith.constant 8 : index
    %91 = vector.load %arg3[%c6_80, %c0_81, %c8_82] : memref<9x8x16xbf16, #tpu.memory_space<vmem>>, vector<1x8x8xbf16>
    %92 = vector.shape_cast %91 : vector<1x8x8xbf16> to vector<8x8xbf16>
    %c0_83 = arith.constant 0 : index
    %c0_84 = arith.constant 0 : index
    %c28_85 = arith.constant 28 : index
    %93 = vector.load %arg2[%c0_83, %c0_84, %c28_85] : memref<1x8x226xf32, #tpu.memory_space<vmem>>, vector<1x8x196xf32>
    %94 = vector.shape_cast %93 : vector<1x8x196xf32> to vector<8x196xf32>
    %95 = arith.truncf %94 : vector<8x196xf32> to vector<8x196xbf16>
    %cst_86 = arith.constant dense<0.000000e+00> : vector<8x196xf32>
    %96 = tpu.matmul %92, %95, %cst_86 {dimension_numbers = #tpu.dot_dimension_numbers<[1], [0], [0], [1], [0, 0, 1, 1], [], []>} : vector<8x8xbf16>, vector<8x196xbf16>, vector<8x196xf32> -> vector<8x196xf32>
    %97 = arith.addf %90, %96 : vector<8x196xf32>
    %c7 = arith.constant 7 : index
    %c0_87 = arith.constant 0 : index
    %c0_88 = arith.constant 0 : index
    %98 = vector.load %arg3[%c7, %c0_87, %c0_88] : memref<9x8x16xbf16, #tpu.memory_space<vmem>>, vector<1x8x8xbf16>
    %99 = vector.shape_cast %98 : vector<1x8x8xbf16> to vector<8x8xbf16>
    %c0_89 = arith.constant 0 : index
    %c0_90 = arith.constant 0 : index
    %c29 = arith.constant 29 : index
    %100 = vector.load %arg1[%c0_89, %c0_90, %c29] : memref<1x8x226xf32, #tpu.memory_space<vmem>>, vector<1x8x196xf32>
    %101 = vector.shape_cast %100 : vector<1x8x196xf32> to vector<8x196xf32>
    %102 = arith.truncf %101 : vector<8x196xf32> to vector<8x196xbf16>
    %cst_91 = arith.constant dense<0.000000e+00> : vector<8x196xf32>
    %103 = tpu.matmul %99, %102, %cst_91 {dimension_numbers = #tpu.dot_dimension_numbers<[1], [0], [0], [1], [0, 0, 1, 1], [], []>} : vector<8x8xbf16>, vector<8x196xbf16>, vector<8x196xf32> -> vector<8x196xf32>
    %104 = arith.addf %97, %103 : vector<8x196xf32>
    %c7_92 = arith.constant 7 : index
    %c0_93 = arith.constant 0 : index
    %c8_94 = arith.constant 8 : index
    %105 = vector.load %arg3[%c7_92, %c0_93, %c8_94] : memref<9x8x16xbf16, #tpu.memory_space<vmem>>, vector<1x8x8xbf16>
    %106 = vector.shape_cast %105 : vector<1x8x8xbf16> to vector<8x8xbf16>
    %c0_95 = arith.constant 0 : index
    %c0_96 = arith.constant 0 : index
    %c29_97 = arith.constant 29 : index
    %107 = vector.load %arg2[%c0_95, %c0_96, %c29_97] : memref<1x8x226xf32, #tpu.memory_space<vmem>>, vector<1x8x196xf32>
    %108 = vector.shape_cast %107 : vector<1x8x196xf32> to vector<8x196xf32>
    %109 = arith.truncf %108 : vector<8x196xf32> to vector<8x196xbf16>
    %cst_98 = arith.constant dense<0.000000e+00> : vector<8x196xf32>
    %110 = tpu.matmul %106, %109, %cst_98 {dimension_numbers = #tpu.dot_dimension_numbers<[1], [0], [0], [1], [0, 0, 1, 1], [], []>} : vector<8x8xbf16>, vector<8x196xbf16>, vector<8x196xf32> -> vector<8x196xf32>
    %111 = arith.addf %104, %110 : vector<8x196xf32>
    %c8_99 = arith.constant 8 : index
    %c0_100 = arith.constant 0 : index
    %c0_101 = arith.constant 0 : index
    %112 = vector.load %arg3[%c8_99, %c0_100, %c0_101] : memref<9x8x16xbf16, #tpu.memory_space<vmem>>, vector<1x8x8xbf16>
    %113 = vector.shape_cast %112 : vector<1x8x8xbf16> to vector<8x8xbf16>
    %c0_102 = arith.constant 0 : index
    %c0_103 = arith.constant 0 : index
    %c30 = arith.constant 30 : index
    %114 = vector.load %arg1[%c0_102, %c0_103, %c30] : memref<1x8x226xf32, #tpu.memory_space<vmem>>, vector<1x8x196xf32>
    %115 = vector.shape_cast %114 : vector<1x8x196xf32> to vector<8x196xf32>
    %116 = arith.truncf %115 : vector<8x196xf32> to vector<8x196xbf16>
    %cst_104 = arith.constant dense<0.000000e+00> : vector<8x196xf32>
    %117 = tpu.matmul %113, %116, %cst_104 {dimension_numbers = #tpu.dot_dimension_numbers<[1], [0], [0], [1], [0, 0, 1, 1], [], []>} : vector<8x8xbf16>, vector<8x196xbf16>, vector<8x196xf32> -> vector<8x196xf32>
    %118 = arith.addf %111, %117 : vector<8x196xf32>
    %c8_105 = arith.constant 8 : index
    %c0_106 = arith.constant 0 : index
    %c8_107 = arith.constant 8 : index
    %119 = vector.load %arg3[%c8_105, %c0_106, %c8_107] : memref<9x8x16xbf16, #tpu.memory_space<vmem>>, vector<1x8x8xbf16>
    %120 = vector.shape_cast %119 : vector<1x8x8xbf16> to vector<8x8xbf16>
    %c0_108 = arith.constant 0 : index
    %c0_109 = arith.constant 0 : index
    %c30_110 = arith.constant 30 : index
    %121 = vector.load %arg2[%c0_108, %c0_109, %c30_110] : memref<1x8x226xf32, #tpu.memory_space<vmem>>, vector<1x8x196xf32>
    %122 = vector.shape_cast %121 : vector<1x8x196xf32> to vector<8x196xf32>
    %123 = arith.truncf %122 : vector<8x196xf32> to vector<8x196xbf16>
    %cst_111 = arith.constant dense<0.000000e+00> : vector<8x196xf32>
    %124 = tpu.matmul %120, %123, %cst_111 {dimension_numbers = #tpu.dot_dimension_numbers<[1], [0], [0], [1], [0, 0, 1, 1], [], []>} : vector<8x8xbf16>, vector<8x196xbf16>, vector<8x196xf32> -> vector<8x196xf32>
    %125 = arith.addf %118, %124 : vector<8x196xf32>
    %c0_112 = arith.constant 0 : index
    %c0_113 = arith.constant 0 : index
    %126 = vector.load %arg4[%c0_112, %c0_113] : memref<8x1xf32, #tpu.memory_space<vmem>>, vector<8x1xf32>
    %127 = vector.broadcast %126 : vector<8x1xf32> to vector<8x196xf32>
    %128 = arith.addf %125, %127 : vector<8x196xf32>
    %129 = vector.broadcast %0 : vector<1x196xf32> to vector<8x196xf32>
    %130 = arith.mulf %128, %129 : vector<8x196xf32>
    %cst_114 = arith.constant dense<0.000000e+00> : vector<8xf32>
    %131 = vector.multi_reduction <add>, %130, %cst_114 [1] : vector<8x196xf32> to vector<8xf32>
    %132 = vector.shape_cast %131 : vector<8xf32> to vector<8x1xf32>
    %cst_115 = arith.constant 0.0069444445 : f32
    %133 = vector.broadcast %cst_115 : f32 to vector<8x1xf32>
    %134 = arith.mulf %132, %133 : vector<8x1xf32>
    %135 = vector.broadcast %134 : vector<8x1xf32> to vector<8x196xf32>
    %136 = arith.subf %130, %135 : vector<8x196xf32>
    %137 = vector.broadcast %0 : vector<1x196xf32> to vector<8x196xf32>
    %138 = arith.mulf %136, %137 : vector<8x196xf32>
    %139 = arith.mulf %138, %138 : vector<8x196xf32>
    %cst_116 = arith.constant dense<0.000000e+00> : vector<8xf32>
    %140 = vector.multi_reduction <add>, %139, %cst_116 [1] : vector<8x196xf32> to vector<8xf32>
    %141 = vector.shape_cast %140 : vector<8xf32> to vector<8x1xf32>
    %cst_117 = arith.constant 0.0069444445 : f32
    %142 = vector.broadcast %cst_117 : f32 to vector<8x1xf32>
    %143 = arith.mulf %141, %142 : vector<8x1xf32>
    %cst_118 = arith.constant 9.99999974E-6 : f32
    %144 = vector.broadcast %cst_118 : f32 to vector<8x1xf32>
    %145 = arith.addf %143, %144 : vector<8x1xf32>
    %146 = math.rsqrt %145 : vector<8x1xf32>
    %147 = vector.broadcast %146 : vector<8x1xf32> to vector<8x196xf32>
    %148 = arith.mulf %138, %147 : vector<8x196xf32>
    %cst_119 = arith.constant 0.000000e+00 : f32
    %149 = vector.broadcast %cst_119 : f32 to vector<8x196xf32>
    %150 = arith.maximumf %148, %149 : vector<8x196xf32>
    %cst_120 = arith.constant 0.000000e+00 : f32
    %151 = vector.broadcast %cst_120 : f32 to vector<8x226xf32>
    %c0_121 = arith.constant 0 : index
    %c0_122 = arith.constant 0 : index
    %152 = vector.load %arg11[%c0_121, %c0_122] : memref<8x226xf32, #tpu.memory_space<vmem>>, vector<8x226xf32>
    tpu.vector_store %arg11[%c0_121, %c0_122], %151 {strides = array<i32>} : memref<8x226xf32, #tpu.memory_space<vmem>>, vector<8x226xf32>,
    %c0_123 = arith.constant 0 : index
    %c15_124 = arith.constant 15 : index
    %153 = vector.load %arg11[%c0_123, %c15_124] : memref<8x226xf32, #tpu.memory_space<vmem>>, vector<8x196xf32>
    tpu.vector_store %arg11[%c0_123, %c15_124], %150 {strides = array<i32>} : memref<8x226xf32, #tpu.memory_space<vmem>>, vector<8x196xf32>,
    %c0_125 = arith.constant 0 : index
    %c0_126 = arith.constant 0 : index
    %c0_127 = arith.constant 0 : index
    %154 = vector.load %arg5[%c0_125, %c0_126, %c0_127] : memref<9x8x8xbf16, #tpu.memory_space<vmem>>, vector<1x8x8xbf16>
    %155 = vector.shape_cast %154 : vector<1x8x8xbf16> to vector<8x8xbf16>
    %c0_128 = arith.constant 0 : index
    %c0_129 = arith.constant 0 : index
    %156 = vector.load %arg11[%c0_128, %c0_129] : memref<8x226xf32, #tpu.memory_space<vmem>>, vector<8x196xf32>
    %157 = arith.truncf %156 : vector<8x196xf32> to vector<8x196xbf16>
    %cst_130 = arith.constant dense<0.000000e+00> : vector<8x196xf32>
    %158 = tpu.matmul %155, %157, %cst_130 {dimension_numbers = #tpu.dot_dimension_numbers<[1], [0], [0], [1], [0, 0, 1, 1], [], []>} : vector<8x8xbf16>, vector<8x196xbf16>, vector<8x196xf32> -> vector<8x196xf32>
    %c1_131 = arith.constant 1 : index
    %c0_132 = arith.constant 0 : index
    %c0_133 = arith.constant 0 : index
    %159 = vector.load %arg5[%c1_131, %c0_132, %c0_133] : memref<9x8x8xbf16, #tpu.memory_space<vmem>>, vector<1x8x8xbf16>
    %160 = vector.shape_cast %159 : vector<1x8x8xbf16> to vector<8x8xbf16>
    %c0_134 = arith.constant 0 : index
    %c1_135 = arith.constant 1 : index
    %161 = vector.load %arg11[%c0_134, %c1_135] : memref<8x226xf32, #tpu.memory_space<vmem>>, vector<8x196xf32>
    %162 = arith.truncf %161 : vector<8x196xf32> to vector<8x196xbf16>
    %cst_136 = arith.constant dense<0.000000e+00> : vector<8x196xf32>
    %163 = tpu.matmul %160, %162, %cst_136 {dimension_numbers = #tpu.dot_dimension_numbers<[1], [0], [0], [1], [0, 0, 1, 1], [], []>} : vector<8x8xbf16>, vector<8x196xbf16>, vector<8x196xf32> -> vector<8x196xf32>
    %164 = arith.addf %158, %163 : vector<8x196xf32>
    %c2_137 = arith.constant 2 : index
    %c0_138 = arith.constant 0 : index
    %c0_139 = arith.constant 0 : index
    %165 = vector.load %arg5[%c2_137, %c0_138, %c0_139] : memref<9x8x8xbf16, #tpu.memory_space<vmem>>, vector<1x8x8xbf16>
    %166 = vector.shape_cast %165 : vector<1x8x8xbf16> to vector<8x8xbf16>
    %c0_140 = arith.constant 0 : index
    %c2_141 = arith.constant 2 : index
    %167 = vector.load %arg11[%c0_140, %c2_141] : memref<8x226xf32, #tpu.memory_space<vmem>>, vector<8x196xf32>
    %168 = arith.truncf %167 : vector<8x196xf32> to vector<8x196xbf16>
    %cst_142 = arith.constant dense<0.000000e+00> : vector<8x196xf32>
    %169 = tpu.matmul %166, %168, %cst_142 {dimension_numbers = #tpu.dot_dimension_numbers<[1], [0], [0], [1], [0, 0, 1, 1], [], []>} : vector<8x8xbf16>, vector<8x196xbf16>, vector<8x196xf32> -> vector<8x196xf32>
    %170 = arith.addf %164, %169 : vector<8x196xf32>
    %c3_143 = arith.constant 3 : index
    %c0_144 = arith.constant 0 : index
    %c0_145 = arith.constant 0 : index
    %171 = vector.load %arg5[%c3_143, %c0_144, %c0_145] : memref<9x8x8xbf16, #tpu.memory_space<vmem>>, vector<1x8x8xbf16>
    %172 = vector.shape_cast %171 : vector<1x8x8xbf16> to vector<8x8xbf16>
    %c0_146 = arith.constant 0 : index
    %c14_147 = arith.constant 14 : index
    %173 = vector.load %arg11[%c0_146, %c14_147] : memref<8x226xf32, #tpu.memory_space<vmem>>, vector<8x196xf32>
    %174 = arith.truncf %173 : vector<8x196xf32> to vector<8x196xbf16>
    %cst_148 = arith.constant dense<0.000000e+00> : vector<8x196xf32>
    %175 = tpu.matmul %172, %174, %cst_148 {dimension_numbers = #tpu.dot_dimension_numbers<[1], [0], [0], [1], [0, 0, 1, 1], [], []>} : vector<8x8xbf16>, vector<8x196xbf16>, vector<8x196xf32> -> vector<8x196xf32>
    %176 = arith.addf %170, %175 : vector<8x196xf32>
    %c4_149 = arith.constant 4 : index
    %c0_150 = arith.constant 0 : index
    %c0_151 = arith.constant 0 : index
    %177 = vector.load %arg5[%c4_149, %c0_150, %c0_151] : memref<9x8x8xbf16, #tpu.memory_space<vmem>>, vector<1x8x8xbf16>
    %178 = vector.shape_cast %177 : vector<1x8x8xbf16> to vector<8x8xbf16>
    %c0_152 = arith.constant 0 : index
    %c15_153 = arith.constant 15 : index
    %179 = vector.load %arg11[%c0_152, %c15_153] : memref<8x226xf32, #tpu.memory_space<vmem>>, vector<8x196xf32>
    %180 = arith.truncf %179 : vector<8x196xf32> to vector<8x196xbf16>
    %cst_154 = arith.constant dense<0.000000e+00> : vector<8x196xf32>
    %181 = tpu.matmul %178, %180, %cst_154 {dimension_numbers = #tpu.dot_dimension_numbers<[1], [0], [0], [1], [0, 0, 1, 1], [], []>} : vector<8x8xbf16>, vector<8x196xbf16>, vector<8x196xf32> -> vector<8x196xf32>
    %182 = arith.addf %176, %181 : vector<8x196xf32>
    %c5_155 = arith.constant 5 : index
    %c0_156 = arith.constant 0 : index
    %c0_157 = arith.constant 0 : index
    %183 = vector.load %arg5[%c5_155, %c0_156, %c0_157] : memref<9x8x8xbf16, #tpu.memory_space<vmem>>, vector<1x8x8xbf16>
    %184 = vector.shape_cast %183 : vector<1x8x8xbf16> to vector<8x8xbf16>
    %c0_158 = arith.constant 0 : index
    %c16_159 = arith.constant 16 : index
    %185 = vector.load %arg11[%c0_158, %c16_159] : memref<8x226xf32, #tpu.memory_space<vmem>>, vector<8x196xf32>
    %186 = arith.truncf %185 : vector<8x196xf32> to vector<8x196xbf16>
    %cst_160 = arith.constant dense<0.000000e+00> : vector<8x196xf32>
    %187 = tpu.matmul %184, %186, %cst_160 {dimension_numbers = #tpu.dot_dimension_numbers<[1], [0], [0], [1], [0, 0, 1, 1], [], []>} : vector<8x8xbf16>, vector<8x196xbf16>, vector<8x196xf32> -> vector<8x196xf32>
    %188 = arith.addf %182, %187 : vector<8x196xf32>
    %c6_161 = arith.constant 6 : index
    %c0_162 = arith.constant 0 : index
    %c0_163 = arith.constant 0 : index
    %189 = vector.load %arg5[%c6_161, %c0_162, %c0_163] : memref<9x8x8xbf16, #tpu.memory_space<vmem>>, vector<1x8x8xbf16>
    %190 = vector.shape_cast %189 : vector<1x8x8xbf16> to vector<8x8xbf16>
    %c0_164 = arith.constant 0 : index
    %c28_165 = arith.constant 28 : index
    %191 = vector.load %arg11[%c0_164, %c28_165] : memref<8x226xf32, #tpu.memory_space<vmem>>, vector<8x196xf32>
    %192 = arith.truncf %191 : vector<8x196xf32> to vector<8x196xbf16>
    %cst_166 = arith.constant dense<0.000000e+00> : vector<8x196xf32>
    %193 = tpu.matmul %190, %192, %cst_166 {dimension_numbers = #tpu.dot_dimension_numbers<[1], [0], [0], [1], [0, 0, 1, 1], [], []>} : vector<8x8xbf16>, vector<8x196xbf16>, vector<8x196xf32> -> vector<8x196xf32>
    %194 = arith.addf %188, %193 : vector<8x196xf32>
    %c7_167 = arith.constant 7 : index
    %c0_168 = arith.constant 0 : index
    %c0_169 = arith.constant 0 : index
    %195 = vector.load %arg5[%c7_167, %c0_168, %c0_169] : memref<9x8x8xbf16, #tpu.memory_space<vmem>>, vector<1x8x8xbf16>
    %196 = vector.shape_cast %195 : vector<1x8x8xbf16> to vector<8x8xbf16>
    %c0_170 = arith.constant 0 : index
    %c29_171 = arith.constant 29 : index
    %197 = vector.load %arg11[%c0_170, %c29_171] : memref<8x226xf32, #tpu.memory_space<vmem>>, vector<8x196xf32>
    %198 = arith.truncf %197 : vector<8x196xf32> to vector<8x196xbf16>
    %cst_172 = arith.constant dense<0.000000e+00> : vector<8x196xf32>
    %199 = tpu.matmul %196, %198, %cst_172 {dimension_numbers = #tpu.dot_dimension_numbers<[1], [0], [0], [1], [0, 0, 1, 1], [], []>} : vector<8x8xbf16>, vector<8x196xbf16>, vector<8x196xf32> -> vector<8x196xf32>
    %200 = arith.addf %194, %199 : vector<8x196xf32>
    %c8_173 = arith.constant 8 : index
    %c0_174 = arith.constant 0 : index
    %c0_175 = arith.constant 0 : index
    %201 = vector.load %arg5[%c8_173, %c0_174, %c0_175] : memref<9x8x8xbf16, #tpu.memory_space<vmem>>, vector<1x8x8xbf16>
    %202 = vector.shape_cast %201 : vector<1x8x8xbf16> to vector<8x8xbf16>
    %c0_176 = arith.constant 0 : index
    %c30_177 = arith.constant 30 : index
    %203 = vector.load %arg11[%c0_176, %c30_177] : memref<8x226xf32, #tpu.memory_space<vmem>>, vector<8x196xf32>
    %204 = arith.truncf %203 : vector<8x196xf32> to vector<8x196xbf16>
    %cst_178 = arith.constant dense<0.000000e+00> : vector<8x196xf32>
    %205 = tpu.matmul %202, %204, %cst_178 {dimension_numbers = #tpu.dot_dimension_numbers<[1], [0], [0], [1], [0, 0, 1, 1], [], []>} : vector<8x8xbf16>, vector<8x196xbf16>, vector<8x196xf32> -> vector<8x196xf32>
    %206 = arith.addf %200, %205 : vector<8x196xf32>
    %c0_179 = arith.constant 0 : index
    %c0_180 = arith.constant 0 : index
    %207 = vector.load %arg6[%c0_179, %c0_180] : memref<8x1xf32, #tpu.memory_space<vmem>>, vector<8x1xf32>
    %208 = vector.broadcast %207 : vector<8x1xf32> to vector<8x196xf32>
    %209 = arith.addf %206, %208 : vector<8x196xf32>
    %210 = vector.broadcast %0 : vector<1x196xf32> to vector<8x196xf32>
    %211 = arith.mulf %209, %210 : vector<8x196xf32>
    %cst_181 = arith.constant dense<0.000000e+00> : vector<8xf32>
    %212 = vector.multi_reduction <add>, %211, %cst_181 [1] : vector<8x196xf32> to vector<8xf32>
    %213 = vector.shape_cast %212 : vector<8xf32> to vector<8x1xf32>
    %cst_182 = arith.constant 0.0069444445 : f32
    %214 = vector.broadcast %cst_182 : f32 to vector<8x1xf32>
    %215 = arith.mulf %213, %214 : vector<8x1xf32>
    %216 = vector.broadcast %215 : vector<8x1xf32> to vector<8x196xf32>
    %217 = arith.subf %211, %216 : vector<8x196xf32>
    %218 = vector.broadcast %0 : vector<1x196xf32> to vector<8x196xf32>
    %219 = arith.mulf %217, %218 : vector<8x196xf32>
    %220 = arith.mulf %219, %219 : vector<8x196xf32>
    %cst_183 = arith.constant dense<0.000000e+00> : vector<8xf32>
    %221 = vector.multi_reduction <add>, %220, %cst_183 [1] : vector<8x196xf32> to vector<8xf32>
    %222 = vector.shape_cast %221 : vector<8xf32> to vector<8x1xf32>
    %cst_184 = arith.constant 0.0069444445 : f32
    %223 = vector.broadcast %cst_184 : f32 to vector<8x1xf32>
    %224 = arith.mulf %222, %223 : vector<8x1xf32>
    %cst_185 = arith.constant 9.99999974E-6 : f32
    %225 = vector.broadcast %cst_185 : f32 to vector<8x1xf32>
    %226 = arith.addf %224, %225 : vector<8x1xf32>
    %227 = math.rsqrt %226 : vector<8x1xf32>
    %228 = vector.broadcast %227 : vector<8x1xf32> to vector<8x196xf32>
    %229 = arith.mulf %219, %228 : vector<8x196xf32>
    %cst_186 = arith.constant 0.000000e+00 : f32
    %230 = vector.broadcast %cst_186 : f32 to vector<8x196xf32>
    %231 = arith.maximumf %229, %230 : vector<8x196xf32>
    %c0_187 = arith.constant 0 : index
    %c0_188 = arith.constant 0 : index
    %232 = vector.load %arg8[%c0_187, %c0_188] : memref<1x8xf32, #tpu.memory_space<vmem>>, vector<1x8xf32>
    %cst_189 = arith.constant dense<0.000000e+00> : vector<1x196xf32>
    %233 = tpu.matmul %232, %231, %cst_189 {dimension_numbers = #tpu.dot_dimension_numbers<[1], [0], [0], [1], [0, 0, 1, 1], [], []>} : vector<1x8xf32>, vector<8x196xf32>, vector<1x196xf32> -> vector<1x196xf32>
    %c0_190 = arith.constant 0 : index
    %c0_191 = arith.constant 0 : index
    %234 = vector.load %arg9[%c0_190, %c0_191] : memref<1x1xf32, #tpu.memory_space<vmem>>, vector<1x1xf32>
    %235 = vector.broadcast %234 : vector<1x1xf32> to vector<1x196xf32>
    %236 = arith.addf %233, %235 : vector<1x196xf32>
    %c0_192 = arith.constant 0 : index
    %c0_193 = arith.constant 0 : index
    %c0_194 = arith.constant 0 : index
    %237 = vector.load %arg10[%c0_192, %c0_193, %c0_194] : memref<1x1x196xf32, #tpu.memory_space<vmem>>, vector<1x1x196xf32>
    %238 = vector.shape_cast %237 : vector<1x1x196xf32> to vector<1x196xf32>
    %239 = vector.shape_cast %236 : vector<1x196xf32> to vector<1x1x196xf32>
    tpu.vector_store %arg10[%c0_192, %c0_193, %c0_194], %239 {strides = array<i32>} : memref<1x1x196xf32, #tpu.memory_space<vmem>>, vector<1x1x196xf32>,
    return
  }
  func.func @transform_0(%arg0: i32) -> (i32, i32, i32) {
    %c0_i32 = arith.constant 0 : i32
    %c0_i32_0 = arith.constant 0 : i32
    %c0_i32_1 = arith.constant 0 : i32
    return %arg0, %c0_i32, %c0_i32_0 : i32, i32, i32
  }
  func.func @transform_1(%arg0: i32) -> (i32, i32, i32) {
    %c0_i32 = arith.constant 0 : i32
    %c0_i32_0 = arith.constant 0 : i32
    %c0_i32_1 = arith.constant 0 : i32
    return %arg0, %c0_i32, %c0_i32_0 : i32, i32, i32
  }
  func.func @transform_2(%arg0: i32) -> (i32, i32, i32) {
    %c0_i32 = arith.constant 0 : i32
    %c0_i32_0 = arith.constant 0 : i32
    %c0_i32_1 = arith.constant 0 : i32
    %c0_i32_2 = arith.constant 0 : i32
    return %c0_i32, %c0_i32_0, %c0_i32_1 : i32, i32, i32
  }
  func.func @transform_3(%arg0: i32) -> (i32, i32) {
    %c0_i32 = arith.constant 0 : i32
    %c0_i32_0 = arith.constant 0 : i32
    %c0_i32_1 = arith.constant 0 : i32
    return %c0_i32, %c0_i32_0 : i32, i32
  }
  func.func @transform_4(%arg0: i32) -> (i32, i32, i32) {
    %c0_i32 = arith.constant 0 : i32
    %c0_i32_0 = arith.constant 0 : i32
    %c0_i32_1 = arith.constant 0 : i32
    %c0_i32_2 = arith.constant 0 : i32
    return %c0_i32, %c0_i32_0, %c0_i32_1 : i32, i32, i32
  }
  func.func @transform_5(%arg0: i32) -> (i32, i32) {
    %c0_i32 = arith.constant 0 : i32
    %c0_i32_0 = arith.constant 0 : i32
    %c0_i32_1 = arith.constant 0 : i32
    return %c0_i32, %c0_i32_0 : i32, i32
  }
  func.func @transform_6(%arg0: i32) -> (i32, i32) {
    %c0_i32 = arith.constant 0 : i32
    %c0_i32_0 = arith.constant 0 : i32
    %c0_i32_1 = arith.constant 0 : i32
    return %c0_i32, %c0_i32_0 : i32, i32
  }
  func.func @transform_7(%arg0: i32) -> (i32, i32) {
    %c0_i32 = arith.constant 0 : i32
    %c0_i32_0 = arith.constant 0 : i32
    %c0_i32_1 = arith.constant 0 : i32
    return %c0_i32, %c0_i32_0 : i32, i32
  }
  func.func @transform_8(%arg0: i32) -> (i32, i32) {
    %c0_i32 = arith.constant 0 : i32
    %c0_i32_0 = arith.constant 0 : i32
    %c0_i32_1 = arith.constant 0 : i32
    return %c0_i32, %c0_i32_0 : i32, i32
  }
  func.func @transform_9(%arg0: i32) -> (i32, i32, i32) {
    %c0_i32 = arith.constant 0 : i32
    %c0_i32_0 = arith.constant 0 : i32
    %c0_i32_1 = arith.constant 0 : i32
    return %arg0, %c0_i32, %c0_i32_0 : i32, i32, i32
  }
}

</mosaic_0001>

<bundles_post_ra>
// kernel: model_forward.6
= control target key start
LH: loop header
LB: loop body
LE: loop exit
PB: predicated region body
PF: predicated region fallthrough
CT: control target
= control target key end

     0   :  { %s1487_s12 = smov 0   ;;  %s1753_s0 = inlined_call_operand.vmem [shape: f32[2,2,290], index: 0, kind: input, shape index: {}]   ;;  %s1754_s1 = inlined_call_operand.vmem [shape: bf16[9,4,2], index: 1, kind: input, shape index: {}]   ;;  %s1755_s2 = inlined_call_operand.vmem [shape: bf16[9,2,4], index: 2, kind: input, shape index: {}]   ;;  %s1756_s3 = inlined_call_operand.vmem [shape: f32[2,2,256], index: 3, kind: output, shape index: {}]  }
   0x1 LB: > { %s1369_s13 = sadd.s32 4294967295, %s1456_s12   ;;  %p1373_p0 = scmp.ge.s32.totalorder %s1456_s12, 1  ;;  %s1456_s12 = sphi %s1487_s12, %s13_s12  }
   0x2   : > { %p137_p1 = scmp.lt.s32.totalorder %s1456_s12, 3 }
   0x4   : > { %p138_p2 = pnand %p1373_p0, %p137_p1 }
   0x5   : > { %p161_p3 = scmp.lt.s32.totalorder (!%p138_p2), %s1369_s13, 1  ;;  %s1458_s18 = smov (!%p138_p2), 127  }
   0x6   : > { %141 = sbr.rel (%p138_p2) target bundleno = 702 (0x2be), region = 32  ;;  %s1459_s19 = smov (!%p138_p2), 126  }
   0x7   : > { %s1460_s20 = smov (!%p138_p2), 112   ;;  %s1461_s21 = smov (!%p138_p2), 111  }
   0x8   : > { %s1462_s22 = smov (!%p138_p2), 110   ;;  %s1463_s23 = smov (!%p138_p2), 96  }
   0x9   : > { %s1464_s24 = smov (!%p138_p2), 95   ;;  %s1465_s25 = smov (!%p138_p2), 94  }
   0xb   : > { %s1758_s13 = smov (!%p161_p3, %s1369_s13), 1  ;;  %vm212_vm0 = vcmask 1040384   ;;  %vm208_vm1 = vcmask 15360   ;;  %v181_v63 = vld [vmem:[%s1754_s1] sm:$0x3]  ;;  %vm205_vm2 = vcmask 1039360  }
   0xc   : > { %s1432_s14 = smul.u32 6, %s1758_s13  ;;  %vm303_vm3 = vcmask 1031168   ;;  %vm366_vm4 = vcmask 916480   ;;  %vm429_vm5 = vcmask 908288   ;;  %vm492_vm6 = vcmask 900096   ;;  %s1431_s10 = sshll.u32 %s1758_s13, 2 }
   0xd   : > { %vm555_vm7 = vcmask 785408   ;;  %vm618_vm8 = vcmask 777216   ;;  %vm681_vm9 = vcmask 769024   ;;  %vm724_vm10 = vcmask 273408   ;;  %s170_s15 = scalar_lea.vmem %s1756_s3, %s1431_s10 }
   0xe   : > { %s1501_s17 = scalar_lea.vmem %s1753_s0, %s1432_s14  ;;  %vm729_vm11 = vcmask 1043456   ;;  %vm776_vm12 = vcmask 1041408   ;;  %vm772_vm13 = vcmask 31744  }
   0xf   : > { %v172_v0 = vld [vmem:[%s1501_s17] sm:$0xf] }
  0x10   : > { %174 = vst [vmem:[#allocation1] ss:$4 sm:$0xff] %v172_v0  ;;  %v182_v1 = vld [vmem:[%s1501_s17] sm:$0x3f] }
  0x11   : > { %v280_v4 = vld [vmem:[%s1501_s17] sm:$0x3f] }
  0x12   : > { %v343_v11 = vld [vmem:[%s1501_s17] sm:$0x3f] }
  0x13   : > { %v406_v17 = vld [vmem:[%s1501_s17] sm:$0x3f] }
  0x14   : > { %v469_v25 = vld [vmem:[%s1501_s17] sm:$0x3f] }
  0x15   : > { %v532_v32 = vld [vmem:[%s1501_s17] sm:$0x3f] }
  0x16   : > { %v595_v39 = vld [vmem:[%s1501_s17] sm:$0x3f] }
  0x17   : > { %v1505_v2 = vld.sshfl [vmem:[#allocation1] sm:$0xff pattern:$0x73625140]  ;;  %v1507_v3 = vld.sshfl [vmem:[#allocation1 + $0x8] sm:$0xff pattern:$0x73625140] }
  0x18   : > { %184 = vst [vmem:[#allocation1] ss:$4 sm:$0xff] %v182_v1  ;;  %v658_v46 = vld [vmem:[%s1501_s17] sm:$0x3f]  ;;  %v179_v59 = vpack.c.bf16 %v1505_v2, %v1505_v2  ;;  %v180_v60 = vpack.c.bf16 %v1507_v3, %v1507_v3 }
  0x1a   : > { %v249_v61 = vsel %vm212_vm0, %v179_v59, 0  ;;  %v252_v62 = vsel %vm212_vm0, %v180_v60, 0 }
  0x1b   : > { %261 = vmatpush.bf16.msra.mxu2 %v249_v61  ;;  %274 = vmatpush.bf16.msra.mxu3 %v252_v62 }
  0x1e   : > { %1380 = vmatmul.msk.bf16.vlgmr.msra.gmra.mxu2 %vm208_vm1, %v181_v63  ;;  %1381 = vmatmul.msk.bf16.vlgmr.msra.gmra.mxu3 %vm208_vm1, %v181_v63  ;;  %v1400_v63 = vld [vmem:[%s1754_s1 + $0x10] sm:$0x3] }
  0x1f   : > { %v186_v5 = vld.sshfl [vmem:[#allocation1 + $0x8] sm:$0xff pattern:$0x73625140]  ;;  %v185_v6 = vld.sshfl [vmem:[#allocation1] sm:$0xff pattern:$0x73625140] }
  0x20   : > { %v192_v7 = vpack.c.bf16 %v186_v5, %v186_v5  ;;  %v191_v8 = vpack.c.bf16 %v185_v6, %v185_v6  ;;  %v187_v9 = vld.sshfl [vmem:[#allocation1 + $0x10] sm:$0xff pattern:$0x73625140]  ;;  %v1377_v6 = vld [vmem:[%s1754_s1 + $0x2] sm:$0x3] }
  0x21   : > { %282 = vst [vmem:[#allocation1] ss:$4 sm:$0xff] %v280_v4  ;;  %v193_v10 = vpack.c.bf16 %v187_v9, %v187_v9 }
  0x22   : > { %201 = vrot.lane.b32.xlu0 %v192_v7, %s1458_s18  ;;  %199 = vrot.lane.b32.xlu1 %v191_v8, %s1458_s18 }
  0x28   : > { %v283_v12 = vld.sshfl [vmem:[#allocation1] sm:$0xff pattern:$0x73625140]  ;;  %v284_v13 = vld.sshfl [vmem:[#allocation1 + $0x8] sm:$0xff pattern:$0x73625140] }
  0x29   : > { %v285_v14 = vld.sshfl [vmem:[#allocation1 + $0x10] sm:$0xff pattern:$0x73625140]  ;;  %v290_v15 = vpack.c.bf16 %v284_v13, %v284_v13  ;;  %v289_v18 = vpack.c.bf16 %v283_v12, %v283_v12 }
  0x2a   : > { %203 = vrot.lane.b32.xlu0 %v193_v10, %s1458_s18  ;;  %345 = vst [vmem:[#allocation1] ss:$4 sm:$0xff] %v343_v11  ;;  %v291_v16 = vpack.c.bf16 %v285_v14, %v285_v14 }
  0x2b   : > { %299 = vrot.lane.b32.xlu1 %v290_v15, %s1459_s19 }
  0x2c   : > { %301 = vrot.lane.b32.xlu2 %v291_v16, %s1459_s19 }
  0x31   : > { %v347_v19 = vld.sshfl [vmem:[#allocation1 + $0x8] sm:$0xff pattern:$0x73625140]  ;;  %v346_v20 = vld.sshfl [vmem:[#allocation1] sm:$0xff pattern:$0x73625140] }
  0x32   : > { %v353_v21 = vpack.c.bf16 %v347_v19, %v347_v19  ;;  %v348_v22 = vld.sshfl [vmem:[#allocation1 + $0x10] sm:$0xff pattern:$0x73625140]  ;;  %v352_v24 = vpack.c.bf16 %v346_v20, %v346_v20  ;;  %v1382_v19 = vld [vmem:[%s1754_s1 + $0x4] sm:$0x3] }
  0x33   : > { %v354_v23 = vpack.c.bf16 %v348_v22, %v348_v22  ;;  %408 = vst [vmem:[#allocation1] ss:$4 sm:$0xff] %v406_v17  ;;  %v1385_v22 = vld [vmem:[%s1754_s1 + $0x6] sm:$0x3] }
  0x34   : > { %362 = vrot.lane.b32.xlu0 %v353_v21, %s1460_s20  ;;  %297 = vrot.lane.b32.xlu2 %v289_v18, %s1459_s19 }
  0x35   : > { %364 = vrot.lane.b32.xlu1 %v354_v23, %s1460_s20 }
  0x3a   : > { %v410_v26 = vld.sshfl [vmem:[#allocation1 + $0x8] sm:$0xff pattern:$0x73625140]  ;;  %v409_v27 = vld.sshfl [vmem:[#allocation1] sm:$0xff pattern:$0x73625140] }
  0x3b   : > { %v416_v28 = vpack.c.bf16 %v410_v26, %v410_v26  ;;  %v411_v29 = vld.sshfl [vmem:[#allocation1 + $0x10] sm:$0xff pattern:$0x73625140]  ;;  %v415_v31 = vpack.c.bf16 %v409_v27, %v409_v27 }
  0x3c   : > { %v417_v30 = vpack.c.bf16 %v411_v29, %v411_v29  ;;  %471 = vst [vmem:[#allocation1] ss:$4 sm:$0xff] %v469_v25  ;;  %360 = vrot.lane.b32.xlu2 %v352_v24, %s1460_s20 }
  0x3d   : > { %425 = vrot.lane.b32.xlu0 %v416_v28, %s1461_s21 }
  0x3e   : > { %427 = vrot.lane.b32.xlu1 %v417_v30, %s1461_s21 }
  0x43   : > { %v473_v33 = vld.sshfl [vmem:[#allocation1 + $0x8] sm:$0xff pattern:$0x73625140]  ;;  %v472_v34 = vld.sshfl [vmem:[#allocation1] sm:$0xff pattern:$0x73625140] }
  0x44   : > { %v479_v35 = vpack.c.bf16 %v473_v33, %v473_v33  ;;  %v474_v36 = vld.sshfl [vmem:[#allocation1 + $0x10] sm:$0xff pattern:$0x73625140]  ;;  %423 = vrot.lane.b32.xlu2 %v415_v31, %s1461_s21  ;;  %v478_v38 = vpack.c.bf16 %v472_v34, %v472_v34 }
  0x45   : > { %v480_v37 = vpack.c.bf16 %v474_v36, %v474_v36  ;;  %534 = vst [vmem:[#allocation1] ss:$4 sm:$0xff] %v532_v32  ;;  %v1388_v32 = vld [vmem:[%s1754_s1 + $0x8] sm:$0x3] }
  0x46   : > { %488 = vrot.lane.b32.xlu0 %v479_v35, %s1462_s22 }
  0x47   : > { %490 = vrot.lane.b32.xlu1 %v480_v37, %s1462_s22 }
  0x4c   : > { %v536_v40 = vld.sshfl [vmem:[#allocation1 + $0x8] sm:$0xff pattern:$0x73625140]  ;;  %v535_v41 = vld.sshfl [vmem:[#allocation1] sm:$0xff pattern:$0x73625140]  ;;  %486 = vrot.lane.b32.xlu2 %v478_v38, %s1462_s22 }
  0x4d   : > { %v542_v42 = vpack.c.bf16 %v536_v40, %v536_v40  ;;  %v537_v43 = vld.sshfl [vmem:[#allocation1 + $0x10] sm:$0xff pattern:$0x73625140]  ;;  %v541_v45 = vpack.c.bf16 %v535_v41, %v535_v41 }
  0x4e   : > { %v543_v44 = vpack.c.bf16 %v537_v43, %v537_v43  ;;  %597 = vst [vmem:[#allocation1] ss:$4 sm:$0xff] %v595_v39  ;;  %v1391_v39 = vld [vmem:[%s1754_s1 + $0xa] sm:$0x3] }
  0x4f   : > { %551 = vrot.lane.b32.xlu0 %v542_v42, %s1463_s23 }
  0x50   : > { %553 = vrot.lane.b32.xlu1 %v543_v44, %s1463_s23 }
  0x54   : > { %549 = vrot.lane.b32.xlu2 %v541_v45, %s1463_s23 }
  0x55   : > { %v599_v47 = vld.sshfl [vmem:[#allocation1 + $0x8] sm:$0xff pattern:$0x73625140]  ;;  %v598_v48 = vld.sshfl [vmem:[#allocation1] sm:$0xff pattern:$0x73625140] }
  0x56   : > { %v605_v49 = vpack.c.bf16 %v599_v47, %v599_v47  ;;  %v600_v50 = vld.sshfl [vmem:[#allocation1 + $0x10] sm:$0xff pattern:$0x73625140]  ;;  %v604_v52 = vpack.c.bf16 %v598_v48, %v598_v48  ;;  %v1394_v47 = vld [vmem:[%s1754_s1 + $0xc] sm:$0x3] }
  0x57   : > { %v606_v51 = vpack.c.bf16 %v600_v50, %v600_v50  ;;  %660 = vst [vmem:[#allocation1] ss:$4 sm:$0xff] %v658_v46 }
  0x58   : > { %614 = vrot.lane.b32.xlu0 %v605_v49, %s1464_s24 }
  0x59   : > { %616 = vrot.lane.b32.xlu1 %v606_v51, %s1464_s24 }
  0x5c   : > { %612 = vrot.lane.b32.xlu2 %v604_v52, %s1464_s24 }
  0x5e   : > { %v662_v53 = vld.sshfl [vmem:[#allocation1 + $0x8] sm:$0xff pattern:$0x73625140]  ;;  %v663_v54 = vld.sshfl [vmem:[#allocation1 + $0x10] sm:$0xff pattern:$0x73625140] }
  0x5f   : > { %v668_v55 = vpack.c.bf16 %v662_v53, %v662_v53  ;;  %v669_v56 = vpack.c.bf16 %v663_v54, %v663_v54  ;;  %v661_v57 = vld.sshfl [vmem:[#allocation1] sm:$0xff pattern:$0x73625140] }
  0x60   : > { %v667_v58 = vpack.c.bf16 %v661_v57, %v661_v57 }
  0x61   : > { %677 = vrot.lane.b32.xlu0 %v668_v55, %s1465_s25  ;;  %679 = vrot.lane.b32.xlu1 %v669_v56, %s1465_s25  ;;  %v1397_v55 = vld [vmem:[%s1754_s1 + $0xe] sm:$0x3] }
  0x64   : > { %675 = vrot.lane.b32.xlu2 %v667_v58, %s1465_s25 }
  0x86   : > { %v302_v0 = vpop.permute.xlu2 %301 }
  0x8e   : > { %v298_v5 = vpop.permute.xlu2 %297 }
  0x94   : > { %v202_v1 = vpop.permute.xlu0 %201  ;;  %v200_v2 = vpop.permute.xlu1 %199 }
  0x95   : > { %v206_v3 = vsel %vm205_vm2, %v200_v2, %v202_v1 }
  0x96   : > { %v214_v4 = vsel %vm212_vm0, %v206_v3, 0  ;;  %v361_v15 = vpop.permute.xlu2 %360 }
  0x97   : > { %226 = vmatpush.bf16.msra.mxu0 %v214_v4 }
  0x9a   : > { %1378 = vmatmul.msk.bf16.vlgmr.msra.gmra.mxu0 %vm208_vm1, %v1377_v6 }
  0x9c   : > { %v204_v7 = vpop.permute.xlu0 %203 }
  0x9d   : > { %v207_v8 = vsel %vm205_vm2, %v202_v1, %v204_v7  ;;  %v300_v9 = vpop.permute.xlu1 %299 }
  0x9e   : > { %v217_v10 = vsel %vm212_vm0, %v207_v8, 0  ;;  %v304_v11 = vsel %vm303_vm3, %v298_v5, %v300_v9  ;;  %v305_v12 = vsel %vm303_vm3, %v300_v9, %v302_v0  ;;  %v424_v24 = vpop.permute.xlu2 %423 }
  0x9f   : > { %239 = vmatpush.bf16.msra.mxu1 %v217_v10  ;;  %v310_v13 = vsel %vm212_vm0, %v304_v11, 0  ;;  %v313_v14 = vsel %vm212_vm0, %v305_v12, 0 }
  0xa0   : > { %322 = vmatpush.bf16.msrb.mxu0 %v310_v13 }
  0xa1   : > { %v263_v0 = vpop.f32.mrf.mxu2  ;;  %v276_v1 = vpop.f32.mrf.mxu3 }
  0xa2   : > { %1379 = vmatmul.msk.bf16.vlgmr.msra.gmra.mxu1 %vm208_vm1, %v1377_v6 }
  0xa3   : > { %335 = vmatpush.bf16.msrb.mxu1 %v313_v14 }
  0xa6   : > { %v363_v16 = vpop.permute.xlu0 %362  ;;  %v487_v31 = vpop.permute.xlu2 %486 }
  0xa7   : > { %v367_v17 = vsel %vm366_vm4, %v361_v15, %v363_v16  ;;  %v365_v18 = vpop.permute.xlu1 %364 }
  0xa8   : > { %v373_v20 = vsel %vm212_vm0, %v367_v17, 0  ;;  %v368_v21 = vsel %vm366_vm4, %v363_v16, %v365_v18  ;;  %v1466_v17 = vmov 0.0  }
  0xa9   : > { %385 = vmatpush.bf16.msrb.mxu2 %v373_v20  ;;  %v376_v23 = vsel %vm212_vm0, %v368_v21, 0  ;;  %v265_v2 = vpop.f32.mrf.mxu2  ;;  %v278_v3 = vpop.f32.mrf.mxu3  ;;  %725 = vst.msk [vmem:[#allocation2 + $0x8] sm:$0xf] %vm724_vm10, %v1466_v17 }
  0xaa   : > { %1383 = vmatmul.msk.bf16.vlgmr.msrb.gmra.mxu0 %vm208_vm1, %v1382_v19  ;;  %398 = vmatpush.bf16.msrb.mxu3 %v376_v23 }
  0xac   : > { %1386 = vmatmul.msk.bf16.vlgmr.msrb.gmra.mxu2 %vm208_vm1, %v1385_v22 }
  0xad   : > { %1387 = vmatmul.msk.bf16.vlgmr.msrb.gmra.mxu3 %vm208_vm1, %v1385_v22 }
  0xae   : > { %v550_v40 = vpop.permute.xlu2 %549 }
  0xaf   : > { %v426_v25 = vpop.permute.xlu0 %425 }
  0xb0   : > { %v430_v26 = vsel %vm429_vm5, %v424_v24, %v426_v25  ;;  %v428_v27 = vpop.permute.xlu1 %427  ;;  %v744_v22 = vld [vmem:[#allocation2 + $0x8] sm:$0xf] }
  0xb1   : > { %v436_v28 = vsel %vm212_vm0, %v430_v26, 0  ;;  %v431_v29 = vsel %vm429_vm5, %v426_v25, %v428_v27  ;;  %749 = vst [vmem:[#allocation1 + $0x10] ss:$2 sm:$0xff] %v744_v22  ;;  %v845_v27 = vld [vmem:[#allocation2 + $0x8] sm:$0xf] }
  0xb2   : > { %v439_v30 = vsel %vm212_vm0, %v431_v29, 0  ;;  %1384 = vmatmul.msk.bf16.vlgmr.msrb.gmra.mxu1 %vm208_vm1, %v1382_v19  ;;  %448 = vmatpush.bf16.msra.mxu0 %v436_v28 }
  0xb3   : > { %461 = vmatpush.bf16.msra.mxu1 %v439_v30 }
  0xb6   : > { %v613_v48 = vpop.permute.xlu2 %612 }
  0xb8   : > { %v489_v33 = vpop.permute.xlu0 %488  ;;  %v752_v28 = vld.sshfl [vmem:[#allocation1 + $0x10] sm:$0xff pattern:$0x75316420] }
  0xb9   : > { %v493_v34 = vsel %vm492_vm6, %v487_v31, %v489_v33  ;;  %v491_v35 = vpop.permute.xlu1 %490  ;;  %v758_v30 = vpack.c.bf16 %v752_v28, %v752_v28  ;;  %850 = vst [vmem:[#allocation1 + $0x10] ss:$2 sm:$0xff] %v845_v27 }
  0xba   : > { %v499_v36 = vsel %vm212_vm0, %v493_v34, 0  ;;  %v494_v37 = vsel %vm492_vm6, %v489_v33, %v491_v35  ;;  %1389 = vmatmul.msk.bf16.vlgmr.msra.gmra.mxu0 %vm208_vm1, %v1388_v32  ;;  %v911_v34 = vld [vmem:[#allocation2 + $0x8] sm:$0xf] }
  0xbb   : > { %511 = vmatpush.bf16.msra.mxu2 %v499_v36  ;;  %v502_v38 = vsel %vm212_vm0, %v494_v37, 0  ;;  %768 = vrot.lane.b32.xlu2 %v758_v30, %s1458_s18 }
  0xbc   : > { %524 = vmatpush.bf16.msra.mxu3 %v502_v38 }
  0xbe   : > { %1392 = vmatmul.msk.bf16.vlgmr.msra.gmra.mxu2 %vm208_vm1, %v1391_v39  ;;  %v676_v56 = vpop.permute.xlu2 %675 }
  0xbf   : > { %1393 = vmatmul.msk.bf16.vlgmr.msra.gmra.mxu3 %vm208_vm1, %v1391_v39 }
  0xc0   : > { %v853_v39 = vld.sshfl [vmem:[#allocation1 + $0x10] sm:$0xff pattern:$0x75316420] }
  0xc1   : > { %v552_v41 = vpop.permute.xlu0 %551  ;;  %916 = vst [vmem:[#allocation1 + $0x10] ss:$2 sm:$0xff] %v911_v34 }
  0xc2   : > { %v556_v42 = vsel %vm555_vm7, %v550_v40, %v552_v41  ;;  %v554_v43 = vpop.permute.xlu1 %553  ;;  %1390 = vmatmul.msk.bf16.vlgmr.msra.gmra.mxu1 %vm208_vm1, %v1388_v32 }
  0xc3   : > { %v562_v44 = vsel %vm212_vm0, %v556_v42, 0  ;;  %v557_v45 = vsel %vm555_vm7, %v552_v41, %v554_v43  ;;  %v859_v42 = vpack.c.bf16 %v853_v39, %v853_v39 }
  0xc4   : > { %v565_v46 = vsel %vm212_vm0, %v557_v45, 0  ;;  %574 = vmatpush.bf16.msrb.mxu0 %v562_v44 }
  0xc5   : > { %587 = vmatpush.bf16.msrb.mxu1 %v565_v46  ;;  %869 = vrot.lane.b32.xlu2 %v859_v42, %s1459_s19 }
  0xca   : > { %v615_v49 = vpop.permute.xlu0 %614  ;;  %1395 = vmatmul.msk.bf16.vlgmr.msrb.gmra.mxu0 %vm208_vm1, %v1394_v47 }
  0xcb   : > { %v619_v50 = vsel %vm618_vm8, %v613_v48, %v615_v49  ;;  %v617_v51 = vpop.permute.xlu1 %616  ;;  %v977_v48 = vld [vmem:[#allocation2 + $0x8] sm:$0xf] }
  0xcc   : > { %v625_v52 = vsel %vm212_vm0, %v619_v50, 0  ;;  %v620_v53 = vsel %vm618_vm8, %v615_v49, %v617_v51 }
  0xcd   : > { %637 = vmatpush.bf16.msrb.mxu2 %v625_v52  ;;  %v628_v54 = vsel %vm212_vm0, %v620_v53, 0  ;;  %v1625_v53 = vld.sshfl [vmem:[#allocation1 + $0x10] sm:$0xff pattern:$0x75316420] }
  0xce   : > { %650 = vmatpush.bf16.msrb.mxu3 %v628_v54  ;;  %982 = vst [vmem:[#allocation1 + $0x10] ss:$2 sm:$0xff] %v977_v48 }
  0xd0   : > { %1398 = vmatmul.msk.bf16.vlgmr.msrb.gmra.mxu2 %vm208_vm1, %v1397_v55 }
  0xd1   : > { %1399 = vmatmul.msk.bf16.vlgmr.msrb.gmra.mxu3 %vm208_vm1, %v1397_v55 }
  0xd2   : > { %1396 = vmatmul.msk.bf16.vlgmr.msrb.gmra.mxu1 %vm208_vm1, %v1394_v47 }
  0xd3   : > { %v678_v57 = vpop.permute.xlu0 %677  ;;  %v680_v58 = vpop.permute.xlu1 %679 }
  0xd4   : > { %v682_v59 = vsel %vm681_vm9, %v676_v56, %v678_v57  ;;  %v683_v60 = vsel %vm681_vm9, %v678_v57, %v680_v58 }
  0xd5   : > { %v688_v61 = vsel %vm212_vm0, %v682_v59, 0  ;;  %v691_v62 = vsel %vm212_vm0, %v683_v60, 0 }
  0xd6   : > { %700 = vmatpush.bf16.msra.mxu0 %v688_v61  ;;  %713 = vmatpush.bf16.msra.mxu1 %v691_v62  ;;  %v1043_v61 = vld [vmem:[#allocation2 + $0x8] sm:$0xf] }
  0xda   : > { %1401 = vmatmul.msk.bf16.vlgmr.msra.gmra.mxu0 %vm208_vm1, %v1400_v63 }
  0xe2   : > { %1402 = vmatmul.msk.bf16.vlgmr.msra.gmra.mxu1 %vm208_vm1, %v1400_v63  ;;  %v985_v63 = vld.sshfl [vmem:[#allocation1 + $0x10] sm:$0xff pattern:$0x75316420] }
  0xe3   : > { %v991_v2 = vpack.c.bf16 %v985_v63, %v985_v63  ;;  %1048 = vst [vmem:[#allocation1 + $0x10] ss:$2 sm:$0xff] %v1043_v61  ;;  %v1403_v63 = vld [vmem:[%s1755_s2 + $0x1] sm:$0x1] }
  0xe5   : > { %1001 = vrot.lane.b32.xlu2 %v991_v2, %s1461_s21 }
 0x117   : > { %v228_v4 = vpop.f32.mrf.mxu0 }
 0x118   : > { %v264_v35 = vadd.f32 %v263_v0, %v228_v4 }
 0x11f   : > { %v230_v5 = vpop.f32.mrf.mxu0  ;;  %v241_v6 = vpop.f32.mrf.mxu1 }
 0x120   : > { %v277_v29 = vadd.f32 %v276_v1, %v241_v6  ;;  %v1109_v5 = vld [vmem:[#allocation2 + $0x8] sm:$0xf] }
 0x121   : > { %v1631_v6 = vld.sshfl [vmem:[#allocation1 + $0x10] sm:$0xff pattern:$0x75316420] }
 0x122   : > { %1114 = vst [vmem:[#allocation1 + $0x10] ss:$2 sm:$0xff] %v1109_v5 }
 0x127   : > { %v243_v7 = vpop.f32.mrf.mxu1  ;;  %v324_v8 = vpop.f32.mrf.mxu0 }
 0x128   : > { %v341_v40 = vadd.f32 %v324_v8, %v264_v35 }
 0x12f   : > { %v387_v9 = vpop.f32.mrf.mxu2  ;;  %v326_v10 = vpop.f32.mrf.mxu0 }
 0x130   : > { %v337_v11 = vpop.f32.mrf.mxu1  ;;  %v400_v12 = vpop.f32.mrf.mxu3  ;;  %v404_v43 = vadd.f32 %v387_v9, %v341_v40 }
 0x131   : > { %v342_v31 = vadd.f32 %v337_v11, %v277_v29  ;;  %v1175_v11 = vld [vmem:[#allocation2 + $0x8] sm:$0xf] }
 0x133   : > { %v405_v36 = vadd.f32 %v400_v12, %v342_v31 }
 0x137   : > { %v389_v13 = vpop.f32.mrf.mxu2  ;;  %v450_v14 = vpop.f32.mrf.mxu0 }
 0x138   : > { %v339_v15 = vpop.f32.mrf.mxu1  ;;  %v402_v16 = vpop.f32.mrf.mxu3  ;;  %v467_v46 = vadd.f32 %v450_v14, %v404_v43  ;;  %v1117_v14 = vld.sshfl [vmem:[#allocation1 + $0x10] sm:$0xff pattern:$0x75316420] }
 0x139   : > { %1180 = vst [vmem:[#allocation1 + $0x10] ss:$2 sm:$0xff] %v1175_v11  ;;  %v1123_v28 = vpack.c.bf16 %v1117_v14, %v1117_v14 }
 0x13f   : > { %v452_v18 = vpop.f32.mrf.mxu0 }
 0x140   : > { %v463_v19 = vpop.f32.mrf.mxu1 }
 0x141   : > { %v513_v20 = vpop.f32.mrf.mxu2  ;;  %v468_v41 = vadd.f32 %v463_v19, %v405_v36  ;;  %v1241_v19 = vld [vmem:[#allocation2 + $0x8] sm:$0xf] }
 0x142   : > { %v526_v21 = vpop.f32.mrf.mxu3  ;;  %v530_v49 = vadd.f32 %v513_v20, %v467_v46  ;;  %v1183_v20 = vld.sshfl [vmem:[#allocation1 + $0x10] sm:$0xff pattern:$0x75316420] }
 0x143   : > { %v531_v47 = vadd.f32 %v526_v21, %v468_v41  ;;  %1246 = vst [vmem:[#allocation1 + $0x10] ss:$2 sm:$0xff] %v1241_v19 }
 0x147   : > { %v576_v23 = vpop.f32.mrf.mxu0 }
 0x148   : > { %v465_v24 = vpop.f32.mrf.mxu1  ;;  %v593_v54 = vadd.f32 %v576_v23, %v530_v49 }
 0x149   : > { %v515_v25 = vpop.f32.mrf.mxu2 }
 0x14a   : > { %v528_v26 = vpop.f32.mrf.mxu3 }
 0x14f   : > { %v578_v32 = vpop.f32.mrf.mxu0 }
 0x150   : > { %v589_v33 = vpop.f32.mrf.mxu1 }
 0x151   : > { %v594_v50 = vadd.f32 %v589_v33, %v531_v47  ;;  %v925_v33 = vpack.c.bf16 %v1625_v53, %v1625_v53  ;;  %v1189_v53 = vpack.c.bf16 %v1183_v20, %v1183_v20 }
 0x153   : > { %v639_v37 = vpop.f32.mrf.mxu2 }
 0x154   : > { %v652_v38 = vpop.f32.mrf.mxu3  ;;  %v656_v55 = vadd.f32 %v639_v37, %v593_v54 }
 0x155   : > { %v657_v56 = vadd.f32 %v652_v38, %v594_v50  ;;  %v1249_v38 = vld.sshfl [vmem:[#allocation1 + $0x10] sm:$0xff pattern:$0x75316420] }
 0x156   : > { %v1255_v39 = vpack.c.bf16 %v1249_v38, %v1249_v38  ;;  %v1420_v38 = vld [vmem:[%s1755_s2 + $0x6] sm:$0x1] }
 0x157   : > { %v702_v44 = vpop.f32.mrf.mxu0 }
 0x158   : > { %v591_v45 = vpop.f32.mrf.mxu1  ;;  %v719_v59 = vadd.f32 %v702_v44, %v656_v55  ;;  %v1057_v44 = vpack.c.bf16 %v1631_v6, %v1631_v6  ;;  %v742_v55 = vld [vmem:[%s1755_s2] sm:$0x1] }
 0x15a   : > { %v721_v0 = vmax.f32 %v719_v59, 0.0 }
 0x15b   : > { %v641_v51 = vpop.f32.mrf.mxu2 }
 0x15c   : > { %v654_v52 = vpop.f32.mrf.mxu3 }
 0x15f   : > { %v704_v57 = vpop.f32.mrf.mxu0 }
 0x160   : > { %v715_v58 = vpop.f32.mrf.mxu1 }
 0x161   : > { %v720_v60 = vadd.f32 %v715_v58, %v657_v56  ;;  %v769_v56 = vpop.permute.xlu2 %768 }
 0x163   : > { %v722_v62 = vmax.f32 %v720_v60, 0.0 }
 0x165   : > { %v728_v1 = vrot.slane %v722_v62, 4 }
 0x167   : > { %v1627_v3 = vsel %vm729_vm11, %v721_v0, %v728_v1 }
 0x168   : > { %v717_v4 = vpop.f32.mrf.mxu1  ;;  %735 = vst [vmem:[#allocation1] ss:$2 sm:$0xff] %v1627_v3 }
 0x169   : > { %v870_v0 = vpop.permute.xlu2 %869 }
 0x16f   : > { %v736_v7 = vld.sshfl [vmem:[#allocation1] sm:$0xff pattern:$0x75316420]  ;;  %v737_v8 = vld.sshfl [vmem:[#allocation1 + $0x8] sm:$0xff pattern:$0x75316420] }
 0x170   : > { %v740_v9 = vpack.c.bf16 %v736_v7, %v736_v7  ;;  %v741_v10 = vpack.c.bf16 %v737_v8, %v737_v8  ;;  %747 = vst [vmem:[#allocation1] ss:$2 sm:$0xff] %v1627_v3  ;;  %v1408_v8 = vld [vmem:[%s1755_s2 + $0x2] sm:$0x1] }
 0x171   : > { %v1002_v7 = vpop.permute.xlu2 %1001 }
 0x172   : > { %v813_v12 = vsel %vm776_vm12, %v740_v9, 0  ;;  %v816_v13 = vsel %vm776_vm12, %v741_v10, 0 }
 0x173   : > { %825 = vmatpush.bf16.msrb.mxu0 %v813_v12  ;;  %838 = vmatpush.bf16.msrb.mxu1 %v816_v13 }
 0x176   : > { %1406 = vmatmul.msk.bf16.vlgmr.msrb.gmra.mxu0 %vm772_vm13, %v742_v55  ;;  %1407 = vmatmul.msk.bf16.vlgmr.msrb.gmra.mxu1 %vm772_vm13, %v742_v55  ;;  %v1423_v55 = vld [vmem:[%s1755_s2 + $0x7] sm:$0x1] }
 0x177   : > { %v751_v15 = vld.sshfl [vmem:[#allocation1 + $0x8] sm:$0xff pattern:$0x75316420]  ;;  %v750_v16 = vld.sshfl [vmem:[#allocation1] sm:$0xff pattern:$0x75316420] }
 0x178   : > { %v757_v17 = vpack.c.bf16 %v751_v15, %v751_v15  ;;  %v756_v18 = vpack.c.bf16 %v750_v16, %v750_v16  ;;  %848 = vst [vmem:[#allocation1] ss:$2 sm:$0xff] %v1627_v3 }
 0x17a   : > { %766 = vrot.lane.b32.xlu1 %v757_v17, %s1458_s18  ;;  %764 = vrot.lane.b32.xlu0 %v756_v18, %s1458_s18 }
 0x17f   : > { %v852_v21 = vld.sshfl [vmem:[#allocation1 + $0x8] sm:$0xff pattern:$0x75316420]  ;;  %v851_v22 = vld.sshfl [vmem:[#allocation1] sm:$0xff pattern:$0x75316420] }
 0x180   : > { %v858_v23 = vpack.c.bf16 %v852_v21, %v852_v21  ;;  %v857_v24 = vpack.c.bf16 %v851_v22, %v851_v22  ;;  %914 = vst [vmem:[#allocation1] ss:$2 sm:$0xff] %v1627_v3 }
 0x182   : > { %867 = vrot.lane.b32.xlu1 %v858_v23, %s1459_s19  ;;  %865 = vrot.lane.b32.xlu0 %v857_v24, %s1459_s19  ;;  %v1414_v23 = vld [vmem:[%s1755_s2 + $0x4] sm:$0x1]  ;;  %v1411_v24 = vld [vmem:[%s1755_s2 + $0x3] sm:$0x1] }
 0x187   : > { %v917_v25 = vld.sshfl [vmem:[#allocation1] sm:$0xff pattern:$0x75316420]  ;;  %v918_v26 = vld.sshfl [vmem:[#allocation1 + $0x8] sm:$0xff pattern:$0x75316420] }
 0x188   : > { %v923_v27 = vpack.c.bf16 %v917_v25, %v917_v25  ;;  %980 = vst [vmem:[#allocation1] ss:$2 sm:$0xff] %v1627_v3  ;;  %v924_v37 = vpack.c.bf16 %v918_v26, %v918_v26 }
 0x18a   : > { %931 = vrot.lane.b32.xlu2 %v923_v27, %s1460_s20 }
 0x18f   : > { %v984_v29 = vld.sshfl [vmem:[#allocation1 + $0x8] sm:$0xff pattern:$0x75316420]  ;;  %v983_v30 = vld.sshfl [vmem:[#allocation1] sm:$0xff pattern:$0x75316420] }
 0x190   : > { %v990_v31 = vpack.c.bf16 %v984_v29, %v984_v29  ;;  %v989_v32 = vpack.c.bf16 %v983_v30, %v983_v30  ;;  %1046 = vst [vmem:[#allocation1] ss:$2 sm:$0xff] %v1627_v3 }
 0x192   : > { %999 = vrot.lane.b32.xlu1 %v990_v31, %s1461_s21  ;;  %1133 = vrot.lane.b32.xlu2 %v1123_v28, %s1463_s23 }
 0x193   : > { %997 = vrot.lane.b32.xlu0 %v989_v32, %s1461_s21 }
 0x197   : > { %v1050_v34 = vld.sshfl [vmem:[#allocation1 + $0x8] sm:$0xff pattern:$0x75316420]  ;;  %v1049_v35 = vld.sshfl [vmem:[#allocation1] sm:$0xff pattern:$0x75316420] }
 0x198   : > { %v1055_v36 = vpack.c.bf16 %v1049_v35, %v1049_v35  ;;  %1112 = vst [vmem:[#allocation1] ss:$2 sm:$0xff] %v1627_v3  ;;  %v1056_v48 = vpack.c.bf16 %v1050_v34, %v1050_v34 }
 0x19a   : > { %935 = vrot.lane.b32.xlu1 %v925_v33, %s1460_s20  ;;  %1063 = vrot.lane.b32.xlu2 %v1055_v36, %s1462_s22 }
 0x19b   : > { %933 = vrot.lane.b32.xlu0 %v924_v37, %s1460_s20 }
 0x19f   : > { %v1116_v40 = vld.sshfl [vmem:[#allocation1 + $0x8] sm:$0xff pattern:$0x75316420]  ;;  %v1115_v41 = vld.sshfl [vmem:[#allocation1] sm:$0xff pattern:$0x75316420] }
 0x1a0   : > { %v1122_v42 = vpack.c.bf16 %v1116_v40, %v1116_v40  ;;  %v1121_v43 = vpack.c.bf16 %v1115_v41, %v1115_v41  ;;  %1178 = vst [vmem:[#allocation1] ss:$2 sm:$0xff] %v1627_v3 }
 0x1a2   : > { %1131 = vrot.lane.b32.xlu1 %v1122_v42, %s1463_s23  ;;  %1265 = vrot.lane.b32.xlu2 %v1255_v39, %s1465_s25  ;;  %v1417_v39 = vld [vmem:[%s1755_s2 + $0x5] sm:$0x1] }
 0x1a3   : > { %1129 = vrot.lane.b32.xlu0 %v1121_v43, %s1463_s23 }
 0x1a7   : > { %v1182_v45 = vld.sshfl [vmem:[#allocation1 + $0x8] sm:$0xff pattern:$0x75316420]  ;;  %v1181_v46 = vld.sshfl [vmem:[#allocation1] sm:$0xff pattern:$0x75316420] }
 0x1a8   : > { %v1187_v47 = vpack.c.bf16 %v1181_v46, %v1181_v46  ;;  %1244 = vst [vmem:[#allocation1] ss:$2 sm:$0xff] %v1627_v3  ;;  %v1188_v54 = vpack.c.bf16 %v1182_v45, %v1182_v45 }
 0x1aa   : > { %1067 = vrot.lane.b32.xlu1 %v1057_v44, %s1462_s22  ;;  %1195 = vrot.lane.b32.xlu2 %v1187_v47, %s1464_s24 }
 0x1ab   : > { %1065 = vrot.lane.b32.xlu0 %v1056_v48, %s1462_s22 }
 0x1af   : > { %v1248_v49 = vld.sshfl [vmem:[#allocation1 + $0x8] sm:$0xff pattern:$0x75316420]  ;;  %v1247_v50 = vld.sshfl [vmem:[#allocation1] sm:$0xff pattern:$0x75316420] }
 0x1b0   : > { %v1254_v51 = vpack.c.bf16 %v1248_v49, %v1248_v49  ;;  %v1253_v52 = vpack.c.bf16 %v1247_v50, %v1247_v50 }
 0x1b2   : > { %1263 = vrot.lane.b32.xlu1 %v1254_v51, %s1465_s25 }
 0x1b3   : > { %1261 = vrot.lane.b32.xlu0 %v1253_v52, %s1465_s25 }
 0x1ba   : > { %1199 = vrot.lane.b32.xlu1 %v1189_v53, %s1464_s24 }
 0x1bb   : > { %1197 = vrot.lane.b32.xlu0 %v1188_v54, %s1464_s24  ;;  %v1426_v54 = vld [vmem:[%s1755_s2 + $0x8] sm:$0x1] }
 0x1e4   : > { %v932_v10 = vpop.permute.xlu2 %931 }
 0x1ec   : > { %v767_v57 = vpop.permute.xlu1 %766  ;;  %v765_v59 = vpop.permute.xlu0 %764 }
 0x1ed   : > { %v771_v58 = vsel %vm205_vm2, %v767_v57, %v769_v56  ;;  %v770_v61 = vsel %vm205_vm2, %v765_v59, %v767_v57  ;;  %v1134_v20 = vpop.permute.xlu2 %1133 }
 0x1ee   : > { %v781_v60 = vsel %vm776_vm12, %v771_v58, 0  ;;  %v778_v62 = vsel %vm776_vm12, %v770_v61, 0 }
 0x1ef   : > { %803 = vmatpush.bf16.msra.mxu3 %v781_v60  ;;  %790 = vmatpush.bf16.msra.mxu2 %v778_v62 }
 0x1f2   : > { %1405 = vmatmul.msk.bf16.vlgmr.msra.gmra.mxu3 %vm772_vm13, %v1403_v63  ;;  %1404 = vmatmul.msk.bf16.vlgmr.msra.gmra.mxu2 %vm772_vm13, %v1403_v63 }
 0x1f3   : > { %v827_v56 = vpop.f32.mrf.mxu0  ;;  %v840_v57 = vpop.f32.mrf.mxu1 }
 0x1f4   : > { %v868_v1 = vpop.permute.xlu1 %867  ;;  %v866_v3 = vpop.permute.xlu0 %865 }
 0x1f5   : > { %v872_v2 = vsel %vm303_vm3, %v868_v1, %v870_v0  ;;  %v871_v5 = vsel %vm303_vm3, %v866_v3, %v868_v1  ;;  %v1064_v31 = vpop.permute.xlu2 %1063 }
 0x1f6   : > { %v880_v4 = vsel %vm776_vm12, %v872_v2, 0  ;;  %v877_v6 = vsel %vm776_vm12, %v871_v5, 0 }
 0x1f7   : > { %902 = vmatpush.bf16.msrb.mxu3 %v880_v4  ;;  %889 = vmatpush.bf16.msrb.mxu2 %v877_v6 }
 0x1fb   : > { %v829_v58 = vpop.f32.mrf.mxu0  ;;  %v842_v59 = vpop.f32.mrf.mxu1 }
 0x1fd   : > { %v1266_v40 = vpop.permute.xlu2 %1265 }
 0x202   : > { %1410 = vmatmul.msk.bf16.vlgmr.msrb.gmra.mxu3 %vm772_vm13, %v1408_v8  ;;  %1409 = vmatmul.msk.bf16.vlgmr.msrb.gmra.mxu2 %vm772_vm13, %v1408_v8 }
 0x204   : > { %v1000_v9 = vpop.permute.xlu1 %999 }
 0x205   : > { %v1004_v11 = vsel %vm429_vm5, %v1000_v9, %v1002_v7  ;;  %v998_v12 = vpop.permute.xlu0 %997  ;;  %v1196_v48 = vpop.permute.xlu2 %1195 }
 0x206   : > { %v1012_v13 = vsel %vm776_vm12, %v1004_v11, 0  ;;  %v1003_v14 = vsel %vm429_vm5, %v998_v12, %v1000_v9 }
 0x207   : > { %v1009_v15 = vsel %vm776_vm12, %v1003_v14, 0  ;;  %1034 = vmatpush.bf16.msra.mxu3 %v1012_v13 }
 0x208   : > { %1021 = vmatpush.bf16.msra.mxu2 %v1009_v15 }
 0x20c   : > { %v936_v16 = vpop.permute.xlu1 %935 }
 0x20d   : > { %v934_v17 = vpop.permute.xlu0 %933 }
 0x20e   : > { %v937_v18 = vsel %vm366_vm4, %v932_v10, %v934_v17  ;;  %v938_v19 = vsel %vm366_vm4, %v934_v17, %v936_v16 }
 0x20f   : > { %v943_v21 = vsel %vm776_vm12, %v937_v18, 0  ;;  %v946_v22 = vsel %vm776_vm12, %v938_v19, 0 }
 0x210   : > { %955 = vmatpush.bf16.msra.mxu0 %v943_v21  ;;  %968 = vmatpush.bf16.msra.mxu1 %v946_v22 }
 0x212   : > { %1416 = vmatmul.msk.bf16.vlgmr.msra.gmra.mxu3 %vm772_vm13, %v1414_v23  ;;  %1415 = vmatmul.msk.bf16.vlgmr.msra.gmra.mxu2 %vm772_vm13, %v1414_v23 }
 0x213   : > { %1412 = vmatmul.msk.bf16.vlgmr.msra.gmra.mxu0 %vm772_vm13, %v1411_v24  ;;  %1413 = vmatmul.msk.bf16.vlgmr.msra.gmra.mxu1 %vm772_vm13, %v1411_v24 }
 0x214   : > { %v1132_v25 = vpop.permute.xlu1 %1131 }
 0x215   : > { %v1136_v26 = vsel %vm555_vm7, %v1132_v25, %v1134_v20  ;;  %v1130_v27 = vpop.permute.xlu0 %1129 }
 0x216   : > { %v1144_v28 = vsel %vm776_vm12, %v1136_v26, 0  ;;  %v1135_v29 = vsel %vm555_vm7, %v1130_v27, %v1132_v25 }
 0x217   : > { %v1141_v30 = vsel %vm776_vm12, %v1135_v29, 0  ;;  %1166 = vmatpush.bf16.msrb.mxu3 %v1144_v28 }
 0x218   : > { %1153 = vmatpush.bf16.msrb.mxu2 %v1141_v30 }
 0x21c   : > { %v1068_v32 = vpop.permute.xlu1 %1067 }
 0x21d   : > { %v1066_v33 = vpop.permute.xlu0 %1065 }
 0x21e   : > { %v1069_v34 = vsel %vm492_vm6, %v1064_v31, %v1066_v33  ;;  %v1070_v35 = vsel %vm492_vm6, %v1066_v33, %v1068_v32 }
 0x21f   : > { %v1075_v36 = vsel %vm776_vm12, %v1069_v34, 0  ;;  %v1078_v37 = vsel %vm776_vm12, %v1070_v35, 0 }
 0x220   : > { %1087 = vmatpush.bf16.msrb.mxu0 %v1075_v36  ;;  %1100 = vmatpush.bf16.msrb.mxu1 %v1078_v37 }
 0x222   : > { %1422 = vmatmul.msk.bf16.vlgmr.msrb.gmra.mxu3 %vm772_vm13, %v1420_v38  ;;  %1421 = vmatmul.msk.bf16.vlgmr.msrb.gmra.mxu2 %vm772_vm13, %v1420_v38 }
 0x223   : > { %1418 = vmatmul.msk.bf16.vlgmr.msrb.gmra.mxu0 %vm772_vm13, %v1417_v39  ;;  %1419 = vmatmul.msk.bf16.vlgmr.msrb.gmra.mxu1 %vm772_vm13, %v1417_v39 }
 0x224   : > { %v1264_v41 = vpop.permute.xlu1 %1263 }
 0x225   : > { %v1268_v42 = vsel %vm681_vm9, %v1264_v41, %v1266_v40  ;;  %v1262_v43 = vpop.permute.xlu0 %1261 }
 0x226   : > { %v1276_v44 = vsel %vm776_vm12, %v1268_v42, 0  ;;  %v1267_v45 = vsel %vm681_vm9, %v1262_v43, %v1264_v41 }
 0x227   : > { %v1273_v46 = vsel %vm776_vm12, %v1267_v45, 0  ;;  %1298 = vmatpush.bf16.msra.mxu3 %v1276_v44 }
 0x228   : > { %1285 = vmatpush.bf16.msra.mxu2 %v1273_v46 }
 0x22c   : > { %v1200_v47 = vpop.permute.xlu1 %1199 }
 0x22d   : > { %v1198_v49 = vpop.permute.xlu0 %1197 }
 0x22e   : > { %v1201_v50 = vsel %vm618_vm8, %v1196_v48, %v1198_v49  ;;  %v1202_v51 = vsel %vm618_vm8, %v1198_v49, %v1200_v47 }
 0x22f   : > { %v1207_v52 = vsel %vm776_vm12, %v1201_v50, 0  ;;  %v1210_v53 = vsel %vm776_vm12, %v1202_v51, 0 }
 0x230   : > { %1219 = vmatpush.bf16.msra.mxu0 %v1207_v52  ;;  %1232 = vmatpush.bf16.msra.mxu1 %v1210_v53 }
 0x232   : > { %1428 = vmatmul.msk.bf16.vlgmr.msra.gmra.mxu3 %vm772_vm13, %v1426_v54  ;;  %1427 = vmatmul.msk.bf16.vlgmr.msra.gmra.mxu2 %vm772_vm13, %v1426_v54 }
 0x233   : > { %1424 = vmatmul.msk.bf16.vlgmr.msra.gmra.mxu0 %vm772_vm13, %v1423_v55  ;;  %1425 = vmatmul.msk.bf16.vlgmr.msra.gmra.mxu1 %vm772_vm13, %v1423_v55 }
 0x275   : > { %v805_v60 = vpop.f32.mrf.mxu3  ;;  %v792_v61 = vpop.f32.mrf.mxu2 }
 0x276   : > { %v841_v16 = vadd.f32 %v840_v57, %v805_v60  ;;  %v828_v19 = vadd.f32 %v827_v56, %v792_v61 }
 0x27d   : > { %v807_v62 = vpop.f32.mrf.mxu3  ;;  %v794_v63 = vpop.f32.mrf.mxu2 }
 0x285   : > { %v904_v0 = vpop.f32.mrf.mxu3  ;;  %v891_v1 = vpop.f32.mrf.mxu2 }
 0x286   : > { %v909_v20 = vadd.f32 %v904_v0, %v841_v16  ;;  %v908_v21 = vadd.f32 %v891_v1, %v828_v19 }
 0x28d   : > { %v906_v2 = vpop.f32.mrf.mxu3  ;;  %v893_v3 = vpop.f32.mrf.mxu2 }
 0x290   : > { %v957_v4 = vpop.f32.mrf.mxu0  ;;  %v970_v5 = vpop.f32.mrf.mxu1 }
 0x291   : > { %v975_v22 = vadd.f32 %v970_v5, %v909_v20  ;;  %v974_v24 = vadd.f32 %v957_v4, %v908_v21 }
 0x295   : > { %v1036_v6 = vpop.f32.mrf.mxu3  ;;  %v1023_v7 = vpop.f32.mrf.mxu2 }
 0x296   : > { %v1041_v25 = vadd.f32 %v1036_v6, %v975_v22  ;;  %v1040_v27 = vadd.f32 %v1023_v7, %v974_v24 }
 0x298   : > { %v959_v8 = vpop.f32.mrf.mxu0  ;;  %v972_v9 = vpop.f32.mrf.mxu1 }
 0x29d   : > { %v1038_v10 = vpop.f32.mrf.mxu3  ;;  %v1025_v11 = vpop.f32.mrf.mxu2 }
 0x2a0   : > { %v1089_v12 = vpop.f32.mrf.mxu0  ;;  %v1102_v13 = vpop.f32.mrf.mxu1 }
 0x2a1   : > { %v1107_v28 = vadd.f32 %v1102_v13, %v1041_v25  ;;  %v1106_v31 = vadd.f32 %v1089_v12, %v1040_v27 }
 0x2a5   : > { %v1168_v14 = vpop.f32.mrf.mxu3  ;;  %v1155_v15 = vpop.f32.mrf.mxu2 }
 0x2a6   : > { %v1173_v32 = vadd.f32 %v1168_v14, %v1107_v28  ;;  %v1172_v33 = vadd.f32 %v1155_v15, %v1106_v31 }
 0x2a8   : > { %v1091_v17 = vpop.f32.mrf.mxu0  ;;  %v1104_v18 = vpop.f32.mrf.mxu1 }
 0x2ad   : > { %v1170_v23 = vpop.f32.mrf.mxu3  ;;  %v1157_v26 = vpop.f32.mrf.mxu2 }
 0x2b0   : > { %v1221_v29 = vpop.f32.mrf.mxu0  ;;  %v1234_v30 = vpop.f32.mrf.mxu1 }
 0x2b1   : > { %v1239_v34 = vadd.f32 %v1234_v30, %v1173_v32  ;;  %v1238_v36 = vadd.f32 %v1221_v29, %v1172_v33 }
 0x2b5   : > { %v1300_v35 = vpop.f32.mrf.mxu3  ;;  %v1287_v38 = vpop.f32.mrf.mxu2 }
 0x2b6   : > { %v1305_v37 = vadd.f32 %v1300_v35, %v1239_v34  ;;  %v1304_v39 = vadd.f32 %v1287_v38, %v1238_v36 }
 0x2b8   : > { %v1307_v40 = vmax.f32 %v1305_v37, 0.0  ;;  %v1236_v41 = vpop.f32.mrf.mxu1  ;;  %v1223_v42 = vpop.f32.mrf.mxu0  ;;  %v1306_v43 = vmax.f32 %v1304_v39, 0.0 }
 0x2ba   : > { %v1310_v44 = vrot.slane %v1307_v40, 6 }
 0x2bc   : > { %v1311_v45 = vsel %vm776_vm12, %v1306_v43, %v1310_v44 }
 0x2bd   : > { %1313 = vst [vmem:[%s170_s15] sm:$0xf] %v1311_v45  ;;  %v1302_v46 = vpop.f32.mrf.mxu3  ;;  %v1289_v47 = vpop.f32.mrf.mxu2 }
 0x2be PF: > { %s13_s12 = sadd.s32 1, %s1456_s12  }
 0x2bf   : > { %p10_p4 = scmp.ge.s32.totalorder %s13_s12, 4  }
 0x2c1   :  { %12 = sbr.rel (!%p10_p4) target bundleno = 1 (0x1), region = 86 }

// kernel: model_forward.7
= control target key start
LH: loop header
LB: loop body
LE: loop exit
PB: predicated region body
PF: predicated region fallthrough
CT: control target
= control target key end

     0   :  { %s1447_s21 = smov 0   ;;  %s1688_s0 = inlined_call_operand.vmem [shape: f32[2,2,226], index: 0, kind: input, shape index: {}]   ;;  %s1689_s1 = inlined_call_operand.vmem [shape: bf16[9,8,2], index: 1, kind: input, shape index: {}]   ;;  %s1690_s2 = inlined_call_operand.vmem [shape: f32[8,1], index: 2, kind: input, shape index: {}]   ;;  %s1691_s3 = inlined_call_operand.vmem [shape: bf16[9,8,8], index: 3, kind: input, shape index: {}]   ;;  %s1692_s4 = inlined_call_operand.vmem [shape: f32[8,1], index: 4, kind: input, shape index: {}]   ;;  %s1693_s5 = inlined_call_operand.vmem [shape: f32[1,196], index: 5, kind: input, shape index: {}]   ;;  %s1694_s6 = inlined_call_operand.vmem [shape: f32[2,8,196], index: 6, kind: output, shape index: {}]  }
   0x1 LB: > { %s1303_s22 = sadd.s32 4294967295, %s1399_s21   ;;  %p1307_p0 = scmp.ge.s32.totalorder %s1399_s21, 1  ;;  %s1399_s21 = sphi %s1447_s21, %s16_s21  }
   0x2   : > { %p212_p1 = scmp.lt.s32.totalorder %s1399_s21, 3 }
   0x4   : > { %p213_p2 = pnand %p1307_p0, %p212_p1 }
   0x5   : > { %p242_p3 = scmp.lt.s32.totalorder (!%p213_p2), %s1303_s22, 1  ;;  %s1401_s27 = smov (!%p213_p2), 127  }
   0x6   : > { %216 = sbr.rel (%p213_p2) target bundleno = 1359 (0x54f), region = 44  ;;  %s1402_s28 = smov (!%p213_p2), 126  }
   0x7   : > { %s1403_s29 = smov (!%p213_p2), 114   ;;  %s1404_s30 = smov (!%p213_p2), 113  }
   0x8   : > { %s1405_s7 = smov (!%p213_p2), 112   ;;  %s1406_s8 = smov (!%p213_p2), 100  }
   0x9   : > { %s1407_s9 = smov (!%p213_p2), 99   ;;  %s1408_s10 = smov (!%p213_p2), 98  }
   0xa   : > { %s1411_s19 = smov (!%p213_p2), 15  }
   0xb   : > { %s1696_s22 = smov (!%p242_p3, %s1303_s22), 1  ;;  %vm287_vm0 = vcmask 1040384   ;;  %v254_v47 = vld [vmem:[%s1689_s1] sm:$0xf]  ;;  %vm283_vm1 = vcmask 15360   ;;  %vm428_vm2 = vcmask 932864  }
   0xc   : > { %s1366_s23 = sshll.u32 %s1696_s22, 2  ;;  %v1320_v54 = vld [vmem:[%s1689_s1 + $0xc] sm:$0xf]  ;;  %vm281_vm3 = vcmask 1039360   ;;  %v1312_v60 = vld [vmem:[%s1689_s1 + $0x4] sm:$0xf] }
   0xd   : > { %s1461_s26 = scalar_lea.vmem %s1688_s0, %s1366_s23  ;;  %vm372_vm4 = vcmask 1031168   ;;  %vm484_vm5 = vcmask 924672   ;;  %vm540_vm6 = vcmask 916480   ;;  %vm596_vm7 = vcmask 818176   ;;  %s1367_s18 = sshll.u32 %s1696_s22, 4 }
   0xe   : > { %v255_v0 = vld [vmem:[%s1461_s26] sm:$0xf]  ;;  %vm652_vm8 = vcmask 809984   ;;  %vm708_vm9 = vcmask 801792   ;;  %vm762_vm10 = vcmask 556032   ;;  %vm807_vm14 = vcmask 1047672  }
   0xf   : > { %257 = vst [vmem:[#allocation1] ss:$4 sm:$0xff] %v255_v0  ;;  %v266_v1 = vld [vmem:[%s1461_s26] sm:$0xf]  ;;  %vm803_vm15 = vcmask 121856  }
  0x10   : > { %v357_v4 = vld [vmem:[%s1461_s26] sm:$0xf] }
  0x11   : > { %v413_v8 = vld [vmem:[%s1461_s26] sm:$0xf] }
  0x12   : > { %v469_v13 = vld [vmem:[%s1461_s26] sm:$0xf] }
  0x13   : > { %v525_v18 = vld [vmem:[%s1461_s26] sm:$0xf] }
  0x14   : > { %v581_v24 = vld [vmem:[%s1461_s26] sm:$0xf] }
  0x15   : > { %v637_v29 = vld [vmem:[%s1461_s26] sm:$0xf] }
  0x16   : > { %v1465_v2 = vld.sshfl [vmem:[#allocation1] sm:$0xff pattern:$0x73625140]  ;;  %v1467_v3 = vld.sshfl [vmem:[#allocation1 + $0x8] sm:$0xff pattern:$0x73625140] }
  0x17   : > { %268 = vst [vmem:[#allocation1] ss:$4 sm:$0xff] %v266_v1  ;;  %v693_v34 = vld [vmem:[%s1461_s26] sm:$0xf]  ;;  %v263_v43 = vpack.c.bf16 %v1467_v3, %v1467_v3  ;;  %v262_v44 = vpack.c.bf16 %v1465_v2, %v1465_v2 }
  0x19   : > { %v327_v45 = vsel %vm287_vm0, %v263_v43, 0  ;;  %v324_v46 = vsel %vm287_vm0, %v262_v44, 0 }
  0x1a   : > { %349 = vmatpush.bf16.msra.mxu3 %v327_v45  ;;  %336 = vmatpush.bf16.msra.mxu2 %v324_v46 }
  0x1d   : > { %1316 = vmatmul.msk.bf16.vlgmr.msra.gmra.mxu3 %vm283_vm1, %v254_v47  ;;  %1315 = vmatmul.msk.bf16.vlgmr.msra.gmra.mxu2 %vm283_vm1, %v254_v47 }
  0x1e   : > { %v269_v5 = vld.sshfl [vmem:[#allocation1] sm:$0xff pattern:$0x73625140]  ;;  %v270_v6 = vld.sshfl [vmem:[#allocation1 + $0x8] sm:$0xff pattern:$0x73625140] }
  0x1f   : > { %v273_v7 = vpack.c.bf16 %v269_v5, %v269_v5  ;;  %359 = vst [vmem:[#allocation1] ss:$4 sm:$0xff] %v357_v4  ;;  %v274_v9 = vpack.c.bf16 %v270_v6, %v270_v6 }
  0x21   : > { %277 = vrot.lane.b32.xlu0 %v273_v7, %s1401_s27  ;;  %v1317_v7 = vld [vmem:[%s1689_s1 + $0x8] sm:$0xf] }
  0x26   : > { %v360_v10 = vld.sshfl [vmem:[#allocation1] sm:$0xff pattern:$0x73625140]  ;;  %v361_v11 = vld.sshfl [vmem:[#allocation1 + $0x8] sm:$0xff pattern:$0x73625140] }
  0x27   : > { %v364_v12 = vpack.c.bf16 %v360_v10, %v360_v10  ;;  %415 = vst [vmem:[#allocation1] ss:$4 sm:$0xff] %v413_v8  ;;  %v365_v14 = vpack.c.bf16 %v361_v11, %v361_v11 }
  0x29   : > { %368 = vrot.lane.b32.xlu1 %v364_v12, %s1402_s28  ;;  %279 = vrot.lane.b32.xlu0 %v274_v9, %s1401_s27 }
  0x2e   : > { %v416_v15 = vld.sshfl [vmem:[#allocation1] sm:$0xff pattern:$0x73625140]  ;;  %v417_v16 = vld.sshfl [vmem:[#allocation1 + $0x8] sm:$0xff pattern:$0x73625140] }
  0x2f   : > { %471 = vst [vmem:[#allocation1] ss:$4 sm:$0xff] %v469_v13  ;;  %v420_v17 = vpack.c.bf16 %v416_v15, %v416_v15  ;;  %v421_v21 = vpack.c.bf16 %v417_v16, %v417_v16 }
  0x31   : > { %370 = vrot.lane.b32.xlu1 %v365_v14, %s1402_s28  ;;  %424 = vrot.lane.b32.xlu2 %v420_v17, %s1403_s29  ;;  %v1326_v14 = vld [vmem:[%s1689_s1 + $0x14] sm:$0xf]  ;;  %v1323_v17 = vld [vmem:[%s1689_s1 + $0x10] sm:$0xf] }
  0x36   : > { %v472_v19 = vld.sshfl [vmem:[#allocation1] sm:$0xff pattern:$0x73625140]  ;;  %v473_v20 = vld.sshfl [vmem:[#allocation1 + $0x8] sm:$0xff pattern:$0x73625140] }
  0x37   : > { %v476_v22 = vpack.c.bf16 %v472_v19, %v472_v19  ;;  %v477_v23 = vpack.c.bf16 %v473_v20, %v473_v20  ;;  %527 = vst [vmem:[#allocation1] ss:$4 sm:$0xff] %v525_v18  ;;  %v747_v19 = vld [vmem:[%s1690_s2] sm:$0xff]  ;;  %v1409_v20 = vmov 0  }
  0x38   : > { %1387 = vset.pattern.permute.xlu1 %v1409_v20  ;;  %1388 = vset.pattern.permute.xlu0 %v1409_v20 }
  0x39   : > { %480 = vrot.lane.b32.xlu0 %v476_v22, %s1404_s30  ;;  %482 = vrot.lane.b32.xlu1 %v477_v23, %s1404_s30 }
  0x3a   : > { %426 = vrot.lane.b32.xlu2 %v421_v21, %s1403_s29 }
  0x3e   : > { %v528_v25 = vld.sshfl [vmem:[#allocation1] sm:$0xff pattern:$0x73625140]  ;;  %v529_v26 = vld.sshfl [vmem:[#allocation1 + $0x8] sm:$0xff pattern:$0x73625140] }
  0x3f   : > { %v533_v27 = vpack.c.bf16 %v529_v26, %v529_v26  ;;  %583 = vst [vmem:[#allocation1] ss:$4 sm:$0xff] %v581_v24  ;;  %v532_v28 = vpack.c.bf16 %v528_v25, %v528_v25  ;;  %v1332_v26 = vld [vmem:[%s1689_s1 + $0x1c] sm:$0xf] }
  0x41   : > { %538 = vrot.lane.b32.xlu0 %v533_v27, %s1405_s7 }
  0x42   : > { %536 = vrot.lane.b32.xlu2 %v532_v28, %s1405_s7 }
  0x46   : > { %v584_v30 = vld.sshfl [vmem:[#allocation1] sm:$0xff pattern:$0x73625140]  ;;  %v585_v31 = vld.sshfl [vmem:[#allocation1 + $0x8] sm:$0xff pattern:$0x73625140] }
  0x47   : > { %v588_v32 = vpack.c.bf16 %v584_v30, %v584_v30  ;;  %639 = vst [vmem:[#allocation1] ss:$4 sm:$0xff] %v637_v29  ;;  %v589_v33 = vpack.c.bf16 %v585_v31, %v585_v31  ;;  %v1329_v31 = vld [vmem:[%s1689_s1 + $0x18] sm:$0xf] }
  0x49   : > { %592 = vrot.lane.b32.xlu1 %v588_v32, %s1406_s8 }
  0x4a   : > { %594 = vrot.lane.b32.xlu2 %v589_v33, %s1406_s8  ;;  %v1335_v33 = vld [vmem:[%s1689_s1 + $0x20] sm:$0xf] }
  0x4e   : > { %v641_v35 = vld.sshfl [vmem:[#allocation1 + $0x8] sm:$0xff pattern:$0x73625140]  ;;  %v640_v36 = vld.sshfl [vmem:[#allocation1] sm:$0xff pattern:$0x73625140] }
  0x4f   : > { %v645_v37 = vpack.c.bf16 %v641_v35, %v641_v35  ;;  %v644_v38 = vpack.c.bf16 %v640_v36, %v640_v36  ;;  %695 = vst [vmem:[#allocation1] ss:$4 sm:$0xff] %v693_v34 }
  0x51   : > { %650 = vrot.lane.b32.xlu1 %v645_v37, %s1407_s9  ;;  %648 = vrot.lane.b32.xlu0 %v644_v38, %s1407_s9 }
  0x56   : > { %v697_v39 = vld.sshfl [vmem:[#allocation1 + $0x8] sm:$0xff pattern:$0x73625140]  ;;  %v696_v40 = vld.sshfl [vmem:[#allocation1] sm:$0xff pattern:$0x73625140] }
  0x57   : > { %v701_v41 = vpack.c.bf16 %v697_v39, %v697_v39  ;;  %v700_v42 = vpack.c.bf16 %v696_v40, %v696_v40 }
  0x59   : > { %706 = vrot.lane.b32.xlu0 %v701_v41, %s1408_s10  ;;  %704 = vrot.lane.b32.xlu2 %v700_v42, %s1408_s10 }
  0x5a   : > { %750 = vperm.xlu1 %1387, %v747_v19  }
  0x8b   : > { %v425_v48 = vpop.permute.xlu2 %424 }
  0x93   : > { %v278_v49 = vpop.permute.xlu0 %277 }
  0x94   : > { %v427_v50 = vpop.permute.xlu2 %426 }
  0x95   : > { %v437_v51 = vsel %vm287_vm0, %v427_v50, 0  ;;  %v429_v52 = vsel %vm428_vm2, %v425_v48, %v427_v50 }
  0x96   : > { %459 = vmatpush.bf16.msrb.mxu3 %v437_v51  ;;  %v434_v53 = vsel %vm287_vm0, %v429_v52, 0 }
  0x97   : > { %446 = vmatpush.bf16.msrb.mxu2 %v434_v53 }
  0x99   : > { %1322 = vmatmul.msk.bf16.vlgmr.msrb.gmra.mxu3 %vm283_vm1, %v1320_v54 }
  0x9a   : > { %1321 = vmatmul.msk.bf16.vlgmr.msrb.gmra.mxu2 %vm283_vm1, %v1320_v54 }
  0x9b   : > { %v369_v55 = vpop.permute.xlu1 %368  ;;  %v280_v56 = vpop.permute.xlu0 %279 }
  0x9c   : > { %v292_v57 = vsel %vm287_vm0, %v280_v56, 0  ;;  %v282_v58 = vsel %vm281_vm3, %v278_v49, %v280_v56  ;;  %v537_v61 = vpop.permute.xlu2 %536 }
  0x9d   : > { %314 = vmatpush.bf16.msra.mxu1 %v292_v57  ;;  %v289_v59 = vsel %vm287_vm0, %v282_v58, 0 }
  0x9e   : > { %301 = vmatpush.bf16.msra.mxu0 %v289_v59 }
  0xa0   : > { %1314 = vmatmul.msk.bf16.vlgmr.msra.gmra.mxu1 %vm283_vm1, %v1312_v60  ;;  %v351_v34 = vpop.f32.mrf.mxu3  ;;  %v338_v35 = vpop.f32.mrf.mxu2 }
  0xa1   : > { %1313 = vmatmul.msk.bf16.vlgmr.msra.gmra.mxu0 %vm283_vm1, %v1312_v60 }
  0xa3   : > { %v371_v62 = vpop.permute.xlu1 %370 }
  0xa4   : > { %v373_v63 = vsel %vm372_vm4, %v369_v55, %v371_v62  ;;  %v381_v0 = vsel %vm287_vm0, %v371_v62, 0  ;;  %v595_v2 = vpop.permute.xlu2 %594 }
  0xa5   : > { %v378_v1 = vsel %vm287_vm0, %v373_v63, 0  ;;  %403 = vmatpush.bf16.msrb.mxu1 %v381_v0  ;;  %v605_v9 = vsel %vm287_vm0, %v595_v2, 0 }
  0xa6   : > { %390 = vmatpush.bf16.msrb.mxu0 %v378_v1 }
  0xa8   : > { %v353_v36 = vpop.f32.mrf.mxu3  ;;  %v340_v37 = vpop.f32.mrf.mxu2 }
  0xab   : > { %v481_v3 = vpop.permute.xlu0 %480  ;;  %v483_v4 = vpop.permute.xlu1 %482 }
  0xac   : > { %v485_v5 = vsel %vm484_vm5, %v481_v3, %v483_v4  ;;  %v493_v6 = vsel %vm287_vm0, %v483_v4, 0 }
  0xad   : > { %v490_v8 = vsel %vm287_vm0, %v485_v5, 0  ;;  %515 = vmatpush.bf16.msra.mxu1 %v493_v6 }
  0xae   : > { %502 = vmatpush.bf16.msra.mxu0 %v490_v8 }
  0xb0   : > { %1319 = vmatmul.msk.bf16.vlgmr.msrb.gmra.mxu1 %vm283_vm1, %v1317_v7 }
  0xb1   : > { %1318 = vmatmul.msk.bf16.vlgmr.msrb.gmra.mxu0 %vm283_vm1, %v1317_v7  ;;  %627 = vmatpush.bf16.msrb.mxu1 %v605_v9 }
  0xb3   : > { %v539_v10 = vpop.permute.xlu0 %538  ;;  %v705_v27 = vpop.permute.xlu2 %704 }
  0xb4   : > { %v541_v11 = vsel %vm540_vm6, %v537_v61, %v539_v10  ;;  %v549_v12 = vsel %vm287_vm0, %v539_v10, 0 }
  0xb5   : > { %v546_v13 = vsel %vm287_vm0, %v541_v11, 0  ;;  %571 = vmatpush.bf16.msra.mxu3 %v549_v12 }
  0xb6   : > { %558 = vmatpush.bf16.msra.mxu2 %v546_v13 }
  0xb8   : > { %1328 = vmatmul.msk.bf16.vlgmr.msra.gmra.mxu3 %vm283_vm1, %v1326_v14 }
  0xb9   : > { %1327 = vmatmul.msk.bf16.vlgmr.msra.gmra.mxu2 %vm283_vm1, %v1326_v14  ;;  %v253_v14 = vld [vmem:[%s1693_s5] sm:$0x3] }
  0xbb   : > { %v593_v15 = vpop.permute.xlu1 %592 }
  0xbc   : > { %v597_v16 = vsel %vm596_vm7, %v593_v15, %v595_v2 }
  0xbd   : > { %v602_v18 = vsel %vm287_vm0, %v597_v16, 0 }
  0xbe   : > { %614 = vmatpush.bf16.msrb.mxu0 %v602_v18 }
  0xc0   : > { %1325 = vmatmul.msk.bf16.vlgmr.msra.gmra.mxu1 %vm283_vm1, %v1323_v17 }
  0xc1   : > { %1324 = vmatmul.msk.bf16.vlgmr.msra.gmra.mxu0 %vm283_vm1, %v1323_v17 }
  0xc3   : > { %v651_v21 = vpop.permute.xlu1 %650  ;;  %v649_v22 = vpop.permute.xlu0 %648 }
  0xc4   : > { %v661_v23 = vsel %vm287_vm0, %v651_v21, 0  ;;  %v653_v24 = vsel %vm652_vm8, %v649_v22, %v651_v21  ;;  %v1573_v21 = vperm.slane %v253_v14, 1 }
  0xc5   : > { %v658_v25 = vsel %vm287_vm0, %v653_v24, 0  ;;  %683 = vmatpush.bf16.msrb.mxu3 %v661_v23  ;;  %v1575_v23 = vperm.slane %v253_v14, 0 }
  0xc6   : > { %670 = vmatpush.bf16.msrb.mxu2 %v658_v25 }
  0xc8   : > { %1334 = vmatmul.msk.bf16.vlgmr.msrb.gmra.mxu3 %vm283_vm1, %v1332_v26 }
  0xc9   : > { %1333 = vmatmul.msk.bf16.vlgmr.msrb.gmra.mxu2 %vm283_vm1, %v1332_v26 }
  0xcb   : > { %v707_v28 = vpop.permute.xlu0 %706 }
  0xcc   : > { %v709_v29 = vsel %vm708_vm9, %v705_v27, %v707_v28  ;;  %v717_v30 = vsel %vm287_vm0, %v707_v28, 0  ;;  %v751_v18 = vpop.permute.xlu1 %750 }
  0xcd   : > { %v714_v32 = vsel %vm287_vm0, %v709_v29, 0  ;;  %739 = vmatpush.bf16.msra.mxu1 %v717_v30  ;;  %vm809_vm0 = vcmask 678912  }
  0xce   : > { %726 = vmatpush.bf16.msra.mxu0 %v714_v32 }
  0xd0   : > { %1331 = vmatmul.msk.bf16.vlgmr.msrb.gmra.mxu1 %vm283_vm1, %v1329_v31 }
  0xd1   : > { %1330 = vmatmul.msk.bf16.vlgmr.msrb.gmra.mxu0 %vm283_vm1, %v1329_v31 }
  0xe0   : > { %1337 = vmatmul.msk.bf16.vlgmr.msra.gmra.mxu1 %vm283_vm1, %v1335_v33 }
  0xe1   : > { %1336 = vmatmul.msk.bf16.vlgmr.msra.gmra.mxu0 %vm283_vm1, %v1335_v33  ;;  %vm829_vm1 = vcmask 1043456  }
 0x11c   : > { %v461_v38 = vpop.f32.mrf.mxu3 }
 0x11d   : > { %v316_v39 = vpop.f32.mrf.mxu1  ;;  %v448_v40 = vpop.f32.mrf.mxu2 }
 0x11e   : > { %v303_v41 = vpop.f32.mrf.mxu0  ;;  %v352_v58 = vadd.f32 %v351_v34, %v316_v39 }
 0x11f   : > { %v339_v59 = vadd.f32 %v338_v35, %v303_v41 }
 0x124   : > { %v463_v42 = vpop.f32.mrf.mxu3 }
 0x125   : > { %v318_v43 = vpop.f32.mrf.mxu1  ;;  %v450_v44 = vpop.f32.mrf.mxu2 }
 0x126   : > { %v305_v45 = vpop.f32.mrf.mxu0 }
 0x127   : > { %v1410_v45 = vmov 0.0  }
 0x128   : > { %794 = vst [vmem:[#allocation2] sm:$0xff] %v1410_v45 }
 0x129   : > { %796 = vst.msk [vmem:[#allocation2 + $0x8] sm:$0xff] %vm708_vm9, %v1410_v45 }
 0x12d   : > { %v405_v46 = vpop.f32.mrf.mxu1 }
 0x12e   : > { %v392_v47 = vpop.f32.mrf.mxu0  ;;  %v410_v61 = vadd.f32 %v405_v46, %v352_v58 }
 0x12f   : > { %v409_v63 = vadd.f32 %v392_v47, %v339_v59 }
 0x130   : > { %v466_v2 = vadd.f32 %v461_v38, %v410_v61 }
 0x131   : > { %v465_v3 = vadd.f32 %v448_v40, %v409_v63 }
 0x135   : > { %v407_v48 = vpop.f32.mrf.mxu1 }
 0x136   : > { %v394_v49 = vpop.f32.mrf.mxu0 }
 0x13b   : > { %v573_v50 = vpop.f32.mrf.mxu3 }
 0x13c   : > { %v560_v51 = vpop.f32.mrf.mxu2 }
 0x13d   : > { %v517_v52 = vpop.f32.mrf.mxu1 }
 0x13e   : > { %v504_v53 = vpop.f32.mrf.mxu0  ;;  %v522_v4 = vadd.f32 %v517_v52, %v466_v2  ;;  %v1205_v2 = vld [vmem:[%s1692_s4] sm:$0xff] }
 0x13f   : > { %v521_v5 = vadd.f32 %v504_v53, %v465_v3  ;;  %v811_v3 = vld [vmem:[%s1691_s3] sm:$0xf] }
 0x140   : > { %v578_v9 = vadd.f32 %v573_v50, %v522_v4 }
 0x141   : > { %v577_v11 = vadd.f32 %v560_v51, %v521_v5 }
 0x143   : > { %v575_v54 = vpop.f32.mrf.mxu3 }
 0x144   : > { %v562_v55 = vpop.f32.mrf.mxu2 }
 0x145   : > { %v519_v56 = vpop.f32.mrf.mxu1 }
 0x146   : > { %v506_v57 = vpop.f32.mrf.mxu0 }
 0x14b   : > { %v685_v60 = vpop.f32.mrf.mxu3 }
 0x14c   : > { %v672_v62 = vpop.f32.mrf.mxu2 }
 0x14d   : > { %v629_v0 = vpop.f32.mrf.mxu1 }
 0x14e   : > { %v616_v1 = vpop.f32.mrf.mxu0  ;;  %v634_v12 = vadd.f32 %v629_v0, %v578_v9 }
 0x14f   : > { %v633_v13 = vadd.f32 %v616_v1, %v577_v11 }
 0x150   : > { %v690_v15 = vadd.f32 %v685_v60, %v634_v12  ;;  %v1338_v12 = vld [vmem:[%s1691_s3 + $0x4] sm:$0xf] }
 0x151   : > { %v689_v16 = vadd.f32 %v672_v62, %v633_v13 }
 0x153   : > { %v687_v6 = vpop.f32.mrf.mxu3 }
 0x154   : > { %v674_v7 = vpop.f32.mrf.mxu2 }
 0x155   : > { %v631_v8 = vpop.f32.mrf.mxu1 }
 0x156   : > { %v618_v10 = vpop.f32.mrf.mxu0 }
 0x15d   : > { %v741_v17 = vpop.f32.mrf.mxu1 }
 0x15e   : > { %v746_v19 = vadd.f32 %v741_v17, %v690_v15  ;;  %v728_v20 = vpop.f32.mrf.mxu0 }
 0x15f   : > { %v745_v22 = vadd.f32 %v728_v20, %v689_v16 }
 0x160   : > { %v754_v24 = vadd.f32 %v751_v18, %v746_v19 }
 0x161   : > { %v753_v25 = vadd.f32 %v751_v18, %v745_v22 }
 0x162   : > { %v761_v26 = vmul.f32 %v1573_v21, %v754_v24  ;;  %v1343_v24 = vld [vmem:[%s1691_s3 + $0x8] sm:$0xf] }
 0x163   : > { %v760_v27 = vmul.f32 %v1575_v23, %v753_v25 }
 0x164   : > { %v763_v28 = vsel %vm762_vm10, %v761_v26, 0.0 }
 0x165   : > { %v743_v29 = vpop.f32.mrf.mxu1  ;;  %v764_v30 = vadd.f32 %v763_v28, %v760_v27 }
 0x166   : > { %v730_v31 = vpop.f32.mrf.mxu0 }
 0x167   : > { %765 = vadd.xlane.f32.xlu2 %v764_v30 }
 0x1da   : > { %v766_v32 = vpop.xlane.xlu2 %765 }
 0x1db   : > { %v767_v33 = vmul.f32 0.0069444445, %v766_v32 }
 0x1dd   : > { %v768_v34 = vsub.f32 %v760_v27, %v767_v33  ;;  %v769_v35 = vsub.f32 %v761_v26, %v767_v33 }
 0x1df   : > { %v770_v36 = vmul.f32 %v768_v34, %v1575_v23  ;;  %v771_v37 = vmul.f32 %v769_v35, %v1573_v21 }
 0x1e1   : > { %v772_v38 = vmul.f32 %v770_v36, %v770_v36  ;;  %v773_v39 = vmul.f32 %v771_v37, %v771_v37 }
 0x1e3   : > { %v774_v40 = vsel %vm762_vm10, %v773_v39, 0.0 }
 0x1e4   : > { %v775_v41 = vadd.f32 %v774_v40, %v772_v38 }
 0x1e6   : > { %776 = vadd.xlane.f32.xlu0 %v775_v41 }
 0x259   : > { %v777_v42 = vpop.xlane.xlu0 %776 }
 0x25a   : > { %v778_v43 = vmul.f32 0.0069444445, %v777_v42 }
 0x25c   : > { %v779_v44 = vadd.f32 1e-05, %v778_v43 }
 0x25e   : > { %1389 = vrsqrt.f32 %v779_v44  ;;  %vm786_vm12 = vweird.f32 %v779_v44 }
 0x264   : > { %v1390_v46 = vpop.eup %1389 }
 0x265   : > { %v781_v47 = vmul.f32 %v1390_v46, %v779_v44  ;;  %vm787_vm11 = vweird.f32 %v1390_v46 }
 0x266   : > { %vm788_vm13 = vmor %vm786_vm12, %vm787_vm11  ;;  %vm825_vm11 = vcmask 64512  }
 0x267   : > { %v782_v48 = vmul.f32 %v1390_v46, %v781_v47 }
 0x269   : > { %v783_v49 = vmul.f32 0.5, %v782_v48 }
 0x26b   : > { %v784_v50 = vsub.f32 1.5, %v783_v49 }
 0x26d   : > { %v785_v51 = vmul.f32 %v1390_v46, %v784_v50  ;;  %v1352_v50 = vld [vmem:[%s1691_s3 + $0x14] sm:$0xf] }
 0x26f   : > { %v789_v52 = vsel %vm788_vm13, %v1390_v46, %v785_v51  ;;  %v1355_v51 = vld [vmem:[%s1691_s3 + $0x18] sm:$0xf] }
 0x270   : > { %v790_v53 = vmul.f32 %v789_v52, %v770_v36  ;;  %v791_v55 = vmul.f32 %v789_v52, %v771_v37  ;;  %v1346_v36 = vld [vmem:[%s1691_s3 + $0xc] sm:$0xf]  ;;  %v1349_v37 = vld [vmem:[%s1691_s3 + $0x10] sm:$0xf]  ;;  %v1358_v52 = vld [vmem:[%s1691_s3 + $0x1c] sm:$0xf] }
 0x272   : > { %v792_v54 = vmax.f32 %v790_v53, 0.0  ;;  %v793_v56 = vmax.f32 %v791_v55, 0.0  ;;  %v1361_v53 = vld [vmem:[%s1691_s3 + $0x20] sm:$0xf] }
 0x274   : > { %799 = vrot.lane.b32.xlu1 %v792_v54, %s1411_s19 }
 0x27c   : > { %801 = vrot.lane.b32.xlu1 %v793_v56, %s1411_s19 }
 0x2e6   : > { %v800_v57 = vpop.permute.xlu1 %799 }
 0x2e7   : > { %808 = vst.msk [vmem:[#allocation2] sm:$0xff] %vm807_vm14, %v800_v57 }
 0x2ee   : > { %v812_v58 = vld [vmem:[#allocation2] sm:$0xff]  ;;  %v802_v59 = vpop.permute.xlu1 %801 }
 0x2ef   : > { %v814_v60 = vpack.c.bf16 %v812_v58, %v812_v58  ;;  %v804_v61 = vsel %vm803_vm15, %v800_v57, %v802_v59 }
 0x2f0   : > { %810 = vst.msk [vmem:[#allocation2 + $0x8] sm:$0xff] %vm809_vm0, %v804_v61 }
 0x2f1   : > { %820 = vrot.lane.b32.xlu1 %v814_v60, %s1401_s27  ;;  %v866_v62 = vsel %vm829_vm1, %v814_v60, 0 }
 0x2f2   : > { %878 = vmatpush.bf16.msrb.mxu0 %v866_v62 }
 0x2f5   : > { %1341 = vmatmul.msk.bf16.vlgmr.msrb.gmra.mxu0 %vm825_vm11, %v811_v3 }
 0x2f7   : > { %v813_v63 = vld [vmem:[#allocation2 + $0x8] sm:$0xff] }
 0x2f8   : > { %v815_v0 = vpack.c.bf16 %v813_v63, %v813_v63 }
 0x2fa   : > { %989 = vrot.lane.b32.xlu0 %v815_v0, %s1404_s30  ;;  %901 = vrot.lane.b32.xlu2 %v815_v0, %s1402_s28  ;;  %v869_v1 = vsel %vm829_vm1, %v815_v0, 0 }
 0x2fb   : > { %822 = vrot.lane.b32.xlu1 %v815_v0, %s1401_s27  ;;  %891 = vmatpush.bf16.msrb.mxu1 %v869_v1 }
 0x2fe   : > { %1342 = vmatmul.msk.bf16.vlgmr.msrb.gmra.mxu1 %vm825_vm11, %v811_v3 }
 0x302   : > { %1077 = vrot.lane.b32.xlu0 %v815_v0, %s1406_s8  ;;  %1075 = vrot.lane.b32.xlu2 %v814_v60, %s1406_s8 }
 0x303   : > { %899 = vrot.lane.b32.xlu1 %v814_v60, %s1402_s28  ;;  %s251_s28 = scalar_lea.vmem %s1694_s6, %s1367_s18 }
 0x30a   : > { %1163 = vrot.lane.b32.xlu0 %v814_v60, %s1408_s10  ;;  %1033 = vrot.lane.b32.xlu2 %v815_v0, %s1405_s7 }
 0x30b   : > { %987 = vrot.lane.b32.xlu1 %v814_v60, %s1404_s30 }
 0x312   : > { %1121 = vrot.lane.b32.xlu0 %v815_v0, %s1407_s9  ;;  %1119 = vrot.lane.b32.xlu2 %v814_v60, %s1407_s9 }
 0x313   : > { %943 = vrot.lane.b32.xlu1 %v814_v60, %s1403_s29 }
 0x31b   : > { %945 = vrot.lane.b32.xlu1 %v815_v0, %s1403_s29 }
 0x323   : > { %1031 = vrot.lane.b32.xlu1 %v814_v60, %s1405_s7 }
 0x32b   : > { %1165 = vrot.lane.b32.xlu1 %v815_v0, %s1408_s10 }
 0x333   : > { %1208 = vperm.xlu1 %1387, %v1205_v2  }
 0x354   : > { %v902_v5 = vpop.permute.xlu2 %901 }
 0x355   : > { %v911_v9 = vsel %vm829_vm1, %v902_v5, 0 }
 0x35c   : > { %v1076_v20 = vpop.permute.xlu2 %1075 }
 0x363   : > { %v821_v4 = vpop.permute.xlu1 %820 }
 0x364   : > { %v1034_v30 = vpop.permute.xlu2 %1033 }
 0x365   : > { %v1043_v34 = vsel %vm829_vm1, %v1034_v30, 0 }
 0x36c   : > { %v990_v10 = vpop.permute.xlu0 %989  ;;  %v1120_v40 = vpop.permute.xlu2 %1119 }
 0x36d   : > { %v823_v6 = vpop.permute.xlu1 %822  ;;  %v999_v13 = vsel %vm829_vm1, %v990_v10, 0 }
 0x36e   : > { %v824_v7 = vsel %vm281_vm3, %v821_v4, %v823_v6  ;;  %v834_v8 = vsel %vm829_vm1, %v823_v6, 0 }
 0x36f   : > { %v831_v11 = vsel %vm829_vm1, %v824_v7, 0  ;;  %856 = vmatpush.bf16.msra.mxu3 %v834_v8 }
 0x370   : > { %843 = vmatpush.bf16.msra.mxu2 %v831_v11 }
 0x372   : > { %1340 = vmatmul.msk.bf16.vlgmr.msra.gmra.mxu3 %vm825_vm11, %v1338_v12  ;;  %v880_v55 = vpop.f32.mrf.mxu0 }
 0x373   : > { %933 = vmatpush.bf16.msrb.mxu3 %v911_v9  ;;  %1339 = vmatmul.msk.bf16.vlgmr.msra.gmra.mxu2 %vm825_vm11, %v1338_v12 }
 0x374   : > { %v1078_v17 = vpop.permute.xlu0 %1077 }
 0x375   : > { %v900_v14 = vpop.permute.xlu1 %899  ;;  %v1079_v25 = vsel %vm596_vm7, %v1076_v20, %v1078_v17  ;;  %v1087_v26 = vsel %vm829_vm1, %v1078_v17, 0 }
 0x376   : > { %v903_v15 = vsel %vm372_vm4, %v900_v14, %v902_v5  ;;  %v1084_v27 = vsel %vm829_vm1, %v1079_v25, 0 }
 0x377   : > { %1021 = vmatpush.bf16.msra.mxu3 %v999_v13  ;;  %v908_v16 = vsel %vm829_vm1, %v903_v15, 0 }
 0x378   : > { %920 = vmatpush.bf16.msrb.mxu2 %v908_v16 }
 0x37a   : > { %v882_v57 = vpop.f32.mrf.mxu0 }
 0x37b   : > { %v893_v54 = vpop.f32.mrf.mxu1 }
 0x37c   : > { %v1164_v29 = vpop.permute.xlu0 %1163 }
 0x37d   : > { %v988_v18 = vpop.permute.xlu1 %987 }
 0x37e   : > { %v991_v19 = vsel %vm484_vm5, %v988_v18, %v990_v10 }
 0x37f   : > { %v996_v22 = vsel %vm829_vm1, %v991_v19, 0 }
 0x380   : > { %1008 = vmatpush.bf16.msra.mxu2 %v996_v22 }
 0x382   : > { %1345 = vmatmul.msk.bf16.vlgmr.msrb.gmra.mxu3 %vm825_vm11, %v1343_v24 }
 0x383   : > { %1109 = vmatpush.bf16.msrb.mxu3 %v1087_v26  ;;  %1344 = vmatmul.msk.bf16.vlgmr.msrb.gmra.mxu2 %vm825_vm11, %v1343_v24  ;;  %v895_v56 = vpop.f32.mrf.mxu1 }
 0x384   : > { %1096 = vmatpush.bf16.msrb.mxu2 %v1084_v27  ;;  %v1122_v38 = vpop.permute.xlu0 %1121 }
 0x385   : > { %v944_v28 = vpop.permute.xlu1 %943  ;;  %v1131_v39 = vsel %vm829_vm1, %v1122_v38, 0  ;;  %v1123_v41 = vsel %vm652_vm8, %v1120_v40, %v1122_v38 }
 0x386   : > { %v1128_v45 = vsel %vm829_vm1, %v1123_v41, 0 }
 0x38d   : > { %v946_v31 = vpop.permute.xlu1 %945 }
 0x38e   : > { %v947_v32 = vsel %vm428_vm2, %v944_v28, %v946_v31  ;;  %v955_v33 = vsel %vm829_vm1, %v946_v31, 0 }
 0x38f   : > { %v952_v35 = vsel %vm829_vm1, %v947_v32, 0  ;;  %977 = vmatpush.bf16.msra.mxu1 %v955_v33 }
 0x390   : > { %964 = vmatpush.bf16.msra.mxu0 %v952_v35 }
 0x392   : > { %1348 = vmatmul.msk.bf16.vlgmr.msra.gmra.mxu1 %vm825_vm11, %v1346_v36  ;;  %1351 = vmatmul.msk.bf16.vlgmr.msra.gmra.mxu3 %vm825_vm11, %v1349_v37 }
 0x393   : > { %1065 = vmatpush.bf16.msrb.mxu1 %v1043_v34  ;;  %1347 = vmatmul.msk.bf16.vlgmr.msra.gmra.mxu0 %vm825_vm11, %v1346_v36 }
 0x394   : > { %1350 = vmatmul.msk.bf16.vlgmr.msra.gmra.mxu2 %vm825_vm11, %v1349_v37 }
 0x395   : > { %v1032_v42 = vpop.permute.xlu1 %1031 }
 0x396   : > { %v1035_v43 = vsel %vm540_vm6, %v1032_v42, %v1034_v30 }
 0x397   : > { %1153 = vmatpush.bf16.msra.mxu1 %v1131_v39  ;;  %v1040_v44 = vsel %vm829_vm1, %v1035_v43, 0 }
 0x398   : > { %1052 = vmatpush.bf16.msrb.mxu0 %v1040_v44 }
 0x39c   : > { %1140 = vmatpush.bf16.msra.mxu0 %v1128_v45 }
 0x39d   : > { %v1166_v46 = vpop.permute.xlu1 %1165 }
 0x39e   : > { %v1167_v47 = vsel %vm708_vm9, %v1164_v29, %v1166_v46  ;;  %v1175_v48 = vsel %vm829_vm1, %v1166_v46, 0 }
 0x39f   : > { %v1172_v49 = vsel %vm829_vm1, %v1167_v47, 0  ;;  %1197 = vmatpush.bf16.msra.mxu3 %v1175_v48 }
 0x3a0   : > { %1184 = vmatpush.bf16.msra.mxu2 %v1172_v49 }
 0x3a2   : > { %1354 = vmatmul.msk.bf16.vlgmr.msrb.gmra.mxu1 %vm825_vm11, %v1352_v50  ;;  %1357 = vmatmul.msk.bf16.vlgmr.msrb.gmra.mxu3 %vm825_vm11, %v1355_v51 }
 0x3a3   : > { %1353 = vmatmul.msk.bf16.vlgmr.msrb.gmra.mxu0 %vm825_vm11, %v1352_v50 }
 0x3a4   : > { %1356 = vmatmul.msk.bf16.vlgmr.msrb.gmra.mxu2 %vm825_vm11, %v1355_v51 }
 0x3a5   : > { %v1209_v39 = vpop.permute.xlu1 %1208 }
 0x3b2   : > { %1360 = vmatmul.msk.bf16.vlgmr.msra.gmra.mxu1 %vm825_vm11, %v1358_v52  ;;  %1363 = vmatmul.msk.bf16.vlgmr.msra.gmra.mxu3 %vm825_vm11, %v1361_v53 }
 0x3b3   : > { %1359 = vmatmul.msk.bf16.vlgmr.msra.gmra.mxu0 %vm825_vm11, %v1358_v52 }
 0x3b4   : > { %1362 = vmatmul.msk.bf16.vlgmr.msra.gmra.mxu2 %vm825_vm11, %v1361_v53 }
 0x3f5   : > { %v858_v58 = vpop.f32.mrf.mxu3 }
 0x3f6   : > { %v845_v59 = vpop.f32.mrf.mxu2  ;;  %v894_v15 = vadd.f32 %v893_v54, %v858_v58 }
 0x3f7   : > { %v881_v17 = vadd.f32 %v880_v55, %v845_v59 }
 0x3fd   : > { %v860_v60 = vpop.f32.mrf.mxu3 }
 0x3fe   : > { %v847_v61 = vpop.f32.mrf.mxu2 }
 0x405   : > { %v935_v62 = vpop.f32.mrf.mxu3 }
 0x406   : > { %v922_v63 = vpop.f32.mrf.mxu2  ;;  %v940_v18 = vadd.f32 %v935_v62, %v894_v15 }
 0x407   : > { %v939_v19 = vadd.f32 %v922_v63, %v881_v17 }
 0x40d   : > { %v937_v0 = vpop.f32.mrf.mxu3 }
 0x40e   : > { %v924_v1 = vpop.f32.mrf.mxu2 }
 0x40f   : > { %v979_v2 = vpop.f32.mrf.mxu1 }
 0x410   : > { %v966_v3 = vpop.f32.mrf.mxu0  ;;  %v984_v20 = vadd.f32 %v979_v2, %v940_v18 }
 0x411   : > { %v983_v22 = vadd.f32 %v966_v3, %v939_v19 }
 0x415   : > { %v1023_v4 = vpop.f32.mrf.mxu3 }
 0x416   : > { %v1028_v25 = vadd.f32 %v1023_v4, %v984_v20 }
 0x417   : > { %v1010_v5 = vpop.f32.mrf.mxu2  ;;  %v981_v6 = vpop.f32.mrf.mxu1 }
 0x418   : > { %v968_v7 = vpop.f32.mrf.mxu0  ;;  %v1027_v27 = vadd.f32 %v1010_v5, %v983_v22 }
 0x41d   : > { %v1025_v8 = vpop.f32.mrf.mxu3 }
 0x41f   : > { %v1012_v9 = vpop.f32.mrf.mxu2  ;;  %v1067_v10 = vpop.f32.mrf.mxu1 }
 0x420   : > { %v1054_v11 = vpop.f32.mrf.mxu0  ;;  %v1072_v29 = vadd.f32 %v1067_v10, %v1028_v25 }
 0x421   : > { %v1071_v31 = vadd.f32 %v1054_v11, %v1027_v27 }
 0x425   : > { %v1111_v12 = vpop.f32.mrf.mxu3 }
 0x426   : > { %v1116_v32 = vadd.f32 %v1111_v12, %v1072_v29 }
 0x427   : > { %v1098_v13 = vpop.f32.mrf.mxu2  ;;  %v1069_v14 = vpop.f32.mrf.mxu1 }
 0x428   : > { %v1056_v16 = vpop.f32.mrf.mxu0  ;;  %v1115_v33 = vadd.f32 %v1098_v13, %v1071_v31 }
 0x42d   : > { %v1113_v24 = vpop.f32.mrf.mxu3 }
 0x42f   : > { %v1100_v26 = vpop.f32.mrf.mxu2  ;;  %v1155_v28 = vpop.f32.mrf.mxu1 }
 0x430   : > { %v1142_v30 = vpop.f32.mrf.mxu0  ;;  %v1160_v34 = vadd.f32 %v1155_v28, %v1116_v32 }
 0x431   : > { %v1159_v35 = vadd.f32 %v1142_v30, %v1115_v33 }
 0x435   : > { %v1199_v36 = vpop.f32.mrf.mxu3 }
 0x436   : > { %v1204_v37 = vadd.f32 %v1199_v36, %v1160_v34 }
 0x437   : > { %v1186_v38 = vpop.f32.mrf.mxu2  ;;  %v1157_v41 = vpop.f32.mrf.mxu1 }
 0x438   : > { %v1203_v40 = vadd.f32 %v1186_v38, %v1159_v35  ;;  %v1212_v42 = vadd.f32 %v1209_v39, %v1204_v37  ;;  %v1144_v43 = vpop.f32.mrf.mxu0 }
 0x43a   : > { %v1211_v44 = vadd.f32 %v1209_v39, %v1203_v40  ;;  %v1214_v45 = vmul.f32 %v1212_v42, %v1573_v21 }
 0x43c   : > { %v1213_v46 = vmul.f32 %v1211_v44, %v1575_v23  ;;  %v1215_v47 = vsel %vm762_vm10, %v1214_v45, 0.0 }
 0x43d   : > { %v1201_v49 = vpop.f32.mrf.mxu3 }
 0x43e   : > { %v1216_v48 = vadd.f32 %v1215_v47, %v1213_v46 }
 0x43f   : > { %v1188_v50 = vpop.f32.mrf.mxu2 }
 0x440   : > { %1217 = vadd.xlane.f32.xlu2 %v1216_v48 }
 0x4b3   : > { %v1218_v51 = vpop.xlane.xlu2 %1217 }
 0x4b4   : > { %v1219_v52 = vmul.f32 0.0069444445, %v1218_v51 }
 0x4b6   : > { %v1220_v53 = vsub.f32 %v1213_v46, %v1219_v52  ;;  %v1221_v54 = vsub.f32 %v1214_v45, %v1219_v52 }
 0x4b8   : > { %v1222_v55 = vmul.f32 %v1220_v53, %v1575_v23  ;;  %v1223_v56 = vmul.f32 %v1221_v54, %v1573_v21 }
 0x4ba   : > { %v1224_v57 = vmul.f32 %v1222_v55, %v1222_v55  ;;  %v1225_v58 = vmul.f32 %v1223_v56, %v1223_v56 }
 0x4bc   : > { %v1226_v59 = vsel %vm762_vm10, %v1225_v58, 0.0 }
 0x4bd   : > { %v1227_v60 = vadd.f32 %v1226_v59, %v1224_v57 }
 0x4bf   : > { %1228 = vadd.xlane.f32.xlu0 %v1227_v60 }
 0x532   : > { %v1229_v61 = vpop.xlane.xlu0 %1228 }
 0x533   : > { %v1230_v62 = vmul.f32 0.0069444445, %v1229_v61 }
 0x535   : > { %v1231_v63 = vadd.f32 1e-05, %v1230_v62 }
 0x537   : > { %1391 = vrsqrt.f32 %v1231_v63  ;;  %vm1238_vm3 = vweird.f32 %v1231_v63 }
 0x53d   : > { %v1392_v0 = vpop.eup %1391 }
 0x53e   : > { %v1233_v1 = vmul.f32 %v1392_v0, %v1231_v63  ;;  %vm1239_vm2 = vweird.f32 %v1392_v0 }
 0x53f   : > { %vm1240_vm4 = vmor %vm1238_vm3, %vm1239_vm2 }
 0x540   : > { %v1234_v2 = vmul.f32 %v1392_v0, %v1233_v1 }
 0x542   : > { %v1235_v3 = vmul.f32 0.5, %v1234_v2 }
 0x544   : > { %v1236_v4 = vsub.f32 1.5, %v1235_v3 }
 0x546   : > { %v1237_v23 = vmul.f32 %v1392_v0, %v1236_v4 }
 0x548   : > { %v1241_v21 = vsel %vm1240_vm4, %v1392_v0, %v1237_v23 }
 0x549   : > { %v1242_v5 = vmul.f32 %v1241_v21, %v1222_v55  ;;  %v1243_v6 = vmul.f32 %v1241_v21, %v1223_v56 }
 0x54b   : > { %v1244_v7 = vmax.f32 %v1242_v5, 0.0  ;;  %v1245_v8 = vmax.f32 %v1243_v6, 0.0 }
 0x54d   : > { %1246 = vst [vmem:[%s251_s28] sm:$0xff] %v1244_v7 }
 0x54e   : > { %1247 = vst.msk [vmem:[%s251_s28 + $0x8] sm:$0xff] %vm762_vm10, %v1245_v8 }
 0x54f PF: > { %s16_s21 = sadd.s32 1, %s1399_s21  }
 0x550   : > { %p13_p4 = scmp.ge.s32.totalorder %s16_s21, 4  }
 0x552   :  { %15 = sbr.rel (!%p13_p4) target bundleno = 1 (0x1), region = 90 }

// kernel: model_forward.8
= control target key start
LH: loop header
LB: loop body
LE: loop exit
PB: predicated region body
PF: predicated region fallthrough
CT: control target
= control target key end

     0   :  { %s1243_s21 = smov 0   ;;  %s1396_s0 = inlined_call_operand.vmem [shape: f32[2,8,82], index: 0, kind: input, shape index: {}]   ;;  %s1397_s1 = inlined_call_operand.vmem [shape: bf16[9,16,8], index: 1, kind: input, shape index: {}]   ;;  %s1398_s2 = inlined_call_operand.vmem [shape: f32[16,1], index: 2, kind: input, shape index: {}]   ;;  %s1399_s3 = inlined_call_operand.vmem [shape: bf16[9,16,16], index: 3, kind: input, shape index: {}]   ;;  %s1400_s4 = inlined_call_operand.vmem [shape: f32[16,1], index: 4, kind: input, shape index: {}]   ;;  %s1401_s5 = inlined_call_operand.vmem [shape: f32[1,64], index: 5, kind: input, shape index: {}]   ;;  %s1402_s6 = inlined_call_operand.vmem [shape: f32[2,16,64], index: 6, kind: output, shape index: {}]  }
   0x1 LB: > { %s1007_s22 = sadd.s32 4294967295, %s1195_s21   ;;  %p1011_p0 = scmp.ge.s32.totalorder %s1195_s21, 1  ;;  %s1195_s21 = sphi %s1243_s21, %s16_s21  }
   0x2   : > { %p211_p1 = scmp.lt.s32.totalorder %s1195_s21, 3 }
   0x4   : > { %p212_p2 = pnand %p1011_p0, %p211_p1 }
   0x5   : > { %p240_p3 = scmp.lt.s32.totalorder (!%p212_p2), %s1007_s22, 1  ;;  %s1197_s27 = smov (!%p212_p2), 127  }
   0x6   : > { %215 = sbr.rel (%p212_p2) target bundleno = 1255 (0x4e7), region = 44  ;;  %s1198_s28 = smov (!%p212_p2), 120  }
   0x7   : > { %s1199_s29 = smov (!%p212_p2), 112   ;;  %s1200_s30 = smov (!%p212_p2), 126  }
   0x8   : > { %s1201_s7 = smov (!%p212_p2), 119   ;;  %s1202_s8 = smov (!%p212_p2), 111  }
   0x9   : > { %s1203_s9 = smov (!%p212_p2), 118   ;;  %s1204_s10 = smov (!%p212_p2), 110  }
   0xb   : > { %s1404_s22 = smov (!%p240_p3, %s1007_s22), 1  ;;  %vm270_vm0 = vcmask 1043456   ;;  %vm266_vm1 = vcmask 64512   ;;  %v1140_v3 = vld [vmem:[%s1397_s1] sm:$0xff]  ;;  %v1141_v11 = vld [vmem:[%s1397_s1 + $0x8] sm:$0xff]  ;;  %v1143_v12 = vld [vmem:[%s1397_s1 + $0x18] sm:$0xff] }
   0xc   : > { %s1012_s23 = sshll.u32 %s1404_s22, 3  ;;  %v538_v13 = vld [vmem:[%s1398_s2 + $0x8] sm:$0xff]  ;;  %v537_v14 = vld [vmem:[%s1398_s2] sm:$0xff]  ;;  %v1205_v15 = vmov 0   ;;  %v1142_v20 = vld [vmem:[%s1397_s1 + $0x10] sm:$0xff]  ;;  %vm556_vm2 = vcmask 523264  }
   0xd   : > { %s243_s26 = scalar_lea.vmem %s1396_s0, %s1012_s23  ;;  %1178 = vset.pattern.permute.xlu0 %v1205_v15  ;;  %1177 = vset.pattern.permute.xlu2 %v1205_v15  ;;  %v1144_v24 = vld [vmem:[%s1397_s1 + $0x20] sm:$0xff]  ;;  %v1147_v26 = vld [vmem:[%s1397_s1 + $0x38] sm:$0xff]  ;;  %v1145_v28 = vld [vmem:[%s1397_s1 + $0x28] sm:$0xff]  ;;  %vm605_vm3 = vcmask 670720   ;;  %s1207_s23 = smov 9   ;;  %vm616_vm10 = vcmask 597064  }
   0xe   : > { %v253_v0 = vld [vmem:[%s243_s26] sm:$0xff]  ;;  %1179 = vset.pattern.permute.xlu1 %v1205_v15  ;;  %v1146_v29 = vld [vmem:[%s1397_s1 + $0x30] sm:$0xff]  ;;  %vm636_vm11 = vcmask 130048   ;;  %s1139_s24 = sshll.u32 %s1404_s22, 4 }
   0xf   : > { %v254_v1 = vpack.c.bf16 %v253_v0, %v253_v0  ;;  %v1148_v30 = vld [vmem:[%s1397_s1 + $0x40] sm:$0xff] }
  0x10   : > { %v1319_v59 = vld [vmem:[%s1401_s5] ss:$0 sm:$0xff] }
  0x11   : > { %264 = vrot.lane.b32.xlu0 %v254_v1, %s1197_s27  ;;  %353 = vrot.lane.b32.xlu1 %v254_v1, %s1198_s28  ;;  %v297_v2 = vsel %vm270_vm0, %v254_v1, 0 }
  0x12   : > { %449 = vrot.lane.b32.xlu2 %v254_v1, %s1199_s29  ;;  %306 = vmatpush.bf16.msra.mxu1 %v297_v2 }
  0x15   : > { %1026 = vmatmul.msk.bf16.vlgmr.msra.gmra.mxu1 %vm266_vm1, %v1140_v3 }
  0x19   : > { %321 = vrot.lane.b32.xlu0 %v254_v1, %s1200_s30  ;;  %385 = vrot.lane.b32.xlu1 %v254_v1, %s1201_s7 }
  0x1a   : > { %481 = vrot.lane.b32.xlu2 %v254_v1, %s1202_s8 }
  0x21   : > { %417 = vrot.lane.b32.xlu0 %v254_v1, %s1203_s9  ;;  %513 = vrot.lane.b32.xlu1 %v254_v1, %s1204_s10 }
  0x22   : > { %541 = vperm.xlu2 %1177, %v537_v14  }
  0x29   : > { %546 = vperm.xlu0 %1178, %v538_v13  }
  0x6c   : > { %v450_v4 = vpop.permute.xlu2 %449 }
  0x6d   : > { %v455_v18 = vsel %vm270_vm0, %v450_v4, 0 }
  0x74   : > { %v482_v5 = vpop.permute.xlu2 %481 }
  0x75   : > { %v487_v8 = vsel %vm270_vm0, %v482_v5, 0 }
  0x7c   : > { %v542_v57 = vpop.permute.xlu2 %541 }
  0x83   : > { %v265_v6 = vpop.permute.xlu0 %264  ;;  %v354_v7 = vpop.permute.xlu1 %353 }
  0x84   : > { %v272_v9 = vsel %vm270_vm0, %v265_v6, 0  ;;  %v359_v10 = vsel %vm270_vm0, %v354_v7, 0 }
  0x85   : > { %281 = vmatpush.bf16.msra.mxu0 %v272_v9  ;;  %368 = vmatpush.bf16.msra.mxu3 %v359_v10 }
  0x88   : > { %1021 = vmatmul.msk.bf16.vlgmr.msra.gmra.mxu0 %vm266_vm1, %v1141_v11  ;;  %1040 = vmatmul.msk.bf16.vlgmr.msra.gmra.mxu3 %vm266_vm1, %v1143_v12 }
  0x89   : > { %496 = vmatpush.bf16.msrb.mxu3 %v487_v8 }
  0x8b   : > { %v322_v16 = vpop.permute.xlu0 %321  ;;  %v386_v17 = vpop.permute.xlu1 %385 }
  0x8c   : > { %v327_v19 = vsel %vm270_vm0, %v322_v16, 0  ;;  %v391_v21 = vsel %vm270_vm0, %v386_v17, 0 }
  0x8d   : > { %336 = vmatpush.bf16.msra.mxu2 %v327_v19  ;;  %400 = vmatpush.bf16.msrb.mxu0 %v391_v21 }
  0x90   : > { %1033 = vmatmul.msk.bf16.vlgmr.msra.gmra.mxu2 %vm266_vm1, %v1142_v20 }
  0x91   : > { %464 = vmatpush.bf16.msrb.mxu2 %v455_v18 }
  0x92   : > { %v308_v32 = vpop.f32.mrf.mxu1 }
  0x93   : > { %v418_v22 = vpop.permute.xlu0 %417  ;;  %v514_v23 = vpop.permute.xlu1 %513 }
  0x94   : > { %v423_v25 = vsel %vm270_vm0, %v418_v22, 0  ;;  %v519_v27 = vsel %vm270_vm0, %v514_v23, 0 }
  0x95   : > { %432 = vmatpush.bf16.msrb.mxu1 %v423_v25  ;;  %528 = vmatpush.bf16.msra.mxu0 %v519_v27  ;;  %v1206_v25 = vmov 0.0  }
  0x96   : > { %607 = vst.msk [vmem:[#allocation2 + $0x8] sm:$0xff] %vm605_vm3, %v1206_v25 }
  0x97   : > { %606 = vst.msk [vmem:[#allocation2] sm:$0xff] %vm605_vm3, %v1206_v25 }
  0x98   : > { %1047 = vmatmul.msk.bf16.vlgmr.msrb.gmra.mxu0 %vm266_vm1, %v1144_v24  ;;  %1068 = vmatmul.msk.bf16.vlgmr.msrb.gmra.mxu3 %vm266_vm1, %v1147_v26 }
  0x99   : > { %1054 = vmatmul.msk.bf16.vlgmr.msrb.gmra.mxu1 %vm266_vm1, %v1145_v28 }
  0x9a   : > { %v310_v37 = vpop.f32.mrf.mxu1 }
  0x9b   : > { %v547_v5 = vpop.permute.xlu0 %546 }
  0xa0   : > { %1061 = vmatmul.msk.bf16.vlgmr.msrb.gmra.mxu2 %vm266_vm1, %v1146_v29 }
  0xa8   : > { %1075 = vmatmul.msk.bf16.vlgmr.msra.gmra.mxu0 %vm266_vm1, %v1148_v30 }
 0x105   : > { %v283_v31 = vpop.f32.mrf.mxu0 }
 0x106   : > { %v309_v36 = vadd.f32 %v308_v32, %v283_v31 }
 0x10b   : > { %v370_v34 = vpop.f32.mrf.mxu3 }
 0x10d   : > { %v285_v33 = vpop.f32.mrf.mxu0 }
 0x10e   : > { %v311_v43 = vadd.f32 %v310_v37, %v285_v33 }
 0x113   : > { %v338_v35 = vpop.f32.mrf.mxu2  ;;  %v372_v40 = vpop.f32.mrf.mxu3 }
 0x114   : > { %v343_v39 = vadd.f32 %v338_v35, %v309_v36 }
 0x115   : > { %v402_v38 = vpop.f32.mrf.mxu0 }
 0x116   : > { %v375_v41 = vadd.f32 %v370_v34, %v343_v39  ;;  %v434_v44 = vpop.f32.mrf.mxu1 }
 0x118   : > { %v407_v46 = vadd.f32 %v402_v38, %v375_v41 }
 0x11a   : > { %v439_v48 = vadd.f32 %v434_v44, %v407_v46 }
 0x11b   : > { %v340_v42 = vpop.f32.mrf.mxu2  ;;  %v498_v50 = vpop.f32.mrf.mxu3 }
 0x11c   : > { %v344_v47 = vadd.f32 %v340_v42, %v311_v43 }
 0x11d   : > { %v404_v45 = vpop.f32.mrf.mxu0 }
 0x11e   : > { %v376_v49 = vadd.f32 %v372_v40, %v344_v47  ;;  %v436_v56 = vpop.f32.mrf.mxu1 }
 0x120   : > { %v408_v54 = vadd.f32 %v404_v45, %v376_v49 }
 0x122   : > { %v440_v60 = vadd.f32 %v436_v56, %v408_v54 }
 0x123   : > { %v466_v51 = vpop.f32.mrf.mxu2  ;;  %v500_v1 = vpop.f32.mrf.mxu3 }
 0x124   : > { %v471_v52 = vadd.f32 %v466_v51, %v439_v48 }
 0x125   : > { %v530_v53 = vpop.f32.mrf.mxu0 }
 0x126   : > { %v503_v55 = vadd.f32 %v498_v50, %v471_v52  ;;  %v886_v52 = vld [vmem:[%s1400_s4] sm:$0xff] }
 0x128   : > { %v535_v58 = vadd.f32 %v530_v53, %v503_v55  ;;  %v1149_v53 = vld [vmem:[%s1399_s3] sm:$0xff]  ;;  %v1152_v55 = vld [vmem:[%s1399_s3 + $0x18] sm:$0xff] }
 0x12a   : > { %v549_v61 = vadd.f32 %v542_v57, %v535_v58  ;;  %v1151_v57 = vld [vmem:[%s1399_s3 + $0x10] sm:$0xff] }
 0x12b   : > { %v468_v62 = vpop.f32.mrf.mxu2 }
 0x12c   : > { %v472_v63 = vadd.f32 %v468_v62, %v440_v60  ;;  %v554_v0 = vmul.f32 %v1319_v59, %v549_v61  ;;  %v1150_v61 = vld [vmem:[%s1399_s3 + $0x8] sm:$0xff] }
 0x12d   : > { %v532_v4 = vpop.f32.mrf.mxu0  ;;  %v887_v62 = vld [vmem:[%s1400_s4 + $0x8] sm:$0xff] }
 0x12e   : > { %v504_v2 = vadd.f32 %v500_v1, %v472_v63  ;;  %v557_v3 = vsel %vm556_vm2, %v554_v0, 0.0  ;;  %v1154_v1 = vld [vmem:[%s1399_s3 + $0x28] sm:$0xff] }
 0x12f   : > { %558 = vadd.xlane.f32.xlu1 %v557_v3  ;;  %v1155_v3 = vld [vmem:[%s1399_s3 + $0x30] sm:$0xff] }
 0x130   : > { %v536_v6 = vadd.f32 %v532_v4, %v504_v2  ;;  %v1156_v4 = vld [vmem:[%s1399_s3 + $0x38] sm:$0xff] }
 0x132   : > { %v550_v7 = vadd.f32 %v547_v5, %v536_v6  ;;  %v1153_v6 = vld [vmem:[%s1399_s3 + $0x20] sm:$0xff] }
 0x134   : > { %v555_v8 = vmul.f32 %v1319_v59, %v550_v7  ;;  %v1157_v7 = vld [vmem:[%s1399_s3 + $0x40] sm:$0xff] }
 0x136   : > { %v560_v9 = vsel %vm556_vm2, %v555_v8, 0.0 }
 0x137   : > { %561 = vadd.xlane.f32.xlu2 %v560_v9 }
 0x1a2   : > { %v559_v10 = vpop.xlane.xlu1 %558 }
 0x1a3   : > { %v563_v11 = vmul.f32 0.027777778, %v559_v10 }
 0x1a5   : > { %v565_v12 = vsub.f32 %v554_v0, %v563_v11 }
 0x1a7   : > { %v567_v13 = vmul.f32 %v1319_v59, %v565_v12 }
 0x1a9   : > { %v569_v14 = vmul.f32 %v567_v13, %v567_v13 }
 0x1aa   : > { %v562_v15 = vpop.xlane.xlu2 %561 }
 0x1ab   : > { %v564_v16 = vmul.f32 0.027777778, %v562_v15  ;;  %v571_v17 = vsel %vm556_vm2, %v569_v14, 0.0 }
 0x1ac   : > { %572 = vadd.xlane.f32.xlu0 %v571_v17 }
 0x1ad   : > { %v566_v18 = vsub.f32 %v555_v8, %v564_v16 }
 0x1af   : > { %v568_v19 = vmul.f32 %v1319_v59, %v566_v18 }
 0x1b1   : > { %v570_v20 = vmul.f32 %v568_v19, %v568_v19 }
 0x1b3   : > { %v574_v21 = vsel %vm556_vm2, %v570_v20, 0.0 }
 0x1b4   : > { %575 = vadd.xlane.f32.xlu2 %v574_v21 }
 0x21f   : > { %v573_v22 = vpop.xlane.xlu0 %572 }
 0x220   : > { %v577_v23 = vmul.f32 0.027777778, %v573_v22 }
 0x222   : > { %v579_v24 = vadd.f32 1e-05, %v577_v23 }
 0x224   : > { %1181 = vrsqrt.f32 %v579_v24  ;;  %vm587_vm5 = vweird.f32 %v579_v24 }
 0x227   : > { %v576_v26 = vpop.xlane.xlu2 %575 }
 0x228   : > { %v578_v27 = vmul.f32 0.027777778, %v576_v26 }
 0x22a   : > { %v1182_v28 = vpop.eup %1181  ;;  %v580_v29 = vadd.f32 1e-05, %v578_v27 }
 0x22b   : > { %v582_v30 = vmul.f32 %v1182_v28, %v579_v24  ;;  %vm588_vm4 = vweird.f32 %v1182_v28 }
 0x22c   : > { %1183 = vrsqrt.f32 %v580_v29  ;;  %vm589_vm6 = vmor %vm587_vm5, %vm588_vm4  ;;  %vm597_vm8 = vweird.f32 %v580_v29 }
 0x22d   : > { %v583_v31 = vmul.f32 %v1182_v28, %v582_v30 }
 0x22f   : > { %v584_v32 = vmul.f32 0.5, %v583_v31 }
 0x231   : > { %v585_v33 = vsub.f32 1.5, %v584_v32 }
 0x232   : > { %v1184_v34 = vpop.eup %1183 }
 0x233   : > { %v592_v35 = vmul.f32 %v1184_v34, %v580_v29  ;;  %v586_v36 = vmul.f32 %v1182_v28, %v585_v33  ;;  %vm598_vm7 = vweird.f32 %v1184_v34 }
 0x234   : > { %vm599_vm9 = vmor %vm597_vm8, %vm598_vm7 }
 0x235   : > { %v593_v37 = vmul.f32 %v1184_v34, %v592_v35  ;;  %v590_v38 = vsel %vm589_vm6, %v1182_v28, %v586_v36 }
 0x236   : > { %v601_v39 = vmul.f32 %v590_v38, %v567_v13 }
 0x237   : > { %v594_v40 = vmul.f32 0.5, %v593_v37 }
 0x238   : > { %v603_v41 = vmax.f32 %v601_v39, 0.0 }
 0x239   : > { %v595_v42 = vsub.f32 1.5, %v594_v40 }
 0x23a   : > { %610 = vrot.lane.b32.xlu1 %v603_v41, %s1207_s23 }
 0x23b   : > { %v596_v43 = vmul.f32 %v1184_v34, %v595_v42 }
 0x23d   : > { %v600_v44 = vsel %vm599_vm9, %v1184_v34, %v596_v43 }
 0x23e   : > { %v602_v45 = vmul.f32 %v600_v44, %v568_v19 }
 0x240   : > { %v604_v46 = vmax.f32 %v602_v45, 0.0 }
 0x242   : > { %612 = vrot.lane.b32.xlu2 %v604_v46, %s1207_s23 }
 0x29c   : > { %v613_v47 = vpop.permute.xlu2 %612 }
 0x29d   : > { %618 = vst.msk [vmem:[#allocation2 + $0x8] sm:$0xff] %vm616_vm10, %v613_v47 }
 0x2a4   : > { %v622_v49 = vld [vmem:[#allocation2 + $0x8] sm:$0xff] }
 0x2ac   : > { %v611_v48 = vpop.permute.xlu1 %610 }
 0x2ad   : > { %617 = vst.msk [vmem:[#allocation2] sm:$0xff] %vm616_vm10, %v611_v48 }
 0x2b4   : > { %v621_v50 = vld [vmem:[#allocation2] sm:$0xff] }
 0x2b5   : > { %v623_v51 = vpack.c.bf16 %v622_v49, %v621_v50 }
 0x2b7   : > { %714 = vrot.lane.b32.xlu2 %v623_v51, %s1198_s28  ;;  %684 = vrot.lane.b32.xlu1 %v623_v51, %s1200_s30  ;;  %s248_s30 = scalar_lea.vmem %s1402_s6, %s1139_s24 }
 0x2b8   : > { %633 = vrot.lane.b32.xlu0 %v623_v51, %s1197_s27  ;;  %669 = vmatpush.bf16.msra.mxu2 %v623_v51 }
 0x2bb   : > { %1087 = vmatmul.msk.bf16.vlgmr.msra.gmra.mxu2 %vm636_vm11, %v1149_v53 }
 0x2bf   : > { %804 = vrot.lane.b32.xlu2 %v623_v51, %s1199_s29  ;;  %744 = vrot.lane.b32.xlu1 %v623_v51, %s1201_s7 }
 0x2c0   : > { %774 = vrot.lane.b32.xlu0 %v623_v51, %s1203_s9 }
 0x2c7   : > { %890 = vperm.xlu2 %1177, %v886_v52   ;;  %834 = vrot.lane.b32.xlu1 %v623_v51, %s1202_s8 }
 0x2c8   : > { %864 = vrot.lane.b32.xlu0 %v623_v51, %s1204_s10 }
 0x2cf   : > { %895 = vperm.xlu1 %1179, %v887_v62  }
 0x311   : > { %v715_v54 = vpop.permute.xlu2 %714 }
 0x312   : > { %727 = vmatpush.bf16.msrb.mxu0 %v715_v54 }
 0x315   : > { %1101 = vmatmul.msk.bf16.vlgmr.msrb.gmra.mxu0 %vm636_vm11, %v1152_v55 }
 0x319   : > { %v805_v58 = vpop.permute.xlu2 %804 }
 0x321   : > { %v891_v37 = vpop.permute.xlu2 %890 }
 0x329   : > { %v685_v56 = vpop.permute.xlu1 %684 }
 0x32a   : > { %v634_v60 = vpop.permute.xlu0 %633  ;;  %697 = vmatpush.bf16.msra.mxu3 %v685_v56 }
 0x32b   : > { %647 = vmatpush.bf16.msra.mxu1 %v634_v60 }
 0x32d   : > { %1094 = vmatmul.msk.bf16.vlgmr.msra.gmra.mxu3 %vm636_vm11, %v1151_v57 }
 0x32e   : > { %817 = vmatpush.bf16.msrb.mxu3 %v805_v58  ;;  %1082 = vmatmul.msk.bf16.vlgmr.msra.gmra.mxu1 %vm636_vm11, %v1150_v61 }
 0x331   : > { %v745_v63 = vpop.permute.xlu1 %744 }
 0x332   : > { %v775_v0 = vpop.permute.xlu0 %774  ;;  %757 = vmatpush.bf16.msrb.mxu1 %v745_v63 }
 0x333   : > { %787 = vmatpush.bf16.msrb.mxu2 %v775_v0 }
 0x336   : > { %1115 = vmatmul.msk.bf16.vlgmr.msrb.gmra.mxu2 %vm636_vm11, %v1154_v1 }
 0x339   : > { %v835_v2 = vpop.permute.xlu1 %834 }
 0x33a   : > { %v865_v5 = vpop.permute.xlu0 %864  ;;  %847 = vmatpush.bf16.msra.mxu0 %v835_v2 }
 0x33b   : > { %877 = vmatpush.bf16.msra.mxu1 %v865_v5 }
 0x33d   : > { %1122 = vmatmul.msk.bf16.vlgmr.msrb.gmra.mxu3 %vm636_vm11, %v1155_v3  ;;  %1129 = vmatmul.msk.bf16.vlgmr.msra.gmra.mxu0 %vm636_vm11, %v1156_v4 }
 0x33e   : > { %1108 = vmatmul.msk.bf16.vlgmr.msrb.gmra.mxu1 %vm636_vm11, %v1153_v6  ;;  %v671_v9 = vpop.f32.mrf.mxu2 }
 0x341   : > { %v896_v45 = vpop.permute.xlu1 %895 }
 0x346   : > { %v673_v13 = vpop.f32.mrf.mxu2 }
 0x34e   : > { %1136 = vmatmul.msk.bf16.vlgmr.msra.gmra.mxu1 %vm636_vm11, %v1157_v7 }
 0x392   : > { %v729_v12 = vpop.f32.mrf.mxu0 }
 0x39a   : > { %v731_v18 = vpop.f32.mrf.mxu0 }
 0x3ab   : > { %v649_v8 = vpop.f32.mrf.mxu1 }
 0x3ac   : > { %v672_v14 = vadd.f32 %v671_v9, %v649_v8 }
 0x3b0   : > { %v699_v10 = vpop.f32.mrf.mxu3 }
 0x3b1   : > { %v704_v16 = vadd.f32 %v699_v10, %v672_v14 }
 0x3b3   : > { %v651_v11 = vpop.f32.mrf.mxu1  ;;  %v734_v19 = vadd.f32 %v729_v12, %v704_v16 }
 0x3b4   : > { %v674_v21 = vadd.f32 %v673_v13, %v651_v11 }
 0x3b8   : > { %v701_v15 = vpop.f32.mrf.mxu3 }
 0x3b9   : > { %v789_v20 = vpop.f32.mrf.mxu2  ;;  %v705_v24 = vadd.f32 %v701_v15, %v674_v21 }
 0x3ba   : > { %v849_v29 = vpop.f32.mrf.mxu0 }
 0x3bb   : > { %v759_v17 = vpop.f32.mrf.mxu1  ;;  %v735_v27 = vadd.f32 %v731_v18, %v705_v24 }
 0x3bc   : > { %v764_v22 = vadd.f32 %v759_v17, %v734_v19 }
 0x3be   : > { %v794_v26 = vadd.f32 %v789_v20, %v764_v22 }
 0x3c0   : > { %v819_v23 = vpop.f32.mrf.mxu3 }
 0x3c1   : > { %v824_v28 = vadd.f32 %v819_v23, %v794_v26  ;;  %v791_v31 = vpop.f32.mrf.mxu2 }
 0x3c2   : > { %v851_v41 = vpop.f32.mrf.mxu0 }
 0x3c3   : > { %v761_v25 = vpop.f32.mrf.mxu1  ;;  %v854_v32 = vadd.f32 %v849_v29, %v824_v28 }
 0x3c4   : > { %v765_v30 = vadd.f32 %v761_v25, %v735_v27 }
 0x3c6   : > { %v795_v35 = vadd.f32 %v791_v31, %v765_v30 }
 0x3c8   : > { %v821_v33 = vpop.f32.mrf.mxu3 }
 0x3c9   : > { %v825_v38 = vadd.f32 %v821_v33, %v795_v35 }
 0x3cb   : > { %v879_v34 = vpop.f32.mrf.mxu1  ;;  %v855_v42 = vadd.f32 %v851_v41, %v825_v38 }
 0x3cc   : > { %v884_v36 = vadd.f32 %v879_v34, %v854_v32 }
 0x3ce   : > { %v898_v39 = vadd.f32 %v891_v37, %v884_v36 }
 0x3d0   : > { %v900_v40 = vmul.f32 %v1319_v59, %v898_v39 }
 0x3d2   : > { %v902_v43 = vsel %vm556_vm2, %v900_v40, 0.0 }
 0x3d3   : > { %v881_v44 = vpop.f32.mrf.mxu1  ;;  %903 = vadd.xlane.f32.xlu0 %v902_v43 }
 0x3d4   : > { %v885_v46 = vadd.f32 %v881_v44, %v855_v42 }
 0x3d6   : > { %v899_v47 = vadd.f32 %v896_v45, %v885_v46 }
 0x3d8   : > { %v901_v48 = vmul.f32 %v1319_v59, %v899_v47 }
 0x3da   : > { %v905_v49 = vsel %vm556_vm2, %v901_v48, 0.0 }
 0x3db   : > { %906 = vadd.xlane.f32.xlu2 %v905_v49 }
 0x446   : > { %v904_v50 = vpop.xlane.xlu0 %903 }
 0x447   : > { %v908_v51 = vmul.f32 0.027777778, %v904_v50 }
 0x449   : > { %v910_v52 = vsub.f32 %v900_v40, %v908_v51 }
 0x44b   : > { %v912_v53 = vmul.f32 %v1319_v59, %v910_v52 }
 0x44d   : > { %v914_v54 = vmul.f32 %v912_v53, %v912_v53 }
 0x44e   : > { %v907_v55 = vpop.xlane.xlu2 %906 }
 0x44f   : > { %v909_v56 = vmul.f32 0.027777778, %v907_v55  ;;  %v916_v57 = vsel %vm556_vm2, %v914_v54, 0.0 }
 0x450   : > { %917 = vadd.xlane.f32.xlu1 %v916_v57 }
 0x451   : > { %v911_v58 = vsub.f32 %v901_v48, %v909_v56 }
 0x453   : > { %v913_v60 = vmul.f32 %v1319_v59, %v911_v58 }
 0x455   : > { %v915_v61 = vmul.f32 %v913_v60, %v913_v60 }
 0x457   : > { %v919_v62 = vsel %vm556_vm2, %v915_v61, 0.0 }
 0x458   : > { %920 = vadd.xlane.f32.xlu0 %v919_v62 }
 0x4c3   : > { %v918_v63 = vpop.xlane.xlu1 %917 }
 0x4c4   : > { %v922_v0 = vmul.f32 0.027777778, %v918_v63 }
 0x4c6   : > { %v924_v1 = vadd.f32 1e-05, %v922_v0 }
 0x4c8   : > { %1185 = vrsqrt.f32 %v924_v1  ;;  %vm932_vm13 = vweird.f32 %v924_v1 }
 0x4cb   : > { %v921_v2 = vpop.xlane.xlu0 %920 }
 0x4cc   : > { %v923_v3 = vmul.f32 0.027777778, %v921_v2 }
 0x4ce   : > { %v1186_v4 = vpop.eup %1185  ;;  %v925_v5 = vadd.f32 1e-05, %v923_v3 }
 0x4cf   : > { %v927_v6 = vmul.f32 %v1186_v4, %v924_v1  ;;  %vm933_vm12 = vweird.f32 %v1186_v4 }
 0x4d0   : > { %1187 = vrsqrt.f32 %v925_v5  ;;  %vm934_vm14 = vmor %vm932_vm13, %vm933_vm12  ;;  %vm942_vm0 = vweird.f32 %v925_v5 }
 0x4d1   : > { %v928_v7 = vmul.f32 %v1186_v4, %v927_v6 }
 0x4d3   : > { %v929_v8 = vmul.f32 0.5, %v928_v7 }
 0x4d5   : > { %v930_v9 = vsub.f32 1.5, %v929_v8 }
 0x4d6   : > { %v1188_v59 = vpop.eup %1187 }
 0x4d7   : > { %v931_v10 = vmul.f32 %v1186_v4, %v930_v9  ;;  %v937_v11 = vmul.f32 %v1188_v59, %v925_v5  ;;  %vm943_vm15 = vweird.f32 %v1188_v59 }
 0x4d8   : > { %vm944_vm1 = vmor %vm942_vm0, %vm943_vm15 }
 0x4d9   : > { %v935_v12 = vsel %vm934_vm14, %v1186_v4, %v931_v10  ;;  %v938_v13 = vmul.f32 %v1188_v59, %v937_v11 }
 0x4da   : > { %v946_v14 = vmul.f32 %v935_v12, %v912_v53 }
 0x4db   : > { %v939_v15 = vmul.f32 0.5, %v938_v13 }
 0x4dc   : > { %v948_v16 = vmax.f32 %v946_v14, 0.0 }
 0x4dd   : > { %v940_v17 = vsub.f32 1.5, %v939_v15 }
 0x4de   : > { %950 = vst.msk [vmem:[%s248_s30] sm:$0xff] %vm556_vm2, %v948_v16 }
 0x4df   : > { %v941_v18 = vmul.f32 %v1188_v59, %v940_v17 }
 0x4e1   : > { %v945_v19 = vsel %vm944_vm1, %v1188_v59, %v941_v18 }
 0x4e2   : > { %v947_v20 = vmul.f32 %v945_v19, %v913_v60 }
 0x4e4   : > { %v949_v21 = vmax.f32 %v947_v20, 0.0 }
 0x4e6   : > { %951 = vst.msk [vmem:[%s248_s30 + $0x8] sm:$0xff] %vm556_vm2, %v949_v21 }
 0x4e7 PF: > { %s16_s21 = sadd.s32 1, %s1195_s21  }
 0x4e8   : > { %p13_p4 = scmp.ge.s32.totalorder %s16_s21, 4  }
 0x4ea   :  { %15 = sbr.rel (!%p13_p4) target bundleno = 1 (0x1), region = 90 }

// kernel: model_forward.9
= control target key start
LH: loop header
LB: loop body
LE: loop exit
PB: predicated region body
PF: predicated region fallthrough
CT: control target
= control target key end

     0   :  { %s1228_s21 = smov 0   ;;  %s1375_s0 = inlined_call_operand.vmem [shape: f32[2,16,37], index: 0, kind: input, shape index: {}]   ;;  %s1376_s1 = inlined_call_operand.vmem [shape: bf16[9,16,16], index: 1, kind: input, shape index: {}]   ;;  %s1377_s2 = inlined_call_operand.vmem [shape: f32[16,1], index: 2, kind: input, shape index: {}]   ;;  %s1378_s3 = inlined_call_operand.vmem [shape: bf16[9,16,16], index: 3, kind: input, shape index: {}]   ;;  %s1379_s4 = inlined_call_operand.vmem [shape: f32[16,1], index: 4, kind: input, shape index: {}]   ;;  %s1380_s5 = inlined_call_operand.vmem [shape: f32[1,25], index: 5, kind: input, shape index: {}]   ;;  %s1381_s6 = inlined_call_operand.vmem [shape: f32[2,16,25], index: 6, kind: output, shape index: {}]  }
   0x1 LB: > { %s990_s22 = sadd.s32 4294967295, %s1180_s21   ;;  %p994_p0 = scmp.ge.s32.totalorder %s1180_s21, 1  ;;  %s1180_s21 = sphi %s1228_s21, %s16_s21  }
   0x2   : > { %p212_p1 = scmp.lt.s32.totalorder %s1180_s21, 3 }
   0x4   : > { %p213_p2 = pnand %p994_p0, %p212_p1 }
   0x5   : > { %p242_p3 = scmp.lt.s32.totalorder (!%p213_p2), %s990_s22, 1  ;;  %s1182_s27 = smov (!%p213_p2), 127  }
   0x6   : > { %216 = sbr.rel (%p213_p2) target bundleno = 1254 (0x4e6), region = 44  ;;  %s1183_s28 = smov (!%p213_p2), 123  }
   0x7   : > { %s1184_s29 = smov (!%p213_p2), 118   ;;  %s1185_s30 = smov (!%p213_p2), 126  }
   0x8   : > { %s1186_s7 = smov (!%p213_p2), 122   ;;  %s1187_s8 = smov (!%p213_p2), 117  }
   0x9   : > { %s1188_s9 = smov (!%p213_p2), 121   ;;  %s1189_s10 = smov (!%p213_p2), 116  }
   0xa   : > { %s1192_s25 = smov (!%p213_p2), 6  }
   0xb   : > { %s1383_s22 = smov (!%p242_p3, %s990_s22), 1  ;;  %vm271_vm0 = vcmask 130048   ;;  %v1125_v3 = vld [vmem:[%s1376_s1] sm:$0xff]  ;;  %v1126_v8 = vld [vmem:[%s1376_s1 + $0x8] sm:$0xff]  ;;  %v1128_v9 = vld [vmem:[%s1376_s1 + $0x18] sm:$0xff]  ;;  %v1190_v12 = vmov 0  }
   0xc   : > { %s1123_s23 = sshll.u32 %s1383_s22, 4  ;;  %v522_v10 = vld [vmem:[%s1377_s2 + $0x8] sm:$0xff]  ;;  %v521_v11 = vld [vmem:[%s1377_s2] sm:$0xff]  ;;  %1163 = vset.pattern.permute.xlu0 %v1190_v12  ;;  %1162 = vset.pattern.permute.xlu2 %v1190_v12  ;;  %v1127_v14 = vld [vmem:[%s1376_s1 + $0x10] sm:$0xff]  ;;  %vm540_vm1 = vcmask 203776   ;;  %vm589_vm2 = vcmask 302080  }
   0xd   : > { %s246_s26 = scalar_lea.vmem %s1375_s0, %s1123_s23  ;;  %1164 = vset.pattern.permute.xlu1 %v1190_v12  ;;  %v1129_v16 = vld [vmem:[%s1376_s1 + $0x20] sm:$0xff]  ;;  %v1132_v18 = vld [vmem:[%s1376_s1 + $0x38] sm:$0xff]  ;;  %v1130_v20 = vld [vmem:[%s1376_s1 + $0x28] sm:$0xff]  ;;  %vm600_vm9 = vcmask 252976  }
   0xe   : > { %v256_v0 = vld [vmem:[%s246_s26] sm:$0xff]  ;;  %v257_v1 = vld [vmem:[%s246_s26 + $0x8] sm:$0xff]  ;;  %v1131_v21 = vld [vmem:[%s1376_s1 + $0x30] sm:$0xff] }
   0xf   : > { %v258_v2 = vpack.c.bf16 %v257_v1, %v256_v0  ;;  %v1133_v22 = vld [vmem:[%s1376_s1 + $0x40] sm:$0xff] }
  0x10   : > { %v1297_v51 = vld [vmem:[%s1380_s5] ss:$0 sm:$0xff] }
  0x11   : > { %268 = vrot.lane.b32.xlu0 %v258_v2, %s1182_s27  ;;  %349 = vrot.lane.b32.xlu1 %v258_v2, %s1183_s28 }
  0x12   : > { %439 = vrot.lane.b32.xlu2 %v258_v2, %s1184_s29  ;;  %304 = vmatpush.bf16.msra.mxu1 %v258_v2 }
  0x15   : > { %1010 = vmatmul.msk.bf16.vlgmr.msra.gmra.mxu1 %vm271_vm0, %v1125_v3 }
  0x19   : > { %319 = vrot.lane.b32.xlu0 %v258_v2, %s1185_s30  ;;  %379 = vrot.lane.b32.xlu1 %v258_v2, %s1186_s7 }
  0x1a   : > { %469 = vrot.lane.b32.xlu2 %v258_v2, %s1187_s8 }
  0x21   : > { %409 = vrot.lane.b32.xlu0 %v258_v2, %s1188_s9  ;;  %499 = vrot.lane.b32.xlu1 %v258_v2, %s1189_s10 }
  0x22   : > { %525 = vperm.xlu2 %1162, %v521_v11  }
  0x29   : > { %530 = vperm.xlu0 %1163, %v522_v10  }
  0x6c   : > { %v440_v4 = vpop.permute.xlu2 %439 }
  0x74   : > { %v470_v5 = vpop.permute.xlu2 %469 }
  0x7c   : > { %v526_v49 = vpop.permute.xlu2 %525 }
  0x83   : > { %v269_v6 = vpop.permute.xlu0 %268  ;;  %v350_v7 = vpop.permute.xlu1 %349 }
  0x84   : > { %282 = vmatpush.bf16.msra.mxu0 %v269_v6  ;;  %362 = vmatpush.bf16.msra.mxu3 %v350_v7 }
  0x87   : > { %1005 = vmatmul.msk.bf16.vlgmr.msra.gmra.mxu0 %vm271_vm0, %v1126_v8  ;;  %1024 = vmatmul.msk.bf16.vlgmr.msra.gmra.mxu3 %vm271_vm0, %v1128_v9 }
  0x88   : > { %482 = vmatpush.bf16.msrb.mxu3 %v470_v5 }
  0x8b   : > { %v320_v13 = vpop.permute.xlu0 %319  ;;  %v380_v15 = vpop.permute.xlu1 %379 }
  0x8c   : > { %332 = vmatpush.bf16.msra.mxu2 %v320_v13  ;;  %392 = vmatpush.bf16.msrb.mxu0 %v380_v15 }
  0x8f   : > { %1017 = vmatmul.msk.bf16.vlgmr.msra.gmra.mxu2 %vm271_vm0, %v1127_v14 }
  0x90   : > { %452 = vmatpush.bf16.msrb.mxu2 %v440_v4 }
  0x92   : > { %v306_v24 = vpop.f32.mrf.mxu1 }
  0x93   : > { %v410_v17 = vpop.permute.xlu0 %409  ;;  %v500_v19 = vpop.permute.xlu1 %499 }
  0x94   : > { %422 = vmatpush.bf16.msrb.mxu1 %v410_v17  ;;  %512 = vmatpush.bf16.msra.mxu0 %v500_v19  ;;  %v1191_v17 = vmov 0.0  }
  0x95   : > { %591 = vst.msk [vmem:[#allocation2 + $0x8] sm:$0xff] %vm589_vm2, %v1191_v17 }
  0x96   : > { %590 = vst.msk [vmem:[#allocation2] sm:$0xff] %vm589_vm2, %v1191_v17 }
  0x97   : > { %1031 = vmatmul.msk.bf16.vlgmr.msrb.gmra.mxu0 %vm271_vm0, %v1129_v16  ;;  %1052 = vmatmul.msk.bf16.vlgmr.msrb.gmra.mxu3 %vm271_vm0, %v1132_v18 }
  0x98   : > { %1038 = vmatmul.msk.bf16.vlgmr.msrb.gmra.mxu1 %vm271_vm0, %v1130_v20 }
  0x9a   : > { %v308_v29 = vpop.f32.mrf.mxu1 }
  0x9b   : > { %v531_v61 = vpop.permute.xlu0 %530 }
  0x9f   : > { %1045 = vmatmul.msk.bf16.vlgmr.msrb.gmra.mxu2 %vm271_vm0, %v1131_v21 }
  0xa7   : > { %1059 = vmatmul.msk.bf16.vlgmr.msra.gmra.mxu0 %vm271_vm0, %v1133_v22 }
 0x104   : > { %v284_v23 = vpop.f32.mrf.mxu0 }
 0x105   : > { %v307_v28 = vadd.f32 %v306_v24, %v284_v23 }
 0x10a   : > { %v364_v26 = vpop.f32.mrf.mxu3 }
 0x10c   : > { %v286_v25 = vpop.f32.mrf.mxu0 }
 0x10d   : > { %v309_v35 = vadd.f32 %v308_v29, %v286_v25 }
 0x112   : > { %v334_v27 = vpop.f32.mrf.mxu2  ;;  %v366_v32 = vpop.f32.mrf.mxu3 }
 0x113   : > { %v339_v31 = vadd.f32 %v334_v27, %v307_v28 }
 0x114   : > { %v394_v30 = vpop.f32.mrf.mxu0 }
 0x115   : > { %v369_v33 = vadd.f32 %v364_v26, %v339_v31  ;;  %v424_v36 = vpop.f32.mrf.mxu1 }
 0x117   : > { %v399_v38 = vadd.f32 %v394_v30, %v369_v33 }
 0x119   : > { %v429_v40 = vadd.f32 %v424_v36, %v399_v38 }
 0x11a   : > { %v336_v34 = vpop.f32.mrf.mxu2  ;;  %v484_v42 = vpop.f32.mrf.mxu3 }
 0x11b   : > { %v340_v39 = vadd.f32 %v336_v34, %v309_v35 }
 0x11c   : > { %v396_v37 = vpop.f32.mrf.mxu0 }
 0x11d   : > { %v370_v41 = vadd.f32 %v366_v32, %v340_v39  ;;  %v426_v48 = vpop.f32.mrf.mxu1 }
 0x11f   : > { %v400_v46 = vadd.f32 %v396_v37, %v370_v41 }
 0x121   : > { %v430_v52 = vadd.f32 %v426_v48, %v400_v46 }
 0x122   : > { %v454_v43 = vpop.f32.mrf.mxu2  ;;  %v486_v57 = vpop.f32.mrf.mxu3 }
 0x123   : > { %v459_v44 = vadd.f32 %v454_v43, %v429_v40 }
 0x124   : > { %v514_v45 = vpop.f32.mrf.mxu0 }
 0x125   : > { %v489_v47 = vadd.f32 %v484_v42, %v459_v44  ;;  %v869_v44 = vld [vmem:[%s1379_s4] sm:$0xff] }
 0x127   : > { %v519_v50 = vadd.f32 %v514_v45, %v489_v47  ;;  %v1134_v45 = vld [vmem:[%s1378_s3] sm:$0xff]  ;;  %v1137_v47 = vld [vmem:[%s1378_s3 + $0x18] sm:$0xff] }
 0x129   : > { %v533_v53 = vadd.f32 %v526_v49, %v519_v50  ;;  %v1136_v49 = vld [vmem:[%s1378_s3 + $0x10] sm:$0xff] }
 0x12a   : > { %v456_v54 = vpop.f32.mrf.mxu2 }
 0x12b   : > { %v460_v55 = vadd.f32 %v456_v54, %v430_v52  ;;  %v538_v56 = vmul.f32 %v1297_v51, %v533_v53  ;;  %v1135_v53 = vld [vmem:[%s1378_s3 + $0x8] sm:$0xff] }
 0x12c   : > { %v516_v60 = vpop.f32.mrf.mxu0  ;;  %v870_v54 = vld [vmem:[%s1379_s4 + $0x8] sm:$0xff] }
 0x12d   : > { %v490_v58 = vadd.f32 %v486_v57, %v460_v55  ;;  %v541_v59 = vsel %vm540_vm1, %v538_v56, 0.0  ;;  %v1139_v57 = vld [vmem:[%s1378_s3 + $0x28] sm:$0xff] }
 0x12e   : > { %542 = vadd.xlane.f32.xlu1 %v541_v59  ;;  %v1140_v59 = vld [vmem:[%s1378_s3 + $0x30] sm:$0xff] }
 0x12f   : > { %v520_v62 = vadd.f32 %v516_v60, %v490_v58  ;;  %v1141_v60 = vld [vmem:[%s1378_s3 + $0x38] sm:$0xff] }
 0x131   : > { %v534_v63 = vadd.f32 %v531_v61, %v520_v62  ;;  %v1138_v62 = vld [vmem:[%s1378_s3 + $0x20] sm:$0xff] }
 0x133   : > { %v539_v0 = vmul.f32 %v1297_v51, %v534_v63  ;;  %v1142_v63 = vld [vmem:[%s1378_s3 + $0x40] sm:$0xff] }
 0x135   : > { %v544_v1 = vsel %vm540_vm1, %v539_v0, 0.0 }
 0x136   : > { %545 = vadd.xlane.f32.xlu2 %v544_v1 }
 0x1a1   : > { %v543_v2 = vpop.xlane.xlu1 %542 }
 0x1a2   : > { %v547_v3 = vmul.f32 0.11111111, %v543_v2 }
 0x1a4   : > { %v549_v4 = vsub.f32 %v538_v56, %v547_v3 }
 0x1a6   : > { %v551_v5 = vmul.f32 %v1297_v51, %v549_v4 }
 0x1a8   : > { %v553_v6 = vmul.f32 %v551_v5, %v551_v5 }
 0x1a9   : > { %v546_v7 = vpop.xlane.xlu2 %545 }
 0x1aa   : > { %v548_v8 = vmul.f32 0.11111111, %v546_v7  ;;  %v555_v9 = vsel %vm540_vm1, %v553_v6, 0.0 }
 0x1ab   : > { %556 = vadd.xlane.f32.xlu0 %v555_v9 }
 0x1ac   : > { %v550_v10 = vsub.f32 %v539_v0, %v548_v8 }
 0x1ae   : > { %v552_v11 = vmul.f32 %v1297_v51, %v550_v10 }
 0x1b0   : > { %v554_v12 = vmul.f32 %v552_v11, %v552_v11 }
 0x1b2   : > { %v558_v13 = vsel %vm540_vm1, %v554_v12, 0.0 }
 0x1b3   : > { %559 = vadd.xlane.f32.xlu2 %v558_v13 }
 0x21e   : > { %v557_v14 = vpop.xlane.xlu0 %556 }
 0x21f   : > { %v561_v15 = vmul.f32 0.11111111, %v557_v14 }
 0x221   : > { %v563_v16 = vadd.f32 1e-05, %v561_v15 }
 0x223   : > { %1166 = vrsqrt.f32 %v563_v16  ;;  %vm571_vm4 = vweird.f32 %v563_v16 }
 0x226   : > { %v560_v18 = vpop.xlane.xlu2 %559 }
 0x227   : > { %v562_v19 = vmul.f32 0.11111111, %v560_v18 }
 0x229   : > { %v1167_v20 = vpop.eup %1166  ;;  %v564_v21 = vadd.f32 1e-05, %v562_v19 }
 0x22a   : > { %v566_v22 = vmul.f32 %v1167_v20, %v563_v16  ;;  %vm572_vm3 = vweird.f32 %v1167_v20 }
 0x22b   : > { %1168 = vrsqrt.f32 %v564_v21  ;;  %vm573_vm5 = vmor %vm571_vm4, %vm572_vm3  ;;  %vm581_vm7 = vweird.f32 %v564_v21 }
 0x22c   : > { %v567_v23 = vmul.f32 %v1167_v20, %v566_v22 }
 0x22e   : > { %v568_v24 = vmul.f32 0.5, %v567_v23 }
 0x230   : > { %v569_v25 = vsub.f32 1.5, %v568_v24 }
 0x231   : > { %v1169_v26 = vpop.eup %1168 }
 0x232   : > { %v576_v27 = vmul.f32 %v1169_v26, %v564_v21  ;;  %v570_v28 = vmul.f32 %v1167_v20, %v569_v25  ;;  %vm582_vm6 = vweird.f32 %v1169_v26 }
 0x233   : > { %vm583_vm8 = vmor %vm581_vm7, %vm582_vm6 }
 0x234   : > { %v577_v29 = vmul.f32 %v1169_v26, %v576_v27  ;;  %v574_v30 = vsel %vm573_vm5, %v1167_v20, %v570_v28 }
 0x235   : > { %v585_v31 = vmul.f32 %v574_v30, %v551_v5 }
 0x236   : > { %v578_v32 = vmul.f32 0.5, %v577_v29 }
 0x237   : > { %v587_v33 = vmax.f32 %v585_v31, 0.0 }
 0x238   : > { %v579_v34 = vsub.f32 1.5, %v578_v32 }
 0x239   : > { %594 = vrot.lane.b32.xlu1 %v587_v33, %s1192_s25 }
 0x23a   : > { %v580_v35 = vmul.f32 %v1169_v26, %v579_v34 }
 0x23c   : > { %v584_v36 = vsel %vm583_vm8, %v1169_v26, %v580_v35 }
 0x23d   : > { %v586_v37 = vmul.f32 %v584_v36, %v552_v11 }
 0x23f   : > { %v588_v38 = vmax.f32 %v586_v37, 0.0 }
 0x241   : > { %596 = vrot.lane.b32.xlu2 %v588_v38, %s1192_s25 }
 0x29b   : > { %v597_v39 = vpop.permute.xlu2 %596 }
 0x29c   : > { %602 = vst.msk [vmem:[#allocation2 + $0x8] sm:$0xff] %vm600_vm9, %v597_v39 }
 0x2a3   : > { %v606_v41 = vld [vmem:[#allocation2 + $0x8] sm:$0xff] }
 0x2ab   : > { %v595_v40 = vpop.permute.xlu1 %594 }
 0x2ac   : > { %601 = vst.msk [vmem:[#allocation2] sm:$0xff] %vm600_vm9, %v595_v40 }
 0x2b3   : > { %v605_v42 = vld [vmem:[#allocation2] sm:$0xff] }
 0x2b4   : > { %v607_v43 = vpack.c.bf16 %v606_v41, %v605_v42 }
 0x2b6   : > { %697 = vrot.lane.b32.xlu2 %v607_v43, %s1183_s28  ;;  %667 = vrot.lane.b32.xlu1 %v607_v43, %s1185_s30  ;;  %s251_s30 = scalar_lea.vmem %s1381_s6, %s1123_s23 }
 0x2b7   : > { %617 = vrot.lane.b32.xlu0 %v607_v43, %s1182_s27  ;;  %652 = vmatpush.bf16.msra.mxu2 %v607_v43 }
 0x2ba   : > { %1071 = vmatmul.msk.bf16.vlgmr.msra.gmra.mxu2 %vm271_vm0, %v1134_v45 }
 0x2be   : > { %787 = vrot.lane.b32.xlu2 %v607_v43, %s1184_s29  ;;  %727 = vrot.lane.b32.xlu1 %v607_v43, %s1186_s7 }
 0x2bf   : > { %757 = vrot.lane.b32.xlu0 %v607_v43, %s1188_s9 }
 0x2c6   : > { %873 = vperm.xlu2 %1162, %v869_v44   ;;  %817 = vrot.lane.b32.xlu1 %v607_v43, %s1187_s8 }
 0x2c7   : > { %847 = vrot.lane.b32.xlu0 %v607_v43, %s1189_s10 }
 0x2ce   : > { %878 = vperm.xlu1 %1164, %v870_v54  }
 0x310   : > { %v698_v46 = vpop.permute.xlu2 %697 }
 0x311   : > { %710 = vmatpush.bf16.msrb.mxu0 %v698_v46 }
 0x314   : > { %1085 = vmatmul.msk.bf16.vlgmr.msrb.gmra.mxu0 %vm271_vm0, %v1137_v47 }
 0x318   : > { %v788_v50 = vpop.permute.xlu2 %787 }
 0x320   : > { %v874_v29 = vpop.permute.xlu2 %873 }
 0x328   : > { %v668_v48 = vpop.permute.xlu1 %667 }
 0x329   : > { %v618_v52 = vpop.permute.xlu0 %617  ;;  %680 = vmatpush.bf16.msra.mxu3 %v668_v48 }
 0x32a   : > { %630 = vmatpush.bf16.msra.mxu1 %v618_v52 }
 0x32c   : > { %1078 = vmatmul.msk.bf16.vlgmr.msra.gmra.mxu3 %vm271_vm0, %v1136_v49 }
 0x32d   : > { %800 = vmatpush.bf16.msrb.mxu3 %v788_v50  ;;  %1066 = vmatmul.msk.bf16.vlgmr.msra.gmra.mxu1 %vm271_vm0, %v1135_v53 }
 0x330   : > { %v728_v55 = vpop.permute.xlu1 %727 }
 0x331   : > { %v758_v56 = vpop.permute.xlu0 %757  ;;  %740 = vmatpush.bf16.msrb.mxu1 %v728_v55 }
 0x332   : > { %770 = vmatpush.bf16.msrb.mxu2 %v758_v56 }
 0x335   : > { %1099 = vmatmul.msk.bf16.vlgmr.msrb.gmra.mxu2 %vm271_vm0, %v1139_v57 }
 0x338   : > { %v818_v58 = vpop.permute.xlu1 %817 }
 0x339   : > { %v848_v61 = vpop.permute.xlu0 %847  ;;  %830 = vmatpush.bf16.msra.mxu0 %v818_v58 }
 0x33a   : > { %860 = vmatpush.bf16.msra.mxu1 %v848_v61 }
 0x33c   : > { %1106 = vmatmul.msk.bf16.vlgmr.msrb.gmra.mxu3 %vm271_vm0, %v1140_v59  ;;  %1113 = vmatmul.msk.bf16.vlgmr.msra.gmra.mxu0 %vm271_vm0, %v1141_v60 }
 0x33d   : > { %1092 = vmatmul.msk.bf16.vlgmr.msrb.gmra.mxu1 %vm271_vm0, %v1138_v62  ;;  %v654_v1 = vpop.f32.mrf.mxu2 }
 0x340   : > { %v879_v37 = vpop.permute.xlu1 %878 }
 0x345   : > { %v656_v5 = vpop.f32.mrf.mxu2 }
 0x34d   : > { %1120 = vmatmul.msk.bf16.vlgmr.msra.gmra.mxu1 %vm271_vm0, %v1142_v63 }
 0x391   : > { %v712_v4 = vpop.f32.mrf.mxu0 }
 0x399   : > { %v714_v10 = vpop.f32.mrf.mxu0 }
 0x3aa   : > { %v632_v0 = vpop.f32.mrf.mxu1 }
 0x3ab   : > { %v655_v6 = vadd.f32 %v654_v1, %v632_v0 }
 0x3af   : > { %v682_v2 = vpop.f32.mrf.mxu3 }
 0x3b0   : > { %v687_v8 = vadd.f32 %v682_v2, %v655_v6 }
 0x3b2   : > { %v634_v3 = vpop.f32.mrf.mxu1  ;;  %v717_v11 = vadd.f32 %v712_v4, %v687_v8 }
 0x3b3   : > { %v657_v13 = vadd.f32 %v656_v5, %v634_v3 }
 0x3b7   : > { %v684_v7 = vpop.f32.mrf.mxu3 }
 0x3b8   : > { %v772_v12 = vpop.f32.mrf.mxu2  ;;  %v688_v16 = vadd.f32 %v684_v7, %v657_v13 }
 0x3b9   : > { %v832_v21 = vpop.f32.mrf.mxu0 }
 0x3ba   : > { %v742_v9 = vpop.f32.mrf.mxu1  ;;  %v718_v19 = vadd.f32 %v714_v10, %v688_v16 }
 0x3bb   : > { %v747_v14 = vadd.f32 %v742_v9, %v717_v11 }
 0x3bd   : > { %v777_v18 = vadd.f32 %v772_v12, %v747_v14 }
 0x3bf   : > { %v802_v15 = vpop.f32.mrf.mxu3 }
 0x3c0   : > { %v807_v20 = vadd.f32 %v802_v15, %v777_v18  ;;  %v774_v23 = vpop.f32.mrf.mxu2 }
 0x3c1   : > { %v834_v33 = vpop.f32.mrf.mxu0 }
 0x3c2   : > { %v744_v17 = vpop.f32.mrf.mxu1  ;;  %v837_v24 = vadd.f32 %v832_v21, %v807_v20 }
 0x3c3   : > { %v748_v22 = vadd.f32 %v744_v17, %v718_v19 }
 0x3c5   : > { %v778_v27 = vadd.f32 %v774_v23, %v748_v22 }
 0x3c7   : > { %v804_v25 = vpop.f32.mrf.mxu3 }
 0x3c8   : > { %v808_v30 = vadd.f32 %v804_v25, %v778_v27 }
 0x3ca   : > { %v862_v26 = vpop.f32.mrf.mxu1  ;;  %v838_v34 = vadd.f32 %v834_v33, %v808_v30 }
 0x3cb   : > { %v867_v28 = vadd.f32 %v862_v26, %v837_v24 }
 0x3cd   : > { %v881_v31 = vadd.f32 %v874_v29, %v867_v28 }
 0x3cf   : > { %v883_v32 = vmul.f32 %v1297_v51, %v881_v31 }
 0x3d1   : > { %v885_v35 = vsel %vm540_vm1, %v883_v32, 0.0 }
 0x3d2   : > { %v864_v36 = vpop.f32.mrf.mxu1  ;;  %886 = vadd.xlane.f32.xlu0 %v885_v35 }
 0x3d3   : > { %v868_v38 = vadd.f32 %v864_v36, %v838_v34 }
 0x3d5   : > { %v882_v39 = vadd.f32 %v879_v37, %v868_v38 }
 0x3d7   : > { %v884_v40 = vmul.f32 %v1297_v51, %v882_v39 }
 0x3d9   : > { %v888_v41 = vsel %vm540_vm1, %v884_v40, 0.0 }
 0x3da   : > { %889 = vadd.xlane.f32.xlu2 %v888_v41 }
 0x445   : > { %v887_v42 = vpop.xlane.xlu0 %886 }
 0x446   : > { %v891_v43 = vmul.f32 0.11111111, %v887_v42 }
 0x448   : > { %v893_v44 = vsub.f32 %v883_v32, %v891_v43 }
 0x44a   : > { %v895_v45 = vmul.f32 %v1297_v51, %v893_v44 }
 0x44c   : > { %v897_v46 = vmul.f32 %v895_v45, %v895_v45 }
 0x44d   : > { %v890_v47 = vpop.xlane.xlu2 %889 }
 0x44e   : > { %v892_v48 = vmul.f32 0.11111111, %v890_v47  ;;  %v899_v49 = vsel %vm540_vm1, %v897_v46, 0.0 }
 0x44f   : > { %900 = vadd.xlane.f32.xlu1 %v899_v49 }
 0x450   : > { %v894_v50 = vsub.f32 %v884_v40, %v892_v48 }
 0x452   : > { %v896_v52 = vmul.f32 %v1297_v51, %v894_v50 }
 0x454   : > { %v898_v53 = vmul.f32 %v896_v52, %v896_v52 }
 0x456   : > { %v902_v54 = vsel %vm540_vm1, %v898_v53, 0.0 }
 0x457   : > { %903 = vadd.xlane.f32.xlu0 %v902_v54 }
 0x4c2   : > { %v901_v55 = vpop.xlane.xlu1 %900 }
 0x4c3   : > { %v905_v56 = vmul.f32 0.11111111, %v901_v55 }
 0x4c5   : > { %v907_v57 = vadd.f32 1e-05, %v905_v56 }
 0x4c7   : > { %1170 = vrsqrt.f32 %v907_v57  ;;  %vm915_vm11 = vweird.f32 %v907_v57 }
 0x4ca   : > { %v904_v58 = vpop.xlane.xlu0 %903 }
 0x4cb   : > { %v906_v59 = vmul.f32 0.11111111, %v904_v58 }
 0x4cd   : > { %v1171_v60 = vpop.eup %1170  ;;  %v908_v61 = vadd.f32 1e-05, %v906_v59 }
 0x4ce   : > { %v910_v62 = vmul.f32 %v1171_v60, %v907_v57  ;;  %vm916_vm10 = vweird.f32 %v1171_v60 }
 0x4cf   : > { %1172 = vrsqrt.f32 %v908_v61  ;;  %vm917_vm12 = vmor %vm915_vm11, %vm916_vm10  ;;  %vm925_vm14 = vweird.f32 %v908_v61 }
 0x4d0   : > { %v911_v63 = vmul.f32 %v1171_v60, %v910_v62 }
 0x4d2   : > { %v912_v0 = vmul.f32 0.5, %v911_v63 }
 0x4d4   : > { %v913_v1 = vsub.f32 1.5, %v912_v0 }
 0x4d5   : > { %v1173_v51 = vpop.eup %1172 }
 0x4d6   : > { %v914_v2 = vmul.f32 %v1171_v60, %v913_v1  ;;  %v920_v3 = vmul.f32 %v1173_v51, %v908_v61  ;;  %vm926_vm13 = vweird.f32 %v1173_v51 }
 0x4d7   : > { %vm927_vm15 = vmor %vm925_vm14, %vm926_vm13 }
 0x4d8   : > { %v918_v4 = vsel %vm917_vm12, %v1171_v60, %v914_v2  ;;  %v921_v5 = vmul.f32 %v1173_v51, %v920_v3 }
 0x4d9   : > { %v929_v6 = vmul.f32 %v918_v4, %v895_v45 }
 0x4da   : > { %v922_v7 = vmul.f32 0.5, %v921_v5 }
 0x4db   : > { %v931_v8 = vmax.f32 %v929_v6, 0.0 }
 0x4dc   : > { %v923_v9 = vsub.f32 1.5, %v922_v7 }
 0x4dd   : > { %933 = vst.msk [vmem:[%s251_s30] sm:$0xff] %vm540_vm1, %v931_v8 }
 0x4de   : > { %v924_v10 = vmul.f32 %v1173_v51, %v923_v9 }
 0x4e0   : > { %v928_v11 = vsel %vm927_vm15, %v1173_v51, %v924_v10 }
 0x4e1   : > { %v930_v12 = vmul.f32 %v928_v11, %v896_v52 }
 0x4e3   : > { %v932_v13 = vmax.f32 %v930_v12, 0.0 }
 0x4e5   : > { %934 = vst.msk [vmem:[%s251_s30 + $0x8] sm:$0xff] %vm540_vm1, %v932_v13 }
 0x4e6 PF: > { %s16_s21 = sadd.s32 1, %s1180_s21  }
 0x4e7   : > { %p13_p4 = scmp.ge.s32.totalorder %s16_s21, 4  }
 0x4e9   :  { %15 = sbr.rel (!%p13_p4) target bundleno = 1 (0x1), region = 90 }

// kernel: model_forward.10
= control target key start
LH: loop header
LB: loop body
LE: loop exit
PB: predicated region body
PF: predicated region fallthrough
CT: control target
= control target key end

     0   :  { %s1222_s24 = smov 0   ;;  %s1425_s0 = inlined_call_operand.vmem [shape: f32[2,16,82], index: 0, kind: input, shape index: {}]   ;;  %s1426_s1 = inlined_call_operand.vmem [shape: f32[2,16,82], index: 1, kind: input, shape index: {}]   ;;  %s1427_s2 = inlined_call_operand.vmem [shape: bf16[9,8,32], index: 2, kind: input, shape index: {}]   ;;  %s1428_s3 = inlined_call_operand.vmem [shape: f32[8,1], index: 3, kind: input, shape index: {}]   ;;  %s1429_s4 = inlined_call_operand.vmem [shape: bf16[9,8,8], index: 4, kind: input, shape index: {}]   ;;  %s1430_s5 = inlined_call_operand.vmem [shape: f32[8,1], index: 5, kind: input, shape index: {}]   ;;  %s1431_s6 = inlined_call_operand.vmem [shape: f32[1,64], index: 6, kind: input, shape index: {}]   ;;  %s1432_s7 = inlined_call_operand.vmem [shape: f32[2,8,64], index: 7, kind: output, shape index: {}]  }
   0x1 LB: > { %s1080_s25 = sadd.s32 4294967295, %s1169_s24   ;;  %p1084_p0 = scmp.ge.s32.totalorder %s1169_s24, 1  ;;  %s1169_s24 = sphi %s1222_s24, %s17_s24  }
   0x2   : > { %p247_p1 = scmp.lt.s32.totalorder %s1169_s24, 3 }
   0x4   : > { %p248_p2 = pnand %p1084_p0, %p247_p1 }
   0x5   : > { %p283_p3 = scmp.lt.s32.totalorder (!%p248_p2), %s1080_s25, 1  ;;  %s1171_s29 = smov (!%p248_p2), 112  }
   0x6   : > { %251 = sbr.rel (%p248_p2) target bundleno = 1290 (0x50a), region = 48  ;;  %s1172_s15 = smov (!%p248_p2), 127  }
   0x7   : > { %s1173_s18 = smov (!%p248_p2), 126   ;;  %s1174_s21 = smov (!%p248_p2), 120  }
   0x8   : > { %s1175_s26 = smov (!%p248_p2), 119   ;;  %s1176_s30 = smov (!%p248_p2), 118  }
   0x9   : > { %s1178_s16 = smov (!%p248_p2), 110   ;;  %s1181_s23 = smov (!%p248_p2), 9  }
   0xb   : > { %v1233_v0 = vld [vmem:[%s1427_s2] sm:$0xf]  ;;  %s1434_s25 = smov (!%p283_p3, %s1080_s25), 1  ;;  %v1249_v3 = vld [vmem:[%s1427_s2 + $0x4] sm:$0xf]  ;;  %vm311_vm0 = vcmask 130048  }
   0xc   : > { %v307_v1 = vunpack.c.l.b16 %v1233_v0  ;;  %s1135_s28 = sshll.u32 %s1434_s25, 4  ;;  %v368_v10 = vunpack.c.l.b16 %v1249_v3  ;;  %v1256_v11 = vld [vmem:[%s1427_s2 + $0x8] sm:$0xf]  ;;  %v1265_v15 = vld [vmem:[%s1427_s2 + $0xc] sm:$0xf]  ;;  %v722_v49 = vld [vmem:[%s1428_s3] sm:$0xff] }
   0xd   : > { %s292_s9 = scalar_lea.vmem %s1426_s1, %s1135_s28  ;;  %s287_s12 = scalar_lea.vmem %s1425_s0, %s1135_s28  ;;  %v416_v13 = vunpack.c.l.b16 %v1256_v11  ;;  %v463_v16 = vunpack.c.l.b16 %v1265_v15  ;;  %v1274_v18 = vld [vmem:[%s1427_s2 + $0x10] sm:$0xf]  ;;  %v1283_v21 = vld [vmem:[%s1427_s2 + $0x14] sm:$0xf]  ;;  %v1292_v24 = vld [vmem:[%s1427_s2 + $0x18] sm:$0xf] }
   0xe   : > { %v308_v2 = vpack.c.b16 %v307_v1, %v307_v1  ;;  %v303_v4 = vld [vmem:[%s292_s9] sm:$0xff]  ;;  %v304_v5 = vld [vmem:[%s292_s9 + $0x8] sm:$0xff]  ;;  %v369_v12 = vpack.c.b16 %v368_v10, %v368_v10  ;;  %v510_v19 = vunpack.c.l.b16 %v1274_v18  ;;  %v557_v22 = vunpack.c.l.b16 %v1283_v21  ;;  %v1301_v27 = vld [vmem:[%s1427_s2 + $0x1c] sm:$0xf] }
   0xf   : > { %v300_v6 = vld [vmem:[%s287_s12] sm:$0xff]  ;;  %v305_v7 = vpack.c.bf16 %v304_v5, %v303_v4  ;;  %v301_v8 = vld [vmem:[%s287_s12 + $0x8] sm:$0xff]  ;;  %v417_v14 = vpack.c.b16 %v416_v13, %v416_v13  ;;  %v464_v17 = vpack.c.b16 %v463_v16, %v463_v16  ;;  %v604_v25 = vunpack.c.l.b16 %v1292_v24  ;;  %s1177_s12 = smov 111  }
  0x10   : > { %309 = vrot.lane.b32.xlu0 %v308_v2, %s1171_s29  ;;  %v302_v9 = vpack.c.bf16 %v301_v8, %v300_v6  ;;  %v511_v20 = vpack.c.b16 %v510_v19, %v510_v19  ;;  %v558_v23 = vpack.c.b16 %v557_v22, %v557_v22  ;;  %v651_v28 = vunpack.c.l.b16 %v1301_v27  ;;  %v1310_v30 = vld [vmem:[%s1427_s2 + $0x20] sm:$0xf] }
  0x11   : > { %373 = vrot.lane.b32.xlu1 %v305_v7, %s1172_s15  ;;  %322 = vmatpush.bf16.msra.mxu0 %v305_v7  ;;  %v605_v26 = vpack.c.b16 %v604_v25, %v604_v25  ;;  %v698_v31 = vunpack.c.l.b16 %v1310_v30  ;;  %v1179_v50 = vmov 0   ;;  %vm733_vm1 = vcmask 523264  }
  0x12   : > { %395 = vrot.lane.b32.xlu2 %v302_v9, %s1173_s18  ;;  %338 = vmatpush.bf16.msra.mxu1 %v302_v9  ;;  %v652_v29 = vpack.c.b16 %v651_v28, %v651_v28  ;;  %vm758_vm2 = vcmask 670720   ;;  %vm764_vm6 = vcmask 597064   ;;  %vm778_vm7 = vcmask 1043456  }
  0x13   : > { %v699_v32 = vpack.c.b16 %v698_v31, %v698_v31  ;;  %1156 = vset.pattern.permute.xlu1 %v1179_v50  ;;  %1157 = vset.pattern.permute.xlu0 %v1179_v50  ;;  %vm774_vm8 = vcmask 64512  }
  0x15   : > { %1091 = vmatmul.msk.bf16.vlgmr.msra.gmra.mxu1 %vm311_vm0, %v1233_v0 }
  0x18   : > { %347 = vrot.lane.b32.xlu0 %v302_v9, %s1172_s15 }
  0x19   : > { %370 = vrot.lane.b32.xlu1 %v369_v12, %s1171_s29 }
  0x1a   : > { %420 = vrot.lane.b32.xlu2 %v305_v7, %s1173_s18 }
  0x20   : > { %418 = vrot.lane.b32.xlu0 %v417_v14, %s1171_s29 }
  0x21   : > { %442 = vrot.lane.b32.xlu1 %v302_v9, %s1174_s21 }
  0x22   : > { %467 = vrot.lane.b32.xlu2 %v305_v7, %s1174_s21 }
  0x28   : > { %465 = vrot.lane.b32.xlu0 %v464_v17, %s1171_s29 }
  0x29   : > { %489 = vrot.lane.b32.xlu1 %v302_v9, %s1175_s26 }
  0x2a   : > { %514 = vrot.lane.b32.xlu2 %v305_v7, %s1175_s26 }
  0x30   : > { %512 = vrot.lane.b32.xlu0 %v511_v20, %s1171_s29 }
  0x31   : > { %536 = vrot.lane.b32.xlu1 %v302_v9, %s1176_s30 }
  0x32   : > { %561 = vrot.lane.b32.xlu2 %v305_v7, %s1176_s30 }
  0x38   : > { %559 = vrot.lane.b32.xlu0 %v558_v23, %s1171_s29 }
  0x39   : > { %583 = vrot.lane.b32.xlu1 %v302_v9, %s1171_s29 }
  0x3a   : > { %608 = vrot.lane.b32.xlu2 %v305_v7, %s1171_s29 }
  0x40   : > { %606 = vrot.lane.b32.xlu0 %v605_v26, %s1171_s29 }
  0x41   : > { %630 = vrot.lane.b32.xlu1 %v302_v9, %s1177_s12 }
  0x42   : > { %655 = vrot.lane.b32.xlu2 %v305_v7, %s1177_s12 }
  0x48   : > { %653 = vrot.lane.b32.xlu0 %v652_v29, %s1171_s29 }
  0x49   : > { %677 = vrot.lane.b32.xlu1 %v302_v9, %s1178_s16 }
  0x4a   : > { %702 = vrot.lane.b32.xlu2 %v305_v7, %s1178_s16 }
  0x50   : > { %700 = vrot.lane.b32.xlu0 %v699_v32, %s1171_s29 }
  0x51   : > { %725 = vperm.xlu1 %1156, %v722_v49  }
  0x6c   : > { %v396_v33 = vpop.permute.xlu2 %395 }
  0x6d   : > { %408 = vmatpush.bf16.msrb.mxu0 %v396_v33 }
  0x74   : > { %v421_v34 = vpop.permute.xlu2 %420 }
  0x75   : > { %433 = vmatpush.bf16.msrb.mxu1 %v421_v34 }
  0x7c   : > { %v468_v35 = vpop.permute.xlu2 %467 }
  0x82   : > { %v310_v36 = vpop.permute.xlu0 %309 }
  0x83   : > { %1090 = vmatmul.msk.bf16.vlgmr.msra.gmra.mxu0 %vm311_vm0, %v310_v36  ;;  %v374_v37 = vpop.permute.xlu1 %373 }
  0x84   : > { %386 = vmatpush.bf16.msra.mxu3 %v374_v37  ;;  %v515_v38 = vpop.permute.xlu2 %514 }
  0x85   : > { %527 = vmatpush.bf16.msra.mxu1 %v515_v38 }
  0x88   : > { %480 = vmatpush.bf16.msrb.mxu3 %v468_v35 }
  0x8a   : > { %v348_v39 = vpop.permute.xlu0 %347 }
  0x8b   : > { %360 = vmatpush.bf16.msra.mxu2 %v348_v39  ;;  %v371_v40 = vpop.permute.xlu1 %370 }
  0x8c   : > { %1094 = vmatmul.msk.bf16.vlgmr.msra.gmra.mxu3 %vm311_vm0, %v371_v40  ;;  %v562_v41 = vpop.permute.xlu2 %561 }
  0x8d   : > { %574 = vmatpush.bf16.msra.mxu3 %v562_v41 }
  0x8e   : > { %1093 = vmatmul.msk.bf16.vlgmr.msra.gmra.mxu2 %vm311_vm0, %v1249_v3 }
  0x92   : > { %v419_v42 = vpop.permute.xlu0 %418  ;;  %v340_v60 = vpop.f32.mrf.mxu1 }
  0x93   : > { %1096 = vmatmul.msk.bf16.vlgmr.msrb.gmra.mxu0 %vm311_vm0, %v1256_v11  ;;  %1097 = vmatmul.msk.bf16.vlgmr.msrb.gmra.mxu1 %vm311_vm0, %v419_v42  ;;  %v443_v43 = vpop.permute.xlu1 %442 }
  0x94   : > { %455 = vmatpush.bf16.msrb.mxu2 %v443_v43  ;;  %v609_v44 = vpop.permute.xlu2 %608 }
  0x95   : > { %621 = vmatpush.bf16.msrb.mxu1 %v609_v44 }
  0x9a   : > { %v466_v45 = vpop.permute.xlu0 %465  ;;  %v342_v61 = vpop.f32.mrf.mxu1 }
  0x9b   : > { %v490_v46 = vpop.permute.xlu1 %489 }
  0x9c   : > { %1100 = vmatmul.msk.bf16.vlgmr.msrb.gmra.mxu3 %vm311_vm0, %v466_v45  ;;  %502 = vmatpush.bf16.msra.mxu0 %v490_v46  ;;  %v656_v47 = vpop.permute.xlu2 %655 }
  0x9d   : > { %668 = vmatpush.bf16.msrb.mxu3 %v656_v47 }
  0x9e   : > { %1099 = vmatmul.msk.bf16.vlgmr.msrb.gmra.mxu2 %vm311_vm0, %v1265_v15 }
  0xa2   : > { %v513_v48 = vpop.permute.xlu0 %512 }
  0xa3   : > { %1102 = vmatmul.msk.bf16.vlgmr.msra.gmra.mxu0 %vm311_vm0, %v1274_v18  ;;  %1103 = vmatmul.msk.bf16.vlgmr.msra.gmra.mxu1 %vm311_vm0, %v513_v48  ;;  %v537_v51 = vpop.permute.xlu1 %536  ;;  %v1351_v48 = vld [vmem:[%s1431_s6] ss:$0 sm:$0xff] }
  0xa4   : > { %549 = vmatpush.bf16.msra.mxu2 %v537_v51  ;;  %v703_v52 = vpop.permute.xlu2 %702 }
  0xa5   : > { %715 = vmatpush.bf16.msra.mxu1 %v703_v52 }
  0xaa   : > { %v560_v53 = vpop.permute.xlu0 %559 }
  0xab   : > { %v584_v54 = vpop.permute.xlu1 %583 }
  0xac   : > { %1106 = vmatmul.msk.bf16.vlgmr.msra.gmra.mxu3 %vm311_vm0, %v560_v53  ;;  %596 = vmatpush.bf16.msrb.mxu0 %v584_v54 }
  0xae   : > { %1105 = vmatmul.msk.bf16.vlgmr.msra.gmra.mxu2 %vm311_vm0, %v1283_v21 }
  0xb2   : > { %v607_v55 = vpop.permute.xlu0 %606 }
  0xb3   : > { %1108 = vmatmul.msk.bf16.vlgmr.msrb.gmra.mxu0 %vm311_vm0, %v1292_v24  ;;  %1109 = vmatmul.msk.bf16.vlgmr.msrb.gmra.mxu1 %vm311_vm0, %v607_v55  ;;  %v631_v56 = vpop.permute.xlu1 %630 }
  0xb4   : > { %643 = vmatpush.bf16.msrb.mxu2 %v631_v56 }
  0xba   : > { %v654_v57 = vpop.permute.xlu0 %653 }
  0xbb   : > { %v678_v58 = vpop.permute.xlu1 %677 }
  0xbc   : > { %1112 = vmatmul.msk.bf16.vlgmr.msrb.gmra.mxu3 %vm311_vm0, %v654_v57  ;;  %690 = vmatpush.bf16.msra.mxu0 %v678_v58 }
  0xbe   : > { %1111 = vmatmul.msk.bf16.vlgmr.msrb.gmra.mxu2 %vm311_vm0, %v1301_v27 }
  0xc2   : > { %v701_v59 = vpop.permute.xlu0 %700 }
  0xc3   : > { %1114 = vmatmul.msk.bf16.vlgmr.msra.gmra.mxu0 %vm311_vm0, %v1310_v30  ;;  %1115 = vmatmul.msk.bf16.vlgmr.msra.gmra.mxu1 %vm311_vm0, %v701_v59  ;;  %v726_v44 = vpop.permute.xlu1 %725 }
 0x100   : > { %v324_v62 = vpop.f32.mrf.mxu0 }
 0x101   : > { %v341_v4 = vadd.f32 %v340_v60, %v324_v62  ;;  %v1180_v60 = vmov 0.0  }
 0x102   : > { %759 = vst.msk [vmem:[#allocation2] sm:$0xff] %vm758_vm2, %v1180_v60 }
 0x108   : > { %v326_v63 = vpop.f32.mrf.mxu0 }
 0x10f   : > { %v388_v3 = vpop.f32.mrf.mxu3 }
 0x110   : > { %v410_v0 = vpop.f32.mrf.mxu0  ;;  %v435_v1 = vpop.f32.mrf.mxu1 }
 0x111   : > { %v362_v2 = vpop.f32.mrf.mxu2 }
 0x112   : > { %v366_v5 = vadd.f32 %v362_v2, %v341_v4 }
 0x114   : > { %v392_v10 = vadd.f32 %v388_v3, %v366_v5 }
 0x116   : > { %v414_v11 = vadd.f32 %v410_v0, %v392_v10 }
 0x117   : > { %v390_v9 = vpop.f32.mrf.mxu3 }
 0x118   : > { %v412_v6 = vpop.f32.mrf.mxu0  ;;  %v437_v7 = vpop.f32.mrf.mxu1  ;;  %v439_v16 = vadd.f32 %v435_v1, %v414_v11 }
 0x119   : > { %v364_v8 = vpop.f32.mrf.mxu2 }
 0x11f   : > { %v482_v15 = vpop.f32.mrf.mxu3 }
 0x120   : > { %v504_v12 = vpop.f32.mrf.mxu0  ;;  %v529_v13 = vpop.f32.mrf.mxu1 }
 0x121   : > { %v457_v14 = vpop.f32.mrf.mxu2 }
 0x122   : > { %v461_v17 = vadd.f32 %v457_v14, %v439_v16  ;;  %v766_v16 = vld [vmem:[%s1429_s4] sm:$0xf] }
 0x124   : > { %v486_v21 = vadd.f32 %v482_v15, %v461_v17  ;;  %v1125_v17 = vld [vmem:[%s1429_s4 + $0x14] sm:$0xf] }
 0x126   : > { %v508_v23 = vadd.f32 %v504_v12, %v486_v21 }
 0x127   : > { %v484_v22 = vpop.f32.mrf.mxu3 }
 0x128   : > { %v506_v18 = vpop.f32.mrf.mxu0  ;;  %v531_v19 = vpop.f32.mrf.mxu1  ;;  %v533_v27 = vadd.f32 %v529_v13, %v508_v23  ;;  %v982_v13 = vld [vmem:[%s1430_s5] sm:$0xff] }
 0x129   : > { %v459_v20 = vpop.f32.mrf.mxu2 }
 0x12a   : > { %v1116_v20 = vld [vmem:[%s1429_s4 + $0x4] sm:$0xf] }
 0x12f   : > { %v576_v28 = vpop.f32.mrf.mxu3 }
 0x130   : > { %v598_v24 = vpop.f32.mrf.mxu0  ;;  %v623_v25 = vpop.f32.mrf.mxu1 }
 0x131   : > { %v551_v26 = vpop.f32.mrf.mxu2 }
 0x132   : > { %v555_v29 = vadd.f32 %v551_v26, %v533_v27  ;;  %v1119_v27 = vld [vmem:[%s1429_s4 + $0x8] sm:$0xf] }
 0x134   : > { %v580_v30 = vadd.f32 %v576_v28, %v555_v29  ;;  %v1123_v28 = vld [vmem:[%s1429_s4 + $0x10] sm:$0xf] }
 0x136   : > { %v602_v35 = vadd.f32 %v598_v24, %v580_v30 }
 0x137   : > { %v578_v34 = vpop.f32.mrf.mxu3 }
 0x138   : > { %v600_v31 = vpop.f32.mrf.mxu0  ;;  %v625_v32 = vpop.f32.mrf.mxu1  ;;  %v627_v38 = vadd.f32 %v623_v25, %v602_v35  ;;  %v1127_v34 = vld [vmem:[%s1429_s4 + $0x18] sm:$0xf]  ;;  %v1131_v35 = vld [vmem:[%s1429_s4 + $0x20] sm:$0xf] }
 0x139   : > { %v553_v33 = vpop.f32.mrf.mxu2  ;;  %v1121_v31 = vld [vmem:[%s1429_s4 + $0xc] sm:$0xf] }
 0x13f   : > { %v670_v41 = vpop.f32.mrf.mxu3 }
 0x140   : > { %v692_v36 = vpop.f32.mrf.mxu0  ;;  %v717_v37 = vpop.f32.mrf.mxu1 }
 0x141   : > { %v645_v39 = vpop.f32.mrf.mxu2 }
 0x142   : > { %v649_v40 = vadd.f32 %v645_v39, %v627_v38  ;;  %v1129_v38 = vld [vmem:[%s1429_s4 + $0x1c] sm:$0xf] }
 0x144   : > { %v674_v42 = vadd.f32 %v670_v41, %v649_v40 }
 0x146   : > { %v696_v43 = vadd.f32 %v692_v36, %v674_v42 }
 0x147   : > { %v672_v51 = vpop.f32.mrf.mxu3 }
 0x148   : > { %v694_v45 = vpop.f32.mrf.mxu0  ;;  %v719_v46 = vpop.f32.mrf.mxu1  ;;  %v721_v47 = vadd.f32 %v717_v37, %v696_v43 }
 0x149   : > { %v647_v49 = vpop.f32.mrf.mxu2 }
 0x14a   : > { %v728_v50 = vadd.f32 %v726_v44, %v721_v47 }
 0x14c   : > { %v732_v52 = vmul.f32 %v1351_v48, %v728_v50 }
 0x14e   : > { %v734_v53 = vsel %vm733_vm1, %v732_v52, 0.0 }
 0x14f   : > { %735 = vadd.xlane.f32.xlu2 %v734_v53 }
 0x1c2   : > { %v736_v54 = vpop.xlane.xlu2 %735 }
 0x1c3   : > { %v737_v55 = vmul.f32 0.027777778, %v736_v54 }
 0x1c5   : > { %v738_v56 = vsub.f32 %v732_v52, %v737_v55 }
 0x1c7   : > { %v739_v57 = vmul.f32 %v1351_v48, %v738_v56 }
 0x1c9   : > { %v740_v58 = vmul.f32 %v739_v57, %v739_v57 }
 0x1cb   : > { %v741_v59 = vsel %vm733_vm1, %v740_v58, 0.0 }
 0x1cc   : > { %742 = vadd.xlane.f32.xlu0 %v741_v59 }
 0x23f   : > { %v743_v61 = vpop.xlane.xlu0 %742 }
 0x240   : > { %v744_v62 = vmul.f32 0.027777778, %v743_v61 }
 0x242   : > { %v745_v63 = vadd.f32 1e-05, %v744_v62 }
 0x244   : > { %1159 = vrsqrt.f32 %v745_v63  ;;  %vm752_vm4 = vweird.f32 %v745_v63 }
 0x24a   : > { %v1160_v0 = vpop.eup %1159 }
 0x24b   : > { %v747_v1 = vmul.f32 %v1160_v0, %v745_v63  ;;  %vm753_vm3 = vweird.f32 %v1160_v0 }
 0x24c   : > { %vm754_vm5 = vmor %vm752_vm4, %vm753_vm3 }
 0x24d   : > { %v748_v2 = vmul.f32 %v1160_v0, %v747_v1 }
 0x24f   : > { %v749_v3 = vmul.f32 0.5, %v748_v2 }
 0x251   : > { %v750_v4 = vsub.f32 1.5, %v749_v3 }
 0x253   : > { %v751_v5 = vmul.f32 %v1160_v0, %v750_v4 }
 0x255   : > { %v755_v6 = vsel %vm754_vm5, %v1160_v0, %v751_v5 }
 0x256   : > { %v756_v7 = vmul.f32 %v755_v6, %v739_v57 }
 0x258   : > { %v757_v8 = vmax.f32 %v756_v7, 0.0 }
 0x25a   : > { %761 = vrot.lane.b32.xlu1 %v757_v8, %s1181_s23  ;;  %s1089_s23 = sshll.u32 %s1434_s25, 3 }
 0x2cc   : > { %v762_v9 = vpop.permute.xlu1 %761 }
 0x2cd   : > { %765 = vst.msk [vmem:[#allocation2] sm:$0xff] %vm764_vm6, %v762_v9 }
 0x2d4   : > { %v767_v10 = vld [vmem:[#allocation2] sm:$0xff] }
 0x2d5   : > { %v768_v11 = vpack.c.bf16 %v767_v10, %v767_v10 }
 0x2d7   : > { %912 = vrot.lane.b32.xlu0 %v768_v11, %s1171_s29  ;;  %888 = vrot.lane.b32.xlu2 %v768_v11, %s1176_s30  ;;  %v799_v12 = vsel %vm778_vm7, %v768_v11, 0  ;;  %s296_s29 = scalar_lea.vmem %s1432_s7, %s1089_s23 }
 0x2d8   : > { %772 = vrot.lane.b32.xlu1 %v768_v11, %s1172_s15  ;;  %808 = vmatpush.bf16.msra.mxu3 %v799_v12 }
 0x2db   : > { %1118 = vmatmul.msk.bf16.vlgmr.msra.gmra.mxu3 %vm774_vm8, %v766_v16 }
 0x2e0   : > { %864 = vrot.lane.b32.xlu1 %v768_v11, %s1175_s26 }
 0x2e8   : > { %816 = vrot.lane.b32.xlu1 %v768_v11, %s1173_s18 }
 0x2f0   : > { %840 = vrot.lane.b32.xlu1 %v768_v11, %s1174_s21 }
 0x2f8   : > { %960 = vrot.lane.b32.xlu1 %v768_v11, %s1178_s16 }
 0x300   : > { %936 = vrot.lane.b32.xlu1 %v768_v11, %s1177_s12 }
 0x308   : > { %985 = vperm.xlu1 %1156, %v982_v13  }
 0x331   : > { %v889_v14 = vpop.permute.xlu2 %888 }
 0x332   : > { %v894_v15 = vsel %vm778_vm7, %v889_v14, 0 }
 0x333   : > { %903 = vmatpush.bf16.msrb.mxu3 %v894_v15 }
 0x336   : > { %1126 = vmatmul.msk.bf16.vlgmr.msrb.gmra.mxu3 %vm774_vm8, %v1125_v17 }
 0x349   : > { %v913_v23 = vpop.permute.xlu0 %912 }
 0x34a   : > { %v773_v18 = vpop.permute.xlu1 %772  ;;  %v918_v26 = vsel %vm778_vm7, %v913_v23, 0 }
 0x34b   : > { %v780_v19 = vsel %vm778_vm7, %v773_v18, 0 }
 0x34c   : > { %789 = vmatpush.bf16.msra.mxu2 %v780_v19 }
 0x34f   : > { %1117 = vmatmul.msk.bf16.vlgmr.msra.gmra.mxu2 %vm774_vm8, %v1116_v20 }
 0x352   : > { %v865_v21 = vpop.permute.xlu1 %864 }
 0x353   : > { %v870_v22 = vsel %vm778_vm7, %v865_v21, 0 }
 0x354   : > { %879 = vmatpush.bf16.msrb.mxu2 %v870_v22 }
 0x35a   : > { %v817_v24 = vpop.permute.xlu1 %816 }
 0x35b   : > { %v822_v25 = vsel %vm778_vm7, %v817_v24, 0 }
 0x35c   : > { %831 = vmatpush.bf16.msrb.mxu0 %v822_v25 }
 0x35e   : > { %v810_v39 = vpop.f32.mrf.mxu3 }
 0x35f   : > { %1120 = vmatmul.msk.bf16.vlgmr.msrb.gmra.mxu0 %vm774_vm8, %v1119_v27  ;;  %1124 = vmatmul.msk.bf16.vlgmr.msrb.gmra.mxu2 %vm774_vm8, %v1123_v28 }
 0x360   : > { %927 = vmatpush.bf16.msra.mxu0 %v918_v26 }
 0x362   : > { %v841_v29 = vpop.permute.xlu1 %840 }
 0x363   : > { %v846_v30 = vsel %vm778_vm7, %v841_v29, 0 }
 0x364   : > { %855 = vmatpush.bf16.msrb.mxu1 %v846_v30 }
 0x366   : > { %v812_v40 = vpop.f32.mrf.mxu3 }
 0x367   : > { %1122 = vmatmul.msk.bf16.vlgmr.msrb.gmra.mxu1 %vm774_vm8, %v1121_v31 }
 0x36a   : > { %v961_v32 = vpop.permute.xlu1 %960 }
 0x36b   : > { %v966_v33 = vsel %vm778_vm7, %v961_v32, 0 }
 0x36c   : > { %975 = vmatpush.bf16.msra.mxu2 %v966_v33 }
 0x36f   : > { %1128 = vmatmul.msk.bf16.vlgmr.msra.gmra.mxu0 %vm774_vm8, %v1127_v34  ;;  %1132 = vmatmul.msk.bf16.vlgmr.msra.gmra.mxu2 %vm774_vm8, %v1131_v35 }
 0x372   : > { %v937_v36 = vpop.permute.xlu1 %936 }
 0x373   : > { %v942_v37 = vsel %vm778_vm7, %v937_v36, 0 }
 0x374   : > { %951 = vmatpush.bf16.msra.mxu1 %v942_v37 }
 0x377   : > { %1130 = vmatmul.msk.bf16.vlgmr.msra.gmra.mxu1 %vm774_vm8, %v1129_v38 }
 0x37a   : > { %v986_v0 = vpop.permute.xlu1 %985 }
 0x3b9   : > { %v905_v41 = vpop.f32.mrf.mxu3 }
 0x3c1   : > { %v907_v42 = vpop.f32.mrf.mxu3 }
 0x3d2   : > { %v791_v43 = vpop.f32.mrf.mxu2 }
 0x3d3   : > { %v811_v50 = vadd.f32 %v810_v39, %v791_v43 }
 0x3da   : > { %v793_v44 = vpop.f32.mrf.mxu2 }
 0x3dc   : > { %v833_v45 = vpop.f32.mrf.mxu0 }
 0x3dd   : > { %v837_v51 = vadd.f32 %v833_v45, %v811_v50 }
 0x3e2   : > { %v881_v46 = vpop.f32.mrf.mxu2 }
 0x3e4   : > { %v857_v47 = vpop.f32.mrf.mxu1  ;;  %v835_v49 = vpop.f32.mrf.mxu0 }
 0x3e5   : > { %v861_v52 = vadd.f32 %v857_v47, %v837_v51 }
 0x3e7   : > { %v885_v56 = vadd.f32 %v881_v46, %v861_v52 }
 0x3e9   : > { %v909_v57 = vadd.f32 %v905_v41, %v885_v56 }
 0x3ea   : > { %v883_v53 = vpop.f32.mrf.mxu2 }
 0x3ec   : > { %v859_v54 = vpop.f32.mrf.mxu1  ;;  %v929_v55 = vpop.f32.mrf.mxu0 }
 0x3ed   : > { %v933_v59 = vadd.f32 %v929_v55, %v909_v57 }
 0x3f2   : > { %v977_v58 = vpop.f32.mrf.mxu2 }
 0x3f4   : > { %v953_v60 = vpop.f32.mrf.mxu1  ;;  %v931_v61 = vpop.f32.mrf.mxu0 }
 0x3f5   : > { %v957_v62 = vadd.f32 %v953_v60, %v933_v59 }
 0x3f7   : > { %v981_v63 = vadd.f32 %v977_v58, %v957_v62 }
 0x3f9   : > { %v988_v1 = vadd.f32 %v986_v0, %v981_v63 }
 0x3fa   : > { %v979_v2 = vpop.f32.mrf.mxu2 }
 0x3fb   : > { %v989_v3 = vmul.f32 %v1351_v48, %v988_v1 }
 0x3fc   : > { %v955_v4 = vpop.f32.mrf.mxu1 }
 0x3fd   : > { %v990_v5 = vsel %vm733_vm1, %v989_v3, 0.0 }
 0x3fe   : > { %991 = vadd.xlane.f32.xlu2 %v990_v5 }
 0x471   : > { %v992_v6 = vpop.xlane.xlu2 %991 }
 0x472   : > { %v993_v7 = vmul.f32 0.027777778, %v992_v6 }
 0x474   : > { %v994_v8 = vsub.f32 %v989_v3, %v993_v7 }
 0x476   : > { %v995_v9 = vmul.f32 %v1351_v48, %v994_v8 }
 0x478   : > { %v996_v10 = vmul.f32 %v995_v9, %v995_v9 }
 0x47a   : > { %v997_v11 = vsel %vm733_vm1, %v996_v10, 0.0 }
 0x47b   : > { %998 = vadd.xlane.f32.xlu0 %v997_v11 }
 0x4ee   : > { %v999_v12 = vpop.xlane.xlu0 %998 }
 0x4ef   : > { %v1000_v13 = vmul.f32 0.027777778, %v999_v12 }
 0x4f1   : > { %v1001_v14 = vadd.f32 1e-05, %v1000_v13 }
 0x4f3   : > { %1161 = vrsqrt.f32 %v1001_v14  ;;  %vm1008_vm10 = vweird.f32 %v1001_v14 }
 0x4f9   : > { %v1162_v15 = vpop.eup %1161 }
 0x4fa   : > { %v1003_v16 = vmul.f32 %v1162_v15, %v1001_v14  ;;  %vm1009_vm9 = vweird.f32 %v1162_v15 }
 0x4fb   : > { %vm1010_vm11 = vmor %vm1008_vm10, %vm1009_vm9 }
 0x4fc   : > { %v1004_v17 = vmul.f32 %v1162_v15, %v1003_v16 }
 0x4fe   : > { %v1005_v18 = vmul.f32 0.5, %v1004_v17 }
 0x500   : > { %v1006_v19 = vsub.f32 1.5, %v1005_v18 }
 0x502   : > { %v1007_v20 = vmul.f32 %v1162_v15, %v1006_v19 }
 0x504   : > { %v1011_v48 = vsel %vm1010_vm11, %v1162_v15, %v1007_v20 }
 0x505   : > { %v1012_v21 = vmul.f32 %v1011_v48, %v995_v9 }
 0x507   : > { %v1013_v22 = vmax.f32 %v1012_v21, 0.0 }
 0x509   : > { %1014 = vst.msk [vmem:[%s296_s29] sm:$0xff] %vm733_vm1, %v1013_v22 }
 0x50a PF: > { %s17_s24 = sadd.s32 1, %s1169_s24  }
 0x50b   : > { %p14_p4 = scmp.ge.s32.totalorder %s17_s24, 4  }
 0x50d   :  { %16 = sbr.rel (!%p14_p4) target bundleno = 1 (0x1), region = 97 }

// kernel: model_forward.11
= control target key start
LH: loop header
LB: loop body
LE: loop exit
PB: predicated region body
PF: predicated region fallthrough
CT: control target
= control target key end

     0   :  { %s1991_s11 = smov 0   ;;  %s2378_s0 = inlined_call_operand.vmem [shape: f32[2,8,226], index: 0, kind: input, shape index: {}]   ;;  %s2379_s1 = inlined_call_operand.vmem [shape: f32[2,8,226], index: 1, kind: input, shape index: {}]   ;;  %s2380_s2 = inlined_call_operand.vmem [shape: bf16[9,8,16], index: 2, kind: input, shape index: {}]   ;;  %s2381_s3 = inlined_call_operand.vmem [shape: f32[8,1], index: 3, kind: input, shape index: {}]   ;;  %s2382_s4 = inlined_call_operand.vmem [shape: bf16[9,8,8], index: 4, kind: input, shape index: {}]   ;;  %s2383_s5 = inlined_call_operand.vmem [shape: f32[8,1], index: 5, kind: input, shape index: {}]   ;;  %s2384_s6 = inlined_call_operand.vmem [shape: f32[1,196], index: 6, kind: input, shape index: {}]   ;;  %s2385_s7 = inlined_call_operand.vmem [shape: f32[1,8], index: 7, kind: input, shape index: {}]   ;;  %s2386_s8 = inlined_call_operand.<no memory space> [shape: f32[1,1], index: 8, kind: input, shape index: {}]   ;;  %s2387_s9 = inlined_call_operand.vmem [shape: f32[2,1,196], index: 9, kind: output, shape index: {}]  }
   0x1   :  { %v14_v0 = vstv %s2386_s8 }
   0x2   :  { %15 = vst [vmem:[#allocation3] sm:$0x1] %v14_v0 }
   0x3 LB: > { %s1805_s12 = sadd.s32 4294967295, %s1924_s11   ;;  %p1809_p0 = scmp.ge.s32.totalorder %s1924_s11, 1  ;;  %s1924_s11 = sphi %s1991_s11, %s21_s11  }
   0x4   : > { %p299_p1 = scmp.lt.s32.totalorder %s1924_s11, 3 }
   0x6   : > { %p300_p2 = pnand %p1809_p0, %p299_p1 }
   0x7   : > { %p339_p3 = scmp.lt.s32.totalorder (!%p300_p2), %s1805_s12, 1  ;;  %s1926_s15 = smov (!%p300_p2), 120  }
   0x8   : > { %303 = sbr.rel (%p300_p2) target bundleno = 1479 (0x5c7), region = 56  ;;  %s1927_s24 = smov (!%p300_p2), 127  }
   0x9   : > { %s1928_s25 = smov (!%p300_p2), 126   ;;  %s1929_s30 = smov (!%p300_p2), 114  }
   0xa   : > { %s1930_s14 = smov (!%p300_p2), 113   ;;  %s1932_s20 = smov (!%p300_p2), 100  }
   0xb   : > { %s1934_s26 = smov (!%p300_p2), 98   ;;  %s1937_s16 = smov (!%p300_p2), 15  }
   0xd   : > { %v2002_v1 = vld [vmem:[%s2380_s2] sm:$0xf]  ;;  %s2392_s12 = smov (!%p339_p3, %s1805_s12), 1  ;;  %v2020_v8 = vld [vmem:[%s2380_s2 + $0x4] sm:$0xf]  ;;  %vm373_vm0 = vcmask 1043456  }
   0xe   : > { %v365_v2 = vunpack.c.l.b16 %v2002_v1  ;;  %s1889_s8 = sshll.u32 %s2392_s12, 4  ;;  %v489_v12 = vunpack.c.l.b16 %v2020_v8  ;;  %v2043_v15 = vld [vmem:[%s2380_s2 + $0x8] sm:$0xf]  ;;  %v2056_v18 = vld [vmem:[%s2380_s2 + $0xc] sm:$0xf]  ;;  %vm369_vm1 = vcmask 64512  }
   0xf   : > { %s348_s18 = scalar_lea.vmem %s2379_s1, %s1889_s8  ;;  %s343_s21 = scalar_lea.vmem %s2378_s0, %s1889_s8  ;;  %v583_v16 = vunpack.c.l.b16 %v2043_v15  ;;  %v675_v19 = vunpack.c.l.b16 %v2056_v18  ;;  %v2071_v21 = vld [vmem:[%s2380_s2 + $0x10] sm:$0xf]  ;;  %v2096_v26 = vld [vmem:[%s2380_s2 + $0x14] sm:$0xf]  ;;  %v2113_v31 = vld [vmem:[%s2380_s2 + $0x18] sm:$0xf] }
  0x10   : > { %v366_v3 = vpack.c.b16 %v365_v2, %v365_v2  ;;  %v361_v4 = vld [vmem:[%s348_s18 + $0x8] sm:$0xff]  ;;  %v360_v5 = vld [vmem:[%s348_s18] sm:$0xff]  ;;  %v490_v14 = vpack.c.b16 %v489_v12, %v489_v12  ;;  %v767_v22 = vunpack.c.l.b16 %v2071_v21  ;;  %s1931_s8 = smov 112   ;;  %v859_v27 = vunpack.c.l.b16 %v2096_v26  ;;  %v2136_v35 = vld [vmem:[%s2380_s2 + $0x1c] sm:$0xf] }
  0x11   : > { %v2015_v6 = vpack.c.bf16 %v361_v4, %v361_v4  ;;  %v357_v7 = vld [vmem:[%s343_s21 + $0x8] sm:$0xff]  ;;  %v2026_v10 = vpack.c.bf16 %v360_v5, %v360_v5  ;;  %v356_v11 = vld [vmem:[%s343_s21] sm:$0xff]  ;;  %v584_v17 = vpack.c.b16 %v583_v16, %v583_v16  ;;  %v676_v20 = vpack.c.b16 %v675_v19, %v675_v19  ;;  %s1933_s21 = smov 99  }
  0x12   : > { %367 = vrot.lane.b32.xlu0 %v366_v3, %s1926_s15  ;;  %v2022_v9 = vpack.c.bf16 %v357_v7, %v357_v7  ;;  %v2033_v13 = vpack.c.bf16 %v356_v11, %v356_v11  ;;  %v768_v23 = vpack.c.b16 %v767_v22, %v767_v22  ;;  %v860_v30 = vpack.c.b16 %v859_v27, %v859_v27  ;;  %v2145_v38 = vld [vmem:[%s2380_s2 + $0x20] sm:$0xf] }
  0x13   : > { %497 = vrot.lane.b32.xlu1 %v2015_v6, %s1927_s24  ;;  %v375_v28 = vsel %vm373_vm0, %v2026_v10, 0  ;;  %v378_v29 = vsel %vm373_vm0, %v2015_v6, 0  ;;  %v951_v32 = vunpack.c.l.b16 %v2113_v31  ;;  %v1043_v37 = vunpack.c.l.b16 %v2136_v35 }
  0x14   : > { %447 = vrot.lane.b32.xlu2 %v2022_v9, %s1927_s24  ;;  %v413_v24 = vsel %vm373_vm0, %v2022_v9, 0  ;;  %v410_v25 = vsel %vm373_vm0, %v2033_v13, 0  ;;  %387 = vmatpush.bf16.msra.mxu0 %v375_v28  ;;  %v1135_v40 = vunpack.c.l.b16 %v2145_v38  ;;  %vm449_vm2 = vcmask 1039360  }
  0x15   : > { %435 = vmatpush.bf16.msra.mxu3 %v413_v24  ;;  %422 = vmatpush.bf16.msra.mxu2 %v410_v25  ;;  %v952_v33 = vpack.c.b16 %v951_v32, %v951_v32  ;;  %v1044_v39 = vpack.c.b16 %v1043_v37, %v1043_v37  ;;  %vm543_vm3 = vcmask 1031168   ;;  %vm635_vm4 = vcmask 932864  }
  0x16   : > { %400 = vmatpush.bf16.msra.mxu1 %v378_v29  ;;  %v1136_v42 = vpack.c.b16 %v1135_v40, %v1135_v40  ;;  %vm727_vm5 = vcmask 924672   ;;  %vm819_vm6 = vcmask 916480   ;;  %vm911_vm7 = vcmask 818176  }
  0x17   : > { %vm1003_vm8 = vcmask 809984   ;;  %vm1095_vm9 = vcmask 801792   ;;  %vm2388_vm10 = vcmask 556032   ;;  %vm1241_vm14 = vcmask 1047672  }
  0x18   : > { %1818 = vmatmul.msk.bf16.vlgmr.msra.gmra.mxu3 %vm369_vm1, %v2002_v1  ;;  %1817 = vmatmul.msk.bf16.vlgmr.msra.gmra.mxu2 %vm369_vm1, %v2002_v1  ;;  %vm1237_vm15 = vcmask 121856  }
  0x1a   : > { %495 = vrot.lane.b32.xlu0 %v2026_v10, %s1927_s24 }
  0x1b   : > { %445 = vrot.lane.b32.xlu1 %v2033_v13, %s1927_s24 }
  0x1c   : > { %491 = vrot.lane.b32.xlu2 %v490_v14, %s1926_s15 }
  0x22   : > { %587 = vrot.lane.b32.xlu0 %v2026_v10, %s1928_s25 }
  0x23   : > { %589 = vrot.lane.b32.xlu1 %v2015_v6, %s1928_s25 }
  0x24   : > { %539 = vrot.lane.b32.xlu2 %v2033_v13, %s1928_s25 }
  0x2a   : > { %541 = vrot.lane.b32.xlu0 %v2022_v9, %s1928_s25 }
  0x2b   : > { %585 = vrot.lane.b32.xlu1 %v584_v17, %s1926_s15 }
  0x2c   : > { %679 = vrot.lane.b32.xlu2 %v2026_v10, %s1929_s30 }
  0x32   : > { %681 = vrot.lane.b32.xlu0 %v2015_v6, %s1929_s30 }
  0x33   : > { %631 = vrot.lane.b32.xlu1 %v2033_v13, %s1929_s30 }
  0x34   : > { %633 = vrot.lane.b32.xlu2 %v2022_v9, %s1929_s30 }
  0x3a   : > { %677 = vrot.lane.b32.xlu0 %v676_v20, %s1926_s15 }
  0x3b   : > { %771 = vrot.lane.b32.xlu1 %v2026_v10, %s1930_s14 }
  0x3c   : > { %773 = vrot.lane.b32.xlu2 %v2015_v6, %s1930_s14 }
  0x42   : > { %723 = vrot.lane.b32.xlu0 %v2033_v13, %s1930_s14 }
  0x43   : > { %725 = vrot.lane.b32.xlu1 %v2022_v9, %s1930_s14 }
  0x44   : > { %769 = vrot.lane.b32.xlu2 %v768_v23, %s1926_s15 }
  0x4a   : > { %863 = vrot.lane.b32.xlu0 %v2026_v10, %s1931_s8 }
  0x4b   : > { %865 = vrot.lane.b32.xlu1 %v2015_v6, %s1931_s8 }
  0x4c   : > { %815 = vrot.lane.b32.xlu2 %v2033_v13, %s1931_s8 }
  0x52   : > { %817 = vrot.lane.b32.xlu0 %v2022_v9, %s1931_s8 }
  0x53   : > { %861 = vrot.lane.b32.xlu1 %v860_v30, %s1926_s15 }
  0x54   : > { %955 = vrot.lane.b32.xlu2 %v2026_v10, %s1932_s20 }
  0x5a   : > { %957 = vrot.lane.b32.xlu0 %v2015_v6, %s1932_s20 }
  0x5b   : > { %907 = vrot.lane.b32.xlu1 %v2033_v13, %s1932_s20 }
  0x5c   : > { %909 = vrot.lane.b32.xlu2 %v2022_v9, %s1932_s20 }
  0x62   : > { %953 = vrot.lane.b32.xlu0 %v952_v33, %s1926_s15 }
  0x63   : > { %1047 = vrot.lane.b32.xlu1 %v2026_v10, %s1933_s21 }
  0x64   : > { %1049 = vrot.lane.b32.xlu2 %v2015_v6, %s1933_s21 }
  0x6a   : > { %999 = vrot.lane.b32.xlu0 %v2033_v13, %s1933_s21 }
  0x6b   : > { %1001 = vrot.lane.b32.xlu1 %v2022_v9, %s1933_s21 }
  0x6c   : > { %1045 = vrot.lane.b32.xlu2 %v1044_v39, %s1926_s15 }
  0x6e   : > { %v448_v34 = vpop.permute.xlu2 %447 }
  0x6f   : > { %v458_v36 = vsel %vm373_vm0, %v448_v34, 0 }
  0x70   : > { %480 = vmatpush.bf16.msrb.mxu1 %v458_v36 }
  0x72   : > { %1139 = vrot.lane.b32.xlu0 %v2026_v10, %s1934_s26 }
  0x73   : > { %1141 = vrot.lane.b32.xlu1 %v2015_v6, %s1934_s26 }
  0x74   : > { %1091 = vrot.lane.b32.xlu2 %v2033_v13, %s1934_s26 }
  0x76   : > { %v492_v41 = vpop.permute.xlu2 %491 }
  0x7a   : > { %1093 = vrot.lane.b32.xlu0 %v2022_v9, %s1934_s26 }
  0x7b   : > { %1137 = vrot.lane.b32.xlu1 %v1136_v42, %s1926_s15 }
  0x7e   : > { %v540_v43 = vpop.permute.xlu2 %539 }
  0x84   : > { %v368_v44 = vpop.permute.xlu0 %367 }
  0x85   : > { %1815 = vmatmul.msk.bf16.vlgmr.msra.gmra.mxu0 %vm369_vm1, %v368_v44  ;;  %1816 = vmatmul.msk.bf16.vlgmr.msra.gmra.mxu1 %vm369_vm1, %v368_v44  ;;  %v498_v45 = vpop.permute.xlu1 %497 }
  0x86   : > { %v507_v46 = vsel %vm373_vm0, %v498_v45, 0  ;;  %v680_v47 = vpop.permute.xlu2 %679 }
  0x87   : > { %529 = vmatpush.bf16.msrb.mxu3 %v507_v46 }
  0x8a   : > { %1823 = vmatmul.msk.bf16.vlgmr.msrb.gmra.mxu3 %vm369_vm1, %v492_v41 }
  0x8c   : > { %v496_v48 = vpop.permute.xlu0 %495 }
  0x8d   : > { %v499_v49 = vsel %vm449_vm2, %v496_v48, %v498_v45  ;;  %v446_v51 = vpop.permute.xlu1 %445 }
  0x8e   : > { %v504_v50 = vsel %vm373_vm0, %v499_v49, 0  ;;  %v450_v52 = vsel %vm449_vm2, %v446_v51, %v448_v34  ;;  %v634_v53 = vpop.permute.xlu2 %633 }
  0x8f   : > { %516 = vmatpush.bf16.msrb.mxu2 %v504_v50  ;;  %v455_v54 = vsel %vm373_vm0, %v450_v52, 0  ;;  %v644_v62 = vsel %vm373_vm0, %v634_v53, 0 }
  0x90   : > { %467 = vmatpush.bf16.msrb.mxu0 %v455_v54 }
  0x92   : > { %1822 = vmatmul.msk.bf16.vlgmr.msrb.gmra.mxu2 %vm369_vm1, %v492_v41 }
  0x94   : > { %v588_v55 = vpop.permute.xlu0 %587 }
  0x95   : > { %1821 = vmatmul.msk.bf16.vlgmr.msrb.gmra.mxu1 %vm369_vm1, %v2020_v8  ;;  %1820 = vmatmul.msk.bf16.vlgmr.msrb.gmra.mxu0 %vm369_vm1, %v2020_v8  ;;  %v590_v56 = vpop.permute.xlu1 %589 }
  0x96   : > { %v591_v57 = vsel %vm543_vm3, %v588_v55, %v590_v56  ;;  %v599_v58 = vsel %vm373_vm0, %v590_v56, 0  ;;  %v774_v60 = vpop.permute.xlu2 %773 }
  0x97   : > { %v596_v59 = vsel %vm373_vm0, %v591_v57, 0  ;;  %621 = vmatpush.bf16.msra.mxu3 %v599_v58  ;;  %v783_v4 = vsel %vm373_vm0, %v774_v60, 0 }
  0x98   : > { %608 = vmatpush.bf16.msra.mxu2 %v596_v59 }
  0x9b   : > { %v437_v49 = vpop.f32.mrf.mxu3  ;;  %v424_v50 = vpop.f32.mrf.mxu2 }
  0x9c   : > { %v542_v61 = vpop.permute.xlu0 %541 }
  0x9d   : > { %v552_v63 = vsel %vm373_vm0, %v542_v61, 0  ;;  %v544_v0 = vsel %vm543_vm3, %v540_v43, %v542_v61  ;;  %v586_v2 = vpop.permute.xlu1 %585 }
  0x9e   : > { %v549_v1 = vsel %vm373_vm0, %v544_v0, 0  ;;  %574 = vmatpush.bf16.msra.mxu1 %v552_v63  ;;  %1828 = vmatmul.msk.bf16.vlgmr.msra.gmra.mxu3 %vm369_vm1, %v586_v2  ;;  %v770_v7 = vpop.permute.xlu2 %769 }
  0x9f   : > { %561 = vmatpush.bf16.msra.mxu0 %v549_v1 }
  0xa2   : > { %666 = vmatpush.bf16.msrb.mxu1 %v644_v62  ;;  %1827 = vmatmul.msk.bf16.vlgmr.msra.gmra.mxu2 %vm369_vm1, %v586_v2 }
  0xa3   : > { %v439_v55 = vpop.f32.mrf.mxu3  ;;  %v426_v56 = vpop.f32.mrf.mxu2 }
  0xa4   : > { %v682_v3 = vpop.permute.xlu0 %681 }
  0xa5   : > { %1826 = vmatmul.msk.bf16.vlgmr.msra.gmra.mxu1 %vm369_vm1, %v2043_v15  ;;  %v691_v5 = vsel %vm373_vm0, %v682_v3, 0  ;;  %v683_v6 = vsel %vm635_vm4, %v680_v47, %v682_v3  ;;  %1825 = vmatmul.msk.bf16.vlgmr.msra.gmra.mxu0 %vm369_vm1, %v2043_v15  ;;  %v632_v9 = vpop.permute.xlu1 %631 }
  0xa6   : > { %v688_v8 = vsel %vm373_vm0, %v683_v6, 0  ;;  %713 = vmatpush.bf16.msrb.mxu3 %v691_v5  ;;  %v636_v10 = vsel %vm635_vm4, %v632_v9, %v634_v53  ;;  %v816_v13 = vpop.permute.xlu2 %815 }
  0xa7   : > { %700 = vmatpush.bf16.msrb.mxu2 %v688_v8  ;;  %v641_v11 = vsel %vm373_vm0, %v636_v10, 0 }
  0xa8   : > { %653 = vmatpush.bf16.msrb.mxu0 %v641_v11 }
  0xaa   : > { %805 = vmatpush.bf16.msra.mxu3 %v783_v4 }
  0xac   : > { %v678_v12 = vpop.permute.xlu0 %677 }
  0xad   : > { %v772_v14 = vpop.permute.xlu1 %771 }
  0xae   : > { %1833 = vmatmul.msk.bf16.vlgmr.msrb.gmra.mxu3 %vm369_vm1, %v678_v12  ;;  %v775_v16 = vsel %vm727_vm5, %v772_v14, %v774_v60  ;;  %v956_v19 = vpop.permute.xlu2 %955 }
  0xaf   : > { %v780_v15 = vsel %vm373_vm0, %v775_v16, 0 }
  0xb0   : > { %792 = vmatpush.bf16.msra.mxu2 %v780_v15 }
  0xb2   : > { %1832 = vmatmul.msk.bf16.vlgmr.msrb.gmra.mxu2 %vm369_vm1, %v678_v12 }
  0xb4   : > { %v724_v17 = vpop.permute.xlu0 %723 }
  0xb5   : > { %1831 = vmatmul.msk.bf16.vlgmr.msrb.gmra.mxu1 %vm369_vm1, %v2056_v18  ;;  %1830 = vmatmul.msk.bf16.vlgmr.msrb.gmra.mxu0 %vm369_vm1, %v2056_v18  ;;  %v726_v20 = vpop.permute.xlu1 %725 }
  0xb6   : > { %v728_v22 = vsel %vm727_vm5, %v724_v17, %v726_v20  ;;  %v736_v23 = vsel %vm373_vm0, %v726_v20, 0  ;;  %v910_v18 = vpop.permute.xlu2 %909 }
  0xb7   : > { %v733_v24 = vsel %vm373_vm0, %v728_v22, 0  ;;  %758 = vmatpush.bf16.msra.mxu1 %v736_v23  ;;  %v920_v33 = vsel %vm373_vm0, %v910_v18, 0 }
  0xb8   : > { %745 = vmatpush.bf16.msra.mxu0 %v733_v24 }
  0xbc   : > { %v864_v25 = vpop.permute.xlu0 %863 }
  0xbd   : > { %v866_v27 = vpop.permute.xlu1 %865 }
  0xbe   : > { %1838 = vmatmul.msk.bf16.vlgmr.msra.gmra.mxu3 %vm369_vm1, %v770_v7  ;;  %v867_v28 = vsel %vm819_vm6, %v864_v25, %v866_v27  ;;  %v875_v29 = vsel %vm373_vm0, %v866_v27, 0  ;;  %v1050_v41 = vpop.permute.xlu2 %1049 }
  0xbf   : > { %v872_v30 = vsel %vm373_vm0, %v867_v28, 0  ;;  %897 = vmatpush.bf16.msrb.mxu3 %v875_v29  ;;  %v1059_v45 = vsel %vm373_vm0, %v1050_v41, 0 }
  0xc0   : > { %884 = vmatpush.bf16.msrb.mxu2 %v872_v30 }
  0xc2   : > { %1837 = vmatmul.msk.bf16.vlgmr.msra.gmra.mxu2 %vm369_vm1, %v770_v7 }
  0xc4   : > { %v818_v32 = vpop.permute.xlu0 %817 }
  0xc5   : > { %1836 = vmatmul.msk.bf16.vlgmr.msra.gmra.mxu1 %vm369_vm1, %v2071_v21  ;;  %v828_v34 = vsel %vm373_vm0, %v818_v32, 0  ;;  %v820_v36 = vsel %vm819_vm6, %v816_v13, %v818_v32  ;;  %1835 = vmatmul.msk.bf16.vlgmr.msra.gmra.mxu0 %vm369_vm1, %v2071_v21  ;;  %v862_v39 = vpop.permute.xlu1 %861  ;;  %v1935_v13 = vmov 0  }
  0xc6   : > { %v825_v37 = vsel %vm373_vm0, %v820_v36, 0  ;;  %850 = vmatpush.bf16.msrb.mxu1 %v828_v34  ;;  %1911 = vset.pattern.permute.xlu2 %v1935_v13 }
  0xc7   : > { %837 = vmatpush.bf16.msrb.mxu0 %v825_v37  ;;  %1912 = vset.pattern.permute.xlu1 %v1935_v13 }
  0xc8   : > { %1913 = vset.pattern.permute.xlu0 %v1935_v13 }
  0xca   : > { %942 = vmatpush.bf16.msra.mxu1 %v920_v33 }
  0xcc   : > { %v958_v40 = vpop.permute.xlu0 %957 }
  0xcd   : > { %v967_v42 = vsel %vm373_vm0, %v958_v40, 0  ;;  %v959_v43 = vsel %vm911_vm7, %v956_v19, %v958_v40  ;;  %v908_v21 = vpop.permute.xlu1 %907 }
  0xce   : > { %v964_v44 = vsel %vm373_vm0, %v959_v43, 0  ;;  %989 = vmatpush.bf16.msra.mxu3 %v967_v42  ;;  %v912_v46 = vsel %vm911_vm7, %v908_v21, %v910_v18 }
  0xcf   : > { %976 = vmatpush.bf16.msra.mxu2 %v964_v44  ;;  %1843 = vmatmul.msk.bf16.vlgmr.msrb.gmra.mxu3 %vm369_vm1, %v862_v39  ;;  %v917_v47 = vsel %vm373_vm0, %v912_v46, 0 }
  0xd0   : > { %929 = vmatpush.bf16.msra.mxu0 %v917_v47 }
  0xd2   : > { %1842 = vmatmul.msk.bf16.vlgmr.msrb.gmra.mxu2 %vm369_vm1, %v862_v39  ;;  %1081 = vmatpush.bf16.msrb.mxu3 %v1059_v45 }
  0xd4   : > { %v954_v48 = vpop.permute.xlu0 %953 }
  0xd5   : > { %1841 = vmatmul.msk.bf16.vlgmr.msrb.gmra.mxu1 %vm369_vm1, %v2096_v26  ;;  %1840 = vmatmul.msk.bf16.vlgmr.msrb.gmra.mxu0 %vm369_vm1, %v2096_v26  ;;  %v1048_v51 = vpop.permute.xlu1 %1047  ;;  %v1046_v26 = vpop.permute.xlu2 %1045 }
  0xd6   : > { %v1051_v52 = vsel %vm1003_vm8, %v1048_v51, %v1050_v41 }
  0xd7   : > { %v1056_v53 = vsel %vm373_vm0, %v1051_v52, 0 }
  0xd8   : > { %1068 = vmatpush.bf16.msrb.mxu2 %v1056_v53 }
  0xdc   : > { %v1000_v54 = vpop.permute.xlu0 %999 }
  0xdd   : > { %v1002_v57 = vpop.permute.xlu1 %1001  ;;  %v1092_v2 = vpop.permute.xlu2 %1091 }
  0xde   : > { %v1004_v58 = vsel %vm1003_vm8, %v1000_v54, %v1002_v57  ;;  %v1012_v59 = vsel %vm373_vm0, %v1002_v57, 0 }
  0xdf   : > { %1848 = vmatmul.msk.bf16.vlgmr.msra.gmra.mxu3 %vm369_vm1, %v954_v48  ;;  %v1009_v60 = vsel %vm373_vm0, %v1004_v58, 0  ;;  %1034 = vmatpush.bf16.msrb.mxu1 %v1012_v59 }
  0xe0   : > { %1021 = vmatpush.bf16.msrb.mxu0 %v1009_v60 }
  0xe2   : > { %1847 = vmatmul.msk.bf16.vlgmr.msra.gmra.mxu2 %vm369_vm1, %v954_v48 }
  0xe4   : > { %v1140_v61 = vpop.permute.xlu0 %1139 }
  0xe5   : > { %1846 = vmatmul.msk.bf16.vlgmr.msra.gmra.mxu1 %vm369_vm1, %v2113_v31  ;;  %1845 = vmatmul.msk.bf16.vlgmr.msra.gmra.mxu0 %vm369_vm1, %v2113_v31  ;;  %v1142_v62 = vpop.permute.xlu1 %1141 }
  0xe6   : > { %v1143_v63 = vsel %vm1095_vm9, %v1140_v61, %v1142_v62  ;;  %v1151_v0 = vsel %vm373_vm0, %v1142_v62, 0 }
  0xe7   : > { %v1148_v1 = vsel %vm373_vm0, %v1143_v63, 0  ;;  %1173 = vmatpush.bf16.msra.mxu3 %v1151_v0 }
  0xe8   : > { %1160 = vmatpush.bf16.msra.mxu2 %v1148_v1 }
  0xec   : > { %v1094_v3 = vpop.permute.xlu0 %1093 }
  0xed   : > { %v1104_v4 = vsel %vm373_vm0, %v1094_v3, 0  ;;  %v1096_v5 = vsel %vm1095_vm9, %v1092_v2, %v1094_v3  ;;  %v1138_v31 = vpop.permute.xlu1 %1137 }
  0xee   : > { %v1101_v6 = vsel %vm373_vm0, %v1096_v5, 0  ;;  %1126 = vmatpush.bf16.msra.mxu1 %v1104_v4 }
  0xef   : > { %1113 = vmatpush.bf16.msra.mxu0 %v1101_v6  ;;  %1853 = vmatmul.msk.bf16.vlgmr.msrb.gmra.mxu3 %vm369_vm1, %v1046_v26 }
  0xf2   : > { %1852 = vmatmul.msk.bf16.vlgmr.msrb.gmra.mxu2 %vm369_vm1, %v1046_v26 }
  0xf5   : > { %1851 = vmatmul.msk.bf16.vlgmr.msrb.gmra.mxu1 %vm369_vm1, %v2136_v35  ;;  %1850 = vmatmul.msk.bf16.vlgmr.msrb.gmra.mxu0 %vm369_vm1, %v2136_v35  ;;  %v1181_v35 = vld [vmem:[%s2381_s3] sm:$0xff] }
  0xf6   : > { %1184 = vperm.xlu2 %1911, %v1181_v35  }
  0xff   : > { %1858 = vmatmul.msk.bf16.vlgmr.msra.gmra.mxu3 %vm369_vm1, %v1138_v31 }
 0x102   : > { %v389_v7 = vpop.f32.mrf.mxu0  ;;  %v402_v8 = vpop.f32.mrf.mxu1  ;;  %1857 = vmatmul.msk.bf16.vlgmr.msra.gmra.mxu2 %vm369_vm1, %v1138_v31 }
 0x103   : > { %v425_v9 = vadd.f32 %v424_v50, %v389_v7  ;;  %v438_v10 = vadd.f32 %v437_v49, %v402_v8 }
 0x105   : > { %1856 = vmatmul.msk.bf16.vlgmr.msra.gmra.mxu1 %vm369_vm1, %v2145_v38  ;;  %1855 = vmatmul.msk.bf16.vlgmr.msra.gmra.mxu0 %vm369_vm1, %v2145_v38 }
 0x10a   : > { %v391_v11 = vpop.f32.mrf.mxu0  ;;  %v404_v12 = vpop.f32.mrf.mxu1 }
 0x10d   : > { %v531_v14 = vpop.f32.mrf.mxu3 }
 0x112   : > { %v482_v16 = vpop.f32.mrf.mxu1  ;;  %v469_v17 = vpop.f32.mrf.mxu0 }
 0x113   : > { %v487_v15 = vadd.f32 %v482_v16, %v438_v10  ;;  %v486_v19 = vadd.f32 %v469_v17, %v425_v9 }
 0x115   : > { %v518_v20 = vpop.f32.mrf.mxu2  ;;  %v533_v22 = vpop.f32.mrf.mxu3  ;;  %v536_v25 = vadd.f32 %v531_v14, %v487_v15 }
 0x116   : > { %v535_v27 = vadd.f32 %v518_v20, %v486_v19 }
 0x11a   : > { %v484_v23 = vpop.f32.mrf.mxu1  ;;  %v471_v38 = vpop.f32.mrf.mxu0 }
 0x11d   : > { %v520_v24 = vpop.f32.mrf.mxu2 }
 0x121   : > { %v623_v32 = vpop.f32.mrf.mxu3 }
 0x122   : > { %v576_v28 = vpop.f32.mrf.mxu1  ;;  %v563_v18 = vpop.f32.mrf.mxu0 }
 0x123   : > { %v581_v29 = vadd.f32 %v576_v28, %v536_v25  ;;  %v580_v30 = vadd.f32 %v563_v18, %v535_v27 }
 0x125   : > { %v628_v33 = vadd.f32 %v623_v32, %v581_v29  ;;  %v610_v34 = vpop.f32.mrf.mxu2 }
 0x126   : > { %v627_v36 = vadd.f32 %v610_v34, %v580_v30 }
 0x129   : > { %v625_v40 = vpop.f32.mrf.mxu3 }
 0x12a   : > { %v578_v37 = vpop.f32.mrf.mxu1  ;;  %v565_v39 = vpop.f32.mrf.mxu0 }
 0x12b   : > { %v354_v39 = vld [vmem:[%s2384_s6] sm:$0x3] }
 0x12d   : > { %v612_v41 = vpop.f32.mrf.mxu2 }
 0x131   : > { %v715_v44 = vpop.f32.mrf.mxu3 }
 0x132   : > { %v668_v42 = vpop.f32.mrf.mxu1  ;;  %v655_v43 = vpop.f32.mrf.mxu0 }
 0x133   : > { %v673_v3 = vadd.f32 %v668_v42, %v628_v33  ;;  %v672_v5 = vadd.f32 %v655_v43, %v627_v36 }
 0x135   : > { %v702_v45 = vpop.f32.mrf.mxu2  ;;  %v720_v6 = vadd.f32 %v715_v44, %v673_v3 }
 0x136   : > { %v719_v31 = vadd.f32 %v702_v45, %v672_v5 }
 0x139   : > { %v717_v47 = vpop.f32.mrf.mxu3 }
 0x13a   : > { %v670_v21 = vpop.f32.mrf.mxu1  ;;  %v657_v46 = vpop.f32.mrf.mxu0 }
 0x13b   : > { %v2259_v46 = vperm.slane %v354_v39, 1 }
 0x13d   : > { %v704_v48 = vpop.f32.mrf.mxu2 }
 0x13e   : > { %v2261_v48 = vperm.slane %v354_v39, 0 }
 0x141   : > { %v807_v51 = vpop.f32.mrf.mxu3 }
 0x142   : > { %v760_v49 = vpop.f32.mrf.mxu1  ;;  %v747_v50 = vpop.f32.mrf.mxu0 }
 0x143   : > { %v765_v8 = vadd.f32 %v760_v49, %v720_v6  ;;  %v764_v10 = vadd.f32 %v747_v50, %v719_v31  ;;  %v1936_v31 = vmov 0.0  }
 0x144   : > { %1228 = vst [vmem:[#allocation2] sm:$0xff] %v1936_v31 }
 0x145   : > { %v794_v52 = vpop.f32.mrf.mxu2  ;;  %v812_v13 = vadd.f32 %v807_v51, %v765_v8  ;;  %1230 = vst.msk [vmem:[#allocation2 + $0x8] sm:$0xff] %vm1095_vm9, %v1936_v31 }
 0x146   : > { %v811_v35 = vadd.f32 %v794_v52, %v764_v10 }
 0x149   : > { %v809_v55 = vpop.f32.mrf.mxu3 }
 0x14a   : > { %v762_v53 = vpop.f32.mrf.mxu1  ;;  %v749_v54 = vpop.f32.mrf.mxu0 }
 0x14d   : > { %v796_v56 = vpop.f32.mrf.mxu2 }
 0x150   : > { %v1185_v44 = vpop.permute.xlu2 %1184 }
 0x152   : > { %v852_v57 = vpop.f32.mrf.mxu1  ;;  %v839_v58 = vpop.f32.mrf.mxu0 }
 0x153   : > { %v899_v59 = vpop.f32.mrf.mxu3  ;;  %v857_v14 = vadd.f32 %v852_v57, %v812_v13  ;;  %v856_v16 = vadd.f32 %v839_v58, %v811_v35 }
 0x155   : > { %v886_v26 = vpop.f32.mrf.mxu2  ;;  %v904_v20 = vadd.f32 %v899_v59, %v857_v14 }
 0x156   : > { %v903_v23 = vadd.f32 %v886_v26, %v856_v16 }
 0x15a   : > { %v854_v60 = vpop.f32.mrf.mxu1  ;;  %v841_v61 = vpop.f32.mrf.mxu0 }
 0x15b   : > { %v901_v62 = vpop.f32.mrf.mxu3 }
 0x15d   : > { %v888_v63 = vpop.f32.mrf.mxu2 }
 0x162   : > { %v944_v0 = vpop.f32.mrf.mxu1  ;;  %v931_v1 = vpop.f32.mrf.mxu0 }
 0x163   : > { %v991_v2 = vpop.f32.mrf.mxu3  ;;  %v949_v38 = vadd.f32 %v944_v0, %v904_v20  ;;  %v948_v24 = vadd.f32 %v931_v1, %v903_v23 }
 0x165   : > { %v978_v4 = vpop.f32.mrf.mxu2  ;;  %v996_v27 = vadd.f32 %v991_v2, %v949_v38 }
 0x166   : > { %v995_v29 = vadd.f32 %v978_v4, %v948_v24 }
 0x16a   : > { %v946_v7 = vpop.f32.mrf.mxu1  ;;  %v933_v9 = vpop.f32.mrf.mxu0 }
 0x16b   : > { %v993_v11 = vpop.f32.mrf.mxu3 }
 0x16d   : > { %v980_v12 = vpop.f32.mrf.mxu2 }
 0x172   : > { %v1036_v15 = vpop.f32.mrf.mxu1  ;;  %v1023_v17 = vpop.f32.mrf.mxu0 }
 0x173   : > { %v1083_v19 = vpop.f32.mrf.mxu3  ;;  %v1041_v30 = vadd.f32 %v1036_v15, %v996_v27  ;;  %v1040_v33 = vadd.f32 %v1023_v17, %v995_v29 }
 0x175   : > { %v1070_v22 = vpop.f32.mrf.mxu2  ;;  %v1088_v34 = vadd.f32 %v1083_v19, %v1041_v30 }
 0x176   : > { %v1087_v36 = vadd.f32 %v1070_v22, %v1040_v33 }
 0x17a   : > { %v1038_v25 = vpop.f32.mrf.mxu1  ;;  %v1025_v28 = vpop.f32.mrf.mxu0 }
 0x17b   : > { %v1085_v18 = vpop.f32.mrf.mxu3  ;;  %v1245_v28 = vld [vmem:[%s2382_s4] sm:$0xf] }
 0x17d   : > { %v1072_v32 = vpop.f32.mrf.mxu2 }
 0x182   : > { %v1128_v37 = vpop.f32.mrf.mxu1  ;;  %v1115_v41 = vpop.f32.mrf.mxu0 }
 0x183   : > { %v1133_v40 = vadd.f32 %v1128_v37, %v1088_v34  ;;  %v1132_v42 = vadd.f32 %v1115_v41, %v1087_v36  ;;  %v1175_v43 = vpop.f32.mrf.mxu3  ;;  %v1859_v34 = vld [vmem:[%s2382_s4 + $0x4] sm:$0xf] }
 0x185   : > { %v1180_v45 = vadd.f32 %v1175_v43, %v1133_v40  ;;  %v1162_v21 = vpop.f32.mrf.mxu2  ;;  %v1864_v43 = vld [vmem:[%s2382_s4 + $0x8] sm:$0xf] }
 0x186   : > { %v1179_v47 = vadd.f32 %v1162_v21, %v1132_v42 }
 0x187   : > { %v1188_v49 = vadd.f32 %v1185_v44, %v1180_v45 }
 0x188   : > { %v1187_v50 = vadd.f32 %v1185_v44, %v1179_v47 }
 0x189   : > { %v1195_v51 = vmul.f32 %v2259_v46, %v1188_v49 }
 0x18a   : > { %v1130_v52 = vpop.f32.mrf.mxu1  ;;  %v1194_v53 = vmul.f32 %v2261_v48, %v1187_v50  ;;  %v1117_v54 = vpop.f32.mrf.mxu0 }
 0x18b   : > { %v1197_v55 = vsel %vm2388_vm10, %v1195_v51, 0.0  ;;  %v1177_v56 = vpop.f32.mrf.mxu3 }
 0x18c   : > { %v1198_v57 = vadd.f32 %v1197_v55, %v1194_v53 }
 0x18d   : > { %v1164_v58 = vpop.f32.mrf.mxu2 }
 0x18e   : > { %1199 = vadd.xlane.f32.xlu0 %v1198_v57 }
 0x201   : > { %v1200_v59 = vpop.xlane.xlu0 %1199 }
 0x202   : > { %v1201_v26 = vmul.f32 0.0069444445, %v1200_v59 }
 0x204   : > { %v1202_v60 = vsub.f32 %v1194_v53, %v1201_v26  ;;  %v1203_v61 = vsub.f32 %v1195_v51, %v1201_v26  ;;  %v1867_v51 = vld [vmem:[%s2382_s4 + $0xc] sm:$0xf] }
 0x206   : > { %v1204_v62 = vmul.f32 %v1202_v60, %v2261_v48  ;;  %v1205_v63 = vmul.f32 %v1203_v61, %v2259_v46  ;;  %v1870_v60 = vld [vmem:[%s2382_s4 + $0x10] sm:$0xf]  ;;  %v1637_v61 = vld [vmem:[%s2383_s5] sm:$0xff] }
 0x208   : > { %v1206_v0 = vmul.f32 %v1204_v62, %v1204_v62  ;;  %v1207_v1 = vmul.f32 %v1205_v63, %v1205_v63 }
 0x20a   : > { %v1208_v2 = vsel %vm2388_vm10, %v1207_v1, 0.0  ;;  %vm1243_vm10 = vcmask 678912  }
 0x20b   : > { %v1209_v3 = vadd.f32 %v1208_v2, %v1206_v0 }
 0x20d   : > { %1210 = vadd.xlane.f32.xlu1 %v1209_v3 }
 0x280   : > { %v1211_v4 = vpop.xlane.xlu1 %1210 }
 0x281   : > { %v1212_v5 = vmul.f32 0.0069444445, %v1211_v4  ;;  %v1873_v4 = vld [vmem:[%s2382_s4 + $0x14] sm:$0xf] }
 0x283   : > { %v1213_v6 = vadd.f32 1e-05, %v1212_v5  ;;  %v1679_v5 = vld [vmem:[#allocation3] sm:$0x1] }
 0x285   : > { %1914 = vrsqrt.f32 %v1213_v6  ;;  %vm1220_vm12 = vweird.f32 %v1213_v6 }
 0x28b   : > { %v1915_v7 = vpop.eup %1914 }
 0x28c   : > { %v1215_v8 = vmul.f32 %v1915_v7, %v1213_v6  ;;  %vm1221_vm11 = vweird.f32 %v1915_v7 }
 0x28d   : > { %vm1222_vm13 = vmor %vm1220_vm12, %vm1221_vm11 }
 0x28e   : > { %v1216_v9 = vmul.f32 %v1915_v7, %v1215_v8  ;;  %v1876_v8 = vld [vmem:[%s2382_s4 + $0x18] sm:$0xf] }
 0x290   : > { %v1217_v10 = vmul.f32 0.5, %v1216_v9 }
 0x292   : > { %v1218_v11 = vsub.f32 1.5, %v1217_v10 }
 0x294   : > { %v1219_v12 = vmul.f32 %v1915_v7, %v1218_v11 }
 0x296   : > { %v1223_v13 = vsel %vm1222_vm13, %v1915_v7, %v1219_v12 }
 0x297   : > { %v1224_v35 = vmul.f32 %v1223_v13, %v1204_v62  ;;  %v1225_v16 = vmul.f32 %v1223_v13, %v1205_v63 }
 0x299   : > { %v1226_v14 = vmax.f32 %v1224_v35, 0.0  ;;  %v1227_v15 = vmax.f32 %v1225_v16, 0.0  ;;  %v1879_v35 = vld [vmem:[%s2382_s4 + $0x1c] sm:$0xf] }
 0x29b   : > { %1233 = vrot.lane.b32.xlu2 %v1226_v14, %s1937_s16  ;;  %v1882_v14 = vld [vmem:[%s2382_s4 + $0x20] sm:$0xf] }
 0x2a3   : > { %1235 = vrot.lane.b32.xlu2 %v1227_v15, %s1937_s16 }
 0x2f5   : > { %v1234_v17 = vpop.permute.xlu2 %1233 }
 0x2f6   : > { %1242 = vst.msk [vmem:[#allocation2] sm:$0xff] %vm1241_vm14, %v1234_v17 }
 0x2fd   : > { %v1246_v19 = vld [vmem:[#allocation2] sm:$0xff]  ;;  %v1236_v20 = vpop.permute.xlu2 %1235 }
 0x2fe   : > { %v1248_v22 = vpack.c.bf16 %v1246_v19, %v1246_v19  ;;  %v1238_v23 = vsel %vm1237_vm15, %v1234_v17, %v1236_v20 }
 0x2ff   : > { %1244 = vst.msk [vmem:[#allocation2 + $0x8] sm:$0xff] %vm1243_vm10, %v1238_v23 }
 0x300   : > { %1375 = vrot.lane.b32.xlu0 %v1248_v22, %s1929_s30  ;;  %1254 = vrot.lane.b32.xlu2 %v1248_v22, %s1927_s24  ;;  %v1298_v38 = vsel %vm373_vm0, %v1248_v22, 0 }
 0x301   : > { %1310 = vmatpush.bf16.msrb.mxu2 %v1298_v38 }
 0x304   : > { %1862 = vmatmul.msk.bf16.vlgmr.msrb.gmra.mxu2 %vm369_vm1, %v1245_v28 }
 0x306   : > { %v1247_v24 = vld [vmem:[#allocation2 + $0x8] sm:$0xff] }
 0x307   : > { %v1249_v25 = vpack.c.bf16 %v1247_v24, %v1247_v24 }
 0x308   : > { %1463 = vrot.lane.b32.xlu0 %v1248_v22, %s1931_s8 }
 0x309   : > { %1377 = vrot.lane.b32.xlu1 %v1249_v25, %s1929_s30  ;;  %1256 = vrot.lane.b32.xlu2 %v1249_v25, %s1927_s24  ;;  %v1301_v27 = vsel %vm373_vm0, %v1249_v25, 0 }
 0x30a   : > { %1323 = vmatpush.bf16.msrb.mxu3 %v1301_v27 }
 0x30d   : > { %1863 = vmatmul.msk.bf16.vlgmr.msrb.gmra.mxu3 %vm369_vm1, %v1245_v28 }
 0x310   : > { %1509 = vrot.lane.b32.xlu0 %v1249_v25, %s1932_s20 }
 0x311   : > { %1507 = vrot.lane.b32.xlu1 %v1248_v22, %s1932_s20  ;;  %1331 = vrot.lane.b32.xlu2 %v1248_v22, %s1928_s25 }
 0x318   : > { %1595 = vrot.lane.b32.xlu0 %v1248_v22, %s1934_s26 }
 0x319   : > { %1553 = vrot.lane.b32.xlu1 %v1249_v25, %s1933_s21  ;;  %1333 = vrot.lane.b32.xlu2 %v1249_v25, %s1928_s25  ;;  %s1814_s25 = sshll.u32 %s2392_s12, 1 }
 0x31a   : > { %s352_s17 = scalar_lea.vmem %s2387_s9, %s1814_s25 }
 0x321   : > { %1419 = vrot.lane.b32.xlu2 %v1248_v22, %s1930_s14  ;;  %1640 = vperm.xlu1 %1912, %v1637_v61  }
 0x329   : > { %1421 = vrot.lane.b32.xlu2 %v1249_v25, %s1930_s14  ;;  %1682 = vperm.xlu1 %1912, %v1679_v5  }
 0x331   : > { %1465 = vrot.lane.b32.xlu2 %v1249_v25, %s1931_s8 }
 0x339   : > { %1551 = vrot.lane.b32.xlu2 %v1248_v22, %s1933_s21 }
 0x341   : > { %1597 = vrot.lane.b32.xlu2 %v1249_v25, %s1934_s26 }
 0x35a   : > { %v1255_v29 = vpop.permute.xlu2 %1254 }
 0x363   : > { %v1257_v18 = vpop.permute.xlu2 %1256 }
 0x364   : > { %v1258_v30 = vsel %vm449_vm2, %v1255_v29, %v1257_v18  ;;  %v1266_v32 = vsel %vm373_vm0, %v1257_v18, 0 }
 0x365   : > { %v1263_v33 = vsel %vm373_vm0, %v1258_v30, 0  ;;  %1288 = vmatpush.bf16.msrb.mxu1 %v1266_v32 }
 0x366   : > { %1275 = vmatpush.bf16.msrb.mxu0 %v1263_v33 }
 0x368   : > { %1861 = vmatmul.msk.bf16.vlgmr.msrb.gmra.mxu1 %vm369_vm1, %v1859_v34 }
 0x369   : > { %1860 = vmatmul.msk.bf16.vlgmr.msrb.gmra.mxu0 %vm369_vm1, %v1859_v34 }
 0x36b   : > { %v1332_v36 = vpop.permute.xlu2 %1331 }
 0x372   : > { %v1376_v37 = vpop.permute.xlu0 %1375 }
 0x373   : > { %v1334_v39 = vpop.permute.xlu2 %1333 }
 0x374   : > { %v1335_v40 = vsel %vm543_vm3, %v1332_v36, %v1334_v39  ;;  %v1343_v41 = vsel %vm373_vm0, %v1334_v39, 0 }
 0x375   : > { %v1340_v42 = vsel %vm373_vm0, %v1335_v40, 0  ;;  %1365 = vmatpush.bf16.msra.mxu1 %v1343_v41 }
 0x376   : > { %1352 = vmatpush.bf16.msra.mxu0 %v1340_v42 }
 0x378   : > { %1866 = vmatmul.msk.bf16.vlgmr.msra.gmra.mxu1 %vm369_vm1, %v1864_v43 }
 0x379   : > { %1865 = vmatmul.msk.bf16.vlgmr.msra.gmra.mxu0 %vm369_vm1, %v1864_v43 }
 0x37a   : > { %v1464_v44 = vpop.permute.xlu0 %1463 }
 0x37b   : > { %v1378_v45 = vpop.permute.xlu1 %1377  ;;  %v1420_v21 = vpop.permute.xlu2 %1419 }
 0x37c   : > { %v1379_v47 = vsel %vm635_vm4, %v1376_v37, %v1378_v45  ;;  %v1387_v49 = vsel %vm373_vm0, %v1378_v45, 0 }
 0x37d   : > { %v1384_v50 = vsel %vm373_vm0, %v1379_v47, 0  ;;  %1409 = vmatpush.bf16.msra.mxu3 %v1387_v49 }
 0x37e   : > { %1396 = vmatpush.bf16.msra.mxu2 %v1384_v50 }
 0x380   : > { %1869 = vmatmul.msk.bf16.vlgmr.msra.gmra.mxu3 %vm369_vm1, %v1867_v51 }
 0x381   : > { %1868 = vmatmul.msk.bf16.vlgmr.msra.gmra.mxu2 %vm369_vm1, %v1867_v51 }
 0x382   : > { %v1510_v52 = vpop.permute.xlu0 %1509 }
 0x383   : > { %v1508_v53 = vpop.permute.xlu1 %1507  ;;  %v1422_v54 = vpop.permute.xlu2 %1421  ;;  %v1519_v58 = vsel %vm373_vm0, %v1510_v52, 0 }
 0x384   : > { %v1511_v55 = vsel %vm911_vm7, %v1508_v53, %v1510_v52  ;;  %v1423_v56 = vsel %vm727_vm5, %v1420_v21, %v1422_v54  ;;  %v1431_v57 = vsel %vm373_vm0, %v1422_v54, 0 }
 0x385   : > { %v1516_v59 = vsel %vm373_vm0, %v1511_v55, 0  ;;  %v1428_v26 = vsel %vm373_vm0, %v1423_v56, 0  ;;  %1453 = vmatpush.bf16.msrb.mxu1 %v1431_v57 }
 0x386   : > { %1440 = vmatpush.bf16.msrb.mxu0 %v1428_v26 }
 0x387   : > { %v1312_v15 = vpop.f32.mrf.mxu2 }
 0x388   : > { %1872 = vmatmul.msk.bf16.vlgmr.msrb.gmra.mxu1 %vm369_vm1, %v1870_v60 }
 0x389   : > { %1541 = vmatpush.bf16.msra.mxu1 %v1519_v58  ;;  %1871 = vmatmul.msk.bf16.vlgmr.msrb.gmra.mxu0 %vm369_vm1, %v1870_v60 }
 0x38a   : > { %1528 = vmatpush.bf16.msra.mxu0 %v1516_v59  ;;  %v1596_v9 = vpop.permute.xlu0 %1595 }
 0x38b   : > { %v1554_v62 = vpop.permute.xlu1 %1553  ;;  %v1466_v63 = vpop.permute.xlu2 %1465 }
 0x38c   : > { %v1563_v0 = vsel %vm373_vm0, %v1554_v62, 0  ;;  %v1467_v1 = vsel %vm819_vm6, %v1464_v44, %v1466_v63  ;;  %v1475_v2 = vsel %vm373_vm0, %v1466_v63, 0  ;;  %vm1732_vm6 = vcmask 1040384  }
 0x38d   : > { %v1472_v3 = vsel %vm373_vm0, %v1467_v1, 0  ;;  %1497 = vmatpush.bf16.msrb.mxu3 %v1475_v2 }
 0x38e   : > { %1484 = vmatpush.bf16.msrb.mxu2 %v1472_v3 }
 0x38f   : > { %v1314_v19 = vpop.f32.mrf.mxu2 }
 0x390   : > { %1875 = vmatmul.msk.bf16.vlgmr.msrb.gmra.mxu3 %vm369_vm1, %v1873_v4  ;;  %v1325_v16 = vpop.f32.mrf.mxu3 }
 0x391   : > { %1585 = vmatpush.bf16.msra.mxu3 %v1563_v0  ;;  %1874 = vmatmul.msk.bf16.vlgmr.msrb.gmra.mxu2 %vm369_vm1, %v1873_v4 }
 0x393   : > { %v1552_v6 = vpop.permute.xlu2 %1551  ;;  %v1641_v2 = vpop.permute.xlu1 %1640 }
 0x394   : > { %v1555_v31 = vsel %vm1003_vm8, %v1552_v6, %v1554_v62 }
 0x395   : > { %v1560_v7 = vsel %vm373_vm0, %v1555_v31, 0 }
 0x396   : > { %1572 = vmatpush.bf16.msra.mxu2 %v1560_v7 }
 0x398   : > { %1878 = vmatmul.msk.bf16.vlgmr.msra.gmra.mxu1 %vm369_vm1, %v1876_v8  ;;  %v1327_v17 = vpop.f32.mrf.mxu3 }
 0x399   : > { %1877 = vmatmul.msk.bf16.vlgmr.msra.gmra.mxu0 %vm369_vm1, %v1876_v8 }
 0x39b   : > { %v1598_v10 = vpop.permute.xlu2 %1597 }
 0x39c   : > { %v1599_v11 = vsel %vm1095_vm9, %v1596_v9, %v1598_v10  ;;  %v1607_v12 = vsel %vm373_vm0, %v1598_v10, 0 }
 0x39d   : > { %v1604_v13 = vsel %vm373_vm0, %v1599_v11, 0  ;;  %1629 = vmatpush.bf16.msrb.mxu1 %v1607_v12  ;;  %vm2389_vm0 = vcmask 556032  }
 0x39e   : > { %1616 = vmatpush.bf16.msrb.mxu0 %v1604_v13  ;;  %vm2390_vm2 = vmmov %vm2389_vm0 }
 0x3a0   : > { %1881 = vmatmul.msk.bf16.vlgmr.msra.gmra.mxu3 %vm369_vm1, %v1879_v35 }
 0x3a1   : > { %1880 = vmatmul.msk.bf16.vlgmr.msra.gmra.mxu2 %vm369_vm1, %v1879_v35 }
 0x3a8   : > { %1884 = vmatmul.msk.bf16.vlgmr.msrb.gmra.mxu1 %vm369_vm1, %v1882_v14 }
 0x3a9   : > { %1883 = vmatmul.msk.bf16.vlgmr.msrb.gmra.mxu0 %vm369_vm1, %v1882_v14 }
 0x3e5   : > { %v1290_v20 = vpop.f32.mrf.mxu1 }
 0x3e6   : > { %v1277_v22 = vpop.f32.mrf.mxu0  ;;  %v1326_v40 = vadd.f32 %v1325_v16, %v1290_v20 }
 0x3e7   : > { %v1313_v42 = vadd.f32 %v1312_v15, %v1277_v22 }
 0x3ed   : > { %v1292_v23 = vpop.f32.mrf.mxu1 }
 0x3ee   : > { %v1279_v38 = vpop.f32.mrf.mxu0 }
 0x3f5   : > { %v1367_v24 = vpop.f32.mrf.mxu1 }
 0x3f6   : > { %v1354_v25 = vpop.f32.mrf.mxu0  ;;  %v1372_v44 = vadd.f32 %v1367_v24, %v1326_v40 }
 0x3f7   : > { %v1371_v21 = vadd.f32 %v1354_v25, %v1313_v42 }
 0x3fd   : > { %v1369_v27 = vpop.f32.mrf.mxu1 }
 0x3fe   : > { %v1356_v28 = vpop.f32.mrf.mxu0 }
 0x403   : > { %v1411_v29 = vpop.f32.mrf.mxu3 }
 0x404   : > { %v1398_v18 = vpop.f32.mrf.mxu2  ;;  %v1416_v47 = vadd.f32 %v1411_v29, %v1372_v44 }
 0x405   : > { %v1455_v30 = vpop.f32.mrf.mxu1  ;;  %v1415_v49 = vadd.f32 %v1398_v18, %v1371_v21 }
 0x406   : > { %v1442_v32 = vpop.f32.mrf.mxu0  ;;  %v1460_v51 = vadd.f32 %v1455_v30, %v1416_v47 }
 0x407   : > { %v1459_v53 = vadd.f32 %v1442_v32, %v1415_v49 }
 0x40b   : > { %v1413_v33 = vpop.f32.mrf.mxu3 }
 0x40c   : > { %v1400_v34 = vpop.f32.mrf.mxu2 }
 0x40d   : > { %v1457_v36 = vpop.f32.mrf.mxu1 }
 0x40e   : > { %v1444_v37 = vpop.f32.mrf.mxu0 }
 0x40f   : > { %v1678_v37 = vld [vmem:[%s2385_s7] sm:$0x1] }
 0x413   : > { %v1499_v39 = vpop.f32.mrf.mxu3 }
 0x414   : > { %v1486_v41 = vpop.f32.mrf.mxu2  ;;  %v1504_v55 = vadd.f32 %v1499_v39, %v1460_v51  ;;  %v1683_v39 = vpop.permute.xlu1 %1682 }
 0x415   : > { %v1543_v43 = vpop.f32.mrf.mxu1  ;;  %v1503_v57 = vadd.f32 %v1486_v41, %v1459_v53  ;;  %v1685_v40 = vperm.slane %v1683_v39, 0  ;;  %v1735_v41 = vlaneseq }
 0x416   : > { %v1530_v45 = vpop.f32.mrf.mxu0  ;;  %v1548_v58 = vadd.f32 %v1543_v43, %v1504_v55 }
 0x417   : > { %v1547_v59 = vadd.f32 %v1530_v45, %v1503_v57  ;;  %vm1737_vm7 = vcmp.lt.s32.totalorder %v1735_v41, 196 }
 0x41b   : > { %v1501_v50 = vpop.f32.mrf.mxu3 }
 0x41c   : > { %v1488_v52 = vpop.f32.mrf.mxu2 }
 0x41d   : > { %v1545_v54 = vpop.f32.mrf.mxu1 }
 0x41e   : > { %v1532_v56 = vpop.f32.mrf.mxu0 }
 0x423   : > { %v1587_v26 = vpop.f32.mrf.mxu3 }
 0x424   : > { %v1592_v60 = vadd.f32 %v1587_v26, %v1548_v58  ;;  %v1574_v61 = vpop.f32.mrf.mxu2 }
 0x425   : > { %v1591_v62 = vadd.f32 %v1574_v61, %v1547_v59  ;;  %v1631_v63 = vpop.f32.mrf.mxu1 }
 0x426   : > { %v1636_v0 = vadd.f32 %v1631_v63, %v1592_v60  ;;  %v1618_v1 = vpop.f32.mrf.mxu0 }
 0x427   : > { %v1635_v3 = vadd.f32 %v1618_v1, %v1591_v62 }
 0x428   : > { %v1644_v4 = vadd.f32 %v1641_v2, %v1636_v0 }
 0x429   : > { %v1643_v5 = vadd.f32 %v1641_v2, %v1635_v3 }
 0x42a   : > { %v1646_v6 = vmul.f32 %v1644_v4, %v2259_v46 }
 0x42b   : > { %v1589_v31 = vpop.f32.mrf.mxu3  ;;  %v1645_v7 = vmul.f32 %v1643_v5, %v2261_v48 }
 0x42c   : > { %v1576_v8 = vpop.f32.mrf.mxu2  ;;  %v1647_v9 = vsel %vm2389_vm0, %v1646_v6, 0.0 }
 0x42d   : > { %v1633_v10 = vpop.f32.mrf.mxu1  ;;  %v1648_v11 = vadd.f32 %v1647_v9, %v1645_v7 }
 0x42e   : > { %v1620_v12 = vpop.f32.mrf.mxu0 }
 0x42f   : > { %1649 = vadd.xlane.f32.xlu0 %v1648_v11 }
 0x4a2   : > { %v1650_v13 = vpop.xlane.xlu0 %1649 }
 0x4a3   : > { %v1651_v35 = vmul.f32 0.0069444445, %v1650_v13 }
 0x4a5   : > { %v1652_v14 = vsub.f32 %v1645_v7, %v1651_v35  ;;  %v1653_v16 = vsub.f32 %v1646_v6, %v1651_v35 }
 0x4a7   : > { %v1654_v15 = vmul.f32 %v1652_v14, %v2261_v48  ;;  %v1655_v17 = vmul.f32 %v1653_v16, %v2259_v46 }
 0x4a9   : > { %v1656_v19 = vmul.f32 %v1654_v15, %v1654_v15  ;;  %v1657_v20 = vmul.f32 %v1655_v17, %v1655_v17 }
 0x4ab   : > { %v1658_v22 = vsel %vm2390_vm2, %v1657_v20, 0.0 }
 0x4ac   : > { %v1659_v23 = vadd.f32 %v1658_v22, %v1656_v19 }
 0x4ae   : > { %1660 = vadd.xlane.f32.xlu2 %v1659_v23 }
 0x521   : > { %v1661_v38 = vpop.xlane.xlu2 %1660 }
 0x522   : > { %v1662_v24 = vmul.f32 0.0069444445, %v1661_v38 }
 0x524   : > { %v1663_v25 = vadd.f32 1e-05, %v1662_v24 }
 0x526   : > { %1916 = vrsqrt.f32 %v1663_v25  ;;  %vm1670_vm4 = vweird.f32 %v1663_v25 }
 0x52c   : > { %v1917_v27 = vpop.eup %1916 }
 0x52d   : > { %v1665_v28 = vmul.f32 %v1917_v27, %v1663_v25  ;;  %vm1671_vm3 = vweird.f32 %v1917_v27 }
 0x52e   : > { %vm1672_vm5 = vmor %vm1670_vm4, %vm1671_vm3 }
 0x52f   : > { %v1666_v29 = vmul.f32 %v1917_v27, %v1665_v28 }
 0x531   : > { %v1667_v18 = vmul.f32 0.5, %v1666_v29 }
 0x533   : > { %v1668_v30 = vsub.f32 1.5, %v1667_v18 }
 0x535   : > { %v1669_v32 = vmul.f32 %v1917_v27, %v1668_v30 }
 0x537   : > { %v1673_v46 = vsel %vm1672_vm5, %v1917_v27, %v1669_v32 }
 0x538   : > { %v1674_v48 = vmul.f32 %v1673_v46, %v1654_v15  ;;  %v1675_v33 = vmul.f32 %v1673_v46, %v1655_v17 }
 0x53a   : > { %v1676_v34 = vmax.f32 %v1674_v48, 0.0  ;;  %v1677_v36 = vmax.f32 %v1675_v33, 0.0 }
 0x53c   : > { %1704 = vmatpush.msrb.mxu2 %v1676_v34  ;;  %1724 = vmatpush.msrb.mxu3 %v1677_v36 }
 0x53d   : > { %1885 = vmatmul.msk.f32.vlgmr.msrb.gmra.mxu2 %vm369_vm1, %v1678_v37  ;;  %1886 = vmatmul.msk.f32.vlgmr.msrb.gmra.mxu3 %vm369_vm1, %v1678_v37 }
 0x5c0   : > { %v1706_v42 = vpop.f32.mrf.mxu2  ;;  %v1726_v43 = vpop.f32.mrf.mxu3 }
 0x5c1   : > { %v1727_v44 = vadd.f32 %v1726_v43, %v1685_v40  ;;  %v1707_v45 = vadd.f32 %v1706_v42, %v1685_v40 }
 0x5c3   : > { %v1731_v21 = vrot.slane %v1727_v44, 7 }
 0x5c5   : > { %v1733_v47 = vsel %vm1732_vm6, %v1707_v45, %v1731_v21 }
 0x5c6   : > { %1739 = vst.msk [vmem:[%s352_s17] sm:$0x3] %vm1737_vm7, %v1733_v47 }
 0x5c7 PF: > { %s21_s11 = sadd.s32 1, %s1924_s11  }
 0x5c8   : > { %p18_p4 = scmp.ge.s32.totalorder %s21_s11, 4  }
 0x5ca   :  { %20 = sbr.rel (!%p18_p4) target bundleno = 3 (0x3), region = 105 }

</bundles_post_ra>
